<compile_context>
chip_gen: v7x
topology: tpu7x:2x2x1
jax: 0.10.0
libtpu: 0.0.40
codegen_flags: <defaults>
</compile_context>

<pallas_src>
import functools

import jax
import jax.numpy as jnp
from jax import lax
from jax.experimental import pallas as pl
from jax.experimental.pallas import tpu as pltpu

BN_EPS = 1e-5


# --------------------------------------------------------------------------
# helpers
# --------------------------------------------------------------------------

def _spatial_tap_masks(H, W, T):
    """(9, 1, T*H*W) f32 validity masks for the 9 taps of a 3x3 / pad-1 conv,
    tiled over the T planes of the flattened slab layout.  Every spatially
    out-of-bounds sample is zeroed, so a circular roll over the flattened
    T*H*W axis never leaks data between adjacent time planes."""
    hh = jnp.arange(H)[:, None]
    ww = jnp.arange(W)[None, :]
    rows = []
    for k in range(9):
        dh, dw = k // 3 - 1, k % 3 - 1
        valid = ((hh + dh >= 0) & (hh + dh < H) &
                 (ww + dw >= 0) & (ww + dw < W))
        rows.append(valid.reshape(1, H * W))
    m = jnp.concatenate(rows, axis=0).astype(jnp.float32)      # (9, H*W)
    return jnp.tile(m, (1, T))[:, None, :]                      # (9, 1, T*H*W)


def _folded_conv(x, w_folded, masks, *, W, dt_shifts):
    """One MXU contraction for a (len(dt_shifts),3,3) / pad-(1,1) conv on the
    flattened (C, L=T*H*W) slab.
      x        : (Cin, L) f32
      w_folded : (Cout, len(dt_shifts)*9*Cin) bf16
      masks    : (9, 1, L) f32 spatial-validity masks
    Rolls and mask multiplies stay in f32 (v5e has no bf16 VPU); the stacked
    operand is cast to bf16 once, right before the single jnp.dot."""
    taps = []
    for dt in dt_shifts:
        for k in range(9):
            delta = dt + (k // 3 - 1) * W + (k % 3 - 1)
            xk = jnp.roll(x, -delta, axis=1) if delta != 0 else x
            if k != 4:                       # centre tap: mask is all-ones
                xk = xk * masks[k]
            taps.append(xk)
    a = jnp.concatenate(taps, axis=0).astype(jnp.bfloat16)      # (K, L)
    return jnp.dot(w_folded, a, preferred_element_type=jnp.float32)


def _bn_scale_shift(stats, gamma, beta, group_count):
    """Fold per-slab (sum, sum_sq) partials into training-mode BatchNorm
    scale/shift.  Uses the within/between-group variance decomposition to
    avoid the catastrophic cancellation of a single global E[x^2]-E[x]^2."""
    s, ss = stats[..., 0], stats[..., 1]            # (G, C)
    n = jnp.float32(group_count)
    mean_g = s / n
    m2_g = ss - s * mean_g                          # per-group sum of sq. deviations
    total_n = n * stats.shape[0]
    mean = jnp.sum(s, axis=0) / total_n
    m2 = jnp.sum(m2_g, axis=0) + jnp.sum(n * (mean_g - mean) ** 2, axis=0)
    var = jnp.maximum(m2 / total_n, 0.0)            # biased, as torch BN normalisation
    inv = lax.rsqrt(var + BN_EPS)
    scale = gamma * inv
    shift = beta - mean * scale
    return scale[:, None].astype(jnp.float32), shift[:, None].astype(jnp.float32)


# --------------------------------------------------------------------------
# Pallas kernels (one batch-element slab per grid step)
# --------------------------------------------------------------------------

def _bn1_stats_kernel(x_ref, w1_ref, m_ref, stats_ref, *, W):
    """conv1 over a whole (Cin, T*H*W) slab; emits only the per-slab BN1
    partial sums — y1 itself never touches HBM (recomputed, fused, in pass B)."""
    y1 = _folded_conv(x_ref[...], w1_ref[...], m_ref[...], W=W, dt_shifts=(0,))
    s = jnp.sum(y1, axis=1, keepdims=True)
    ss = jnp.sum(y1 * y1, axis=1, keepdims=True)
    stats_ref[...] = jnp.concatenate([s, ss], axis=1)           # (C1, 2)


def _conv_block_kernel(x_ref, w1_ref, sc1_ref, sh1_ref, w2_ref, m_ref,
                       y2_ref, stats_ref, *, W, HW, T2):
    """Recomputed conv1 -> BN1+ReLU -> conv2, with the 2 temporal x 9 spatial
    taps of conv2 folded into a single K = 2*9*C1 contraction.  Emits the
    pre-BN conv2 activation (bf16) for the first T-1 planes plus its BN2
    partial sums (f32, straight from the accumulator)."""
    masks = m_ref[...]
    y1 = _folded_conv(x_ref[...], w1_ref[...], masks, W=W, dt_shifts=(0,))
    a = jnp.maximum(y1 * sc1_ref[...] + sh1_ref[...], 0.0)      # BN1 + ReLU (f32)
    y2 = _folded_conv(a, w2_ref[...], masks, W=W, dt_shifts=(0, HW))
    y2 = y2[:, :T2 * HW]                # drop the temporally-invalid last plane
    s = jnp.sum(y2, axis=1, keepdims=True)
    ss = jnp.sum(y2 * y2, axis=1, keepdims=True)
    # NOTE: the (C,2) stats store is a masked 2-lane store, but it happens only
    # once per slab (grid has N steps), so it is negligible.
    stats_ref[...] = jnp.concatenate([s, ss], axis=1)           # (C2, 2)
    y2_ref[...] = y2.astype(jnp.bfloat16)


def _bn_relu_kernel(y2_ref, sc_ref, sh_ref, skip_ref):
    """BN2 + ReLU2, written lane-dense into the channel-major skip layout."""
    skip_ref[...] = jnp.maximum(
        y2_ref[...].astype(jnp.float32) * sc_ref[...] + sh_ref[...], 0.0)


# --------------------------------------------------------------------------
# Down forward pass
# --------------------------------------------------------------------------

def down_forward(x, params):
    """x: (N, Cin, T, H, W) float32 (torch NCDHW).
    Returns (skip.view(N, C2*(T-1), H, W), pooled (N, C2, T-1, H//2, W//2))."""
    N, Cin, T, H, W = x.shape
    assert H % 2 == 0 and W % 2 == 0, "MaxPool3d((1,2,2)) needs even H, W"
    assert T >= 2
    T2, HW = T - 1, H * W
    L = T * HW
    w1, w2 = params['w1'], params['w2']
    C1, C2 = w1.shape[0], w2.shape[0]
    # Conv biases b1/b2 intentionally unused: cancelled by training-mode BN.

    # Channel-major flattened-slab layout: x is already (N, Cin, T, H, W).
    x_slab = x.reshape(N, Cin, L).astype(jnp.float32)
    masks = _spatial_tap_masks(H, W, T)                          # (9, 1, L) f32

    # Fold the taps into the contraction dimension of a single matmul.
    #   w1f[c, k*Cin + ci]            = w1[c, ci, 0, kh, kw],  k = kh*3 + kw
    #   w2f[c, (kt*9 + k)*C1 + ci]    = w2[c, ci, kt, kh, kw]
    w1f = jnp.transpose(w1[:, :, 0], (0, 2, 3, 1)).reshape(C1, 9 * Cin)
    w1f = w1f.astype(jnp.bfloat16)
    w2f = jnp.transpose(w2, (0, 2, 3, 4, 1)).reshape(C2, 18 * C1)
    w2f = w2f.astype(jnp.bfloat16)

    par = pltpu.CompilerParams(dimension_semantics=("parallel",))

    # ---- pass A: BN1 statistics only (conv1 recomputed fused into pass B) ---
    stats1 = pl.pallas_call(
        functools.partial(_bn1_stats_kernel, W=W),
        grid=(N,),
        in_specs=[
            pl.BlockSpec((None, Cin, L), lambda n: (n, 0, 0)),
            pl.BlockSpec((C1, 9 * Cin), lambda n: (0, 0)),
            pl.BlockSpec((9, 1, L), lambda n: (0, 0, 0)),
        ],
        out_specs=pl.BlockSpec((None, C1, 2), lambda n: (n, 0, 0)),
        out_shape=jax.ShapeDtypeStruct((N, C1, 2), jnp.float32),
        compiler_params=par,
    )(x_slab, w1f, masks)
    scale1, shift1 = _bn_scale_shift(stats1, params['gamma1'], params['beta1'], L)

    # ---- pass B: conv1 -> BN1+ReLU -> conv2 (+ BN2 partial stats), bf16 y2 --
    y2, stats2 = pl.pallas_call(
        functools.partial(_conv_block_kernel, W=W, HW=HW, T2=T2),
        grid=(N,),
        in_specs=[
            pl.BlockSpec((None, Cin, L), lambda n: (n, 0, 0)),
            pl.BlockSpec((C1, 9 * Cin), lambda n: (0, 0)),
            pl.BlockSpec((C1, 1), lambda n: (0, 0)),
            pl.BlockSpec((C1, 1), lambda n: (0, 0)),
            pl.BlockSpec((C2, 18 * C1), lambda n: (0, 0)),
            pl.BlockSpec((9, 1, L), lambda n: (0, 0, 0)),
        ],
        out_specs=(
            pl.BlockSpec((None, C2, T2 * HW), lambda n: (n, 0, 0)),
            pl.BlockSpec((None, C2, 2), lambda n: (n, 0, 0)),
        ),
        out_shape=(
            jax.ShapeDtypeStruct((N, C2, T2 * HW), jnp.bfloat16),
            jax.ShapeDtypeStruct((N, C2, 2), jnp.float32),
        ),
        compiler_params=par,
    )(x_slab, w1f, scale1, shift1, w2f, masks)
    scale2, shift2 = _bn_scale_shift(stats2, params['gamma2'], params['beta2'],
                                     T2 * HW)

    # ---- pass C: BN2 + ReLU, lane-dense channel-major skip ------------------
    skip_cm = pl.pallas_call(
        _bn_relu_kernel,
        grid=(N,),
        in_specs=[
            pl.BlockSpec((None, C2, T2 * HW), lambda n: (n, 0, 0)),
            pl.BlockSpec((C2, 1), lambda n: (0, 0)),
            pl.BlockSpec((C2, 1), lambda n: (0, 0)),
        ],
        out_specs=pl.BlockSpec((None, C2, T2 * HW), lambda n: (n, 0, 0)),
        out_shape=jax.ShapeDtypeStruct((N, C2, T2 * HW), jnp.float32),
        compiler_params=par,
    )(y2, scale2, shift2)

    # torch: skip.view(b, c*t, h, w) — free, contiguous reshape.
    skip = skip_cm.reshape(N, C2 * T2, H, W)

    # MaxPool3d((1,2,2),(1,2,2)) recomputed from the small bf16 y2 instead of
    # re-reading the just-written f32 skip (half the HBM bytes; XLA fuses the
    # affine+relu+window-max into one pass).
    # TODO(synk): fold the pool into the pass-C kernel once strided lane loads
    # (pl.ds(..., stride=2) on the minor dims) are validated on all targets.
    act5 = jnp.maximum(
        y2.astype(jnp.float32).reshape(N, C2, T2, H, W)
        * scale2.reshape(1, C2, 1, 1, 1) + shift2.reshape(1, C2, 1, 1, 1), 0.0)
    pooled = jnp.max(act5.reshape(N, C2, T2, H // 2, 2, W // 2, 2), axis=(4, 6))
    return skip, pooled


# --------------------------------------------------------------------------
# pure-JAX reference (tolerance-asserted in __main__)
# --------------------------------------------------------------------------

def down_reference(x, params):
    dn = ('NCDHW', 'OIDHW', 'NCDHW')
    pad = [(0, 0), (1, 1), (1, 1)]

    def bn_relu(y, gamma, beta):
        mean = jnp.mean(y, axis=(0, 2, 3, 4), keepdims=True)
        var = jnp.mean((y - mean) ** 2, axis=(0, 2, 3, 4), keepdims=True)
        yn = (y - mean) * lax.rsqrt(var + BN_EPS)
        return jnp.maximum(yn * gamma.reshape(1, -1, 1, 1, 1)
                           + beta.reshape(1, -1, 1, 1, 1), 0.0)

    y1 = lax.conv_general_dilated(x, params['w1'], (1, 1, 1), pad,
                                  dimension_numbers=dn)
    y1 = bn_relu(y1 + params['b1'].reshape(1, -1, 1, 1, 1),
                 params['gamma1'], params['beta1'])
    y2 = lax.conv_general_dilated(y1, params['w2'], (1, 1, 1), pad,
                                  dimension_numbers=dn)
    skip5 = bn_relu(y2 + params['b2'].reshape(1, -1, 1, 1, 1),
                    params['gamma2'], params['beta2'])
    N, C2, T2, H, W = skip5.shape
    skip = skip5.reshape(N, C2 * T2, H, W)
    pooled = jnp.max(skip5.reshape(N, C2, T2, H // 2, 2, W // 2, 2), axis=(4, 6))
    return skip, pooled


# --------------------------------------------------------------------------
# parameter init (mirrors the torch module layout)
# --------------------------------------------------------------------------

def init_down_params(key, cin, cout):
    inter = cin // 2 if cin > cout else cout // 2
    k1, k2, k3, k4 = jax.random.split(key, 4)

    def conv_w(k, co, ci, kt):
        fan_in = float(ci * kt * 9)
        return jax.random.normal(k, (co, ci, kt, 3, 3), jnp.float32) / jnp.sqrt(fan_in)

    return {
        'w1': conv_w(k1, inter, cin, 1),
        'b1': jax.random.normal(k2, (inter,), jnp.float32) * 0.01,  # cancelled by BN
        'gamma1': jnp.ones((inter,), jnp.float32),
        'beta1': jnp.zeros((inter,), jnp.float32),
        'w2': conv_w(k3, cout, inter, 2),
        'b2': jax.random.normal(k4, (cout,), jnp.float32) * 0.01,   # cancelled by BN
        'gamma2': jnp.ones((cout,), jnp.float32),
        'beta2': jnp.zeros((cout,), jnp.float32),
    }


# --------------------------------------------------------------------------
# main
# --------------------------------------------------------------------------

if __name__ == "__main__":
    key = jax.random.PRNGKey(0)
    kx, kp = jax.random.split(key)

    B, Cin, T, H, W = 2, 4, 8, 16, 16     # T=8 -> T_out=7; H*W=256 (lane-dense)
    Cout = 16                              # -> inter channels C1 = 8

    x = jax.random.normal(kx, (B, Cin, T, H, W), jnp.float32)
    params = init_down_params(kp, Cin, Cout)

    fwd = jax.jit(down_forward)
    skip, pooled = jax.block_until_ready(fwd(x, params))

    assert skip.shape == (B, Cout * (T - 1), H, W), skip.shape
    assert pooled.shape == (B, Cout, T - 1, H // 2, W // 2), pooled.shape
    assert bool(jnp.all(jnp.isfinite(skip))) and bool(jnp.all(jnp.isfinite(pooled)))

    # Tolerance-asserted pure-JAX (f32) reference; kernel uses bf16 MXU operands.
    skip_ref, pooled_ref = jax.jit(down_reference)(x, params)
    err_s = float(jnp.max(jnp.abs(skip - skip_ref)))
    err_p = float(jnp.max(jnp.abs(pooled - pooled_ref)))
    assert err_s < 0.25 and err_p < 0.25, (err_s, err_p)

    print("KERNEL_OK")
</pallas_src>

<mosaic_0001>
module attributes {stable_mosaic.version = 11 : i64} {
  func.func @_bn1_stats_kernel(%arg0: i32, %arg1: memref<1x4x2048xf32, #tpu.memory_space<vmem>>, %arg2: memref<8x36xbf16, #tpu.memory_space<vmem>>, %arg3: memref<9x1x2048xf32, #tpu.memory_space<vmem>>, %arg4: memref<1x8x2xf32, #tpu.memory_space<vmem>>) attributes {dimension_semantics = [#tpu.dimension_semantics<parallel>], iteration_bounds = array<i64: 2>, scalar_prefetch = 0 : i64, scratch_operands = 0 : i64, tpu.core_type = #tpu.core_type<tc>, window_params = [{transform_indices = @transform_0, window_bounds = array<i64: 1, 4, 2048>}, {pipeline_mode = #tpu.pipeline_mode<synchronous>, transform_indices = @transform_1, window_bounds = array<i64: 8, 36>}, {pipeline_mode = #tpu.pipeline_mode<synchronous>, transform_indices = @transform_2, window_bounds = array<i64: 9, 1, 2048>}, {transform_indices = @transform_3, window_bounds = array<i64: 1, 8, 2>}]} {
    %c0 = arith.constant 0 : index
    %c0_0 = arith.constant 0 : index
    %c0_1 = arith.constant 0 : index
    %0 = vector.load %arg1[%c0, %c0_0, %c0_1] : memref<1x4x2048xf32, #tpu.memory_space<vmem>>, vector<1x4x2048xf32>
    %1 = vector.shape_cast %0 : vector<1x4x2048xf32> to vector<4x2048xf32>
    %c0_2 = arith.constant 0 : index
    %c0_3 = arith.constant 0 : index
    %2 = vector.load %arg2[%c0_2, %c0_3] : memref<8x36xbf16, #tpu.memory_space<vmem>>, vector<8x36xbf16>
    %c0_4 = arith.constant 0 : index
    %c0_5 = arith.constant 0 : index
    %c0_6 = arith.constant 0 : index
    %3 = vector.load %arg3[%c0_4, %c0_5, %c0_6] : memref<9x1x2048xf32, #tpu.memory_space<vmem>>, vector<9x1x2048xf32>
    %4 = vector.extract_strided_slice %1 {offsets = [0, 2031], sizes = [4, 17], strides = [1, 1]} : vector<4x2048xf32> to vector<4x17xf32>
    %5 = vector.extract_strided_slice %1 {offsets = [0, 0], sizes = [4, 2031], strides = [1, 1]} : vector<4x2048xf32> to vector<4x2031xf32>
    %6 = tpu.concatenate %4, %5 in 1 : vector<4x17xf32>, vector<4x2031xf32> -> vector<4x2048xf32>
    %7 = vector.extract_strided_slice %3 {offsets = [0, 0, 0], sizes = [1, 1, 2048], strides = [1, 1, 1]} : vector<9x1x2048xf32> to vector<1x1x2048xf32>
    %8 = vector.shape_cast %7 : vector<1x1x2048xf32> to vector<1x2048xf32>
    %9 = vector.broadcast %8 : vector<1x2048xf32> to vector<4x2048xf32>
    %10 = arith.mulf %6, %9 : vector<4x2048xf32>
    %11 = vector.extract_strided_slice %1 {offsets = [0, 2032], sizes = [4, 16], strides = [1, 1]} : vector<4x2048xf32> to vector<4x16xf32>
    %12 = vector.extract_strided_slice %1 {offsets = [0, 0], sizes = [4, 2032], strides = [1, 1]} : vector<4x2048xf32> to vector<4x2032xf32>
    %13 = tpu.concatenate %11, %12 in 1 : vector<4x16xf32>, vector<4x2032xf32> -> vector<4x2048xf32>
    %14 = vector.extract_strided_slice %3 {offsets = [1, 0, 0], sizes = [1, 1, 2048], strides = [1, 1, 1]} : vector<9x1x2048xf32> to vector<1x1x2048xf32>
    %15 = vector.shape_cast %14 : vector<1x1x2048xf32> to vector<1x2048xf32>
    %16 = vector.broadcast %15 : vector<1x2048xf32> to vector<4x2048xf32>
    %17 = arith.mulf %13, %16 : vector<4x2048xf32>
    %18 = vector.extract_strided_slice %1 {offsets = [0, 2033], sizes = [4, 15], strides = [1, 1]} : vector<4x2048xf32> to vector<4x15xf32>
    %19 = vector.extract_strided_slice %1 {offsets = [0, 0], sizes = [4, 2033], strides = [1, 1]} : vector<4x2048xf32> to vector<4x2033xf32>
    %20 = tpu.concatenate %18, %19 in 1 : vector<4x15xf32>, vector<4x2033xf32> -> vector<4x2048xf32>
    %21 = vector.extract_strided_slice %3 {offsets = [2, 0, 0], sizes = [1, 1, 2048], strides = [1, 1, 1]} : vector<9x1x2048xf32> to vector<1x1x2048xf32>
    %22 = vector.shape_cast %21 : vector<1x1x2048xf32> to vector<1x2048xf32>
    %23 = vector.broadcast %22 : vector<1x2048xf32> to vector<4x2048xf32>
    %24 = arith.mulf %20, %23 : vector<4x2048xf32>
    %25 = vector.extract_strided_slice %1 {offsets = [0, 2047], sizes = [4, 1], strides = [1, 1]} : vector<4x2048xf32> to vector<4x1xf32>
    %26 = vector.extract_strided_slice %1 {offsets = [0, 0], sizes = [4, 2047], strides = [1, 1]} : vector<4x2048xf32> to vector<4x2047xf32>
    %27 = tpu.concatenate %25, %26 in 1 : vector<4x1xf32>, vector<4x2047xf32> -> vector<4x2048xf32>
    %28 = vector.extract_strided_slice %3 {offsets = [3, 0, 0], sizes = [1, 1, 2048], strides = [1, 1, 1]} : vector<9x1x2048xf32> to vector<1x1x2048xf32>
    %29 = vector.shape_cast %28 : vector<1x1x2048xf32> to vector<1x2048xf32>
    %30 = vector.broadcast %29 : vector<1x2048xf32> to vector<4x2048xf32>
    %31 = arith.mulf %27, %30 : vector<4x2048xf32>
    %32 = vector.extract_strided_slice %1 {offsets = [0, 1], sizes = [4, 2047], strides = [1, 1]} : vector<4x2048xf32> to vector<4x2047xf32>
    %33 = vector.extract_strided_slice %1 {offsets = [0, 0], sizes = [4, 1], strides = [1, 1]} : vector<4x2048xf32> to vector<4x1xf32>
    %34 = tpu.concatenate %32, %33 in 1 : vector<4x2047xf32>, vector<4x1xf32> -> vector<4x2048xf32>
    %35 = vector.extract_strided_slice %3 {offsets = [5, 0, 0], sizes = [1, 1, 2048], strides = [1, 1, 1]} : vector<9x1x2048xf32> to vector<1x1x2048xf32>
    %36 = vector.shape_cast %35 : vector<1x1x2048xf32> to vector<1x2048xf32>
    %37 = vector.broadcast %36 : vector<1x2048xf32> to vector<4x2048xf32>
    %38 = arith.mulf %34, %37 : vector<4x2048xf32>
    %39 = vector.extract_strided_slice %1 {offsets = [0, 15], sizes = [4, 2033], strides = [1, 1]} : vector<4x2048xf32> to vector<4x2033xf32>
    %40 = vector.extract_strided_slice %1 {offsets = [0, 0], sizes = [4, 15], strides = [1, 1]} : vector<4x2048xf32> to vector<4x15xf32>
    %41 = tpu.concatenate %39, %40 in 1 : vector<4x2033xf32>, vector<4x15xf32> -> vector<4x2048xf32>
    %42 = vector.extract_strided_slice %3 {offsets = [6, 0, 0], sizes = [1, 1, 2048], strides = [1, 1, 1]} : vector<9x1x2048xf32> to vector<1x1x2048xf32>
    %43 = vector.shape_cast %42 : vector<1x1x2048xf32> to vector<1x2048xf32>
    %44 = vector.broadcast %43 : vector<1x2048xf32> to vector<4x2048xf32>
    %45 = arith.mulf %41, %44 : vector<4x2048xf32>
    %46 = vector.extract_strided_slice %1 {offsets = [0, 16], sizes = [4, 2032], strides = [1, 1]} : vector<4x2048xf32> to vector<4x2032xf32>
    %47 = vector.extract_strided_slice %1 {offsets = [0, 0], sizes = [4, 16], strides = [1, 1]} : vector<4x2048xf32> to vector<4x16xf32>
    %48 = tpu.concatenate %46, %47 in 1 : vector<4x2032xf32>, vector<4x16xf32> -> vector<4x2048xf32>
    %49 = vector.extract_strided_slice %3 {offsets = [7, 0, 0], sizes = [1, 1, 2048], strides = [1, 1, 1]} : vector<9x1x2048xf32> to vector<1x1x2048xf32>
    %50 = vector.shape_cast %49 : vector<1x1x2048xf32> to vector<1x2048xf32>
    %51 = vector.broadcast %50 : vector<1x2048xf32> to vector<4x2048xf32>
    %52 = arith.mulf %48, %51 : vector<4x2048xf32>
    %53 = vector.extract_strided_slice %1 {offsets = [0, 17], sizes = [4, 2031], strides = [1, 1]} : vector<4x2048xf32> to vector<4x2031xf32>
    %54 = vector.extract_strided_slice %1 {offsets = [0, 0], sizes = [4, 17], strides = [1, 1]} : vector<4x2048xf32> to vector<4x17xf32>
    %55 = tpu.concatenate %53, %54 in 1 : vector<4x2031xf32>, vector<4x17xf32> -> vector<4x2048xf32>
    %56 = vector.extract_strided_slice %3 {offsets = [8, 0, 0], sizes = [1, 1, 2048], strides = [1, 1, 1]} : vector<9x1x2048xf32> to vector<1x1x2048xf32>
    %57 = vector.shape_cast %56 : vector<1x1x2048xf32> to vector<1x2048xf32>
    %58 = vector.broadcast %57 : vector<1x2048xf32> to vector<4x2048xf32>
    %59 = arith.mulf %55, %58 : vector<4x2048xf32>
    %60 = tpu.concatenate %10, %17, %24, %31, %1, %38, %45, %52, %59 in 0 : vector<4x2048xf32>, vector<4x2048xf32>, vector<4x2048xf32>, vector<4x2048xf32>, vector<4x2048xf32>, vector<4x2048xf32>, vector<4x2048xf32>, vector<4x2048xf32>, vector<4x2048xf32> -> vector<36x2048xf32>
    %61 = arith.truncf %60 : vector<36x2048xf32> to vector<36x2048xbf16>
    %cst = arith.constant dense<0.000000e+00> : vector<8x2048xf32>
    %62 = tpu.matmul %2, %61, %cst {dimension_numbers = #tpu.dot_dimension_numbers<[1], [0], [0], [1], [0, 0, 1, 1], [], []>} : vector<8x36xbf16>, vector<36x2048xbf16>, vector<8x2048xf32> -> vector<8x2048xf32>
    %cst_7 = arith.constant dense<0.000000e+00> : vector<8xf32>
    %63 = vector.multi_reduction <add>, %62, %cst_7 [1] : vector<8x2048xf32> to vector<8xf32>
    %64 = vector.shape_cast %63 : vector<8xf32> to vector<8x1xf32>
    %65 = arith.mulf %62, %62 : vector<8x2048xf32>
    %cst_8 = arith.constant dense<0.000000e+00> : vector<8xf32>
    %66 = vector.multi_reduction <add>, %65, %cst_8 [1] : vector<8x2048xf32> to vector<8xf32>
    %67 = vector.shape_cast %66 : vector<8xf32> to vector<8x1xf32>
    %68 = tpu.concatenate %64, %67 in 1 : vector<8x1xf32>, vector<8x1xf32> -> vector<8x2xf32>
    %c0_9 = arith.constant 0 : index
    %c0_10 = arith.constant 0 : index
    %c0_11 = arith.constant 0 : index
    %69 = vector.load %arg4[%c0_9, %c0_10, %c0_11] : memref<1x8x2xf32, #tpu.memory_space<vmem>>, vector<1x8x2xf32>
    %70 = vector.shape_cast %69 : vector<1x8x2xf32> to vector<8x2xf32>
    %71 = vector.shape_cast %68 : vector<8x2xf32> to vector<1x8x2xf32>
    tpu.vector_store %arg4[%c0_9, %c0_10, %c0_11], %71 {strides = array<i32>} : memref<1x8x2xf32, #tpu.memory_space<vmem>>, vector<1x8x2xf32>,
    return
  }
  func.func @transform_0(%arg0: i32) -> (i32, i32, i32) {
    %c0_i32 = arith.constant 0 : i32
    %c0_i32_0 = arith.constant 0 : i32
    %c0_i32_1 = arith.constant 0 : i32
    return %arg0, %c0_i32, %c0_i32_0 : i32, i32, i32
  }
  func.func @transform_1(%arg0: i32) -> (i32, i32) {
    %c0_i32 = arith.constant 0 : i32
    %c0_i32_0 = arith.constant 0 : i32
    %c0_i32_1 = arith.constant 0 : i32
    return %c0_i32, %c0_i32_0 : i32, i32
  }
  func.func @transform_2(%arg0: i32) -> (i32, i32, i32) {
    %c0_i32 = arith.constant 0 : i32
    %c0_i32_0 = arith.constant 0 : i32
    %c0_i32_1 = arith.constant 0 : i32
    %c0_i32_2 = arith.constant 0 : i32
    return %c0_i32, %c0_i32_0, %c0_i32_1 : i32, i32, i32
  }
  func.func @transform_3(%arg0: i32) -> (i32, i32, i32) {
    %c0_i32 = arith.constant 0 : i32
    %c0_i32_0 = arith.constant 0 : i32
    %c0_i32_1 = arith.constant 0 : i32
    return %arg0, %c0_i32, %c0_i32_0 : i32, i32, i32
  }
}

module attributes {stable_mosaic.version = 11 : i64} {
  func.func @_conv_block_kernel(%arg0: i32, %arg1: memref<1x4x2048xf32, #tpu.memory_space<vmem>>, %arg2: memref<8x36xbf16, #tpu.memory_space<vmem>>, %arg3: memref<8x1xf32, #tpu.memory_space<vmem>>, %arg4: memref<8x1xf32, #tpu.memory_space<vmem>>, %arg5: memref<16x144xbf16, #tpu.memory_space<vmem>>, %arg6: memref<9x1x2048xf32, #tpu.memory_space<vmem>>, %arg7: memref<1x16x1792xbf16, #tpu.memory_space<vmem>>, %arg8: memref<1x16x2xf32, #tpu.memory_space<vmem>>) attributes {dimension_semantics = [#tpu.dimension_semantics<parallel>], iteration_bounds = array<i64: 2>, scalar_prefetch = 0 : i64, scratch_operands = 0 : i64, tpu.core_type = #tpu.core_type<tc>, window_params = [{transform_indices = @transform_0, window_bounds = array<i64: 1, 4, 2048>}, {pipeline_mode = #tpu.pipeline_mode<synchronous>, transform_indices = @transform_1, window_bounds = array<i64: 8, 36>}, {pipeline_mode = #tpu.pipeline_mode<synchronous>, transform_indices = @transform_2, window_bounds = array<i64: 8, 1>}, {pipeline_mode = #tpu.pipeline_mode<synchronous>, transform_indices = @transform_3, window_bounds = array<i64: 8, 1>}, {pipeline_mode = #tpu.pipeline_mode<synchronous>, transform_indices = @transform_4, window_bounds = array<i64: 16, 144>}, {pipeline_mode = #tpu.pipeline_mode<synchronous>, transform_indices = @transform_5, window_bounds = array<i64: 9, 1, 2048>}, {transform_indices = @transform_6, window_bounds = array<i64: 1, 16, 1792>}, {transform_indices = @transform_7, window_bounds = array<i64: 1, 16, 2>}]} {
    %c0 = arith.constant 0 : index
    %c0_0 = arith.constant 0 : index
    %c0_1 = arith.constant 0 : index
    %0 = vector.load %arg6[%c0, %c0_0, %c0_1] : memref<9x1x2048xf32, #tpu.memory_space<vmem>>, vector<9x1x2048xf32>
    %c0_2 = arith.constant 0 : index
    %c0_3 = arith.constant 0 : index
    %c0_4 = arith.constant 0 : index
    %1 = vector.load %arg1[%c0_2, %c0_3, %c0_4] : memref<1x4x2048xf32, #tpu.memory_space<vmem>>, vector<1x4x2048xf32>
    %2 = vector.shape_cast %1 : vector<1x4x2048xf32> to vector<4x2048xf32>
    %c0_5 = arith.constant 0 : index
    %c0_6 = arith.constant 0 : index
    %3 = vector.load %arg2[%c0_5, %c0_6] : memref<8x36xbf16, #tpu.memory_space<vmem>>, vector<8x36xbf16>
    %4 = vector.extract_strided_slice %2 {offsets = [0, 2031], sizes = [4, 17], strides = [1, 1]} : vector<4x2048xf32> to vector<4x17xf32>
    %5 = vector.extract_strided_slice %2 {offsets = [0, 0], sizes = [4, 2031], strides = [1, 1]} : vector<4x2048xf32> to vector<4x2031xf32>
    %6 = tpu.concatenate %4, %5 in 1 : vector<4x17xf32>, vector<4x2031xf32> -> vector<4x2048xf32>
    %7 = vector.extract_strided_slice %0 {offsets = [0, 0, 0], sizes = [1, 1, 2048], strides = [1, 1, 1]} : vector<9x1x2048xf32> to vector<1x1x2048xf32>
    %8 = vector.shape_cast %7 : vector<1x1x2048xf32> to vector<1x2048xf32>
    %9 = vector.broadcast %8 : vector<1x2048xf32> to vector<4x2048xf32>
    %10 = arith.mulf %6, %9 : vector<4x2048xf32>
    %11 = vector.extract_strided_slice %2 {offsets = [0, 2032], sizes = [4, 16], strides = [1, 1]} : vector<4x2048xf32> to vector<4x16xf32>
    %12 = vector.extract_strided_slice %2 {offsets = [0, 0], sizes = [4, 2032], strides = [1, 1]} : vector<4x2048xf32> to vector<4x2032xf32>
    %13 = tpu.concatenate %11, %12 in 1 : vector<4x16xf32>, vector<4x2032xf32> -> vector<4x2048xf32>
    %14 = vector.extract_strided_slice %0 {offsets = [1, 0, 0], sizes = [1, 1, 2048], strides = [1, 1, 1]} : vector<9x1x2048xf32> to vector<1x1x2048xf32>
    %15 = vector.shape_cast %14 : vector<1x1x2048xf32> to vector<1x2048xf32>
    %16 = vector.broadcast %15 : vector<1x2048xf32> to vector<4x2048xf32>
    %17 = arith.mulf %13, %16 : vector<4x2048xf32>
    %18 = vector.extract_strided_slice %2 {offsets = [0, 2033], sizes = [4, 15], strides = [1, 1]} : vector<4x2048xf32> to vector<4x15xf32>
    %19 = vector.extract_strided_slice %2 {offsets = [0, 0], sizes = [4, 2033], strides = [1, 1]} : vector<4x2048xf32> to vector<4x2033xf32>
    %20 = tpu.concatenate %18, %19 in 1 : vector<4x15xf32>, vector<4x2033xf32> -> vector<4x2048xf32>
    %21 = vector.extract_strided_slice %0 {offsets = [2, 0, 0], sizes = [1, 1, 2048], strides = [1, 1, 1]} : vector<9x1x2048xf32> to vector<1x1x2048xf32>
    %22 = vector.shape_cast %21 : vector<1x1x2048xf32> to vector<1x2048xf32>
    %23 = vector.broadcast %22 : vector<1x2048xf32> to vector<4x2048xf32>
    %24 = arith.mulf %20, %23 : vector<4x2048xf32>
    %25 = vector.extract_strided_slice %2 {offsets = [0, 2047], sizes = [4, 1], strides = [1, 1]} : vector<4x2048xf32> to vector<4x1xf32>
    %26 = vector.extract_strided_slice %2 {offsets = [0, 0], sizes = [4, 2047], strides = [1, 1]} : vector<4x2048xf32> to vector<4x2047xf32>
    %27 = tpu.concatenate %25, %26 in 1 : vector<4x1xf32>, vector<4x2047xf32> -> vector<4x2048xf32>
    %28 = vector.extract_strided_slice %0 {offsets = [3, 0, 0], sizes = [1, 1, 2048], strides = [1, 1, 1]} : vector<9x1x2048xf32> to vector<1x1x2048xf32>
    %29 = vector.shape_cast %28 : vector<1x1x2048xf32> to vector<1x2048xf32>
    %30 = vector.broadcast %29 : vector<1x2048xf32> to vector<4x2048xf32>
    %31 = arith.mulf %27, %30 : vector<4x2048xf32>
    %32 = vector.extract_strided_slice %2 {offsets = [0, 1], sizes = [4, 2047], strides = [1, 1]} : vector<4x2048xf32> to vector<4x2047xf32>
    %33 = vector.extract_strided_slice %2 {offsets = [0, 0], sizes = [4, 1], strides = [1, 1]} : vector<4x2048xf32> to vector<4x1xf32>
    %34 = tpu.concatenate %32, %33 in 1 : vector<4x2047xf32>, vector<4x1xf32> -> vector<4x2048xf32>
    %35 = vector.extract_strided_slice %0 {offsets = [5, 0, 0], sizes = [1, 1, 2048], strides = [1, 1, 1]} : vector<9x1x2048xf32> to vector<1x1x2048xf32>
    %36 = vector.shape_cast %35 : vector<1x1x2048xf32> to vector<1x2048xf32>
    %37 = vector.broadcast %36 : vector<1x2048xf32> to vector<4x2048xf32>
    %38 = arith.mulf %34, %37 : vector<4x2048xf32>
    %39 = vector.extract_strided_slice %2 {offsets = [0, 15], sizes = [4, 2033], strides = [1, 1]} : vector<4x2048xf32> to vector<4x2033xf32>
    %40 = vector.extract_strided_slice %2 {offsets = [0, 0], sizes = [4, 15], strides = [1, 1]} : vector<4x2048xf32> to vector<4x15xf32>
    %41 = tpu.concatenate %39, %40 in 1 : vector<4x2033xf32>, vector<4x15xf32> -> vector<4x2048xf32>
    %42 = vector.extract_strided_slice %0 {offsets = [6, 0, 0], sizes = [1, 1, 2048], strides = [1, 1, 1]} : vector<9x1x2048xf32> to vector<1x1x2048xf32>
    %43 = vector.shape_cast %42 : vector<1x1x2048xf32> to vector<1x2048xf32>
    %44 = vector.broadcast %43 : vector<1x2048xf32> to vector<4x2048xf32>
    %45 = arith.mulf %41, %44 : vector<4x2048xf32>
    %46 = vector.extract_strided_slice %2 {offsets = [0, 16], sizes = [4, 2032], strides = [1, 1]} : vector<4x2048xf32> to vector<4x2032xf32>
    %47 = vector.extract_strided_slice %2 {offsets = [0, 0], sizes = [4, 16], strides = [1, 1]} : vector<4x2048xf32> to vector<4x16xf32>
    %48 = tpu.concatenate %46, %47 in 1 : vector<4x2032xf32>, vector<4x16xf32> -> vector<4x2048xf32>
    %49 = vector.extract_strided_slice %0 {offsets = [7, 0, 0], sizes = [1, 1, 2048], strides = [1, 1, 1]} : vector<9x1x2048xf32> to vector<1x1x2048xf32>
    %50 = vector.shape_cast %49 : vector<1x1x2048xf32> to vector<1x2048xf32>
    %51 = vector.broadcast %50 : vector<1x2048xf32> to vector<4x2048xf32>
    %52 = arith.mulf %48, %51 : vector<4x2048xf32>
    %53 = vector.extract_strided_slice %2 {offsets = [0, 17], sizes = [4, 2031], strides = [1, 1]} : vector<4x2048xf32> to vector<4x2031xf32>
    %54 = vector.extract_strided_slice %2 {offsets = [0, 0], sizes = [4, 17], strides = [1, 1]} : vector<4x2048xf32> to vector<4x17xf32>
    %55 = tpu.concatenate %53, %54 in 1 : vector<4x2031xf32>, vector<4x17xf32> -> vector<4x2048xf32>
    %56 = vector.extract_strided_slice %0 {offsets = [8, 0, 0], sizes = [1, 1, 2048], strides = [1, 1, 1]} : vector<9x1x2048xf32> to vector<1x1x2048xf32>
    %57 = vector.shape_cast %56 : vector<1x1x2048xf32> to vector<1x2048xf32>
    %58 = vector.broadcast %57 : vector<1x2048xf32> to vector<4x2048xf32>
    %59 = arith.mulf %55, %58 : vector<4x2048xf32>
    %60 = tpu.concatenate %10, %17, %24, %31, %2, %38, %45, %52, %59 in 0 : vector<4x2048xf32>, vector<4x2048xf32>, vector<4x2048xf32>, vector<4x2048xf32>, vector<4x2048xf32>, vector<4x2048xf32>, vector<4x2048xf32>, vector<4x2048xf32>, vector<4x2048xf32> -> vector<36x2048xf32>
    %61 = arith.truncf %60 : vector<36x2048xf32> to vector<36x2048xbf16>
    %cst = arith.constant dense<0.000000e+00> : vector<8x2048xf32>
    %62 = tpu.matmul %3, %61, %cst {dimension_numbers = #tpu.dot_dimension_numbers<[1], [0], [0], [1], [0, 0, 1, 1], [], []>} : vector<8x36xbf16>, vector<36x2048xbf16>, vector<8x2048xf32> -> vector<8x2048xf32>
    %c0_7 = arith.constant 0 : index
    %c0_8 = arith.constant 0 : index
    %63 = vector.load %arg3[%c0_7, %c0_8] : memref<8x1xf32, #tpu.memory_space<vmem>>, vector<8x1xf32>
    %64 = vector.broadcast %63 : vector<8x1xf32> to vector<8x2048xf32>
    %65 = arith.mulf %62, %64 : vector<8x2048xf32>
    %c0_9 = arith.constant 0 : index
    %c0_10 = arith.constant 0 : index
    %66 = vector.load %arg4[%c0_9, %c0_10] : memref<8x1xf32, #tpu.memory_space<vmem>>, vector<8x1xf32>
    %67 = vector.broadcast %66 : vector<8x1xf32> to vector<8x2048xf32>
    %68 = arith.addf %65, %67 : vector<8x2048xf32>
    %cst_11 = arith.constant 0.000000e+00 : f32
    %69 = vector.broadcast %cst_11 : f32 to vector<8x2048xf32>
    %70 = arith.maximumf %68, %69 : vector<8x2048xf32>
    %c0_12 = arith.constant 0 : index
    %c0_13 = arith.constant 0 : index
    %71 = vector.load %arg5[%c0_12, %c0_13] : memref<16x144xbf16, #tpu.memory_space<vmem>>, vector<16x144xbf16>
    %72 = vector.extract_strided_slice %70 {offsets = [0, 2031], sizes = [8, 17], strides = [1, 1]} : vector<8x2048xf32> to vector<8x17xf32>
    %73 = vector.extract_strided_slice %70 {offsets = [0, 0], sizes = [8, 2031], strides = [1, 1]} : vector<8x2048xf32> to vector<8x2031xf32>
    %74 = tpu.concatenate %72, %73 in 1 : vector<8x17xf32>, vector<8x2031xf32> -> vector<8x2048xf32>
    %75 = vector.extract_strided_slice %0 {offsets = [0, 0, 0], sizes = [1, 1, 2048], strides = [1, 1, 1]} : vector<9x1x2048xf32> to vector<1x1x2048xf32>
    %76 = vector.shape_cast %75 : vector<1x1x2048xf32> to vector<1x2048xf32>
    %77 = vector.broadcast %76 : vector<1x2048xf32> to vector<8x2048xf32>
    %78 = arith.mulf %74, %77 : vector<8x2048xf32>
    %79 = vector.extract_strided_slice %70 {offsets = [0, 2032], sizes = [8, 16], strides = [1, 1]} : vector<8x2048xf32> to vector<8x16xf32>
    %80 = vector.extract_strided_slice %70 {offsets = [0, 0], sizes = [8, 2032], strides = [1, 1]} : vector<8x2048xf32> to vector<8x2032xf32>
    %81 = tpu.concatenate %79, %80 in 1 : vector<8x16xf32>, vector<8x2032xf32> -> vector<8x2048xf32>
    %82 = vector.extract_strided_slice %0 {offsets = [1, 0, 0], sizes = [1, 1, 2048], strides = [1, 1, 1]} : vector<9x1x2048xf32> to vector<1x1x2048xf32>
    %83 = vector.shape_cast %82 : vector<1x1x2048xf32> to vector<1x2048xf32>
    %84 = vector.broadcast %83 : vector<1x2048xf32> to vector<8x2048xf32>
    %85 = arith.mulf %81, %84 : vector<8x2048xf32>
    %86 = vector.extract_strided_slice %70 {offsets = [0, 2033], sizes = [8, 15], strides = [1, 1]} : vector<8x2048xf32> to vector<8x15xf32>
    %87 = vector.extract_strided_slice %70 {offsets = [0, 0], sizes = [8, 2033], strides = [1, 1]} : vector<8x2048xf32> to vector<8x2033xf32>
    %88 = tpu.concatenate %86, %87 in 1 : vector<8x15xf32>, vector<8x2033xf32> -> vector<8x2048xf32>
    %89 = vector.extract_strided_slice %0 {offsets = [2, 0, 0], sizes = [1, 1, 2048], strides = [1, 1, 1]} : vector<9x1x2048xf32> to vector<1x1x2048xf32>
    %90 = vector.shape_cast %89 : vector<1x1x2048xf32> to vector<1x2048xf32>
    %91 = vector.broadcast %90 : vector<1x2048xf32> to vector<8x2048xf32>
    %92 = arith.mulf %88, %91 : vector<8x2048xf32>
    %93 = vector.extract_strided_slice %70 {offsets = [0, 2047], sizes = [8, 1], strides = [1, 1]} : vector<8x2048xf32> to vector<8x1xf32>
    %94 = vector.extract_strided_slice %70 {offsets = [0, 0], sizes = [8, 2047], strides = [1, 1]} : vector<8x2048xf32> to vector<8x2047xf32>
    %95 = tpu.concatenate %93, %94 in 1 : vector<8x1xf32>, vector<8x2047xf32> -> vector<8x2048xf32>
    %96 = vector.extract_strided_slice %0 {offsets = [3, 0, 0], sizes = [1, 1, 2048], strides = [1, 1, 1]} : vector<9x1x2048xf32> to vector<1x1x2048xf32>
    %97 = vector.shape_cast %96 : vector<1x1x2048xf32> to vector<1x2048xf32>
    %98 = vector.broadcast %97 : vector<1x2048xf32> to vector<8x2048xf32>
    %99 = arith.mulf %95, %98 : vector<8x2048xf32>
    %100 = vector.extract_strided_slice %70 {offsets = [0, 1], sizes = [8, 2047], strides = [1, 1]} : vector<8x2048xf32> to vector<8x2047xf32>
    %101 = vector.extract_strided_slice %70 {offsets = [0, 0], sizes = [8, 1], strides = [1, 1]} : vector<8x2048xf32> to vector<8x1xf32>
    %102 = tpu.concatenate %100, %101 in 1 : vector<8x2047xf32>, vector<8x1xf32> -> vector<8x2048xf32>
    %103 = vector.extract_strided_slice %0 {offsets = [5, 0, 0], sizes = [1, 1, 2048], strides = [1, 1, 1]} : vector<9x1x2048xf32> to vector<1x1x2048xf32>
    %104 = vector.shape_cast %103 : vector<1x1x2048xf32> to vector<1x2048xf32>
    %105 = vector.broadcast %104 : vector<1x2048xf32> to vector<8x2048xf32>
    %106 = arith.mulf %102, %105 : vector<8x2048xf32>
    %107 = vector.extract_strided_slice %70 {offsets = [0, 15], sizes = [8, 2033], strides = [1, 1]} : vector<8x2048xf32> to vector<8x2033xf32>
    %108 = vector.extract_strided_slice %70 {offsets = [0, 0], sizes = [8, 15], strides = [1, 1]} : vector<8x2048xf32> to vector<8x15xf32>
    %109 = tpu.concatenate %107, %108 in 1 : vector<8x2033xf32>, vector<8x15xf32> -> vector<8x2048xf32>
    %110 = vector.extract_strided_slice %0 {offsets = [6, 0, 0], sizes = [1, 1, 2048], strides = [1, 1, 1]} : vector<9x1x2048xf32> to vector<1x1x2048xf32>
    %111 = vector.shape_cast %110 : vector<1x1x2048xf32> to vector<1x2048xf32>
    %112 = vector.broadcast %111 : vector<1x2048xf32> to vector<8x2048xf32>
    %113 = arith.mulf %109, %112 : vector<8x2048xf32>
    %114 = vector.extract_strided_slice %70 {offsets = [0, 16], sizes = [8, 2032], strides = [1, 1]} : vector<8x2048xf32> to vector<8x2032xf32>
    %115 = vector.extract_strided_slice %70 {offsets = [0, 0], sizes = [8, 16], strides = [1, 1]} : vector<8x2048xf32> to vector<8x16xf32>
    %116 = tpu.concatenate %114, %115 in 1 : vector<8x2032xf32>, vector<8x16xf32> -> vector<8x2048xf32>
    %117 = vector.extract_strided_slice %0 {offsets = [7, 0, 0], sizes = [1, 1, 2048], strides = [1, 1, 1]} : vector<9x1x2048xf32> to vector<1x1x2048xf32>
    %118 = vector.shape_cast %117 : vector<1x1x2048xf32> to vector<1x2048xf32>
    %119 = vector.broadcast %118 : vector<1x2048xf32> to vector<8x2048xf32>
    %120 = arith.mulf %116, %119 : vector<8x2048xf32>
    %121 = vector.extract_strided_slice %70 {offsets = [0, 17], sizes = [8, 2031], strides = [1, 1]} : vector<8x2048xf32> to vector<8x2031xf32>
    %122 = vector.extract_strided_slice %70 {offsets = [0, 0], sizes = [8, 17], strides = [1, 1]} : vector<8x2048xf32> to vector<8x17xf32>
    %123 = tpu.concatenate %121, %122 in 1 : vector<8x2031xf32>, vector<8x17xf32> -> vector<8x2048xf32>
    %124 = vector.extract_strided_slice %0 {offsets = [8, 0, 0], sizes = [1, 1, 2048], strides = [1, 1, 1]} : vector<9x1x2048xf32> to vector<1x1x2048xf32>
    %125 = vector.shape_cast %124 : vector<1x1x2048xf32> to vector<1x2048xf32>
    %126 = vector.broadcast %125 : vector<1x2048xf32> to vector<8x2048xf32>
    %127 = arith.mulf %123, %126 : vector<8x2048xf32>
    %128 = vector.extract_strided_slice %70 {offsets = [0, 239], sizes = [8, 1809], strides = [1, 1]} : vector<8x2048xf32> to vector<8x1809xf32>
    %129 = vector.extract_strided_slice %70 {offsets = [0, 0], sizes = [8, 239], strides = [1, 1]} : vector<8x2048xf32> to vector<8x239xf32>
    %130 = tpu.concatenate %128, %129 in 1 : vector<8x1809xf32>, vector<8x239xf32> -> vector<8x2048xf32>
    %131 = vector.extract_strided_slice %0 {offsets = [0, 0, 0], sizes = [1, 1, 2048], strides = [1, 1, 1]} : vector<9x1x2048xf32> to vector<1x1x2048xf32>
    %132 = vector.shape_cast %131 : vector<1x1x2048xf32> to vector<1x2048xf32>
    %133 = vector.broadcast %132 : vector<1x2048xf32> to vector<8x2048xf32>
    %134 = arith.mulf %130, %133 : vector<8x2048xf32>
    %135 = vector.extract_strided_slice %70 {offsets = [0, 240], sizes = [8, 1808], strides = [1, 1]} : vector<8x2048xf32> to vector<8x1808xf32>
    %136 = vector.extract_strided_slice %70 {offsets = [0, 0], sizes = [8, 240], strides = [1, 1]} : vector<8x2048xf32> to vector<8x240xf32>
    %137 = tpu.concatenate %135, %136 in 1 : vector<8x1808xf32>, vector<8x240xf32> -> vector<8x2048xf32>
    %138 = vector.extract_strided_slice %0 {offsets = [1, 0, 0], sizes = [1, 1, 2048], strides = [1, 1, 1]} : vector<9x1x2048xf32> to vector<1x1x2048xf32>
    %139 = vector.shape_cast %138 : vector<1x1x2048xf32> to vector<1x2048xf32>
    %140 = vector.broadcast %139 : vector<1x2048xf32> to vector<8x2048xf32>
    %141 = arith.mulf %137, %140 : vector<8x2048xf32>
    %142 = vector.extract_strided_slice %70 {offsets = [0, 241], sizes = [8, 1807], strides = [1, 1]} : vector<8x2048xf32> to vector<8x1807xf32>
    %143 = vector.extract_strided_slice %70 {offsets = [0, 0], sizes = [8, 241], strides = [1, 1]} : vector<8x2048xf32> to vector<8x241xf32>
    %144 = tpu.concatenate %142, %143 in 1 : vector<8x1807xf32>, vector<8x241xf32> -> vector<8x2048xf32>
    %145 = vector.extract_strided_slice %0 {offsets = [2, 0, 0], sizes = [1, 1, 2048], strides = [1, 1, 1]} : vector<9x1x2048xf32> to vector<1x1x2048xf32>
    %146 = vector.shape_cast %145 : vector<1x1x2048xf32> to vector<1x2048xf32>
    %147 = vector.broadcast %146 : vector<1x2048xf32> to vector<8x2048xf32>
    %148 = arith.mulf %144, %147 : vector<8x2048xf32>
    %149 = vector.extract_strided_slice %70 {offsets = [0, 255], sizes = [8, 1793], strides = [1, 1]} : vector<8x2048xf32> to vector<8x1793xf32>
    %150 = vector.extract_strided_slice %70 {offsets = [0, 0], sizes = [8, 255], strides = [1, 1]} : vector<8x2048xf32> to vector<8x255xf32>
    %151 = tpu.concatenate %149, %150 in 1 : vector<8x1793xf32>, vector<8x255xf32> -> vector<8x2048xf32>
    %152 = vector.extract_strided_slice %0 {offsets = [3, 0, 0], sizes = [1, 1, 2048], strides = [1, 1, 1]} : vector<9x1x2048xf32> to vector<1x1x2048xf32>
    %153 = vector.shape_cast %152 : vector<1x1x2048xf32> to vector<1x2048xf32>
    %154 = vector.broadcast %153 : vector<1x2048xf32> to vector<8x2048xf32>
    %155 = arith.mulf %151, %154 : vector<8x2048xf32>
    %156 = vector.extract_strided_slice %70 {offsets = [0, 256], sizes = [8, 1792], strides = [1, 1]} : vector<8x2048xf32> to vector<8x1792xf32>
    %157 = vector.extract_strided_slice %70 {offsets = [0, 0], sizes = [8, 256], strides = [1, 1]} : vector<8x2048xf32> to vector<8x256xf32>
    %158 = tpu.concatenate %156, %157 in 1 : vector<8x1792xf32>, vector<8x256xf32> -> vector<8x2048xf32>
    %159 = vector.extract_strided_slice %70 {offsets = [0, 257], sizes = [8, 1791], strides = [1, 1]} : vector<8x2048xf32> to vector<8x1791xf32>
    %160 = vector.extract_strided_slice %70 {offsets = [0, 0], sizes = [8, 257], strides = [1, 1]} : vector<8x2048xf32> to vector<8x257xf32>
    %161 = tpu.concatenate %159, %160 in 1 : vector<8x1791xf32>, vector<8x257xf32> -> vector<8x2048xf32>
    %162 = vector.extract_strided_slice %0 {offsets = [5, 0, 0], sizes = [1, 1, 2048], strides = [1, 1, 1]} : vector<9x1x2048xf32> to vector<1x1x2048xf32>
    %163 = vector.shape_cast %162 : vector<1x1x2048xf32> to vector<1x2048xf32>
    %164 = vector.broadcast %163 : vector<1x2048xf32> to vector<8x2048xf32>
    %165 = arith.mulf %161, %164 : vector<8x2048xf32>
    %166 = vector.extract_strided_slice %70 {offsets = [0, 271], sizes = [8, 1777], strides = [1, 1]} : vector<8x2048xf32> to vector<8x1777xf32>
    %167 = vector.extract_strided_slice %70 {offsets = [0, 0], sizes = [8, 271], strides = [1, 1]} : vector<8x2048xf32> to vector<8x271xf32>
    %168 = tpu.concatenate %166, %167 in 1 : vector<8x1777xf32>, vector<8x271xf32> -> vector<8x2048xf32>
    %169 = vector.extract_strided_slice %0 {offsets = [6, 0, 0], sizes = [1, 1, 2048], strides = [1, 1, 1]} : vector<9x1x2048xf32> to vector<1x1x2048xf32>
    %170 = vector.shape_cast %169 : vector<1x1x2048xf32> to vector<1x2048xf32>
    %171 = vector.broadcast %170 : vector<1x2048xf32> to vector<8x2048xf32>
    %172 = arith.mulf %168, %171 : vector<8x2048xf32>
    %173 = vector.extract_strided_slice %70 {offsets = [0, 272], sizes = [8, 1776], strides = [1, 1]} : vector<8x2048xf32> to vector<8x1776xf32>
    %174 = vector.extract_strided_slice %70 {offsets = [0, 0], sizes = [8, 272], strides = [1, 1]} : vector<8x2048xf32> to vector<8x272xf32>
    %175 = tpu.concatenate %173, %174 in 1 : vector<8x1776xf32>, vector<8x272xf32> -> vector<8x2048xf32>
    %176 = vector.extract_strided_slice %0 {offsets = [7, 0, 0], sizes = [1, 1, 2048], strides = [1, 1, 1]} : vector<9x1x2048xf32> to vector<1x1x2048xf32>
    %177 = vector.shape_cast %176 : vector<1x1x2048xf32> to vector<1x2048xf32>
    %178 = vector.broadcast %177 : vector<1x2048xf32> to vector<8x2048xf32>
    %179 = arith.mulf %175, %178 : vector<8x2048xf32>
    %180 = vector.extract_strided_slice %70 {offsets = [0, 273], sizes = [8, 1775], strides = [1, 1]} : vector<8x2048xf32> to vector<8x1775xf32>
    %181 = vector.extract_strided_slice %70 {offsets = [0, 0], sizes = [8, 273], strides = [1, 1]} : vector<8x2048xf32> to vector<8x273xf32>
    %182 = tpu.concatenate %180, %181 in 1 : vector<8x1775xf32>, vector<8x273xf32> -> vector<8x2048xf32>
    %183 = vector.extract_strided_slice %0 {offsets = [8, 0, 0], sizes = [1, 1, 2048], strides = [1, 1, 1]} : vector<9x1x2048xf32> to vector<1x1x2048xf32>
    %184 = vector.shape_cast %183 : vector<1x1x2048xf32> to vector<1x2048xf32>
    %185 = vector.broadcast %184 : vector<1x2048xf32> to vector<8x2048xf32>
    %186 = arith.mulf %182, %185 : vector<8x2048xf32>
    %187 = tpu.concatenate %78, %85, %92, %99, %70, %106, %113, %120, %127, %134, %141, %148, %155, %158, %165, %172 in 0 : vector<8x2048xf32>, vector<8x2048xf32>, vector<8x2048xf32>, vector<8x2048xf32>, vector<8x2048xf32>, vector<8x2048xf32>, vector<8x2048xf32>, vector<8x2048xf32>, vector<8x2048xf32>, vector<8x2048xf32>, vector<8x2048xf32>, vector<8x2048xf32>, vector<8x2048xf32>, vector<8x2048xf32>, vector<8x2048xf32>, vector<8x2048xf32> -> vector<128x2048xf32>
    %188 = tpu.concatenate %179, %186 in 0 : vector<8x2048xf32>, vector<8x2048xf32> -> vector<16x2048xf32>
    %189 = tpu.concatenate %187, %188 in 0 : vector<128x2048xf32>, vector<16x2048xf32> -> vector<144x2048xf32>
    %190 = arith.truncf %189 : vector<144x2048xf32> to vector<144x2048xbf16>
    %cst_14 = arith.constant dense<0.000000e+00> : vector<16x2048xf32>
    %191 = tpu.matmul %71, %190, %cst_14 {dimension_numbers = #tpu.dot_dimension_numbers<[1], [0], [0], [1], [0, 0, 1, 1], [], []>} : vector<16x144xbf16>, vector<144x2048xbf16>, vector<16x2048xf32> -> vector<16x2048xf32>
    %192 = vector.extract_strided_slice %191 {offsets = [0, 0], sizes = [16, 1792], strides = [1, 1]} : vector<16x2048xf32> to vector<16x1792xf32>
    %cst_15 = arith.constant dense<0.000000e+00> : vector<16xf32>
    %193 = vector.multi_reduction <add>, %192, %cst_15 [1] : vector<16x1792xf32> to vector<16xf32>
    %194 = vector.shape_cast %193 : vector<16xf32> to vector<16x1xf32>
    %195 = arith.mulf %192, %192 : vector<16x1792xf32>
    %cst_16 = arith.constant dense<0.000000e+00> : vector<16xf32>
    %196 = vector.multi_reduction <add>, %195, %cst_16 [1] : vector<16x1792xf32> to vector<16xf32>
    %197 = vector.shape_cast %196 : vector<16xf32> to vector<16x1xf32>
    %198 = tpu.concatenate %194, %197 in 1 : vector<16x1xf32>, vector<16x1xf32> -> vector<16x2xf32>
    %c0_17 = arith.constant 0 : index
    %c0_18 = arith.constant 0 : index
    %c0_19 = arith.constant 0 : index
    %199 = vector.load %arg8[%c0_17, %c0_18, %c0_19] : memref<1x16x2xf32, #tpu.memory_space<vmem>>, vector<1x16x2xf32>
    %200 = vector.shape_cast %199 : vector<1x16x2xf32> to vector<16x2xf32>
    %201 = vector.shape_cast %198 : vector<16x2xf32> to vector<1x16x2xf32>
    tpu.vector_store %arg8[%c0_17, %c0_18, %c0_19], %201 {strides = array<i32>} : memref<1x16x2xf32, #tpu.memory_space<vmem>>, vector<1x16x2xf32>,
    %202 = arith.truncf %192 : vector<16x1792xf32> to vector<16x1792xbf16>
    %c0_20 = arith.constant 0 : index
    %c0_21 = arith.constant 0 : index
    %c0_22 = arith.constant 0 : index
    %203 = vector.load %arg7[%c0_20, %c0_21, %c0_22] : memref<1x16x1792xbf16, #tpu.memory_space<vmem>>, vector<1x16x1792xbf16>
    %204 = vector.shape_cast %203 : vector<1x16x1792xbf16> to vector<16x1792xbf16>
    %205 = vector.shape_cast %202 : vector<16x1792xbf16> to vector<1x16x1792xbf16>
    tpu.vector_store %arg7[%c0_20, %c0_21, %c0_22], %205 {strides = array<i32>} : memref<1x16x1792xbf16, #tpu.memory_space<vmem>>, vector<1x16x1792xbf16>,
    return
  }
  func.func @transform_0(%arg0: i32) -> (i32, i32, i32) {
    %c0_i32 = arith.constant 0 : i32
    %c0_i32_0 = arith.constant 0 : i32
    %c0_i32_1 = arith.constant 0 : i32
    return %arg0, %c0_i32, %c0_i32_0 : i32, i32, i32
  }
  func.func @transform_1(%arg0: i32) -> (i32, i32) {
    %c0_i32 = arith.constant 0 : i32
    %c0_i32_0 = arith.constant 0 : i32
    %c0_i32_1 = arith.constant 0 : i32
    return %c0_i32, %c0_i32_0 : i32, i32
  }
  func.func @transform_2(%arg0: i32) -> (i32, i32) {
    %c0_i32 = arith.constant 0 : i32
    %c0_i32_0 = arith.constant 0 : i32
    %c0_i32_1 = arith.constant 0 : i32
    return %c0_i32, %c0_i32_0 : i32, i32
  }
  func.func @transform_3(%arg0: i32) -> (i32, i32) {
    %c0_i32 = arith.constant 0 : i32
    %c0_i32_0 = arith.constant 0 : i32
    %c0_i32_1 = arith.constant 0 : i32
    return %c0_i32, %c0_i32_0 : i32, i32
  }
  func.func @transform_4(%arg0: i32) -> (i32, i32) {
    %c0_i32 = arith.constant 0 : i32
    %c0_i32_0 = arith.constant 0 : i32
    %c0_i32_1 = arith.constant 0 : i32
    return %c0_i32, %c0_i32_0 : i32, i32
  }
  func.func @transform_5(%arg0: i32) -> (i32, i32, i32) {
    %c0_i32 = arith.constant 0 : i32
    %c0_i32_0 = arith.constant 0 : i32
    %c0_i32_1 = arith.constant 0 : i32
    %c0_i32_2 = arith.constant 0 : i32
    return %c0_i32, %c0_i32_0, %c0_i32_1 : i32, i32, i32
  }
  func.func @transform_6(%arg0: i32) -> (i32, i32, i32) {
    %c0_i32 = arith.constant 0 : i32
    %c0_i32_0 = arith.constant 0 : i32
    %c0_i32_1 = arith.constant 0 : i32
    return %arg0, %c0_i32, %c0_i32_0 : i32, i32, i32
  }
  func.func @transform_7(%arg0: i32) -> (i32, i32, i32) {
    %c0_i32 = arith.constant 0 : i32
    %c0_i32_0 = arith.constant 0 : i32
    %c0_i32_1 = arith.constant 0 : i32
    return %arg0, %c0_i32, %c0_i32_0 : i32, i32, i32
  }
}

module attributes {stable_mosaic.version = 11 : i64} {
  func.func @_bn_relu_kernel(%arg0: i32, %arg1: memref<1x16x1792xbf16, #tpu.memory_space<vmem>>, %arg2: memref<16x1xf32, #tpu.memory_space<vmem>>, %arg3: memref<16x1xf32, #tpu.memory_space<vmem>>, %arg4: memref<1x16x1792xf32, #tpu.memory_space<vmem>>) attributes {dimension_semantics = [#tpu.dimension_semantics<parallel>], iteration_bounds = array<i64: 2>, scalar_prefetch = 0 : i64, scratch_operands = 0 : i64, tpu.core_type = #tpu.core_type<tc>, window_params = [{transform_indices = @transform_0, window_bounds = array<i64: 1, 16, 1792>}, {pipeline_mode = #tpu.pipeline_mode<synchronous>, transform_indices = @transform_1, window_bounds = array<i64: 16, 1>}, {pipeline_mode = #tpu.pipeline_mode<synchronous>, transform_indices = @transform_2, window_bounds = array<i64: 16, 1>}, {transform_indices = @transform_3, window_bounds = array<i64: 1, 16, 1792>}]} {
    %c0 = arith.constant 0 : index
    %c0_0 = arith.constant 0 : index
    %c0_1 = arith.constant 0 : index
    %0 = vector.load %arg1[%c0, %c0_0, %c0_1] : memref<1x16x1792xbf16, #tpu.memory_space<vmem>>, vector<1x16x1792xbf16>
    %1 = vector.shape_cast %0 : vector<1x16x1792xbf16> to vector<16x1792xbf16>
    %2 = arith.extf %1 : vector<16x1792xbf16> to vector<16x1792xf32>
    %c0_2 = arith.constant 0 : index
    %c0_3 = arith.constant 0 : index
    %3 = vector.load %arg2[%c0_2, %c0_3] : memref<16x1xf32, #tpu.memory_space<vmem>>, vector<16x1xf32>
    %4 = vector.broadcast %3 : vector<16x1xf32> to vector<16x1792xf32>
    %5 = arith.mulf %2, %4 : vector<16x1792xf32>
    %c0_4 = arith.constant 0 : index
    %c0_5 = arith.constant 0 : index
    %6 = vector.load %arg3[%c0_4, %c0_5] : memref<16x1xf32, #tpu.memory_space<vmem>>, vector<16x1xf32>
    %7 = vector.broadcast %6 : vector<16x1xf32> to vector<16x1792xf32>
    %8 = arith.addf %5, %7 : vector<16x1792xf32>
    %cst = arith.constant 0.000000e+00 : f32
    %9 = vector.broadcast %cst : f32 to vector<16x1792xf32>
    %10 = arith.maximumf %8, %9 : vector<16x1792xf32>
    %c0_6 = arith.constant 0 : index
    %c0_7 = arith.constant 0 : index
    %c0_8 = arith.constant 0 : index
    %11 = vector.load %arg4[%c0_6, %c0_7, %c0_8] : memref<1x16x1792xf32, #tpu.memory_space<vmem>>, vector<1x16x1792xf32>
    %12 = vector.shape_cast %11 : vector<1x16x1792xf32> to vector<16x1792xf32>
    %13 = vector.shape_cast %10 : vector<16x1792xf32> to vector<1x16x1792xf32>
    tpu.vector_store %arg4[%c0_6, %c0_7, %c0_8], %13 {strides = array<i32>} : memref<1x16x1792xf32, #tpu.memory_space<vmem>>, vector<1x16x1792xf32>,
    return
  }
  func.func @transform_0(%arg0: i32) -> (i32, i32, i32) {
    %c0_i32 = arith.constant 0 : i32
    %c0_i32_0 = arith.constant 0 : i32
    %c0_i32_1 = arith.constant 0 : i32
    return %arg0, %c0_i32, %c0_i32_0 : i32, i32, i32
  }
  func.func @transform_1(%arg0: i32) -> (i32, i32) {
    %c0_i32 = arith.constant 0 : i32
    %c0_i32_0 = arith.constant 0 : i32
    %c0_i32_1 = arith.constant 0 : i32
    return %c0_i32, %c0_i32_0 : i32, i32
  }
  func.func @transform_2(%arg0: i32) -> (i32, i32) {
    %c0_i32 = arith.constant 0 : i32
    %c0_i32_0 = arith.constant 0 : i32
    %c0_i32_1 = arith.constant 0 : i32
    return %c0_i32, %c0_i32_0 : i32, i32
  }
  func.func @transform_3(%arg0: i32) -> (i32, i32, i32) {
    %c0_i32 = arith.constant 0 : i32
    %c0_i32_0 = arith.constant 0 : i32
    %c0_i32_1 = arith.constant 0 : i32
    return %arg0, %c0_i32, %c0_i32_0 : i32, i32, i32
  }
}

</mosaic_0001>

<bundles_post_ra>
// kernel: down_forward.3
= control target key start
LH: loop header
LB: loop body
LE: loop exit
PB: predicated region body
PF: predicated region fallthrough
CT: control target
= control target key end

     0   :  { %s2417_s12 = smov 0   ;;  %s3604_s0 = inlined_call_operand.vmem [shape: f32[2,4,2048], index: 0, kind: input, shape index: {}]   ;;  %s3605_s1 = inlined_call_operand.vmem [shape: bf16[8,36], index: 1, kind: input, shape index: {}]   ;;  %s3606_s2 = inlined_call_operand.vmem [shape: f32[9,1,2048], index: 2, kind: input, shape index: {}]   ;;  %s3607_s3 = inlined_call_operand.vmem [shape: f32[2,8,2], index: 3, kind: output, shape index: {}]  }
   0x1 LB: > { %s2323_s13 = sadd.s32 4294967295, %s2386_s12   ;;  %p2327_p0 = scmp.ge.s32.totalorder %s2386_s12, 1  ;;  %s2386_s12 = sphi %s2417_s12, %s13_s12  }
   0x2   : > { %p137_p1 = scmp.lt.s32.totalorder %s2386_s12, 3 }
   0x4   : > { %p138_p2 = pnand %p2327_p0, %p137_p1 }
   0x6   : > { %141 = sbr.rel (%p138_p2) target bundleno = 761 (0x2f9), region = 32 }
   0xd   : > { %p160_p3 = scmp.lt.s32.totalorder %s2323_s13, 1  ;;  %s2388_s18 = smov 1   ;;  %v3608_v8 = vmov 0   ;;  %v279_v11 = vlaneseq  ;;  %v2602_v18 = vld [vmem:[%s3606_s2 + $0x30] sm:$0xff]  ;;  %vm736_vm0 = vcmask 7168   ;;  %vm408_vm1 = vcmask 130048  }
   0xe   : > { %s2389_s19 = smov 16   ;;  %s2390_s20 = smov 17   ;;  %1921 = vmatprep.mubr.bf16.mxu0 %v3608_v8  ;;  %1962 = vmatprep.mubr.bf16.mxu1 %v3608_v8  ;;  %v2611_v19 = vld [vmem:[%s3606_s2 + $0x10] sm:$0xff]  ;;  %v2628_v25 = vld [vmem:[%s3606_s2] sm:$0xff]  ;;  %vm244_vm2 = vcmask 138240   ;;  %vm572_vm3 = vcmask 121856  }
   0xf   : > { %s3633_s13 = smov (!%p160_p3, %s2323_s13), 1  ;;  %s2391_s21 = smov 15   ;;  %v2586_v14 = vshrl.u32 %v279_v11, 7  ;;  %v2643_v29 = vld [vmem:[%s3606_s2 + $0x20] sm:$0xff]  ;;  %vm1723_vm4 = vcmask 1043456   ;;  %vm899_vm5 = vcmask 1039360  }
  0x10   : > { %s2349_s14 = sshll.u32 %s3633_s13, 6  ;;  %s2392_s22 = smov 127   ;;  %vm1227_vm6 = vcmask 916480   ;;  %vm1063_vm7 = vcmask 924672   ;;  %vm1391_vm8 = vcmask 908288   ;;  %vm1840_vm9 = vcmask 1041408  }
  0x11   : > { %s2431_s17 = scalar_lea.vmem %s3604_s0, %s2349_s14  ;;  %s2393_s23 = smov 112   ;;  %v2597_v17 = vsub.s32 1, %v2586_v14  ;;  %v2623_v24 = vsub.s32 0, %v2586_v14  ;;  %vm1836_vm10 = vcmask 293888   ;;  %vm2268_vm11 = vcmask 15360  }
  0x12   : > { %v2434_v0 = vld [vmem:[%s2431_s17] sm:$0xff]  ;;  %v2445_v2 = vld [vmem:[%s2431_s17 + $0x38] sm:$0xff]  ;;  %v2468_v4 = vld [vmem:[%s2431_s17 + $0x8] sm:$0xff]  ;;  %s2394_s24 = smov 113   ;;  %s2395_s25 = smov 111  }
  0x13   : > { %706 = vrot.lane.b32.xlu1 %v2434_v0, %s2388_s18  ;;  %378 = vrot.lane.b32.xlu0 %v2434_v0, %s2389_s19  ;;  %v2442_v1 = vcombine.high %v2434_v0, %v2434_v0  ;;  %v2453_v3 = vcombine.high %v2445_v2, %v2445_v2  ;;  %v2476_v5 = vcombine.high %v2468_v4, %v2468_v4  ;;  %v2515_v6 = vld [vmem:[%s2431_s17 + $0x10] sm:$0xff]  ;;  %v2556_v9 = vld [vmem:[%s2431_s17 + $0x18] sm:$0xff]  ;;  %s2330_s10 = sshll.u32 %s3633_s13, 3 }
  0x14   : > { %v2535_v7 = vcombine.high %v2515_v6, %v2515_v6  ;;  %v2564_v10 = vcombine.high %v2556_v9, %v2556_v9  ;;  %v2614_v20 = vld [vmem:[%s2431_s17 + $0x20] sm:$0xff]  ;;  %v778_v23 = vrot.slane %v2602_v18, %v2597_v17  ;;  %v450_v27 = vrot.slane %v2611_v19, %v2597_v17  ;;  %s168_s15 = scalar_lea.vmem %s3607_s3, %s2330_s10 }
  0x15   : > { %v286_v31 = vrot.slane %v2628_v25, %v2597_v17  ;;  %v774_v34 = vrot.slane %v2602_v18, %v2623_v24  ;;  %v446_v37 = vrot.slane %v2611_v19, %v2623_v24  ;;  %v614_v38 = vrot.slane %v2643_v29, %v2597_v17 }
  0x16   : > { %v610_v46 = vrot.slane %v2643_v29, %v2623_v24  ;;  %v282_v47 = vrot.slane %v2628_v25, %v2623_v24  ;;  %v2689_v59 = vcombine.high %v2614_v20, %v2614_v20 }
  0x17   : > { %708 = vrot.lane.b32.xlu1 %v2442_v1, %s2388_s18  ;;  %380 = vrot.lane.b32.xlu0 %v2442_v1, %s2389_s19 }
  0x1b   : > { %703 = vrot.lane.b32.xlu1 %v2453_v3, %s2388_s18  ;;  %375 = vrot.lane.b32.xlu0 %v2453_v3, %s2389_s19 }
  0x1f   : > { %216 = vrot.lane.b32.xlu1 %v2442_v1, %s2390_s20  ;;  %214 = vrot.lane.b32.xlu0 %v2434_v0, %s2390_s20 }
  0x23   : > { %544 = vrot.lane.b32.xlu1 %v2442_v1, %s2391_s21  ;;  %542 = vrot.lane.b32.xlu0 %v2434_v0, %s2391_s21 }
  0x27   : > { %539 = vrot.lane.b32.xlu1 %v2453_v3, %s2391_s21  ;;  %197 = vrot.lane.b32.xlu0 %v2453_v3, %s2390_s20 }
  0x2b   : > { %384 = vrot.lane.b32.xlu1 %v2476_v5, %s2389_s19  ;;  %382 = vrot.lane.b32.xlu0 %v2468_v4, %s2389_s19 }
  0x2f   : > { %712 = vrot.lane.b32.xlu1 %v2476_v5, %s2388_s18  ;;  %710 = vrot.lane.b32.xlu0 %v2468_v4, %s2388_s18 }
  0x33   : > { %871 = vrot.lane.b32.xlu1 %v2468_v4, %s2392_s22  ;;  %869 = vrot.lane.b32.xlu0 %v2442_v1, %s2392_s22 }
  0x37   : > { %1199 = vrot.lane.b32.xlu1 %v2468_v4, %s2393_s23  ;;  %1197 = vrot.lane.b32.xlu0 %v2442_v1, %s2393_s23 }
  0x3b   : > { %1195 = vrot.lane.b32.xlu1 %v2434_v0, %s2393_s23  ;;  %867 = vrot.lane.b32.xlu0 %v2434_v0, %s2392_s22 }
  0x3f   : > { %220 = vrot.lane.b32.xlu1 %v2476_v5, %s2390_s20  ;;  %218 = vrot.lane.b32.xlu0 %v2468_v4, %s2390_s20 }
  0x43   : > { %548 = vrot.lane.b32.xlu1 %v2476_v5, %s2391_s21  ;;  %546 = vrot.lane.b32.xlu0 %v2468_v4, %s2391_s21 }
  0x47   : > { %1035 = vrot.lane.b32.xlu1 %v2468_v4, %s2394_s24  ;;  %1033 = vrot.lane.b32.xlu0 %v2442_v1, %s2394_s24 }
  0x4b   : > { %873 = vrot.lane.b32.xlu1 %v2476_v5, %s2392_s22  ;;  %1031 = vrot.lane.b32.xlu0 %v2434_v0, %s2394_s24 }
  0x4f   : > { %1201 = vrot.lane.b32.xlu1 %v2476_v5, %s2393_s23  ;;  %875 = vrot.lane.b32.xlu0 %v2515_v6, %s2392_s22 }
  0x53   : > { %1037 = vrot.lane.b32.xlu1 %v2476_v5, %s2394_s24  ;;  %1203 = vrot.lane.b32.xlu0 %v2515_v6, %s2393_s23 }
  0x57   : > { %1359 = vrot.lane.b32.xlu1 %v2434_v0, %s2395_s25  ;;  %1039 = vrot.lane.b32.xlu0 %v2515_v6, %s2394_s24 }
  0x5b   : > { %1363 = vrot.lane.b32.xlu1 %v2468_v4, %s2395_s25  ;;  %1361 = vrot.lane.b32.xlu0 %v2442_v1, %s2395_s25 }
  0x5f   : > { %388 = vrot.lane.b32.xlu1 %v2535_v7, %s2389_s19  ;;  %386 = vrot.lane.b32.xlu0 %v2515_v6, %s2389_s19 }
  0x63   : > { %716 = vrot.lane.b32.xlu1 %v2535_v7, %s2388_s18  ;;  %714 = vrot.lane.b32.xlu0 %v2515_v6, %s2388_s18 }
  0x67   : > { %224 = vrot.lane.b32.xlu1 %v2535_v7, %s2390_s20  ;;  %222 = vrot.lane.b32.xlu0 %v2515_v6, %s2390_s20 }
  0x6b   : > { %552 = vrot.lane.b32.xlu1 %v2535_v7, %s2391_s21  ;;  %550 = vrot.lane.b32.xlu0 %v2515_v6, %s2391_s21 }
  0x6f   : > { %1367 = vrot.lane.b32.xlu1 %v2515_v6, %s2395_s25  ;;  %1365 = vrot.lane.b32.xlu0 %v2476_v5, %s2395_s25 }
  0x73   : > { %392 = vrot.lane.b32.xlu1 %v2564_v10, %s2389_s19  ;;  %390 = vrot.lane.b32.xlu0 %v2556_v9, %s2389_s19 }
  0x77   : > { %720 = vrot.lane.b32.xlu1 %v2564_v10, %s2388_s18  ;;  %718 = vrot.lane.b32.xlu0 %v2556_v9, %s2388_s18 }
  0x7b   : > { %879 = vrot.lane.b32.xlu1 %v2556_v9, %s2392_s22  ;;  %877 = vrot.lane.b32.xlu0 %v2535_v7, %s2392_s22 }
  0x7f   : > { %1207 = vrot.lane.b32.xlu1 %v2556_v9, %s2393_s23  ;;  %1205 = vrot.lane.b32.xlu0 %v2535_v7, %s2393_s23 }
  0x83   : > { %228 = vrot.lane.b32.xlu1 %v2564_v10, %s2390_s20  ;;  %226 = vrot.lane.b32.xlu0 %v2556_v9, %s2390_s20 }
  0x85   : > { %v707_v12 = vpop.permute.xlu1 %706  ;;  %v379_v13 = vpop.permute.xlu0 %378 }
  0x87   : > { %556 = vrot.lane.b32.xlu1 %v2564_v10, %s2391_s21  ;;  %554 = vrot.lane.b32.xlu0 %v2556_v9, %s2391_s21 }
  0x89   : > { %v2592_v15 = vpop.permute.xlu1 %708  ;;  %v2594_v16 = vpop.permute.xlu0 %380 }
  0x8a   : > { %v737_v26 = vsel %vm736_vm0, %v707_v12, %v2592_v15  ;;  %v409_v28 = vsel %vm408_vm1, %v379_v13, %v2594_v16 }
  0x8b   : > { %1043 = vrot.lane.b32.xlu1 %v2556_v9, %s2394_s24  ;;  %1041 = vrot.lane.b32.xlu0 %v2535_v7, %s2394_s24  ;;  %v852_v33 = vmul.f32 %v778_v23, %v737_v26  ;;  %v524_v36 = vmul.f32 %v450_v27, %v409_v28 }
  0x8d   : > { %v2616_v21 = vpop.permute.xlu1 %703  ;;  %v2618_v22 = vpop.permute.xlu0 %375  ;;  %v1588_v44 = vrot.slane %v852_v33, 4  ;;  %v1540_v48 = vrot.slane %v524_v36, 4  ;;  %v2716_v33 = vsub.s32 2, %v2586_v14 }
  0x8e   : > { %3617 = vst [vmem:[#allocation2_spill] sm:$0xff] %v2616_v21  ;;  %3618 = vst [vmem:[#allocation3_spill] sm:$0xff] %v2618_v22  ;;  %v768_v39 = vsel %vm736_vm0, %v2616_v21, %v707_v12  ;;  %v440_v40 = vsel %vm408_vm1, %v2618_v22, %v379_v13 }
  0x8f   : > { %883 = vrot.lane.b32.xlu1 %v2614_v20, %s2392_s22  ;;  %881 = vrot.lane.b32.xlu0 %v2564_v10, %s2392_s22  ;;  %v851_v49 = vmul.f32 %v774_v34, %v768_v39  ;;  %v523_v50 = vmul.f32 %v446_v37, %v440_v40  ;;  %v2719_v34 = vsub.s32 3, %v2586_v14  ;;  %v2728_v37 = vld [vmem:[%s3606_s2 + $0x50] sm:$0xff]  ;;  %v454_v39 = vrot.slane %v2611_v19, %v2716_v33 }
  0x91   : > { %v2645_v30 = vpop.permute.xlu1 %216  ;;  %v215_v32 = vpop.permute.xlu0 %214  ;;  %v1587_v60 = vrot.slane %v851_v49, 4  ;;  %v1539_v61 = vrot.slane %v523_v50, 4  ;;  %v458_v40 = vrot.slane %v2611_v19, %v2719_v34 }
  0x92   : > { %v245_v35 = vsel %vm244_vm2, %v215_v32, %v2645_v30 }
  0x93   : > { %1211 = vrot.lane.b32.xlu1 %v2614_v20, %s2393_s23  ;;  %1209 = vrot.lane.b32.xlu0 %v2564_v10, %s2393_s23  ;;  %v360_v41 = vmul.f32 %v286_v31, %v245_v35 }
  0x95   : > { %v2665_v42 = vpop.permute.xlu1 %544  ;;  %v543_v43 = vpop.permute.xlu0 %542  ;;  %v1725_v54 = vsel %vm1723_vm4, %v360_v41, %v1540_v48  ;;  %v782_v41 = vrot.slane %v2602_v18, %v2716_v33  ;;  %v942_v48 = vrot.slane %v2728_v37, %v2597_v17 }
  0x96   : > { %v573_v45 = vsel %vm572_vm3, %v543_v43, %v2665_v42 }
  0x97   : > { %v688_v51 = vmul.f32 %v614_v38, %v573_v45  ;;  %1047 = vrot.lane.b32.xlu1 %v2614_v20, %s2394_s24  ;;  %1045 = vrot.lane.b32.xlu0 %v2564_v10, %s2394_s24  ;;  %v2735_v38 = vld [vmem:[%s2431_s17 + $0x28] sm:$0xff] }
  0x99   : > { %v2677_v52 = vpop.permute.xlu1 %539  ;;  %v2679_v53 = vpop.permute.xlu0 %197  ;;  %v1741_v55 = vsel %vm1723_vm4, %v688_v51, %v1588_v44 }
  0x9a   : > { %3619 = vst [vmem:[#allocation4_spill] sm:$0xff] %v2677_v52  ;;  %3620 = vst [vmem:[#allocation5_spill] sm:$0xff] %v2679_v53  ;;  %v604_v56 = vsel %vm572_vm3, %v2677_v52, %v543_v43  ;;  %v276_v57 = vsel %vm244_vm2, %v2679_v53, %v215_v32  ;;  %v1789_v58 = vpack.c.bf16 %v1741_v55, %v1725_v54  ;;  %v2746_v43 = vld [vmem:[%s3606_s2 + $0x70] sm:$0xff] }
  0x9b   : > { %v687_v62 = vmul.f32 %v610_v46, %v604_v56  ;;  %v359_v63 = vmul.f32 %v282_v47, %v276_v57  ;;  %1371 = vrot.lane.b32.xlu1 %v2556_v9, %s2395_s25  ;;  %1369 = vrot.lane.b32.xlu0 %v2535_v7, %s2395_s25  ;;  %v786_v47 = vrot.slane %v2602_v18, %v2719_v34 }
  0x9c   : > { %1889 = vmatprep.subr.bf16.mxu0 %v1789_v58  ;;  %v1270_v54 = vrot.slane %v2746_v43, %v2597_v17  ;;  %v938_v55 = vrot.slane %v2728_v37, %v2623_v24  ;;  %v290_v58 = vrot.slane %v2628_v25, %v2716_v33 }
  0x9d   : > { %v2695_v11 = vpop.permute.xlu1 %384  ;;  %v383_v12 = vpop.permute.xlu0 %382  ;;  %v1724_v13 = vsel %vm1723_vm4, %v359_v63, %v1539_v61  ;;  %v1740_v23 = vsel %vm1723_vm4, %v687_v62, %v1587_v60  ;;  %v294_v60 = vrot.slane %v2628_v25, %v2719_v34  ;;  %v2789_v62 = vld [vmem:[%s3606_s2 + $0x60] sm:$0xff] }
  0x9e   : > { %v1788_v26 = vpack.c.bf16 %v1740_v23, %v1724_v13  ;;  %v410_v46 = vsel %vm408_vm1, %v2594_v16, %v383_v12  ;;  %v411_v49 = vsel %vm408_vm1, %v383_v12, %v2695_v11  ;;  %v2768_v16 = vcombine.high %v2735_v38, %v2735_v38 }
  0x9f   : > { %396 = vrot.lane.b32.xlu1 %v2689_v59, %s2389_s19  ;;  %394 = vrot.lane.b32.xlu0 %v2614_v20, %s2389_s19  ;;  %v526_v63 = vmul.f32 %v458_v40, %v411_v49 }
  0xa0   : > { %1890 = vmatpush1.bf16.msra.mxu0 %v1788_v26 }
  0xa1   : > { %v2703_v27 = vpop.permute.xlu1 %712  ;;  %v711_v28 = vpop.permute.xlu0 %710  ;;  %v1542_v8 = vrot.slane %v526_v63, 4 }
  0xa2   : > { %v738_v50 = vsel %vm736_vm0, %v2592_v15, %v711_v28  ;;  %v739_v51 = vsel %vm736_vm0, %v711_v28, %v2703_v27  ;;  %v1266_v15 = vrot.slane %v2746_v43, %v2623_v24  ;;  %v618_v28 = vrot.slane %v2643_v29, %v2716_v33 }
  0xa3   : > { %724 = vrot.lane.b32.xlu1 %v2689_v59, %s2388_s18  ;;  %722 = vrot.lane.b32.xlu0 %v2614_v20, %s2388_s18  ;;  %v853_v12 = vmul.f32 %v782_v41, %v738_v50  ;;  %v854_v26 = vmul.f32 %v786_v47, %v739_v51  ;;  %v1106_v41 = vrot.slane %v2789_v62, %v2597_v17 }
  0xa5   : > { %v2709_v31 = vpop.permute.xlu1 %871  ;;  %v870_v32 = vpop.permute.xlu0 %869  ;;  %v1589_v53 = vrot.slane %v853_v12, 4  ;;  %v1590_v52 = vrot.slane %v854_v26, 4 }
  0xa6   : > { %v901_v56 = vsel %vm899_vm5, %v870_v32, %v2709_v31 }
  0xa7   : > { %232 = vrot.lane.b32.xlu1 %v2689_v59, %s2390_s20  ;;  %230 = vrot.lane.b32.xlu0 %v2614_v20, %s2390_s20  ;;  %v1016_v40 = vmul.f32 %v942_v48, %v901_v56 }
  0xa9   : > { %v2721_v35 = vpop.permute.xlu1 %1199  ;;  %v2723_v36 = vpop.permute.xlu0 %1197 }
  0xab   : > { %560 = vrot.lane.b32.xlu1 %v2689_v59, %s2391_s21  ;;  %558 = vrot.lane.b32.xlu0 %v2614_v20, %s2391_s21 }
  0xad   : > { %v2748_v44 = vpop.permute.xlu1 %1195  ;;  %v2750_v45 = vpop.permute.xlu0 %867 }
  0xae   : > { %3621 = vst [vmem:[#allocation6_spill] sm:$0xff] %v2750_v45  ;;  %v900_v47 = vsel %vm899_vm5, %v2750_v45, %v870_v32  ;;  %v1644_v32 = vrot.slane %v1016_v40, 4 }
  0xaf   : > { %1375 = vrot.lane.b32.xlu1 %v2614_v20, %s2395_s25  ;;  %1373 = vrot.lane.b32.xlu0 %v2564_v10, %s2395_s25  ;;  %v525_v20 = vmul.f32 %v454_v39, %v410_v46  ;;  %v622_v39 = vrot.slane %v2643_v29, %v2719_v34 }
  0xb1   : > { %v2780_v57 = vpop.permute.xlu1 %220  ;;  %v219_v61 = vpop.permute.xlu0 %218  ;;  %v1541_v46 = vrot.slane %v525_v20, 4 }
  0xb2   : > { %v246_v13 = vsel %vm244_vm2, %v2645_v30, %v219_v61  ;;  %v247_v23 = vsel %vm244_vm2, %v219_v61, %v2780_v57  ;;  %v1229_v30 = vsel %vm1227_vm6, %v2723_v36, %v2721_v35 }
  0xb3   : > { %400 = vrot.lane.b32.xlu1 %v2768_v16, %s2389_s19  ;;  %398 = vrot.lane.b32.xlu0 %v2735_v38, %s2389_s19  ;;  %v361_v49 = vmul.f32 %v290_v58, %v246_v13  ;;  %v362_v50 = vmul.f32 %v294_v60, %v247_v23  ;;  %v1344_v22 = vmul.f32 %v1270_v54, %v1229_v30 }
  0xb4   : > { %v1228_v58 = vsel %vm1227_vm6, %v2748_v44, %v2723_v36  ;;  %v1015_v60 = vmul.f32 %v938_v55, %v900_v47 }
  0xb5   : > { %v2810_v51 = vpop.permute.xlu1 %548  ;;  %v547_v61 = vpop.permute.xlu0 %546  ;;  %v1727_v12 = vsel %vm1723_vm4, %v362_v50, %v1542_v8  ;;  %v1726_v13 = vsel %vm1723_vm4, %v361_v49, %v1541_v46  ;;  %v1692_v40 = vrot.slane %v1344_v22, 4  ;;  %v1343_v30 = vmul.f32 %v1266_v15, %v1228_v58 }
  0xb6   : > { %v574_v48 = vsel %vm572_vm3, %v2665_v42, %v547_v61  ;;  %v575_v56 = vsel %vm572_vm3, %v547_v61, %v2810_v51  ;;  %v1102_v8 = vrot.slane %v2789_v62, %v2623_v24  ;;  %v1757_v22 = vsel %vm1723_vm4, %v2442_v1, %v1644_v32 }
  0xb7   : > { %v689_v21 = vmul.f32 %v618_v28, %v574_v48  ;;  %v690_v20 = vmul.f32 %v622_v39, %v575_v56  ;;  %728 = vrot.lane.b32.xlu1 %v2768_v16, %s2388_s18  ;;  %726 = vrot.lane.b32.xlu0 %v2735_v38, %s2388_s18  ;;  %v950_v49 = vrot.slane %v2728_v37, %v2719_v34 }
  0xb8   : > { %v946_v56 = vrot.slane %v2728_v37, %v2716_v33 }
  0xb9   : > { %v1036_v42 = vpop.permute.xlu1 %1035  ;;  %v1034_v63 = vpop.permute.xlu0 %1033  ;;  %v1743_v54 = vsel %vm1723_vm4, %v690_v20, %v1590_v52  ;;  %v1742_v23 = vsel %vm1723_vm4, %v689_v21, %v1589_v53  ;;  %v1643_v52 = vrot.slane %v1015_v60, 4  ;;  %v1274_v20 = vrot.slane %v2746_v43, %v2716_v33 }
  0xba   : > { %v1065_v26 = vsel %vm1063_vm7, %v1034_v63, %v1036_v42  ;;  %v1791_v28 = vpack.c.bf16 %v1743_v54, %v1727_v12  ;;  %v1790_v39 = vpack.c.bf16 %v1742_v23, %v1726_v13  ;;  %v1110_v12 = vrot.slane %v2789_v62, %v2716_v33 }
  0xbb   : > { %v1180_v61 = vmul.f32 %v1106_v41, %v1065_v26  ;;  %887 = vrot.lane.b32.xlu1 %v2735_v38, %s2392_s22  ;;  %885 = vrot.lane.b32.xlu0 %v2689_v59, %s2392_s22  ;;  %v1691_v41 = vrot.slane %v1343_v30, 4  ;;  %v1756_v50 = vsel %vm1723_vm4, %v2434_v0, %v1643_v52  ;;  %v1278_v0 = vrot.slane %v2746_v43, %v2719_v34 }
  0xbc   : > { %1930 = vmatprep.subr.bf16.mxu1 %v1791_v28 }
  0xbd   : > { %v874_v36 = vpop.permute.xlu1 %873  ;;  %1931 = vmatpush1.bf16.msra.mxu1 %v1790_v39  ;;  %v2834_v21 = vpop.permute.xlu0 %1031  ;;  %v1773_v53 = vsel %vm1723_vm4, %v1180_v61, %v1692_v40  ;;  %v1114_v40 = vrot.slane %v2789_v62, %v2719_v34  ;;  %v2884_v61 = vld [vmem:[%s3606_s2 + $0x80] sm:$0xff] }
  0xbe   : > { %3622 = vst [vmem:[#allocation7_spill] sm:$0xff] %v2834_v21  ;;  %v1064_v15 = vsel %vm1063_vm7, %v2834_v21, %v1034_v63  ;;  %v1805_v55 = vpack.c.bf16 %v1773_v53, %v1757_v22  ;;  %v902_v60 = vsel %vm899_vm5, %v2709_v31, %v874_v36 }
  0xbf   : > { %v1179_v46 = vmul.f32 %v1102_v8, %v1064_v15  ;;  %1215 = vrot.lane.b32.xlu1 %v2735_v38, %s2393_s23  ;;  %1213 = vrot.lane.b32.xlu0 %v2689_v59, %s2393_s23  ;;  %v1017_v31 = vmul.f32 %v946_v56, %v902_v60 }
  0xc0   : > { %1891 = vmatprep.subr.bf16.mxu0 %v1805_v55 }
  0xc1   : > { %v1202_v47 = vpop.permute.xlu1 %1201  ;;  %v2847_v1 = vpop.permute.xlu0 %875  ;;  %v1772_v48 = vsel %vm1723_vm4, %v1179_v46, %v1691_v41  ;;  %v1430_v41 = vrot.slane %v2884_v61, %v2623_v24  ;;  %v1434_v46 = vrot.slane %v2884_v61, %v2597_v17 }
  0xc2   : > { %v903_v32 = vsel %vm899_vm5, %v874_v36, %v2847_v1  ;;  %v1804_v58 = vpack.c.bf16 %v1772_v48, %v1756_v50  ;;  %v1230_v63 = vsel %vm1227_vm6, %v2721_v35, %v1202_v47  ;;  %v1645_v36 = vrot.slane %v1017_v31, 4 }
  0xc3   : > { %236 = vrot.lane.b32.xlu1 %v2768_v16, %s2390_s20  ;;  %234 = vrot.lane.b32.xlu0 %v2735_v38, %s2390_s20  ;;  %v1018_v54 = vmul.f32 %v950_v49, %v903_v32  ;;  %v1345_v26 = vmul.f32 %v1274_v20, %v1230_v63 }
  0xc4   : > { %1892 = vmatpush1.bf16.msra.mxu0 %v1804_v58  ;;  %v1758_v63 = vsel %vm1723_vm4, %v2468_v4, %v1645_v36  ;;  %v2925_v4 = vsub.s32 5, %v2586_v14 }
  0xc5   : > { %v1038_v13 = vpop.permute.xlu1 %1037  ;;  %v2870_v23 = vpop.permute.xlu0 %1203  ;;  %v1693_v22 = vrot.slane %v1345_v26, 4 }
  0xc6   : > { %v1066_v35 = vsel %vm1063_vm7, %v1036_v42, %v1038_v13  ;;  %v1231_v28 = vsel %vm1227_vm6, %v1202_v47, %v2870_v23  ;;  %v1646_v42 = vrot.slane %v1018_v54, 4  ;;  %v2901_v47 = vld [vmem:[%s2431_s17 + $0x30] sm:$0xff]  ;;  %v466_v36 = vrot.slane %v2611_v19, %v2925_v4 }
  0xc7   : > { %v1346_v39 = vmul.f32 %v1278_v0, %v1231_v28  ;;  %564 = vrot.lane.b32.xlu1 %v2768_v16, %s2391_s21  ;;  %562 = vrot.lane.b32.xlu0 %v2735_v38, %s2391_s21  ;;  %v1181_v30 = vmul.f32 %v1110_v12, %v1066_v35  ;;  %v2922_v35 = vsub.s32 4, %v2586_v14 }
  0xc8   : > { %v1759_v56 = vsel %vm1723_vm4, %v2476_v5, %v1646_v42 }
  0xc9   : > { %v2886_v8 = vpop.permute.xlu1 %1359  ;;  %v2888_v52 = vpop.permute.xlu0 %1039  ;;  %v1694_v15 = vrot.slane %v1346_v39, 4  ;;  %v1774_v49 = vsel %vm1723_vm4, %v1181_v30, %v1693_v22  ;;  %v2938_v30 = vld [vmem:[%s3605_s1] sm:$0xf]  ;;  %v462_v42 = vrot.slane %v2611_v19, %v2922_v35  ;;  %v790_v22 = vrot.slane %v2602_v18, %v2922_v35 }
  0xca   : > { %3623 = vst [vmem:[#allocation8_spill] sm:$0xff] %v2886_v8  ;;  %v1067_v53 = vsel %vm1063_vm7, %v1038_v13, %v2888_v52  ;;  %v1806_v5 = vpack.c.bf16 %v1774_v49, %v1758_v63  ;;  %v298_v49 = vrot.slane %v2628_v25, %v2922_v35 }
  0xcb   : > { %v1182_v55 = vmul.f32 %v1114_v40, %v1067_v53  ;;  %1051 = vrot.lane.b32.xlu1 %v2735_v38, %s2394_s24  ;;  %1049 = vrot.lane.b32.xlu0 %v2689_v59, %s2394_s24 }
  0xcd   : > { %v2904_v50 = vpop.permute.xlu1 %1363  ;;  %v1362_v48 = vpop.permute.xlu0 %1361  ;;  %v1775_v20 = vsel %vm1723_vm4, %v1182_v55, %v1694_v15  ;;  %v794_v55 = vrot.slane %v2602_v18, %v2925_v4 }
  0xce   : > { %v1392_v32 = vsel %vm1391_vm8, %v2886_v8, %v1362_v48  ;;  %v1393_v58 = vsel %vm1391_vm8, %v1362_v48, %v2904_v50  ;;  %v1807_v60 = vpack.c.bf16 %v1775_v20, %v1759_v56  ;;  %v302_v48 = vrot.slane %v2628_v25, %v2925_v4 }
  0xcf   : > { %v1507_v0 = vmul.f32 %v1430_v41, %v1392_v32  ;;  %v1508_v12 = vmul.f32 %v1434_v46, %v1393_v58  ;;  %891 = vrot.lane.b32.xlu1 %v2901_v47, %s2392_s22  ;;  %889 = vrot.lane.b32.xlu0 %v2768_v16, %s2392_s22  ;;  %v626_v20 = vrot.slane %v2643_v29, %v2922_v35  ;;  %v3624_v32 = vmov 0  }
  0xd0   : > { %1932 = vmatprep.subr.bf16.mxu1 %v1807_v60 }
  0xd1   : > { %v1820_v54 = vpack.c.bf16 %v1507_v0, %v1507_v0  ;;  %v1821_v13 = vpack.c.bf16 %v1508_v12, %v1508_v12  ;;  %v2919_v31 = vpop.permute.xlu1 %388  ;;  %1933 = vmatpush1.bf16.msra.mxu1 %v1806_v5  ;;  %v387_v26 = vpop.permute.xlu0 %386 }
  0xd2   : > { %v412_v53 = vsel %vm408_vm1, %v2695_v11, %v387_v26  ;;  %v413_v15 = vsel %vm408_vm1, %v387_v26, %v2919_v31 }
  0xd3   : > { %1219 = vrot.lane.b32.xlu1 %v2901_v47, %s2393_s23  ;;  %1217 = vrot.lane.b32.xlu0 %v2768_v16, %s2393_s23  ;;  %v1842_v28 = vsel %vm1840_vm9, %v1820_v54, 0  ;;  %v527_v58 = vmul.f32 %v462_v42, %v412_v53  ;;  %v528_v60 = vmul.f32 %v466_v36, %v413_v15  ;;  %v2983_v54 = vcombine.high %v2901_v47, %v2901_v47 }
  0xd4   : > { %2331 = vmatprep.subr.msk.bf16.mxu0 %vm1840_vm9, %v1821_v13  ;;  %v1442_v42 = vrot.slane %v2884_v61, %v2719_v34 }
  0xd5   : > { %1894 = vmatpush1.bf16.msra.mxu0 %v1842_v28  ;;  %v2933_v39 = vpop.permute.xlu1 %716  ;;  %v715_v40 = vpop.permute.xlu0 %714  ;;  %v1543_v36 = vrot.slane %v527_v58, 4 }
  0xd6   : > { %v740_v41 = vsel %vm736_vm0, %v2703_v27, %v715_v40  ;;  %v741_v46 = vsel %vm736_vm0, %v715_v40, %v2933_v39  ;;  %v630_v27 = vrot.slane %v2643_v29, %v2925_v4  ;;  %v1438_v40 = vrot.slane %v2884_v61, %v2716_v33 }
  0xd7   : > { %1055 = vrot.lane.b32.xlu1 %v2901_v47, %s2394_s24  ;;  %1053 = vrot.lane.b32.xlu0 %v2768_v16, %s2394_s24  ;;  %v855_v12 = vmul.f32 %v790_v22, %v740_v41  ;;  %v856_v5 = vmul.f32 %v794_v55, %v741_v46 }
  0xd8   : > { %2332 = vmatmul.mubr.msk.bf16.vlgmr.msra.gmra.mrb[0].mxu0 %vm1836_vm10, %v2938_v30 }
  0xd9   : > { %v2962_v11 = vpop.permute.xlu1 %224  ;;  %v223_v56 = vpop.permute.xlu0 %222  ;;  %2003 = vmatprep.mubr.bf16.mxu0 %v3624_v32  ;;  %v1591_v15 = vrot.slane %v855_v12, 4  ;;  %v1592_v55 = vrot.slane %v856_v5, 4 }
  0xda   : > { %v248_v63 = vsel %vm244_vm2, %v2780_v57, %v223_v56  ;;  %v249_v0 = vsel %vm244_vm2, %v223_v56, %v2962_v11 }
  0xdb   : > { %1379 = vrot.lane.b32.xlu1 %v2735_v38, %s2395_s25  ;;  %1377 = vrot.lane.b32.xlu0 %v2689_v59, %s2395_s25  ;;  %v363_v13 = vmul.f32 %v298_v49, %v248_v63  ;;  %v364_v26 = vmul.f32 %v302_v48, %v249_v0  ;;  %v1544_v38 = vrot.slane %v528_v60, 4 }
  0xdd   : > { %v2985_v28 = vpop.permute.xlu1 %552  ;;  %v551_v57 = vpop.permute.xlu0 %550  ;;  %v1728_v49 = vsel %vm1723_vm4, %v363_v13, %v1543_v36  ;;  %v1729_v58 = vsel %vm1723_vm4, %v364_v26, %v1544_v38  ;;  %v3030_v38 = vsub.s32 6, %v2586_v14 }
  0xde   : > { %v576_v22 = vsel %vm572_vm3, %v2810_v51, %v551_v57  ;;  %v577_v53 = vsel %vm572_vm3, %v551_v57, %v2985_v28 }
  0xdf   : > { %v691_v41 = vmul.f32 %v626_v20, %v576_v22  ;;  %v692_v46 = vmul.f32 %v630_v27, %v577_v53  ;;  %404 = vrot.lane.b32.xlu1 %v2983_v54, %s2389_s19  ;;  %402 = vrot.lane.b32.xlu0 %v2901_v47, %s2389_s19  ;;  %v3033_v22 = vsub.s32 7, %v2586_v14  ;;  %v798_v14 = vrot.slane %v2602_v18, %v3030_v38 }
  0xe1   : > { %v1744_v48 = vsel %vm1723_vm4, %v691_v41, %v1591_v15  ;;  %v3001_v56 = vpop.permute.xlu1 %1367  ;;  %v1366_v51 = vpop.permute.xlu0 %1365  ;;  %v1745_v60 = vsel %vm1723_vm4, %v692_v46, %v1592_v55  ;;  %v470_v55 = vrot.slane %v2611_v19, %v3030_v38  ;;  %v474_v41 = vrot.slane %v2611_v19, %v3033_v22 }
  0xe2   : > { %v1394_v20 = vsel %vm1391_vm8, %v2904_v50, %v1366_v51  ;;  %v1395_v27 = vsel %vm1391_vm8, %v1366_v51, %v3001_v56  ;;  %v1793_v63 = vpack.c.bf16 %v1745_v60, %v1729_v58  ;;  %v1792_v0 = vpack.c.bf16 %v1744_v48, %v1728_v49 }
  0xe3   : > { %v1509_v12 = vmul.f32 %v1438_v40, %v1394_v20  ;;  %v1510_v5 = vmul.f32 %v1442_v42, %v1395_v27  ;;  %732 = vrot.lane.b32.xlu1 %v2983_v54, %s2388_s18  ;;  %730 = vrot.lane.b32.xlu0 %v2901_v47, %s2388_s18  ;;  %v802_v46 = vrot.slane %v2602_v18, %v3033_v22 }
  0xe4   : > { %1971 = vmatprep.subr.bf16.mxu0 %v1793_v63  ;;  %v954_v58 = vrot.slane %v2728_v37, %v2922_v35  ;;  %v958_v19 = vrot.slane %v2728_v37, %v2925_v4  ;;  %v1282_v18 = vrot.slane %v2746_v43, %v2922_v35  ;;  %v1286_v20 = vrot.slane %v2746_v43, %v2925_v4 }
  0xe5   : > { %v1822_v13 = vpack.c.bf16 %v1509_v12, %v1509_v12  ;;  %v1823_v26 = vpack.c.bf16 %v1510_v5, %v1510_v5  ;;  %v3013_v57 = vpop.permute.xlu1 %392  ;;  %1972 = vmatpush1.bf16.msra.mxu0 %v1792_v0  ;;  %v391_v50 = vpop.permute.xlu0 %390  ;;  %v306_v27 = vrot.slane %v2628_v25, %v3030_v38  ;;  %v634_v63 = vrot.slane %v2643_v29, %v3030_v38 }
  0xe6   : > { %v415_v51 = vsel %vm408_vm1, %v391_v50, %v3013_v57 }
  0xe7   : > { %240 = vrot.lane.b32.xlu1 %v2983_v54, %s2390_s20  ;;  %238 = vrot.lane.b32.xlu0 %v2901_v47, %s2390_s20  ;;  %v1848_v40 = vsel %vm1840_vm9, %v1822_v13, 0  ;;  %v530_v12 = vmul.f32 %v474_v41, %v415_v51 }
  0xe8   : > { %2333 = vmatprep.subr.msk.bf16.mxu1 %vm1840_vm9, %v1823_v26 }
  0xe9   : > { %1935 = vmatpush1.bf16.msra.mxu1 %v1848_v40  ;;  %v3021_v42 = vpop.permute.xlu1 %720  ;;  %v719_v36 = vpop.permute.xlu0 %718  ;;  %v1546_v51 = vrot.slane %v530_v12, 4 }
  0xea   : > { %v742_v60 = vsel %vm736_vm0, %v2933_v39, %v719_v36  ;;  %v310_v39 = vrot.slane %v2628_v25, %v3033_v22 }
  0xeb   : > { %568 = vrot.lane.b32.xlu1 %v2983_v54, %s2391_s21  ;;  %566 = vrot.lane.b32.xlu0 %v2901_v47, %s2391_s21  ;;  %v857_v40 = vmul.f32 %v798_v14, %v742_v60 }
  0xec   : > { %2334 = vmatmul.mubr.msk.bf16.vlgmr.msra.gmra.mrb[0].mxu1 %vm1836_vm10, %v2938_v30 }
  0xed   : > { %v3035_v53 = vpop.permute.xlu1 %879  ;;  %v878_v15 = vpop.permute.xlu0 %877  ;;  %2044 = vmatprep.mubr.bf16.mxu1 %v3624_v32  ;;  %v1593_v8 = vrot.slane %v857_v40, 4 }
  0xee   : > { %v904_v5 = vsel %vm899_vm5, %v2847_v1, %v878_v15  ;;  %v905_v13 = vsel %vm899_vm5, %v878_v15, %v3035_v53  ;;  %v1118_v15 = vrot.slane %v2789_v62, %v2922_v35 }
  0xef   : > { %1383 = vrot.lane.b32.xlu1 %v2901_v47, %s2395_s25  ;;  %1381 = vrot.lane.b32.xlu0 %v2768_v16, %s2395_s25  ;;  %v414_v47 = vsel %vm408_vm1, %v2919_v31, %v391_v50  ;;  %v743_v31 = vsel %vm736_vm0, %v719_v36, %v3021_v42  ;;  %v1020_v14 = vmul.f32 %v958_v19, %v905_v13 }
  0xf0   : > { %v529_v0 = vmul.f32 %v470_v55, %v414_v47  ;;  %v638_v55 = vrot.slane %v2643_v29, %v3033_v22  ;;  %v858_v41 = vmul.f32 %v802_v46, %v743_v31  ;;  %v1122_v29 = vrot.slane %v2789_v62, %v2925_v4 }
  0xf1   : > { %v3050_v49 = vpop.permute.xlu1 %1207  ;;  %v1206_v48 = vpop.permute.xlu0 %1205 }
  0xf2   : > { %v1232_v1 = vsel %vm1227_vm6, %v2870_v23, %v1206_v48  ;;  %v1233_v47 = vsel %vm1227_vm6, %v1206_v48, %v3050_v49  ;;  %v1545_v46 = vrot.slane %v529_v0, 4  ;;  %v1594_v19 = vrot.slane %v858_v41, 4 }
  0xf3   : > { %734 = vrot.lane.b32.xlu1 %v2445_v2, %s2388_s18  ;;  %406 = vrot.lane.b32.xlu0 %v2445_v2, %s2389_s19  ;;  %v1347_v21 = vmul.f32 %v1282_v18, %v1232_v1  ;;  %v1348_v48 = vmul.f32 %v1286_v20, %v1233_v47 }
  0xf5   : > { %v3082_v26 = vpop.permute.xlu1 %228  ;;  %v227_v50 = vpop.permute.xlu0 %226  ;;  %v1696_v41 = vrot.slane %v1348_v48, 4 }
  0xf6   : > { %v250_v36 = vsel %vm244_vm2, %v2962_v11, %v227_v50  ;;  %v251_v25 = vsel %vm244_vm2, %v227_v50, %v3082_v26  ;;  %v1019_v11 = vmul.f32 %v954_v58, %v904_v5 }
  0xf7   : > { %895 = vrot.lane.b32.xlu1 %v2445_v2, %s2392_s22  ;;  %893 = vrot.lane.b32.xlu0 %v2983_v54, %s2392_s22  ;;  %v365_v23 = vmul.f32 %v306_v27, %v250_v36  ;;  %v366_v60 = vmul.f32 %v310_v39, %v251_v25  ;;  %v1648_v39 = vrot.slane %v1020_v14, 4 }
  0xf8   : > { %v1647_v27 = vrot.slane %v1019_v11, 4 }
  0xf9   : > { %v3102_v31 = vpop.permute.xlu1 %556  ;;  %v555_v50 = vpop.permute.xlu0 %554  ;;  %v1730_v18 = vsel %vm1723_vm4, %v365_v23, %v1545_v46  ;;  %v1731_v40 = vsel %vm1723_vm4, %v366_v60, %v1546_v51 }
  0xfa   : > { %v578_v45 = vsel %vm572_vm3, %v2985_v28, %v555_v50  ;;  %v579_v58 = vsel %vm572_vm3, %v555_v50, %v3102_v31  ;;  %v1760_v14 = vsel %vm1723_vm4, %v2515_v6, %v1647_v27  ;;  %v1290_v6 = vrot.slane %v2746_v43, %v3030_v38 }
  0xfb   : > { %v693_v5 = vmul.f32 %v634_v63, %v578_v45  ;;  %v694_v13 = vmul.f32 %v638_v55, %v579_v58  ;;  %1223 = vrot.lane.b32.xlu1 %v2445_v2, %s2393_s23  ;;  %1221 = vrot.lane.b32.xlu0 %v2983_v54, %s2393_s23  ;;  %v1695_v55 = vrot.slane %v1347_v21, 4 }
  0xfd   : > { %v1746_v0 = vsel %vm1723_vm4, %v693_v5, %v1593_v8  ;;  %v1044_v28 = vpop.permute.xlu1 %1043  ;;  %v1042_v12 = vpop.permute.xlu0 %1041  ;;  %v1747_v20 = vsel %vm1723_vm4, %v694_v13, %v1594_v19  ;;  %v962_v8 = vrot.slane %v2728_v37, %v3030_v38  ;;  %v1126_v5 = vrot.slane %v2789_v62, %v3030_v38 }
  0xfe   : > { %v1068_v45 = vsel %vm1063_vm7, %v2888_v52, %v1042_v12  ;;  %v1069_v63 = vsel %vm1063_vm7, %v1042_v12, %v1044_v28  ;;  %v1795_v36 = vpack.c.bf16 %v1747_v20, %v1731_v40  ;;  %v1794_v25 = vpack.c.bf16 %v1746_v0, %v1730_v18 }
  0xff   : > { %v1183_v1 = vmul.f32 %v1118_v15, %v1068_v45  ;;  %v1184_v11 = vmul.f32 %v1122_v29, %v1069_v63  ;;  %570 = vrot.lane.b32.xlu1 %v2445_v2, %s2391_s21  ;;  %242 = vrot.lane.b32.xlu0 %v2445_v2, %s2390_s20  ;;  %v966_v52 = vrot.slane %v2728_v37, %v3033_v22 }
 0x100   : > { %2012 = vmatprep.subr.bf16.mxu1 %v1795_v36  ;;  %v1761_v29 = vsel %vm1723_vm4, %v2535_v7, %v1648_v39  ;;  %v1294_v7 = vrot.slane %v2746_v43, %v3033_v22  ;;  %v1130_v43 = vrot.slane %v2789_v62, %v3033_v22  ;;  %v1446_v20 = vrot.slane %v2884_v61, %v2922_v35 }
 0x101   : > { %v1776_v21 = vsel %vm1723_vm4, %v1183_v1, %v1695_v55  ;;  %v3130_v15 = vpop.permute.xlu1 %883  ;;  %2013 = vmatpush1.bf16.msra.mxu1 %v1794_v25  ;;  %v882_v47 = vpop.permute.xlu0 %881  ;;  %v1777_v46 = vsel %vm1723_vm4, %v1184_v11, %v1696_v41  ;;  %v1450_v45 = vrot.slane %v2884_v61, %v2925_v4 }
 0x102   : > { %v906_v51 = vsel %vm899_vm5, %v3035_v53, %v882_v47  ;;  %v907_v37 = vsel %vm899_vm5, %v882_v47, %v3130_v15  ;;  %v1809_v23 = vpack.c.bf16 %v1777_v46, %v1761_v29  ;;  %v1808_v60 = vpack.c.bf16 %v1776_v21, %v1760_v14  ;;  %v3189_v46 = vld [vmem:[%s2431_s17 + $0x38] sm:$0xff] }
 0x103   : > { %1059 = vrot.lane.b32.xlu1 %v2445_v2, %s2394_s24  ;;  %1057 = vrot.lane.b32.xlu0 %v2983_v54, %s2394_s24  ;;  %v1021_v50 = vmul.f32 %v962_v8, %v906_v51  ;;  %v1022_v53 = vmul.f32 %v966_v52, %v907_v37 }
 0x104   : > { %1973 = vmatprep.subr.bf16.mxu0 %v1809_v23  ;;  %v3198_v23 = vld [vmem:[%s3606_s2 + $0x18] sm:$0xff] }
 0x105   : > { %v3147_v58 = vpop.permute.xlu1 %1211  ;;  %1974 = vmatpush1.bf16.msra.mxu0 %v1808_v60  ;;  %v1210_v19 = vpop.permute.xlu0 %1209  ;;  %v1649_v39 = vrot.slane %v1021_v50, 4  ;;  %v1650_v18 = vrot.slane %v1022_v53, 4  ;;  %v478_v53 = vrot.slane %v3198_v23, %v2623_v24 }
 0x106   : > { %v1234_v48 = vsel %vm1227_vm6, %v3050_v49, %v1210_v19  ;;  %v1235_v2 = vsel %vm1227_vm6, %v1210_v19, %v3147_v58  ;;  %v482_v19 = vrot.slane %v3198_v23, %v2597_v17 }
 0x107   : > { %v1349_v13 = vmul.f32 %v1290_v6, %v1234_v48  ;;  %v1350_v27 = vmul.f32 %v1294_v7, %v1235_v2  ;;  %1225 = vrot.lane.b32.xlu1 %v2453_v3, %s2393_s23  ;;  %897 = vrot.lane.b32.xlu0 %v2453_v3, %s2392_s22  ;;  %v1763_v11 = vsel %vm1723_vm4, %v2564_v10, %v1650_v18  ;;  %v3205_v6 = vld [vmem:[%s3606_s2 + $0x38] sm:$0xff]  ;;  %v3216_v48 = vld [vmem:[%s3606_s2 + $0x8] sm:$0xff] }
 0x109   : > { %v3161_v49 = vpop.permute.xlu1 %1047  ;;  %v1046_v0 = vpop.permute.xlu0 %1045  ;;  %v1697_v63 = vrot.slane %v1349_v13, 4  ;;  %v1698_v36 = vrot.slane %v1350_v27, 4  ;;  %v806_v13 = vrot.slane %v3205_v6, %v2623_v24  ;;  %v810_v27 = vrot.slane %v3205_v6, %v2597_v17 }
 0x10a   : > { %v1070_v12 = vsel %vm1063_vm7, %v1044_v28, %v1046_v0  ;;  %v1071_v40 = vsel %vm1063_vm7, %v1046_v0, %v3161_v49  ;;  %v1762_v28 = vsel %vm1723_vm4, %v2556_v9, %v1649_v39  ;;  %v314_v0 = vrot.slane %v3216_v48, %v2623_v24 }
 0x10b   : > { %v1185_v25 = vmul.f32 %v1126_v5, %v1070_v12  ;;  %v1186_v62 = vmul.f32 %v1130_v43, %v1071_v40  ;;  %1385 = vrot.lane.b32.xlu1 %v2983_v54, %s2395_s25  ;;  %1061 = vrot.lane.b32.xlu0 %v2453_v3, %s2394_s24  ;;  %v318_v12 = vrot.slane %v3216_v48, %v2597_v17 }
 0x10d   : > { %v1778_v55 = vsel %vm1723_vm4, %v1185_v25, %v1697_v63  ;;  %v3177_v41 = vpop.permute.xlu1 %1371  ;;  %v1370_v1 = vpop.permute.xlu0 %1369  ;;  %v1779_v8 = vsel %vm1723_vm4, %v1186_v62, %v1698_v36 }
 0x10e   : > { %v1396_v52 = vsel %vm1391_vm8, %v3001_v56, %v1370_v1  ;;  %v1397_v14 = vsel %vm1391_vm8, %v1370_v1, %v3177_v41  ;;  %v1811_v21 = vpack.c.bf16 %v1779_v8, %v1763_v11  ;;  %v1810_v47 = vpack.c.bf16 %v1778_v55, %v1762_v28 }
 0x10f   : > { %v1511_v29 = vmul.f32 %v1446_v20, %v1396_v52  ;;  %v1512_v9 = vmul.f32 %v1450_v45, %v1397_v14  ;;  %1389 = vrot.lane.b32.xlu1 %v2453_v3, %s2395_s25  ;;  %1387 = vrot.lane.b32.xlu0 %v3189_v46, %s2395_s25  ;;  %v1454_v52 = vrot.slane %v2884_v61, %v3030_v38 }
 0x110   : > { %2014 = vmatprep.subr.bf16.mxu1 %v1811_v21 }
 0x111   : > { %v1824_v10 = vpack.c.bf16 %v1511_v29, %v1511_v29  ;;  %v1825_v51 = vpack.c.bf16 %v1512_v9, %v1512_v9  ;;  %v3193_v37 = vpop.permute.xlu1 %396  ;;  %2015 = vmatpush1.bf16.msra.mxu1 %v1810_v47  ;;  %v395_v56 = vpop.permute.xlu0 %394 }
 0x112   : > { %v416_v2 = vsel %vm408_vm1, %v3013_v57, %v395_v56  ;;  %v417_v5 = vsel %vm408_vm1, %v395_v56, %v3193_v37  ;;  %v3235_v57 = vld [vmem:[%s3606_s2 + $0x28] sm:$0xff] }
 0x113   : > { %2335 = vmatprep.subr.msk.bf16.mxu0 %vm1840_vm9, %v1825_v51  ;;  %v1854_v60 = vsel %vm1840_vm9, %v1824_v10, 0  ;;  %v532_v20 = vmul.f32 %v482_v19, %v417_v5  ;;  %v642_v62 = vrot.slane %v3235_v57, %v2623_v24  ;;  %v646_v28 = vrot.slane %v3235_v57, %v2597_v17 }
 0x114   : > { %1976 = vmatpush1.bf16.msra.mxu0 %v1854_v60 }
 0x115   : > { %v3207_v7 = vpop.permute.xlu1 %724  ;;  %v723_v50 = vpop.permute.xlu0 %722  ;;  %v1548_v21 = vrot.slane %v532_v20, 4 }
 0x116   : > { %v744_v43 = vsel %vm736_vm0, %v3021_v42, %v723_v50  ;;  %v745_v39 = vsel %vm736_vm0, %v723_v50, %v3207_v7  ;;  %v531_v42 = vmul.f32 %v478_v53, %v416_v2 }
 0x117   : > { %2336 = vmatmul.mubr.msk.bf16.vlgmr.msra.gmra.mrb[4].mxu0 %vm1836_vm10, %v2938_v30  ;;  %v859_v36 = vmul.f32 %v806_v13, %v744_v43  ;;  %v860_v25 = vmul.f32 %v810_v27, %v745_v39 }
 0x118   : > { %2085 = vmatprep.mubr.bf16.mxu0 %v3624_v32  ;;  %v1547_v14 = vrot.slane %v531_v42, 4 }
 0x119   : > { %v3238_v18 = vpop.permute.xlu1 %232  ;;  %v231_v40 = vpop.permute.xlu0 %230  ;;  %v1595_v9 = vrot.slane %v859_v36, 4  ;;  %v1596_v10 = vrot.slane %v860_v25, 4  ;;  %v3286_v25 = vld [vmem:[%s3606_s2 + $0x58] sm:$0xff] }
 0x11a   : > { %v252_v45 = vsel %vm244_vm2, %v3082_v26, %v231_v40  ;;  %v253_v63 = vsel %vm244_vm2, %v231_v40, %v3238_v18  ;;  %v1458_v26 = vrot.slane %v2884_v61, %v3033_v22 }
 0x11b   : > { %v367_v55 = vmul.f32 %v314_v0, %v252_v45  ;;  %v368_v1 = vmul.f32 %v318_v12, %v253_v63 }
 0x11d   : > { %v3252_v11 = vpop.permute.xlu1 %560  ;;  %v559_v8 = vpop.permute.xlu0 %558  ;;  %v1732_v60 = vsel %vm1723_vm4, %v367_v55, %v1547_v14  ;;  %v1733_v61 = vsel %vm1723_vm4, %v368_v1, %v1548_v21  ;;  %v3297_v1 = vld [vmem:[%s3606_s2 + $0x78] sm:$0xff]  ;;  %v814_v14 = vrot.slane %v3205_v6, %v2716_v33  ;;  %v818_v21 = vrot.slane %v3205_v6, %v2719_v34 }
 0x11e   : > { %v580_v47 = vsel %vm572_vm3, %v3102_v31, %v559_v8  ;;  %v581_v29 = vsel %vm572_vm3, %v559_v8, %v3252_v11 }
 0x11f   : > { %v695_v51 = vmul.f32 %v642_v62, %v580_v47  ;;  %v696_v56 = vmul.f32 %v646_v28, %v581_v29  ;;  %v486_v62 = vrot.slane %v3198_v23, %v2716_v33  ;;  %v490_v28 = vrot.slane %v3198_v23, %v2719_v34 }
 0x121   : > { %v1748_v50 = vsel %vm1723_vm4, %v695_v51, %v1595_v9  ;;  %v3264_v53 = vpop.permute.xlu1 %1375  ;;  %v1374_v19 = vpop.permute.xlu0 %1373  ;;  %v1749_v2 = vsel %vm1723_vm4, %v696_v56, %v1596_v10  ;;  %v970_v9 = vrot.slane %v3286_v25, %v2623_v24  ;;  %v1298_v10 = vrot.slane %v3297_v1, %v2623_v24 }
 0x122   : > { %v1398_v31 = vsel %vm1391_vm8, %v3177_v41, %v1374_v19  ;;  %v1399_v5 = vsel %vm1391_vm8, %v1374_v19, %v3264_v53  ;;  %v1797_v13 = vpack.c.bf16 %v1749_v2, %v1733_v61  ;;  %v1796_v27 = vpack.c.bf16 %v1748_v50, %v1732_v60  ;;  %v3326_v60 = vld [vmem:[%s3606_s2 + $0x68] sm:$0xff] }
 0x123   : > { %v1513_v43 = vmul.f32 %v1454_v52, %v1398_v31  ;;  %v1514_v39 = vmul.f32 %v1458_v26, %v1399_v5  ;;  %v1302_v51 = vrot.slane %v3297_v1, %v2597_v17  ;;  %v322_v56 = vrot.slane %v3216_v48, %v2716_v33 }
 0x124   : > { %2053 = vmatprep.subr.bf16.mxu0 %v1797_v13 }
 0x125   : > { %v1826_v0 = vpack.c.bf16 %v1513_v43, %v1513_v43  ;;  %v1827_v12 = vpack.c.bf16 %v1514_v39, %v1514_v39  ;;  %v3272_v40 = vpop.permute.xlu1 %400  ;;  %2054 = vmatpush1.bf16.msra.mxu0 %v1796_v27  ;;  %v399_v42 = vpop.permute.xlu0 %398 }
 0x126   : > { %v418_v52 = vsel %vm408_vm1, %v3193_v37, %v399_v42  ;;  %v419_v26 = vsel %vm408_vm1, %v399_v42, %v3272_v40  ;;  %v974_v37 = vrot.slane %v3286_v25, %v2597_v17  ;;  %v1138_v42 = vrot.slane %v3326_v60, %v2597_v17 }
 0x127   : > { %2337 = vmatprep.subr.msk.bf16.mxu1 %vm1840_vm9, %v1827_v12  ;;  %v1860_v20 = vsel %vm1840_vm9, %v1826_v0, 0  ;;  %v533_v50 = vmul.f32 %v486_v62, %v418_v52  ;;  %v534_v19 = vmul.f32 %v490_v28, %v419_v26  ;;  %v650_v0 = vrot.slane %v3235_v57, %v2716_v33 }
 0x128   : > { %2017 = vmatpush1.bf16.msra.mxu1 %v1860_v20  ;;  %v1134_v12 = vrot.slane %v3326_v60, %v2623_v24 }
 0x129   : > { %v3276_v41 = vpop.permute.xlu1 %728  ;;  %v727_v45 = vpop.permute.xlu0 %726  ;;  %v1549_v62 = vrot.slane %v533_v50, 4  ;;  %v1550_v28 = vrot.slane %v534_v19, 4 }
 0x12a   : > { %v746_v47 = vsel %vm736_vm0, %v3207_v7, %v727_v45  ;;  %v747_v29 = vsel %vm736_vm0, %v727_v45, %v3276_v41  ;;  %v326_v7 = vrot.slane %v3216_v48, %v2719_v34 }
 0x12b   : > { %2338 = vmatmul.mubr.msk.bf16.vlgmr.msra.gmra.mrb[4].mxu1 %vm1836_vm10, %v2938_v30  ;;  %v861_v13 = vmul.f32 %v814_v14, %v746_v47  ;;  %v862_v27 = vmul.f32 %v818_v21, %v747_v29 }
 0x12c   : > { %2126 = vmatprep.mubr.bf16.mxu1 %v3624_v32 }
 0x12d   : > { %v3281_v63 = vpop.permute.xlu1 %887  ;;  %v886_v36 = vpop.permute.xlu0 %885  ;;  %v1597_v47 = vrot.slane %v861_v13, 4  ;;  %v1598_v29 = vrot.slane %v862_v27, 4 }
 0x12e   : > { %v908_v61 = vsel %vm899_vm5, %v3130_v15, %v886_v36  ;;  %v909_v2 = vsel %vm899_vm5, %v886_v36, %v3281_v63  ;;  %v654_v15 = vrot.slane %v3235_v57, %v2719_v34 }
 0x12f   : > { %v1023_v20 = vmul.f32 %v970_v9, %v908_v61  ;;  %v1024_v45 = vmul.f32 %v974_v37, %v909_v2 }
 0x131   : > { %v3292_v55 = vpop.permute.xlu1 %1215  ;;  %v1214_v8 = vpop.permute.xlu0 %1213  ;;  %v1652_v50 = vrot.slane %v1024_v45, 4 }
 0x132   : > { %v1237_v36 = vsel %vm1227_vm6, %v1214_v8, %v3292_v55 }
 0x135   : > { %v3332_v31 = vpop.permute.xlu1 %236  ;;  %v235_v5 = vpop.permute.xlu0 %234 }
 0x136   : > { %v254_v43 = vsel %vm244_vm2, %v3238_v18, %v235_v5  ;;  %v255_v39 = vsel %vm244_vm2, %v235_v5, %v3332_v31  ;;  %v1236_v18 = vsel %vm1227_vm6, %v3147_v58, %v1214_v8  ;;  %v1352_v58 = vmul.f32 %v1302_v51, %v1237_v36 }
 0x137   : > { %v369_v52 = vmul.f32 %v322_v56, %v254_v43  ;;  %v370_v26 = vmul.f32 %v326_v7, %v255_v39  ;;  %v1351_v37 = vmul.f32 %v1298_v10, %v1236_v18  ;;  %v1651_v8 = vrot.slane %v1023_v20, 4 }
 0x138   : > { %v978_v18 = vrot.slane %v3286_v25, %v2716_v33  ;;  %v982_v36 = vrot.slane %v3286_v25, %v2719_v34 }
 0x139   : > { %v3350_v14 = vpop.permute.xlu1 %564  ;;  %v563_v21 = vpop.permute.xlu0 %562  ;;  %v1734_v56 = vsel %vm1723_vm4, %v369_v52, %v1549_v62  ;;  %v1735_v27 = vsel %vm1723_vm4, %v370_v26, %v1550_v28  ;;  %v2376_v62 = vld [vmem:[%s2431_s17 + $0x20] sm:$0xff] }
 0x13a   : > { %v582_v5 = vsel %vm572_vm3, %v3252_v11, %v563_v21  ;;  %v583_v9 = vsel %vm572_vm3, %v563_v21, %v3350_v14  ;;  %v1764_v28 = vsel %vm1723_vm4, %v2376_v62, %v1651_v8  ;;  %v2377_v62 = vld [vmem:[%s2431_s17 + $0x28] sm:$0xff] }
 0x13b   : > { %v697_v61 = vmul.f32 %v650_v0, %v582_v5  ;;  %v698_v2 = vmul.f32 %v654_v15, %v583_v9  ;;  %v1699_v0 = vrot.slane %v1351_v37, 4  ;;  %v1700_v15 = vrot.slane %v1352_v58, 4 }
 0x13c   : > { %v1306_v9 = vrot.slane %v3297_v1, %v2716_v33  ;;  %v1310_v37 = vrot.slane %v3297_v1, %v2719_v34 }
 0x13d   : > { %v1750_v7 = vsel %vm1723_vm4, %v697_v61, %v1597_v47  ;;  %v1052_v19 = vpop.permute.xlu1 %1051  ;;  %v1050_v13 = vpop.permute.xlu0 %1049  ;;  %v1751_v11 = vsel %vm1723_vm4, %v698_v2, %v1598_v29 }
 0x13e   : > { %v1072_v43 = vsel %vm1063_vm7, %v3161_v49, %v1050_v13  ;;  %v1073_v10 = vsel %vm1063_vm7, %v1050_v13, %v1052_v19  ;;  %v1799_v51 = vpack.c.bf16 %v1751_v11, %v1735_v27  ;;  %v1798_v39 = vpack.c.bf16 %v1750_v7, %v1734_v56  ;;  %v3396_v27 = vld [vmem:[%s3606_s2 + $0x88] sm:$0xff] }
 0x13f   : > { %v1187_v20 = vmul.f32 %v1134_v12, %v1072_v43  ;;  %v1188_v45 = vmul.f32 %v1138_v42, %v1073_v10  ;;  %v1765_v12 = vsel %vm1723_vm4, %v2689_v59, %v1652_v50  ;;  %v1142_v7 = vrot.slane %v3326_v60, %v2716_v33 }
 0x140   : > { %2094 = vmatprep.subr.bf16.mxu1 %v1799_v51  ;;  %v1146_v13 = vrot.slane %v3326_v60, %v2719_v34 }
 0x141   : > { %v1780_v49 = vsel %vm1723_vm4, %v1187_v20, %v1699_v0  ;;  %v3370_v52 = vpop.permute.xlu1 %891  ;;  %2095 = vmatpush1.bf16.msra.mxu1 %v1798_v39  ;;  %v890_v26 = vpop.permute.xlu0 %889  ;;  %v1781_v42 = vsel %vm1723_vm4, %v1188_v45, %v1700_v15  ;;  %v1462_v0 = vrot.slane %v3396_v27, %v2623_v24  ;;  %v1466_v15 = vrot.slane %v3396_v27, %v2597_v17 }
 0x142   : > { %v910_v21 = vsel %vm899_vm5, %v3281_v63, %v890_v26  ;;  %v911_v47 = vsel %vm899_vm5, %v890_v26, %v3370_v52  ;;  %v1813_v29 = vpack.c.bf16 %v1781_v42, %v1765_v12  ;;  %v1812_v5 = vpack.c.bf16 %v1780_v49, %v1764_v28 }
 0x143   : > { %v1025_v58 = vmul.f32 %v978_v18, %v910_v21  ;;  %v1026_v61 = vmul.f32 %v982_v36, %v911_v47 }
 0x144   : > { %2055 = vmatprep.subr.bf16.mxu0 %v1813_v29 }
 0x145   : > { %v3383_v59 = vpop.permute.xlu1 %1219  ;;  %2056 = vmatpush1.bf16.msra.mxu0 %v1812_v5  ;;  %v1218_v2 = vpop.permute.xlu0 %1217  ;;  %v1653_v11 = vrot.slane %v1025_v58, 4  ;;  %v1654_v43 = vrot.slane %v1026_v61, 4 }
 0x146   : > { %v1238_v63 = vsel %vm1227_vm6, %v3292_v55, %v1218_v2  ;;  %v1239_v8 = vsel %vm1227_vm6, %v1218_v2, %v3383_v59 }
 0x147   : > { %v1353_v50 = vmul.f32 %v1306_v9, %v1238_v63  ;;  %v1354_v56 = vmul.f32 %v1310_v37, %v1239_v8  ;;  %v1766_v28 = vsel %vm1723_vm4, %v2377_v62, %v1653_v11  ;;  %v1767_v12 = vsel %vm1723_vm4, %v2768_v16, %v1654_v43 }
 0x148   : > { %v494_v63 = vrot.slane %v3198_v23, %v2922_v35  ;;  %v498_v8 = vrot.slane %v3198_v23, %v2925_v4  ;;  %v662_v62 = vrot.slane %v3235_v57, %v2925_v4 }
 0x149   : > { %v3398_v55 = vpop.permute.xlu1 %1055  ;;  %v1054_v10 = vpop.permute.xlu0 %1053  ;;  %v1701_v20 = vrot.slane %v1353_v50, 4  ;;  %v1702_v45 = vrot.slane %v1354_v56, 4 }
 0x14a   : > { %v1074_v51 = vsel %vm1063_vm7, %v1052_v19, %v1054_v10  ;;  %v1075_v39 = vsel %vm1063_vm7, %v1054_v10, %v3398_v55  ;;  %v330_v10 = vrot.slane %v3216_v48, %v2922_v35 }
 0x14b   : > { %v1189_v18 = vmul.f32 %v1142_v7, %v1074_v51  ;;  %v1190_v36 = vmul.f32 %v1146_v13, %v1075_v39  ;;  %v822_v7 = vrot.slane %v3205_v6, %v2922_v35  ;;  %v826_v13 = vrot.slane %v3205_v6, %v2925_v4 }
 0x14c   : > { %v334_v51 = vrot.slane %v3216_v48, %v2925_v4 }
 0x14d   : > { %v1782_v49 = vsel %vm1723_vm4, %v1189_v18, %v1701_v20  ;;  %v3410_v26 = vpop.permute.xlu1 %1379  ;;  %v1378_v19 = vpop.permute.xlu0 %1377  ;;  %v1783_v24 = vsel %vm1723_vm4, %v1190_v36, %v1702_v45  ;;  %v658_v36 = vrot.slane %v3235_v57, %v2922_v35 }
 0x14e   : > { %v1400_v17 = vsel %vm1391_vm8, %v3264_v53, %v1378_v19  ;;  %v1401_v42 = vsel %vm1391_vm8, %v1378_v19, %v3410_v26  ;;  %v1815_v21 = vpack.c.bf16 %v1783_v24, %v1767_v12  ;;  %v1814_v47 = vpack.c.bf16 %v1782_v49, %v1766_v28 }
 0x14f   : > { %v1515_v29 = vmul.f32 %v1462_v0, %v1400_v17  ;;  %v1516_v5 = vmul.f32 %v1466_v15, %v1401_v42  ;;  %v1470_v24 = vrot.slane %v3396_v27, %v2716_v33 }
 0x150   : > { %2096 = vmatprep.subr.bf16.mxu1 %v1815_v21 }
 0x151   : > { %v1828_v9 = vpack.c.bf16 %v1515_v29, %v1515_v29  ;;  %v1829_v37 = vpack.c.bf16 %v1516_v5, %v1516_v5  ;;  %v3419_v58 = vpop.permute.xlu1 %404  ;;  %2097 = vmatpush1.bf16.msra.mxu1 %v1814_v47  ;;  %v403_v61 = vpop.permute.xlu0 %402 }
 0x152   : > { %v420_v50 = vsel %vm408_vm1, %v3272_v40, %v403_v61  ;;  %v421_v56 = vsel %vm408_vm1, %v403_v61, %v3419_v58 }
 0x153   : > { %2339 = vmatprep.subr.msk.bf16.mxu0 %vm1840_vm9, %v1829_v37  ;;  %v1866_v16 = vsel %vm1840_vm9, %v1828_v9, 0  ;;  %v535_v0 = vmul.f32 %v494_v63, %v420_v50  ;;  %v536_v15 = vmul.f32 %v498_v8, %v421_v56 }
 0x154   : > { %2058 = vmatpush1.bf16.msra.mxu0 %v1866_v16 }
 0x155   : > { %v733_v53 = vpop.permute.xlu1 %732  ;;  %v731_v2 = vpop.permute.xlu0 %730  ;;  %v1551_v17 = vrot.slane %v535_v0, 4  ;;  %v1552_v42 = vrot.slane %v536_v15, 4 }
 0x156   : > { %v748_v11 = vsel %vm736_vm0, %v3276_v41, %v731_v2  ;;  %v749_v43 = vsel %vm736_vm0, %v731_v2, %v733_v53 }
 0x157   : > { %2340 = vmatmul.mubr.msk.bf16.vlgmr.msra.gmra.mrb[8].mxu0 %vm1836_vm10, %v2938_v30  ;;  %v863_v45 = vmul.f32 %v822_v7, %v748_v11  ;;  %v864_v18 = vmul.f32 %v826_v13, %v749_v43 }
 0x158   : > { %2167 = vmatprep.mubr.bf16.mxu0 %v3624_v32 }
 0x159   : > { %v3441_v40 = vpop.permute.xlu1 %240  ;;  %v239_v39 = vpop.permute.xlu0 %238  ;;  %v1599_v29 = vrot.slane %v863_v45, 4  ;;  %v1600_v5 = vrot.slane %v864_v18, 4  ;;  %v502_v45 = vrot.slane %v3198_v23, %v3030_v38  ;;  %v506_v18 = vrot.slane %v3198_v23, %v3033_v22 }
 0x15a   : > { %v256_v20 = vsel %vm244_vm2, %v3332_v31, %v239_v39  ;;  %v257_v41 = vsel %vm244_vm2, %v239_v39, %v3441_v40  ;;  %v1474_v31 = vrot.slane %v3396_v27, %v2719_v34  ;;  %v830_v39 = vrot.slane %v3205_v6, %v3030_v38 }
 0x15b   : > { %v371_v28 = vmul.f32 %v330_v10, %v256_v20  ;;  %v372_v49 = vmul.f32 %v334_v51, %v257_v41  ;;  %v3625_v20 = vld [vmem:[#allocation2_spill] sm:$0xff]  ;;  %v1318_v23 = vrot.slane %v3297_v1, %v2925_v4 }
 0x15d   : > { %v3455_v19 = vpop.permute.xlu1 %568  ;;  %v567_v12 = vpop.permute.xlu0 %566  ;;  %v1736_v61 = vsel %vm1723_vm4, %v371_v28, %v1551_v17  ;;  %v1737_v34 = vsel %vm1723_vm4, %v372_v49, %v1552_v42  ;;  %v3626_v28 = vld [vmem:[#allocation3_spill] sm:$0xff]  ;;  %v670_v42 = vrot.slane %v3235_v57, %v3033_v22 }
 0x15e   : > { %v584_v21 = vsel %vm572_vm3, %v3350_v14, %v567_v12  ;;  %v585_v47 = vsel %vm572_vm3, %v567_v12, %v3455_v19  ;;  %v990_v12 = vrot.slane %v3286_v25, %v2925_v4 }
 0x15f   : > { %v699_v9 = vmul.f32 %v658_v36, %v584_v21  ;;  %v700_v37 = vmul.f32 %v662_v62, %v585_v47 }
 0x161   : > { %v1752_v16 = vsel %vm1723_vm4, %v699_v9, %v1599_v29  ;;  %v3467_v33 = vpop.permute.xlu1 %1383  ;;  %v1382_v2 = vpop.permute.xlu0 %1381  ;;  %v1753_v63 = vsel %vm1723_vm4, %v700_v37, %v1600_v5 }
 0x162   : > { %v1402_v14 = vsel %vm1391_vm8, %v3410_v26, %v1382_v2  ;;  %v1403_v8 = vsel %vm1391_vm8, %v1382_v2, %v3467_v33  ;;  %v1801_v50 = vpack.c.bf16 %v1753_v63, %v1737_v34  ;;  %v1800_v56 = vpack.c.bf16 %v1752_v16, %v1736_v61 }
 0x163   : > { %v1517_v7 = vmul.f32 %v1470_v24, %v1402_v14  ;;  %v1518_v13 = vmul.f32 %v1474_v31, %v1403_v8  ;;  %v834_v26 = vrot.slane %v3205_v6, %v3033_v22  ;;  %v1314_v24 = vrot.slane %v3297_v1, %v2922_v35 }
 0x164   : > { %2135 = vmatprep.subr.bf16.mxu0 %v1801_v50  ;;  %v342_v16 = vrot.slane %v3216_v48, %v3033_v22  ;;  %v1154_v2 = vrot.slane %v3326_v60, %v2925_v4 }
 0x165   : > { %v1830_v11 = vpack.c.bf16 %v1517_v7, %v1517_v7  ;;  %v1831_v43 = vpack.c.bf16 %v1518_v13, %v1518_v13  ;;  %v735_v10 = vpop.permute.xlu1 %734  ;;  %2136 = vmatpush1.bf16.msra.mxu0 %v1800_v56  ;;  %v407_v51 = vpop.permute.xlu0 %406 }
 0x166   : > { %v750_v15 = vsel %vm736_vm0, %v733_v53, %v735_v10  ;;  %v751_v41 = vsel %vm736_vm0, %v735_v10, %v3625_v20  ;;  %v422_v6 = vsel %vm408_vm1, %v3419_v58, %v407_v51  ;;  %v423_v49 = vsel %vm408_vm1, %v407_v51, %v3626_v28  ;;  %v3627_v10 = vld [vmem:[#allocation4_spill] sm:$0xff] }
 0x167   : > { %2341 = vmatprep.subr.msk.bf16.mxu1 %vm1840_vm9, %v1831_v43  ;;  %v1872_v0 = vsel %vm1840_vm9, %v1830_v11, 0  ;;  %v986_v53 = vrot.slane %v3286_v25, %v2922_v35  ;;  %v865_v31 = vmul.f32 %v830_v39, %v750_v15  ;;  %v866_v17 = vmul.f32 %v834_v26, %v751_v41 }
 0x168   : > { %2099 = vmatpush1.bf16.msra.mxu1 %v1872_v0  ;;  %v666_v58 = vrot.slane %v3235_v57, %v3030_v38  ;;  %v537_v21 = vmul.f32 %v502_v45, %v422_v6  ;;  %v538_v47 = vmul.f32 %v506_v18, %v423_v49 }
 0x169   : > { %v3488_v36 = vpop.permute.xlu1 %895  ;;  %v894_v62 = vpop.permute.xlu0 %893  ;;  %v1601_v34 = vrot.slane %v865_v31, 4  ;;  %v1602_v63 = vrot.slane %v866_v17, 4 }
 0x16a   : > { %v912_v29 = vsel %vm899_vm5, %v3370_v52, %v894_v62  ;;  %v913_v5 = vsel %vm899_vm5, %v894_v62, %v3488_v36  ;;  %v1150_v52 = vrot.slane %v3326_v60, %v2922_v35  ;;  %v1553_v50 = vrot.slane %v537_v21, 4 }
 0x16b   : > { %2342 = vmatmul.mubr.msk.bf16.vlgmr.msra.gmra.mrb[8].mxu1 %vm1836_vm10, %v2938_v30  ;;  %v338_v30 = vrot.slane %v3216_v48, %v3030_v38  ;;  %v1027_v14 = vmul.f32 %v986_v53, %v912_v29  ;;  %v1028_v8 = vmul.f32 %v990_v12, %v913_v5  ;;  %v1554_v56 = vrot.slane %v538_v47, 4 }
 0x16c   : > { %2208 = vmatprep.mubr.bf16.mxu1 %v3624_v32  ;;  %v1322_v32 = vrot.slane %v3297_v1, %v3030_v38  ;;  %v994_v62 = vrot.slane %v3286_v25, %v3030_v38  ;;  %v1478_v47 = vrot.slane %v3396_v27, %v2922_v35  ;;  %v1158_v29 = vrot.slane %v3326_v60, %v3030_v38 }
 0x16d   : > { %v1224_v9 = vpop.permute.xlu1 %1223  ;;  %v1222_v37 = vpop.permute.xlu0 %1221  ;;  %v1655_v45 = vrot.slane %v1027_v14, 4  ;;  %v1656_v18 = vrot.slane %v1028_v8, 4  ;;  %v1162_v5 = vrot.slane %v3326_v60, %v3033_v22 }
 0x16e   : > { %v1240_v61 = vsel %vm1227_vm6, %v3383_v59, %v1222_v37  ;;  %v1241_v57 = vsel %vm1227_vm6, %v1222_v37, %v1224_v9  ;;  %v1326_v59 = vrot.slane %v3297_v1, %v3033_v22  ;;  %v3628_v1 = vld [vmem:[#allocation5_spill] sm:$0xff]  ;;  %v2378_v37 = vld [vmem:[%s2431_s17 + $0x30] sm:$0xff] }
 0x16f   : > { %v1355_v7 = vmul.f32 %v1314_v24, %v1240_v61  ;;  %v1356_v48 = vmul.f32 %v1318_v23, %v1241_v57 }
 0x171   : > { %v571_v13 = vpop.permute.xlu1 %570  ;;  %v243_v11 = vpop.permute.xlu0 %242 }
 0x172   : > { %v586_v43 = vsel %vm572_vm3, %v3455_v19, %v571_v13  ;;  %v587_v51 = vsel %vm572_vm3, %v571_v13, %v3627_v10  ;;  %v258_v39 = vsel %vm244_vm2, %v3441_v40, %v243_v11  ;;  %v259_v26 = vsel %vm244_vm2, %v243_v11, %v3628_v1 }
 0x173   : > { %v701_v0 = vmul.f32 %v666_v58, %v586_v43  ;;  %v702_v15 = vmul.f32 %v670_v42, %v587_v51  ;;  %v373_v20 = vmul.f32 %v338_v30, %v258_v39  ;;  %v374_v41 = vmul.f32 %v342_v16, %v259_v26  ;;  %v3630_v51 = vld [vmem:[#allocation7_spill] sm:$0xff] }
 0x174   : > { %v998_v19 = vrot.slane %v3286_v25, %v3033_v22  ;;  %v1703_v58 = vrot.slane %v1355_v7, 4  ;;  %v1704_v25 = vrot.slane %v1356_v48, 4  ;;  %v1769_v16 = vsel %vm1723_vm4, %v2983_v54, %v1656_v18 }
 0x175   : > { %v1754_v6 = vsel %vm1723_vm4, %v701_v0, %v1601_v34  ;;  %v1738_v28 = vsel %vm1723_vm4, %v373_v20, %v1553_v50  ;;  %v1060_v40 = vpop.permute.xlu1 %1059  ;;  %v1058_v49 = vpop.permute.xlu0 %1057  ;;  %v1739_v53 = vsel %vm1723_vm4, %v374_v41, %v1554_v56  ;;  %v1755_v12 = vsel %vm1723_vm4, %v702_v15, %v1602_v63  ;;  %v3629_v34 = vld [vmem:[#allocation6_spill] sm:$0xff] }
 0x176   : > { %v1076_v24 = vsel %vm1063_vm7, %v3398_v55, %v1058_v49  ;;  %v1077_v23 = vsel %vm1063_vm7, %v1058_v49, %v1060_v40  ;;  %v1803_v31 = vpack.c.bf16 %v1755_v12, %v1739_v53  ;;  %v1802_v17 = vpack.c.bf16 %v1754_v6, %v1738_v28 }
 0x177   : > { %v1191_v42 = vmul.f32 %v1150_v52, %v1076_v24  ;;  %v1192_v21 = vmul.f32 %v1154_v2, %v1077_v23  ;;  %v1768_v55 = vsel %vm1723_vm4, %v2378_v37, %v1655_v45  ;;  %v1490_v54 = vrot.slane %v3396_v27, %v3033_v22  ;;  %v3631_v45 = vld [vmem:[#allocation8_spill] sm:$0xff] }
 0x178   : > { %2176 = vmatprep.subr.bf16.mxu1 %v1803_v31  ;;  %v2379_v31 = vld [vmem:[%s3605_s1] sm:$0xf] }
 0x179   : > { %v1784_v61 = vsel %vm1723_vm4, %v1191_v42, %v1703_v58  ;;  %v1226_v57 = vpop.permute.xlu1 %1225  ;;  %2177 = vmatpush1.bf16.msra.mxu1 %v1802_v17  ;;  %v898_v30 = vpop.permute.xlu0 %897  ;;  %v1785_v52 = vsel %vm1723_vm4, %v1192_v21, %v1704_v25 }
 0x17a   : > { %v1242_v35 = vsel %vm1227_vm6, %v1224_v9, %v1226_v57  ;;  %v1260_v2 = vsel %vm1227_vm6, %v1226_v57, %v2748_v44  ;;  %v914_v60 = vsel %vm899_vm5, %v3488_v36, %v898_v30  ;;  %v932_v63 = vsel %vm899_vm5, %v898_v30, %v3629_v34 }
 0x17b   : > { %v1357_v14 = vmul.f32 %v1322_v32, %v1242_v35  ;;  %v1358_v8 = vmul.f32 %v1326_v59, %v1260_v2  ;;  %v1029_v50 = vmul.f32 %v994_v62, %v914_v60  ;;  %v1030_v56 = vmul.f32 %v998_v19, %v932_v63 }
 0x17c   : > { %v1817_v7 = vpack.c.bf16 %v1785_v52, %v1769_v16  ;;  %v1816_v48 = vpack.c.bf16 %v1784_v61, %v1768_v55  ;;  %v1482_v44 = vrot.slane %v3396_v27, %v2925_v4  ;;  %v1486_v36 = vrot.slane %v3396_v27, %v3030_v38 }
 0x17d   : > { %v1657_v13 = vrot.slane %v1029_v50, 4  ;;  %v1658_v9 = vrot.slane %v1030_v56, 4  ;;  %v1386_v11 = vpop.permute.xlu1 %1385  ;;  %v1062_v43 = vpop.permute.xlu0 %1061  ;;  %v1705_v10 = vrot.slane %v1357_v14, 4  ;;  %v1706_v39 = vrot.slane %v1358_v8, 4 }
 0x17e   : > { %2137 = vmatprep.subr.bf16.mxu0 %v1817_v7  ;;  %v1404_v32 = vsel %vm1391_vm8, %v3467_v33, %v1386_v11  ;;  %v1078_v59 = vsel %vm1063_vm7, %v1060_v40, %v1062_v43  ;;  %v1096_v22 = vsel %vm1063_vm7, %v1062_v43, %v3630_v51 }
 0x17f   : > { %v1519_v1 = vmul.f32 %v1478_v47, %v1404_v32  ;;  %2138 = vmatpush1.bf16.msra.mxu0 %v1816_v48  ;;  %v1193_v26 = vmul.f32 %v1158_v29, %v1078_v59  ;;  %v1194_v0 = vmul.f32 %v1162_v5, %v1096_v22  ;;  %v1770_v4 = vsel %vm1723_vm4, %v3189_v46, %v1657_v13 }
 0x180   : > { %v1771_v33 = vsel %vm1723_vm4, %v2453_v3, %v1658_v9 }
 0x181   : > { %v1832_v15 = vpack.c.bf16 %v1519_v1, %v1519_v1  ;;  %v1786_v38 = vsel %vm1723_vm4, %v1193_v26, %v1705_v10  ;;  %v1390_v27 = vpop.permute.xlu1 %1389  ;;  %v1388_v20 = vpop.permute.xlu0 %1387  ;;  %v1787_v41 = vsel %vm1723_vm4, %v1194_v0, %v1706_v39 }
 0x182   : > { %v1424_v18 = vsel %vm1391_vm8, %v1390_v27, %v3631_v45  ;;  %v1405_v62 = vsel %vm1391_vm8, %v1386_v11, %v1388_v20  ;;  %v1406_v19 = vsel %vm1391_vm8, %v1388_v20, %v1390_v27  ;;  %v1819_v6 = vpack.c.bf16 %v1787_v41, %v1771_v33 }
 0x183   : > { %v1522_v28 = vmul.f32 %v1490_v54, %v1424_v18  ;;  %v1520_v46 = vmul.f32 %v1482_v44, %v1405_v62  ;;  %v1521_v40 = vmul.f32 %v1486_v36, %v1406_v19  ;;  %v1818_v49 = vpack.c.bf16 %v1786_v38, %v1770_v4 }
 0x184   : > { %2178 = vmatprep.subr.bf16.mxu1 %v1819_v6  ;;  %v1878_v3 = vsel %vm1840_vm9, %v1832_v15, 0 }
 0x185   : > { %v1835_v53 = vpack.c.bf16 %v1522_v28, %v1522_v28  ;;  %v1833_v12 = vpack.c.bf16 %v1520_v46, %v1520_v46  ;;  %v1834_v24 = vpack.c.bf16 %v1521_v40, %v1521_v40  ;;  %2179 = vmatpush1.bf16.msra.mxu1 %v1818_v49 }
 0x187   : > { %2343 = vmatprep.subr.msk.bf16.mxu0 %vm1840_vm9, %v1833_v12  ;;  %2345 = vmatprep.subr.msk.bf16.mxu1 %vm1840_vm9, %v1835_v53  ;;  %v1884_v23 = vsel %vm1840_vm9, %v1834_v24, 0 }
 0x188   : > { %2140 = vmatpush1.bf16.msra.mxu0 %v1878_v3 }
 0x189   : > { %2181 = vmatpush1.bf16.msra.mxu1 %v1884_v23 }
 0x18b   : > { %2344 = vmatmul.mubr.msk.bf16.vlgmr.msra.gmra.mrb[12].mxu0 %vm1836_vm10, %v2379_v31 }
 0x18c   : > { %2346 = vmatmul.mubr.msk.bf16.vlgmr.msra.gmra.mrb[12].mxu1 %vm1836_vm10, %v2379_v31 }
 0x1ab   : > { %v1923_v17 = vpop.f32.mrb[0].mxu0 }
 0x1ac   : > { %v2234_v58 = vmul.f32 %v1923_v17, %v1923_v17  ;;  %v1925_v25 = vpop.f32.mrb[1].mxu0 }
 0x1ad   : > { %v2217_v42 = vadd.f32 %v1925_v25, %v1923_v17  ;;  %v2235_v21 = vmul.f32 %v1925_v25, %v1925_v25  ;;  %v1927_v47 = vpop.f32.mrb[2].mxu0 }
 0x1ae   : > { %v1928_v29 = vpop.f32.mrb[3].mxu0 }
 0x1af   : > { %v2250_v5 = vadd.f32 %v2235_v21, %v2234_v58 }
 0x1bf   : > { %v1964_v37 = vpop.f32.mrb[0].mxu1 }
 0x1c0   : > { %v2218_v55 = vadd.f32 %v2217_v42, %v1964_v37  ;;  %v2236_v61 = vmul.f32 %v1964_v37, %v1964_v37  ;;  %v1966_v57 = vpop.f32.mrb[1].mxu1 }
 0x1c1   : > { %v2237_v30 = vmul.f32 %v1966_v57, %v1966_v57  ;;  %v1968_v16 = vpop.f32.mrb[2].mxu1 }
 0x1c2   : > { %v2251_v52 = vadd.f32 %v2250_v5, %v2236_v61  ;;  %v2219_v35 = vadd.f32 %v2218_v55, %v1966_v57  ;;  %v1969_v2 = vpop.f32.mrb[3].mxu1 }
 0x1c4   : > { %v2252_v60 = vadd.f32 %v2251_v52, %v2237_v30 }
 0x1ea   : > { %v2005_v34 = vpop.f32.mrb[4].mxu0 }
 0x1eb   : > { %v2220_v63 = vadd.f32 %v2219_v35, %v2005_v34  ;;  %v2238_v14 = vmul.f32 %v2005_v34, %v2005_v34  ;;  %v2007_v8 = vpop.f32.mrb[5].mxu0 }
 0x1ec   : > { %v2239_v50 = vmul.f32 %v2007_v8, %v2007_v8  ;;  %v2009_v56 = vpop.f32.mrb[6].mxu0 }
 0x1ed   : > { %v2253_v7 = vadd.f32 %v2252_v60, %v2238_v14  ;;  %v2221_v48 = vadd.f32 %v2220_v63, %v2007_v8  ;;  %v2010_v54 = vpop.f32.mrb[7].mxu0 }
 0x1ef   : > { %v2254_v13 = vadd.f32 %v2253_v7, %v2239_v50 }
 0x1fe   : > { %v2046_v9 = vpop.f32.mrb[4].mxu1 }
 0x1ff   : > { %v2222_v11 = vadd.f32 %v2221_v48, %v2046_v9  ;;  %v2240_v43 = vmul.f32 %v2046_v9, %v2046_v9  ;;  %v2048_v44 = vpop.f32.mrb[5].mxu1 }
 0x200   : > { %v2241_v36 = vmul.f32 %v2048_v44, %v2048_v44  ;;  %v2050_v10 = vpop.f32.mrb[6].mxu1 }
 0x201   : > { %v2255_v32 = vadd.f32 %v2254_v13, %v2240_v43  ;;  %v2223_v59 = vadd.f32 %v2222_v11, %v2048_v44  ;;  %v2051_v51 = vpop.f32.mrb[7].mxu1 }
 0x203   : > { %v2256_v22 = vadd.f32 %v2255_v32, %v2241_v36 }
 0x22a   : > { %v2087_v39 = vpop.f32.mrb[8].mxu0 }
 0x22b   : > { %v2224_v1 = vadd.f32 %v2223_v59, %v2087_v39  ;;  %v2242_v26 = vmul.f32 %v2087_v39, %v2087_v39  ;;  %v2089_v0 = vpop.f32.mrb[9].mxu0 }
 0x22c   : > { %v2243_v4 = vmul.f32 %v2089_v0, %v2089_v0  ;;  %v2091_v15 = vpop.f32.mrb[10].mxu0 }
 0x22d   : > { %v2257_v38 = vadd.f32 %v2256_v22, %v2242_v26  ;;  %v2225_v27 = vadd.f32 %v2224_v1, %v2089_v0  ;;  %v2092_v20 = vpop.f32.mrb[11].mxu0 }
 0x22f   : > { %v2258_v33 = vadd.f32 %v2257_v38, %v2243_v4 }
 0x23e   : > { %v2128_v41 = vpop.f32.mrb[8].mxu1 }
 0x23f   : > { %v2226_v45 = vadd.f32 %v2225_v27, %v2128_v41  ;;  %v2244_v18 = vmul.f32 %v2128_v41, %v2128_v41  ;;  %v2130_v62 = vpop.f32.mrb[9].mxu1 }
 0x240   : > { %v2245_v19 = vmul.f32 %v2130_v62, %v2130_v62  ;;  %v2132_v6 = vpop.f32.mrb[10].mxu1 }
 0x241   : > { %v2259_v28 = vadd.f32 %v2258_v33, %v2244_v18  ;;  %v2227_v46 = vadd.f32 %v2226_v45, %v2130_v62  ;;  %v2133_v40 = vpop.f32.mrb[11].mxu1 }
 0x243   : > { %v2260_v49 = vadd.f32 %v2259_v28, %v2245_v19 }
 0x25e   : > { %v2169_v53 = vpop.f32.mrb[12].mxu0 }
 0x25f   : > { %v2228_v12 = vadd.f32 %v2227_v46, %v2169_v53  ;;  %v2246_v24 = vmul.f32 %v2169_v53, %v2169_v53  ;;  %v2171_v3 = vpop.f32.mrb[13].mxu0  ;;  %v2210_v23 = vpop.f32.mrb[12].mxu1 }
 0x260   : > { %v2247_v31 = vmul.f32 %v2171_v3, %v2171_v3  ;;  %v2173_v17 = vpop.f32.mrb[14].mxu0  ;;  %v2212_v58 = vpop.f32.mrb[13].mxu1  ;;  %v2248_v21 = vmul.f32 %v2210_v23, %v2210_v23 }
 0x261   : > { %v2261_v25 = vadd.f32 %v2260_v49, %v2246_v24  ;;  %v2229_v42 = vadd.f32 %v2228_v12, %v2171_v3  ;;  %v2174_v47 = vpop.f32.mrb[15].mxu0  ;;  %v2214_v29 = vpop.f32.mrb[14].mxu1  ;;  %v2249_v30 = vmul.f32 %v2212_v58, %v2212_v58 }
 0x262   : > { %v2215_v5 = vpop.f32.mrb[15].mxu1 }
 0x263   : > { %v2262_v37 = vadd.f32 %v2261_v25, %v2247_v31  ;;  %v2230_v55 = vadd.f32 %v2229_v42, %v2210_v23 }
 0x265   : > { %v2263_v61 = vadd.f32 %v2262_v37, %v2248_v21  ;;  %v2231_v57 = vadd.f32 %v2230_v55, %v2212_v58 }
 0x267   : > { %v2264_v16 = vadd.f32 %v2263_v61, %v2249_v30  ;;  %2232 = vadd.xlane.f32.xlu0 %v2231_v57 }
 0x269   : > { %2265 = vadd.xlane.f32.xlu1 %v2264_v16 }
 0x2f4   : > { %v2233_v52 = vpop.xlane.xlu0 %2232 }
 0x2f6   : > { %v2266_v35 = vpop.xlane.xlu1 %2265 }
 0x2f7   : > { %v2267_v2 = vsel %vm736_vm0, %v2233_v52, %v2266_v35 }
 0x2f8   : > { %2269 = vst.msk [vmem:[%s168_s15] sm:$0xff] %vm2268_vm11, %v2267_v2 }
 0x2f9 PF: > { %s13_s12 = sadd.s32 1, %s2386_s12  }
 0x2fa   : > { %p10_p4 = scmp.ge.s32.totalorder %s13_s12, 4  }
 0x2fc   :  { %12 = sbr.rel (!%p10_p4) target bundleno = 1 (0x1), region = 62 }

// kernel: down_forward.4
= control target key start
LH: loop header
LB: loop body
LE: loop exit
PB: predicated region body
PF: predicated region fallthrough
CT: control target
= control target key end

     0   :  { %s4049_s24 = smov 0   ;;  %s7150_s0 = inlined_call_operand.vmem [shape: f32[2,4,2048], index: 0, kind: input, shape index: {}]   ;;  %s7151_s1 = inlined_call_operand.vmem [shape: bf16[8,36], index: 1, kind: input, shape index: {}]   ;;  %s7152_s2 = inlined_call_operand.vmem [shape: f32[8,1], index: 2, kind: input, shape index: {}]   ;;  %s7153_s3 = inlined_call_operand.vmem [shape: f32[8,1], index: 3, kind: input, shape index: {}]   ;;  %s7154_s4 = inlined_call_operand.vmem [shape: bf16[16,144], index: 4, kind: input, shape index: {}]   ;;  %s7155_s5 = inlined_call_operand.vmem [shape: f32[9,1,2048], index: 5, kind: input, shape index: {}]   ;;  %s7156_s6 = inlined_call_operand.vmem [shape: bf16[2,16,1792], index: 6, kind: output, shape index: {0}]   ;;  %s7157_s7 = inlined_call_operand.vmem [shape: f32[2,16,2], index: 7, kind: output, shape index: {1}]  }
   0x1 LB: > { %s3880_s25 = sadd.s32 4294967295, %s3998_s24   ;;  %p3884_p0 = scmp.ge.s32.totalorder %s3998_s24, 1  ;;  %s3998_s24 = sphi %s4049_s24, %s18_s24  }
   0x2   : > { %p240_p1 = scmp.lt.s32.totalorder %s3998_s24, 3 }
   0x4   : > { %p241_p2 = pnand %p3884_p0, %p240_p1 }
   0x6   : > { %244 = sbr.rel (%p241_p2) target bundleno = 1324 (0x52c), region = 44 }
   0xd   : > { %p277_p3 = scmp.lt.s32.totalorder %s3880_s25, 1  ;;  %s4000_s30 = smov 1   ;;  %v7158_v6 = vmov 0   ;;  %v402_v12 = vlaneseq  ;;  %v4239_v19 = vld [vmem:[%s7155_s5 + $0x30] sm:$0xff]  ;;  %vm859_vm0 = vcmask 7168   ;;  %vm531_vm1 = vcmask 130048  }
   0xe   : > { %s4001_s8 = smov 16   ;;  %s4002_s9 = smov 17   ;;  %2044 = vmatprep.mubr.bf16.mxu1 %v7158_v6  ;;  %2126 = vmatprep.mubr.bf16.mxu0 %v7158_v6  ;;  %v4251_v21 = vld [vmem:[%s7155_s5 + $0x10] sm:$0xff]  ;;  %v4267_v26 = vld [vmem:[%s7155_s5] sm:$0xff]  ;;  %vm367_vm2 = vcmask 138240   ;;  %vm695_vm3 = vcmask 121856  }
   0xf   : > { %s8002_s25 = smov (!%p277_p3, %s3880_s25), 1  ;;  %s4003_s10 = smov 15   ;;  %3965 = vset.pattern.permute.xlu0 %v7158_v6  ;;  %3966 = vset.pattern.permute.xlu1 %v7158_v6  ;;  %v4223_v15 = vshrl.u32 %v402_v12, 7  ;;  %v4288_v31 = vld [vmem:[%s7155_s5 + $0x20] sm:$0xff]  ;;  %vm1846_vm4 = vcmask 1043456   ;;  %vm1022_vm5 = vcmask 1039360  }
  0x10   : > { %s3931_s26 = sshll.u32 %s8002_s25, 6  ;;  %s4004_s11 = smov 127   ;;  %vm1350_vm6 = vcmask 916480   ;;  %vm1186_vm7 = vcmask 924672   ;;  %vm1514_vm8 = vcmask 908288   ;;  %vm1963_vm9 = vcmask 1041408  }
  0x11   : > { %s4063_s29 = scalar_lea.vmem %s7150_s0, %s3931_s26  ;;  %s4005_s12 = smov 112   ;;  %v4234_v18 = vsub.s32 1, %v4223_v15  ;;  %v4262_v25 = vsub.s32 0, %v4223_v15  ;;  %vm1959_vm10 = vcmask 293888   ;;  %vm3691_vm11 = vcmask 15360  }
  0x12   : > { %v4066_v0 = vld [vmem:[%s4063_s29] sm:$0xff]  ;;  %v4077_v2 = vld [vmem:[%s4063_s29 + $0x38] sm:$0xff]  ;;  %v4104_v4 = vld [vmem:[%s4063_s29 + $0x8] sm:$0xff]  ;;  %s4006_s13 = smov 113   ;;  %s4007_s14 = smov 111  }
  0x13   : > { %829 = vrot.lane.b32.xlu1 %v4066_v0, %s4000_s30  ;;  %501 = vrot.lane.b32.xlu0 %v4066_v0, %s4001_s8  ;;  %v4074_v1 = vcombine.high %v4066_v0, %v4066_v0  ;;  %v4085_v3 = vcombine.high %v4077_v2, %v4077_v2  ;;  %v4132_v5 = vcombine.high %v4104_v4, %v4104_v4  ;;  %v4155_v7 = vld [vmem:[%s4063_s29 + $0x10] sm:$0xff]  ;;  %v4170_v8 = vld [vmem:[%s4063_s29 + $0x18] sm:$0xff]  ;;  %s3932_s26 = sshll.u32 %s8002_s25, 4 }
  0x14   : > { %v4178_v9 = vcombine.high %v4170_v8, %v4170_v8  ;;  %v4190_v10 = vcombine.high %v4155_v7, %v4155_v7  ;;  %v4209_v11 = vld [vmem:[%s4063_s29 + $0x20] sm:$0xff]  ;;  %v4246_v20 = vld [vmem:[%s4063_s29 + $0x28] sm:$0xff]  ;;  %v4259_v24 = vrot.slane %v4239_v19, %v4234_v18  ;;  %v4273_v28 = vrot.slane %v4251_v21, %v4234_v18  ;;  %s291_s15 = scalar_lea.vmem %s7157_s7, %s3932_s26 }
  0x15   : > { %v4281_v29 = vcombine.high %v4246_v20, %v4246_v20  ;;  %v4294_v33 = vrot.slane %v4267_v26, %v4234_v18  ;;  %v4299_v36 = vrot.slane %v4239_v19, %v4262_v25  ;;  %v4306_v39 = vrot.slane %v4251_v21, %v4262_v25 }
  0x16   : > { %7518 = vst [vmem:[#allocation2_spill] sm:$0xff] %v4190_v10  ;;  %7519 = vst [vmem:[#allocation3_spill] sm:$0xff] %v4259_v24  ;;  %v4314_v40 = vrot.slane %v4288_v31, %v4234_v18  ;;  %v4325_v46 = vrot.slane %v4288_v31, %v4262_v25  ;;  %v4331_v49 = vrot.slane %v4267_v26, %v4262_v25 }
  0x17   : > { %831 = vrot.lane.b32.xlu1 %v4074_v1, %s4000_s30  ;;  %503 = vrot.lane.b32.xlu0 %v4074_v1, %s4001_s8  ;;  %7520 = vst [vmem:[#allocation4_spill] sm:$0xff] %v4273_v28  ;;  %7521 = vst [vmem:[#allocation5_spill] sm:$0xff] %v4294_v33  ;;  %v4335_v50 = vcombine.high %v4209_v11, %v4209_v11 }
  0x18   : > { %7522 = vst [vmem:[#allocation6_spill] sm:$0xff] %v4299_v36  ;;  %7523 = vst [vmem:[#allocation7_spill] sm:$0xff] %v4306_v39 }
  0x19   : > { %7524 = vst [vmem:[#allocation8_spill] sm:$0xff] %v4314_v40  ;;  %7525 = vst [vmem:[#allocation9_spill] sm:$0xff] %v4325_v46 }
  0x1a   : > { %7526 = vst [vmem:[#allocation10_spill] sm:$0xff] %v4331_v49  ;;  %7527 = vst [vmem:[#allocation11_spill] sm:$0xff] %v4335_v50 }
  0x1b   : > { %826 = vrot.lane.b32.xlu1 %v4085_v3, %s4000_s30  ;;  %498 = vrot.lane.b32.xlu0 %v4085_v3, %s4001_s8 }
  0x1f   : > { %339 = vrot.lane.b32.xlu1 %v4074_v1, %s4002_s9  ;;  %337 = vrot.lane.b32.xlu0 %v4066_v0, %s4002_s9 }
  0x23   : > { %667 = vrot.lane.b32.xlu1 %v4074_v1, %s4003_s10  ;;  %665 = vrot.lane.b32.xlu0 %v4066_v0, %s4003_s10 }
  0x27   : > { %662 = vrot.lane.b32.xlu1 %v4085_v3, %s4003_s10  ;;  %320 = vrot.lane.b32.xlu0 %v4085_v3, %s4002_s9 }
  0x2b   : > { %994 = vrot.lane.b32.xlu1 %v4104_v4, %s4004_s11  ;;  %992 = vrot.lane.b32.xlu0 %v4074_v1, %s4004_s11 }
  0x2f   : > { %1322 = vrot.lane.b32.xlu1 %v4104_v4, %s4005_s12  ;;  %1320 = vrot.lane.b32.xlu0 %v4074_v1, %s4005_s12 }
  0x33   : > { %1318 = vrot.lane.b32.xlu1 %v4066_v0, %s4005_s12  ;;  %990 = vrot.lane.b32.xlu0 %v4066_v0, %s4004_s11 }
  0x37   : > { %1158 = vrot.lane.b32.xlu1 %v4104_v4, %s4006_s13  ;;  %1156 = vrot.lane.b32.xlu0 %v4074_v1, %s4006_s13 }
  0x3b   : > { %1482 = vrot.lane.b32.xlu1 %v4066_v0, %s4007_s14  ;;  %1154 = vrot.lane.b32.xlu0 %v4066_v0, %s4006_s13 }
  0x3f   : > { %1486 = vrot.lane.b32.xlu1 %v4104_v4, %s4007_s14  ;;  %1484 = vrot.lane.b32.xlu0 %v4074_v1, %s4007_s14 }
  0x43   : > { %507 = vrot.lane.b32.xlu1 %v4132_v5, %s4001_s8  ;;  %505 = vrot.lane.b32.xlu0 %v4104_v4, %s4001_s8 }
  0x47   : > { %835 = vrot.lane.b32.xlu1 %v4132_v5, %s4000_s30  ;;  %833 = vrot.lane.b32.xlu0 %v4104_v4, %s4000_s30 }
  0x4b   : > { %343 = vrot.lane.b32.xlu1 %v4132_v5, %s4002_s9  ;;  %341 = vrot.lane.b32.xlu0 %v4104_v4, %s4002_s9 }
  0x4f   : > { %671 = vrot.lane.b32.xlu1 %v4132_v5, %s4003_s10  ;;  %669 = vrot.lane.b32.xlu0 %v4104_v4, %s4003_s10 }
  0x53   : > { %998 = vrot.lane.b32.xlu1 %v4155_v7, %s4004_s11  ;;  %996 = vrot.lane.b32.xlu0 %v4132_v5, %s4004_s11 }
  0x57   : > { %1326 = vrot.lane.b32.xlu1 %v4155_v7, %s4005_s12  ;;  %1324 = vrot.lane.b32.xlu0 %v4132_v5, %s4005_s12 }
  0x5b   : > { %1162 = vrot.lane.b32.xlu1 %v4155_v7, %s4006_s13  ;;  %1160 = vrot.lane.b32.xlu0 %v4132_v5, %s4006_s13 }
  0x5f   : > { %1490 = vrot.lane.b32.xlu1 %v4155_v7, %s4007_s14  ;;  %1488 = vrot.lane.b32.xlu0 %v4132_v5, %s4007_s14 }
  0x63   : > { %515 = vrot.lane.b32.xlu1 %v4178_v9, %s4001_s8  ;;  %513 = vrot.lane.b32.xlu0 %v4170_v8, %s4001_s8 }
  0x67   : > { %843 = vrot.lane.b32.xlu1 %v4178_v9, %s4000_s30  ;;  %841 = vrot.lane.b32.xlu0 %v4170_v8, %s4000_s30 }
  0x6b   : > { %839 = vrot.lane.b32.xlu1 %v4190_v10, %s4000_s30  ;;  %511 = vrot.lane.b32.xlu0 %v4190_v10, %s4001_s8 }
  0x6f   : > { %351 = vrot.lane.b32.xlu1 %v4178_v9, %s4002_s9  ;;  %349 = vrot.lane.b32.xlu0 %v4170_v8, %s4002_s9 }
  0x73   : > { %679 = vrot.lane.b32.xlu1 %v4178_v9, %s4003_s10  ;;  %677 = vrot.lane.b32.xlu0 %v4170_v8, %s4003_s10 }
  0x77   : > { %675 = vrot.lane.b32.xlu1 %v4190_v10, %s4003_s10  ;;  %347 = vrot.lane.b32.xlu0 %v4190_v10, %s4002_s9 }
  0x7b   : > { %1006 = vrot.lane.b32.xlu1 %v4209_v11, %s4004_s11  ;;  %1004 = vrot.lane.b32.xlu0 %v4178_v9, %s4004_s11 }
  0x7f   : > { %1334 = vrot.lane.b32.xlu1 %v4209_v11, %s4005_s12  ;;  %1332 = vrot.lane.b32.xlu0 %v4178_v9, %s4005_s12 }
  0x83   : > { %1330 = vrot.lane.b32.xlu1 %v4170_v8, %s4005_s12  ;;  %1002 = vrot.lane.b32.xlu0 %v4170_v8, %s4004_s11 }
  0x85   : > { %v830_v13 = vpop.permute.xlu1 %829  ;;  %v502_v14 = vpop.permute.xlu0 %501 }
  0x87   : > { %1170 = vrot.lane.b32.xlu1 %v4209_v11, %s4006_s13  ;;  %1168 = vrot.lane.b32.xlu0 %v4178_v9, %s4006_s13 }
  0x89   : > { %v4229_v16 = vpop.permute.xlu1 %831  ;;  %v4231_v17 = vpop.permute.xlu0 %503 }
  0x8a   : > { %v860_v27 = vsel %vm859_vm0, %v830_v13, %v4229_v16  ;;  %v532_v30 = vsel %vm531_vm1, %v502_v14, %v4231_v17 }
  0x8b   : > { %1494 = vrot.lane.b32.xlu1 %v4170_v8, %s4007_s14  ;;  %1166 = vrot.lane.b32.xlu0 %v4170_v8, %s4006_s13  ;;  %v975_v35 = vmul.f32 %v4259_v24, %v860_v27  ;;  %v647_v38 = vmul.f32 %v4273_v28, %v532_v30 }
  0x8d   : > { %v4253_v22 = vpop.permute.xlu1 %826  ;;  %v4255_v23 = vpop.permute.xlu0 %498  ;;  %v1711_v47 = vrot.slane %v975_v35, 4  ;;  %v1663_v51 = vrot.slane %v647_v38, 4  ;;  %v4367_v35 = vld [vmem:[%s7155_s5 + $0x50] sm:$0xff] }
  0x8e   : > { %v891_v41 = vsel %vm859_vm0, %v4253_v22, %v830_v13  ;;  %v563_v42 = vsel %vm531_vm1, %v4255_v23, %v502_v14  ;;  %v4376_v38 = vld [vmem:[%s7155_s5 + $0x70] sm:$0xff] }
  0x8f   : > { %1498 = vrot.lane.b32.xlu1 %v4209_v11, %s4007_s14  ;;  %1496 = vrot.lane.b32.xlu0 %v4178_v9, %s4007_s14  ;;  %v974_v52 = vmul.f32 %v4299_v36, %v891_v41  ;;  %v646_v53 = vmul.f32 %v4306_v39, %v563_v42  ;;  %v4380_v41 = vrot.slane %v4367_v35, %v4234_v18  ;;  %v7544_v39 = vmov 0  }
  0x91   : > { %v4290_v32 = vpop.permute.xlu1 %339  ;;  %v338_v34 = vpop.permute.xlu0 %337  ;;  %v1710_v62 = vrot.slane %v974_v52, 4  ;;  %v1662_v63 = vrot.slane %v646_v53, 4  ;;  %7528 = vst [vmem:[#allocation12_spill] sm:$0xff] %v4380_v41 }
  0x92   : > { %v368_v37 = vsel %vm367_vm2, %v338_v34, %v4290_v32 }
  0x93   : > { %523 = vrot.lane.b32.xlu1 %v4281_v29, %s4001_s8  ;;  %521 = vrot.lane.b32.xlu0 %v4246_v20, %s4001_s8  ;;  %v483_v43 = vmul.f32 %v4294_v33, %v368_v37 }
  0x95   : > { %v4321_v44 = vpop.permute.xlu1 %667  ;;  %v666_v45 = vpop.permute.xlu0 %665  ;;  %v1848_v57 = vsel %vm1846_vm4, %v483_v43, %v1663_v51  ;;  %v4399_v51 = vld [vmem:[%s7155_s5 + $0x60] sm:$0xff] }
  0x96   : > { %v696_v48 = vsel %vm695_vm3, %v666_v45, %v4321_v44 }
  0x97   : > { %v811_v54 = vmul.f32 %v4314_v40, %v696_v48  ;;  %851 = vrot.lane.b32.xlu1 %v4281_v29, %s4000_s30  ;;  %849 = vrot.lane.b32.xlu0 %v4246_v20, %s4000_s30 }
  0x99   : > { %v4344_v55 = vpop.permute.xlu1 %662  ;;  %v4346_v56 = vpop.permute.xlu0 %320  ;;  %v1864_v58 = vsel %vm1846_vm4, %v811_v54, %v1711_v47  ;;  %v4388_v47 = vrot.slane %v4376_v38, %v4234_v18  ;;  %v4406_v54 = vrot.slane %v4367_v35, %v4262_v25 }
  0x9a   : > { %v727_v59 = vsel %vm695_vm3, %v4344_v55, %v666_v45  ;;  %v399_v60 = vsel %vm367_vm2, %v4346_v56, %v338_v34  ;;  %v1912_v61 = vpack.c.bf16 %v1864_v58, %v1848_v57 }
  0x9b   : > { %v810_v12 = vmul.f32 %v4325_v46, %v727_v59  ;;  %v482_v13 = vmul.f32 %v4331_v49, %v399_v60  ;;  %847 = vrot.lane.b32.xlu1 %v4335_v50, %s4000_s30  ;;  %519 = vrot.lane.b32.xlu0 %v4335_v50, %s4001_s8  ;;  %7529 = vst [vmem:[#allocation13_spill] sm:$0xff] %v4388_v47  ;;  %7530 = vst [vmem:[#allocation14_spill] sm:$0xff] %v4406_v54 }
  0x9c   : > { %2012 = vmatprep.subr.bf16.mxu1 %v1912_v61  ;;  %v4415_v60 = vrot.slane %v4376_v38, %v4262_v25  ;;  %v4423_v61 = vrot.slane %v4399_v51, %v4234_v18 }
  0x9d   : > { %v4360_v14 = vpop.permute.xlu1 %994  ;;  %v993_v27 = vpop.permute.xlu0 %992  ;;  %v1847_v30 = vsel %vm1846_vm4, %v482_v13, %v1662_v63  ;;  %v1863_v34 = vsel %vm1846_vm4, %v810_v12, %v1710_v62  ;;  %v4428_v63 = vld [vmem:[%s4063_s29 + $0x30] sm:$0xff] }
  0x9e   : > { %v1911_v37 = vpack.c.bf16 %v1863_v34, %v1847_v30  ;;  %v1024_v45 = vsel %vm1022_vm5, %v993_v27, %v4360_v14  ;;  %7531 = vst [vmem:[#allocation15_spill] sm:$0xff] %v4415_v60  ;;  %7532 = vst [vmem:[#allocation16_spill] sm:$0xff] %v4423_v61 }
  0x9f   : > { %359 = vrot.lane.b32.xlu1 %v4281_v29, %s4002_s9  ;;  %357 = vrot.lane.b32.xlu0 %v4246_v20, %s4002_s9  ;;  %v1139_v52 = vmul.f32 %v4380_v41, %v1024_v45 }
  0xa0   : > { %2013 = vmatpush1.bf16.msra.mxu1 %v1911_v37 }
  0xa1   : > { %v4382_v42 = vpop.permute.xlu1 %1322  ;;  %v1321_v43 = vpop.permute.xlu0 %1320  ;;  %v1767_v12 = vrot.slane %v1139_v52, 4  ;;  %v4448_v52 = vld [vmem:[%s7155_s5 + $0x80] sm:$0xff] }
  0xa2   : > { %v1352_v48 = vsel %vm1350_vm6, %v1321_v43, %v4382_v42 }
  0xa3   : > { %687 = vrot.lane.b32.xlu1 %v4281_v29, %s4003_s10  ;;  %685 = vrot.lane.b32.xlu0 %v4246_v20, %s4003_s10  ;;  %v1467_v59 = vmul.f32 %v4388_v47, %v1352_v48 }
  0xa5   : > { %v4402_v53 = vpop.permute.xlu1 %1318  ;;  %v4408_v57 = vpop.permute.xlu0 %990  ;;  %v1815_v37 = vrot.slane %v1467_v59, 4 }
  0xa6   : > { %v1023_v58 = vsel %vm1022_vm5, %v4408_v57, %v993_v27  ;;  %v1351_v62 = vsel %vm1350_vm6, %v4402_v53, %v1321_v43  ;;  %v4443_v43 = vrot.slane %v4399_v51, %v4262_v25 }
  0xa7   : > { %683 = vrot.lane.b32.xlu1 %v4335_v50, %s4003_s10  ;;  %355 = vrot.lane.b32.xlu0 %v4335_v50, %s4002_s9  ;;  %v1138_v13 = vmul.f32 %v4406_v54, %v1023_v58  ;;  %v1466_v45 = vmul.f32 %v4415_v60, %v1351_v62 }
  0xa8   : > { %7533 = vst [vmem:[#allocation17_spill] sm:$0xff] %v4443_v43 }
  0xa9   : > { %v4431_v27 = vpop.permute.xlu1 %1158  ;;  %v1157_v30 = vpop.permute.xlu0 %1156  ;;  %v1766_v58 = vrot.slane %v1138_v13, 4  ;;  %v1814_v47 = vrot.slane %v1466_v45, 4  ;;  %v4466_v13 = vrot.slane %v4448_v52, %v4234_v18 }
  0xaa   : > { %v1188_v34 = vsel %vm1186_vm7, %v1157_v30, %v4431_v27 }
  0xab   : > { %v1303_v48 = vmul.f32 %v4423_v61, %v1188_v34  ;;  %1014 = vrot.lane.b32.xlu1 %v4428_v63, %s4004_s11  ;;  %1012 = vrot.lane.b32.xlu0 %v4281_v29, %s4004_s11  ;;  %v1880_v34 = vsel %vm1846_vm4, %v4074_v1, %v1767_v12  ;;  %7534 = vst [vmem:[#allocation18_spill] sm:$0xff] %v4466_v13 }
  0xac   : > { %v4470_v1 = vrot.slane %v4448_v52, %v4262_v25 }
  0xad   : > { %v4450_v59 = vpop.permute.xlu1 %1482  ;;  %v4452_v62 = vpop.permute.xlu0 %1154  ;;  %v1896_v6 = vsel %vm1846_vm4, %v1303_v48, %v1815_v37 }
  0xae   : > { %v1187_v61 = vsel %vm1186_vm7, %v4452_v62, %v1157_v30  ;;  %v1928_v60 = vpack.c.bf16 %v1896_v6, %v1880_v34  ;;  %7535 = vst [vmem:[#allocation19_spill] sm:$0xff] %v4470_v1 }
  0xaf   : > { %v1302_v41 = vmul.f32 %v4443_v43, %v1187_v61  ;;  %1342 = vrot.lane.b32.xlu1 %v4428_v63, %s4005_s12  ;;  %1340 = vrot.lane.b32.xlu0 %v4281_v29, %s4005_s12  ;;  %v1879_v61 = vsel %vm1846_vm4, %v4066_v0, %v1766_v58 }
  0xb0   : > { %2014 = vmatprep.subr.bf16.mxu1 %v1928_v60 }
  0xb1   : > { %v4472_v6 = vpop.permute.xlu1 %1486  ;;  %v1485_v12 = vpop.permute.xlu0 %1484  ;;  %v1895_v30 = vsel %vm1846_vm4, %v1302_v41, %v1814_v47 }
  0xb2   : > { %v1515_v37 = vsel %vm1514_vm8, %v4450_v59, %v1485_v12  ;;  %v1516_v45 = vsel %vm1514_vm8, %v1485_v12, %v4472_v6  ;;  %v1927_v48 = vpack.c.bf16 %v1895_v30, %v1879_v61  ;;  %v4490_v12 = vsub.s32 2, %v4223_v15 }
  0xb3   : > { %v1631_v34 = vmul.f32 %v4466_v13, %v1516_v45  ;;  %1338 = vrot.lane.b32.xlu1 %v4246_v20, %s4005_s12  ;;  %1010 = vrot.lane.b32.xlu0 %v4246_v20, %s4004_s11  ;;  %v1630_v60 = vmul.f32 %v4470_v1, %v1515_v37  ;;  %v4493_v61 = vsub.s32 3, %v4223_v15 }
  0xb4   : > { %2015 = vmatpush1.bf16.msra.mxu1 %v1927_v48  ;;  %v4506_v48 = vld [vmem:[%s7151_s1] sm:$0xf] }
  0xb5   : > { %v1944_v0 = vpack.c.bf16 %v1631_v34, %v1631_v34  ;;  %v4487_v41 = vpop.permute.xlu1 %507  ;;  %v506_v47 = vpop.permute.xlu0 %505  ;;  %v1943_v58 = vpack.c.bf16 %v1630_v60, %v1630_v60  ;;  %v4510_v34 = vrot.slane %v4251_v21, %v4490_v12  ;;  %v4514_v60 = vrot.slane %v4251_v21, %v4493_v61 }
  0xb6   : > { %v4526_v1 = vrot.slane %v4239_v19, %v4493_v61  ;;  %v4546_v36 = vrot.slane %v4267_v26, %v4493_v61 }
  0xb7   : > { %1178 = vrot.lane.b32.xlu1 %v4428_v63, %s4006_s13  ;;  %1176 = vrot.lane.b32.xlu0 %v4281_v29, %s4006_s13  ;;  %v1965_v30 = vsel %vm1963_vm9, %v1943_v58, 0  ;;  %7536 = vst [vmem:[#allocation20_spill] sm:$0xff] %v4510_v34  ;;  %7537 = vst [vmem:[#allocation21_spill] sm:$0xff] %v4514_v60  ;;  %v533_v58 = vsel %vm531_vm1, %v4231_v17, %v506_v47 }
  0xb8   : > { %3890 = vmatprep.subr.msk.bf16.mxu1 %vm1963_vm9, %v1944_v0  ;;  %v4518_v0 = vrot.slane %v4239_v19, %v4490_v12  ;;  %7539 = vst [vmem:[#allocation23_spill] sm:$0xff] %v4526_v1  ;;  %7542 = vst [vmem:[#allocation26_spill] sm:$0xff] %v4546_v36 }
  0xb9   : > { %2017 = vmatpush1.bf16.msra.mxu1 %v1965_v30  ;;  %v4501_v37 = vpop.permute.xlu1 %835  ;;  %v834_v45 = vpop.permute.xlu0 %833  ;;  %v534_v30 = vsel %vm531_vm1, %v506_v47, %v4487_v41  ;;  %v4542_v47 = vrot.slane %v4267_v26, %v4490_v12 }
  0xba   : > { %7538 = vst [vmem:[#allocation22_spill] sm:$0xff] %v4518_v0  ;;  %v861_v13 = vsel %vm859_vm0, %v4229_v16, %v834_v45  ;;  %v862_v43 = vsel %vm859_vm0, %v834_v45, %v4501_v37  ;;  %v4550_v16 = vrot.slane %v4288_v31, %v4490_v12  ;;  %v648_v45 = vmul.f32 %v4510_v34, %v533_v58 }
  0xbb   : > { %1502 = vrot.lane.b32.xlu1 %v4246_v20, %s4007_s14  ;;  %1174 = vrot.lane.b32.xlu0 %v4246_v20, %s4006_s13  ;;  %7541 = vst [vmem:[#allocation25_spill] sm:$0xff] %v4542_v47  ;;  %v649_v49 = vmul.f32 %v4514_v60, %v534_v30  ;;  %v976_v54 = vmul.f32 %v4518_v0, %v861_v13 }
  0xbc   : > { %3891 = vmatmul.mubr.msk.bf16.vlgmr.msra.gmra.mrb[0].mxu1 %vm1959_vm10, %v4506_v48  ;;  %7543 = vst [vmem:[#allocation27_spill] sm:$0xff] %v4550_v16  ;;  %v977_v28 = vmul.f32 %v4526_v1, %v862_v43  ;;  %v4567_v58 = vrot.slane %v4288_v31, %v4493_v61  ;;  %v4575_v43 = vcombine.high %v4428_v63, %v4428_v63  ;;  %v1664_v13 = vrot.slane %v648_v45, 4 }
  0xbd   : > { %v4538_v17 = vpop.permute.xlu1 %343  ;;  %v342_v46 = vpop.permute.xlu0 %341  ;;  %2085 = vmatprep.mubr.bf16.mxu1 %v7544_v39  ;;  %v1665_v0 = vrot.slane %v649_v49, 4  ;;  %v1712_v33 = vrot.slane %v976_v54, 4  ;;  %v4589_v49 = vrot.slane %v4367_v35, %v4490_v12 }
  0xbe   : > { %7540 = vst [vmem:[#allocation24_spill] sm:$0xff] %v4538_v17  ;;  %v369_v24 = vsel %vm367_vm2, %v4290_v32, %v342_v46  ;;  %v370_v40 = vsel %vm367_vm2, %v342_v46, %v4538_v17  ;;  %7545 = vst [vmem:[#allocation28_spill] sm:$0xff] %v4567_v58  ;;  %v1713_v17 = vrot.slane %v977_v28, 4 }
  0xbf   : > { %1506 = vrot.lane.b32.xlu1 %v4428_v63, %s4007_s14  ;;  %1504 = vrot.lane.b32.xlu0 %v4281_v29, %s4007_s14  ;;  %v484_v30 = vmul.f32 %v4542_v47, %v369_v24  ;;  %v485_v32 = vmul.f32 %v4546_v36, %v370_v40  ;;  %7546 = vst [vmem:[#allocation29_spill] sm:$0xff] %v4575_v43  ;;  %7547 = vst [vmem:[#allocation30_spill] sm:$0xff] %v4589_v49 }
  0xc1   : > { %v4571_v34 = vpop.permute.xlu1 %671  ;;  %v670_v46 = vpop.permute.xlu0 %669  ;;  %v1849_v45 = vsel %vm1846_vm4, %v484_v30, %v1664_v13 }
  0xc2   : > { %v697_v1 = vsel %vm695_vm3, %v4321_v44, %v670_v46  ;;  %v698_v60 = vsel %vm695_vm3, %v670_v46, %v4571_v34  ;;  %v4593_v44 = vrot.slane %v4367_v35, %v4493_v61 }
  0xc3   : > { %v812_v24 = vmul.f32 %v4550_v16, %v697_v1  ;;  %v813_v40 = vmul.f32 %v4567_v58, %v698_v60  ;;  %857 = vrot.lane.b32.xlu1 %v4077_v2, %s4000_s30  ;;  %529 = vrot.lane.b32.xlu0 %v4077_v2, %s4001_s8  ;;  %v1850_v1 = vsel %vm1846_vm4, %v485_v32, %v1665_v0 }
  0xc4   : > { %7548 = vst [vmem:[#allocation31_spill] sm:$0xff] %v4593_v44  ;;  %v4611_v0 = vrot.slane %v4376_v38, %v4490_v12 }
  0xc5   : > { %v4595_v54 = vpop.permute.xlu1 %998  ;;  %v997_v28 = vpop.permute.xlu0 %996  ;;  %v1866_v60 = vsel %vm1846_vm4, %v813_v40, %v1713_v17  ;;  %v1865_v46 = vsel %vm1846_vm4, %v812_v24, %v1712_v33  ;;  %v4615_v33 = vrot.slane %v4376_v38, %v4493_v61  ;;  %v4627_v40 = vrot.slane %v4399_v51, %v4490_v12 }
  0xc6   : > { %v1025_v16 = vsel %vm1022_vm5, %v4360_v14, %v997_v28  ;;  %v1026_v58 = vsel %vm1022_vm5, %v997_v28, %v4595_v54  ;;  %v1914_v36 = vpack.c.bf16 %v1866_v60, %v1850_v1  ;;  %v1913_v47 = vpack.c.bf16 %v1865_v46, %v1849_v45  ;;  %7549 = vst [vmem:[#allocation32_spill] sm:$0xff] %v4611_v0 }
  0xc7   : > { %855 = vrot.lane.b32.xlu1 %v4575_v43, %s4000_s30  ;;  %527 = vrot.lane.b32.xlu0 %v4575_v43, %s4001_s8  ;;  %7550 = vst [vmem:[#allocation33_spill] sm:$0xff] %v4615_v33  ;;  %v1140_v14 = vmul.f32 %v4589_v49, %v1025_v16  ;;  %v1141_v17 = vmul.f32 %v4593_v44, %v1026_v58  ;;  %7551 = vst [vmem:[#allocation34_spill] sm:$0xff] %v4627_v40 }
  0xc8   : > { %2053 = vmatprep.subr.bf16.mxu1 %v1914_v36  ;;  %v4647_v46 = vrot.slane %v4448_v52, %v4490_v12 }
  0xc9   : > { %v4619_v30 = vpop.permute.xlu1 %1326  ;;  %2054 = vmatpush1.bf16.msra.mxu1 %v1913_v47  ;;  %v1325_v32 = vpop.permute.xlu0 %1324  ;;  %v1768_v47 = vrot.slane %v1140_v14, 4  ;;  %v1769_v58 = vrot.slane %v1141_v17, 4 }
  0xca   : > { %v1353_v13 = vsel %vm1350_vm6, %v4382_v42, %v1325_v32  ;;  %v1354_v24 = vsel %vm1350_vm6, %v1325_v32, %v4619_v30  ;;  %v4637_v42 = vrot.slane %v4399_v51, %v4493_v61  ;;  %7553 = vst [vmem:[#allocation36_spill] sm:$0xff] %v4647_v46  ;;  %v4651_v32 = vrot.slane %v4448_v52, %v4493_v61 }
  0xcb   : > { %v1468_v36 = vmul.f32 %v4611_v0, %v1353_v13  ;;  %v1469_v16 = vmul.f32 %v4615_v33, %v1354_v24  ;;  %693 = vrot.lane.b32.xlu1 %v4077_v2, %s4003_s10  ;;  %365 = vrot.lane.b32.xlu0 %v4077_v2, %s4002_s9  ;;  %v1882_v0 = vsel %vm1846_vm4, %v4132_v5, %v1769_v58 }
  0xcc   : > { %7552 = vst [vmem:[#allocation35_spill] sm:$0xff] %v4637_v42  ;;  %7554 = vst [vmem:[#allocation37_spill] sm:$0xff] %v4651_v32 }
  0xcd   : > { %v4639_v28 = vpop.permute.xlu1 %1162  ;;  %v1161_v1 = vpop.permute.xlu0 %1160  ;;  %v1816_v13 = vrot.slane %v1468_v36, 4  ;;  %v1817_v14 = vrot.slane %v1469_v16, 4  ;;  %v1881_v36 = vsel %vm1846_vm4, %v4104_v4, %v1768_v47 }
  0xce   : > { %v1189_v60 = vsel %vm1186_vm7, %v4431_v27, %v1161_v1  ;;  %v1190_v45 = vsel %vm1186_vm7, %v1161_v1, %v4639_v28 }
  0xcf   : > { %v1304_v17 = vmul.f32 %v4627_v40, %v1189_v60  ;;  %v1305_v24 = vmul.f32 %v4637_v42, %v1190_v45  ;;  %691 = vrot.lane.b32.xlu1 %v4575_v43, %s4003_s10  ;;  %363 = vrot.lane.b32.xlu0 %v4575_v43, %s4002_s9 }
  0xd1   : > { %v4659_v27 = vpop.permute.xlu1 %1490  ;;  %v1489_v1 = vpop.permute.xlu0 %1488  ;;  %v1898_v33 = vsel %vm1846_vm4, %v1305_v24, %v1817_v14  ;;  %v1897_v16 = vsel %vm1846_vm4, %v1304_v17, %v1816_v13  ;;  %v4706_v13 = vsub.s32 6, %v4223_v15 }
  0xd2   : > { %v1517_v60 = vsel %vm1514_vm8, %v4472_v6, %v1489_v1  ;;  %v1518_v45 = vsel %vm1514_vm8, %v1489_v1, %v4659_v27  ;;  %v1930_v40 = vpack.c.bf16 %v1898_v33, %v1882_v0  ;;  %v1929_v42 = vpack.c.bf16 %v1897_v16, %v1881_v36 }
  0xd3   : > { %v1632_v49 = vmul.f32 %v4647_v46, %v1517_v60  ;;  %v1633_v44 = vmul.f32 %v4651_v32, %v1518_v45  ;;  %1348 = vrot.lane.b32.xlu1 %v4085_v3, %s4005_s12  ;;  %1020 = vrot.lane.b32.xlu0 %v4085_v3, %s4004_s11  ;;  %v4729_v45 = vrot.slane %v4239_v19, %v4706_v13 }
  0xd4   : > { %2055 = vmatprep.subr.bf16.mxu1 %v1930_v40  ;;  %v4757_v32 = vrot.slane %v4288_v31, %v4706_v13 }
  0xd5   : > { %v1945_v4 = vpack.c.bf16 %v1632_v49, %v1632_v49  ;;  %v1946_v5 = vpack.c.bf16 %v1633_v44, %v1633_v44  ;;  %v4677_v47 = vpop.permute.xlu1 %515  ;;  %2056 = vmatpush1.bf16.msra.mxu1 %v1929_v42  ;;  %v514_v6 = vpop.permute.xlu0 %513  ;;  %v4688_v49 = vsub.s32 7, %v4223_v15  ;;  %7561 = vst [vmem:[#allocation44_spill] sm:$0xff] %v4729_v45 }
  0xd6   : > { %7555 = vst [vmem:[#allocation38_spill] sm:$0xff] %v4677_v47  ;;  %v538_v14 = vsel %vm531_vm1, %v514_v6, %v4677_v47  ;;  %7565 = vst [vmem:[#allocation48_spill] sm:$0xff] %v4757_v32 }
  0xd7   : > { %1346 = vrot.lane.b32.xlu1 %v4077_v2, %s4005_s12  ;;  %1018 = vrot.lane.b32.xlu0 %v4077_v2, %s4004_s11  ;;  %v1971_v0 = vsel %vm1963_vm9, %v1945_v4, 0  ;;  %v4703_v58 = vrot.slane %v4251_v21, %v4688_v49  ;;  %v4712_v17 = vrot.slane %v4239_v19, %v4688_v49  ;;  %v4724_v36 = vrot.slane %v4267_v26, %v4688_v49 }
  0xd8   : > { %3892 = vmatprep.subr.msk.bf16.mxu1 %vm1963_vm9, %v1946_v5  ;;  %v4736_v5 = vrot.slane %v4251_v21, %v4706_v13 }
  0xd9   : > { %v4685_v33 = vpop.permute.xlu1 %843  ;;  %2058 = vmatpush1.bf16.msra.mxu1 %v1971_v0  ;;  %v842_v40 = vpop.permute.xlu0 %841  ;;  %7557 = vst [vmem:[#allocation40_spill] sm:$0xff] %v4703_v58  ;;  %7558 = vst [vmem:[#allocation41_spill] sm:$0xff] %v4712_v17  ;;  %v653_v60 = vmul.f32 %v4703_v58, %v538_v14  ;;  %v4744_v0 = vrot.slane %v4288_v31, %v4688_v49 }
  0xda   : > { %7556 = vst [vmem:[#allocation39_spill] sm:$0xff] %v4685_v33  ;;  %v866_v24 = vsel %vm859_vm0, %v842_v40, %v4685_v33  ;;  %7560 = vst [vmem:[#allocation43_spill] sm:$0xff] %v4724_v36 }
  0xdb   : > { %1182 = vrot.lane.b32.xlu1 %v4077_v2, %s4006_s13  ;;  %1184 = vrot.lane.b32.xlu0 %v4085_v3, %s4006_s13  ;;  %7562 = vst [vmem:[#allocation45_spill] sm:$0xff] %v4736_v5  ;;  %7563 = vst [vmem:[#allocation46_spill] sm:$0xff] %v4744_v0  ;;  %v1669_v58 = vrot.slane %v653_v60, 4 }
  0xdc   : > { %3893 = vmatmul.mubr.msk.bf16.vlgmr.msra.gmra.mrb[4].mxu1 %vm1959_vm10, %v4506_v48 }
  0xdd   : > { %v4696_v44 = vpop.permute.xlu1 %839  ;;  %v4698_v42 = vpop.permute.xlu0 %511  ;;  %2167 = vmatprep.mubr.bf16.mxu1 %v7544_v39 }
  0xde   : > { %v865_v19 = vsel %vm859_vm0, %v4696_v44, %v842_v40  ;;  %v537_v14 = vsel %vm531_vm1, %v4698_v42, %v514_v6 }
  0xdf   : > { %1512 = vrot.lane.b32.xlu1 %v4085_v3, %s4007_s14  ;;  %1510 = vrot.lane.b32.xlu0 %v4077_v2, %s4007_s14  ;;  %v981_v2 = vmul.f32 %v4712_v17, %v866_v24  ;;  %v980_v6 = vmul.f32 %v4729_v45, %v865_v19 }
  0xe1   : > { %v4720_v1 = vpop.permute.xlu1 %351  ;;  %v350_v16 = vpop.permute.xlu0 %349  ;;  %v1717_v40 = vrot.slane %v981_v2, 4 }
  0xe2   : > { %7559 = vst [vmem:[#allocation42_spill] sm:$0xff] %v4720_v1  ;;  %v374_v4 = vsel %vm367_vm2, %v350_v16, %v4720_v1  ;;  %v4761_v1 = vrot.slane %v4267_v26, %v4706_v13 }
  0xe3   : > { %837 = vrot.lane.b32.xlu1 %v4155_v7, %s4000_s30  ;;  %509 = vrot.lane.b32.xlu0 %v4155_v7, %s4001_s8  ;;  %v489_v24 = vmul.f32 %v4724_v36, %v374_v4  ;;  %v652_v4 = vmul.f32 %v4736_v5, %v537_v14 }
  0xe4   : > { %7566 = vst [vmem:[#allocation49_spill] sm:$0xff] %v4761_v1 }
  0xe5   : > { %v4751_v21 = vpop.permute.xlu1 %679  ;;  %v678_v17 = vpop.permute.xlu0 %677  ;;  %v1854_v26 = vsel %vm1846_vm4, %v489_v24, %v1669_v58  ;;  %v1668_v45 = vrot.slane %v652_v4, 4 }
  0xe6   : > { %7564 = vst [vmem:[#allocation47_spill] sm:$0xff] %v4751_v21  ;;  %v702_v46 = vsel %vm695_vm3, %v678_v17, %v4751_v21 }
  0xe7   : > { %v817_v36 = vmul.f32 %v4744_v0, %v702_v46  ;;  %673 = vrot.lane.b32.xlu1 %v4155_v7, %s4003_s10  ;;  %345 = vrot.lane.b32.xlu0 %v4155_v7, %s4002_s9  ;;  %v1716_v0 = vrot.slane %v980_v6, 4 }
  0xe9   : > { %v4770_v60 = vpop.permute.xlu1 %675  ;;  %v4772_v31 = vpop.permute.xlu0 %347  ;;  %v1870_v2 = vsel %vm1846_vm4, %v817_v36, %v1717_v40  ;;  %v4796_v40 = vrot.slane %v4367_v35, %v4688_v49 }
  0xea   : > { %v701_v19 = vsel %vm695_vm3, %v4770_v60, %v678_v17  ;;  %v373_v46 = vsel %vm367_vm2, %v4772_v31, %v350_v16  ;;  %v1918_v14 = vpack.c.bf16 %v1870_v2, %v1854_v26 }
  0xeb   : > { %v816_v5 = vmul.f32 %v4757_v32, %v701_v19  ;;  %v488_v7 = vmul.f32 %v4761_v1, %v373_v46  ;;  %1328 = vrot.lane.b32.xlu1 %v4190_v10, %s4005_s12  ;;  %1000 = vrot.lane.b32.xlu0 %v4190_v10, %s4004_s11  ;;  %7568 = vst [vmem:[#allocation51_spill] sm:$0xff] %v4796_v40  ;;  %v2340_v1 = vld [vmem:[%s7152_s2] sm:$0xff] }
  0xec   : > { %2135 = vmatprep.subr.bf16.mxu1 %v1918_v14  ;;  %v4817_v19 = vrot.slane %v4367_v35, %v4706_v13  ;;  %v4834_v35 = vrot.slane %v4399_v51, %v4688_v49 }
  0xed   : > { %v4786_v58 = vpop.permute.xlu1 %1006  ;;  %v1005_v17 = vpop.permute.xlu0 %1004  ;;  %v1853_v36 = vsel %vm1846_vm4, %v488_v7, %v1668_v45  ;;  %v1869_v16 = vsel %vm1846_vm4, %v816_v5, %v1716_v0  ;;  %v4804_v5 = vrot.slane %v4376_v38, %v4688_v49 }
  0xee   : > { %7567 = vst [vmem:[#allocation50_spill] sm:$0xff] %v4786_v58  ;;  %v1917_v24 = vpack.c.bf16 %v1869_v16, %v1853_v36  ;;  %v1030_v45 = vsel %vm1022_vm5, %v1005_v17, %v4786_v58  ;;  %7571 = vst [vmem:[#allocation54_spill] sm:$0xff] %v4817_v19  ;;  %v4826_v36 = vrot.slane %v4376_v38, %v4706_v13 }
  0xef   : > { %1492 = vrot.lane.b32.xlu1 %v4190_v10, %s4007_s14  ;;  %1164 = vrot.lane.b32.xlu0 %v4190_v10, %s4006_s13  ;;  %7570 = vst [vmem:[#allocation53_spill] sm:$0xff] %v4804_v5  ;;  %v1145_v26 = vmul.f32 %v4796_v40, %v1030_v45  ;;  %7573 = vst [vmem:[#allocation56_spill] sm:$0xff] %v4834_v35 }
  0xf0   : > { %2136 = vmatpush1.bf16.msra.mxu1 %v1917_v24  ;;  %7572 = vst [vmem:[#allocation55_spill] sm:$0xff] %v4826_v36 }
  0xf1   : > { %v4798_v6 = vpop.permute.xlu1 %1334  ;;  %v1333_v4 = vpop.permute.xlu0 %1332 }
  0xf2   : > { %7569 = vst [vmem:[#allocation52_spill] sm:$0xff] %v4798_v6  ;;  %v1358_v0 = vsel %vm1350_vm6, %v1333_v4, %v4798_v6 }
  0xf3   : > { %845 = vrot.lane.b32.xlu1 %v4209_v11, %s4000_s30  ;;  %517 = vrot.lane.b32.xlu0 %v4209_v11, %s4001_s8  ;;  %v1473_v7 = vmul.f32 %v4804_v5, %v1358_v0 }
  0xf5   : > { %v4813_v2 = vpop.permute.xlu1 %1330  ;;  %v4819_v46 = vpop.permute.xlu0 %1002  ;;  %v1821_v5 = vrot.slane %v1473_v7, 4 }
  0xf6   : > { %v1029_v14 = vsel %vm1022_vm5, %v4819_v46, %v1005_v17  ;;  %v1357_v16 = vsel %vm1350_vm6, %v4813_v2, %v1333_v4  ;;  %v1773_v17 = vrot.slane %v1145_v26, 4  ;;  %v4851_v4 = vrot.slane %v4399_v51, %v4706_v13 }
  0xf7   : > { %681 = vrot.lane.b32.xlu1 %v4209_v11, %s4003_s10  ;;  %353 = vrot.lane.b32.xlu0 %v4209_v11, %s4002_s9  ;;  %v1144_v24 = vmul.f32 %v4817_v19, %v1029_v14  ;;  %v1472_v40 = vmul.f32 %v4826_v36, %v1357_v16  ;;  %v4869_v51 = vrot.slane %v4448_v52, %v4706_v13 }
  0xf8   : > { %7575 = vst [vmem:[#allocation58_spill] sm:$0xff] %v4851_v4  ;;  %v1886_v7 = vsel %vm1846_vm4, %v4178_v9, %v1773_v17  ;;  %v4873_v9 = vrot.slane %v4448_v52, %v4688_v49 }
  0xf9   : > { %v4839_v45 = vpop.permute.xlu1 %1170  ;;  %v1169_v38 = vpop.permute.xlu0 %1168  ;;  %v1772_v26 = vrot.slane %v1144_v24, 4  ;;  %v1820_v36 = vrot.slane %v1472_v40, 4  ;;  %7576 = vst [vmem:[#allocation59_spill] sm:$0xff] %v4869_v51 }
  0xfa   : > { %7574 = vst [vmem:[#allocation57_spill] sm:$0xff] %v4839_v45  ;;  %v1194_v0 = vsel %vm1186_vm7, %v1169_v38, %v4839_v45  ;;  %7577 = vst [vmem:[#allocation60_spill] sm:$0xff] %v4873_v9 }
  0xfb   : > { %v1309_v11 = vmul.f32 %v4834_v35, %v1194_v0  ;;  %1336 = vrot.lane.b32.xlu1 %v4335_v50, %s4005_s12  ;;  %1008 = vrot.lane.b32.xlu0 %v4335_v50, %s4004_s11  ;;  %v1885_v17 = vsel %vm1846_vm4, %v4170_v8, %v1772_v26 }
  0xfd   : > { %v4853_v14 = vpop.permute.xlu1 %1494  ;;  %v4855_v19 = vpop.permute.xlu0 %1166  ;;  %v1902_v16 = vsel %vm1846_vm4, %v1309_v11, %v1821_v5 }
  0xfe   : > { %v1193_v0 = vsel %vm1186_vm7, %v4855_v19, %v1169_v38  ;;  %v1934_v35 = vpack.c.bf16 %v1902_v16, %v1886_v7 }
  0xff   : > { %v1308_v32 = vmul.f32 %v4851_v4, %v1193_v0  ;;  %1500 = vrot.lane.b32.xlu1 %v4335_v50, %s4007_s14  ;;  %1172 = vrot.lane.b32.xlu0 %v4335_v50, %s4006_s13 }
 0x100   : > { %2137 = vmatprep.subr.bf16.mxu1 %v1934_v35 }
 0x101   : > { %v4875_v5 = vpop.permute.xlu1 %1498  ;;  %v1497_v40 = vpop.permute.xlu0 %1496  ;;  %v1901_v24 = vsel %vm1846_vm4, %v1308_v32, %v1820_v36 }
 0x102   : > { %7578 = vst [vmem:[#allocation61_spill] sm:$0xff] %v4875_v5  ;;  %v1521_v38 = vsel %vm1514_vm8, %v4853_v14, %v1497_v40  ;;  %v1522_v11 = vsel %vm1514_vm8, %v1497_v40, %v4875_v5  ;;  %v1933_v7 = vpack.c.bf16 %v1901_v24, %v1885_v17  ;;  %v4903_v24 = vld [vmem:[%s7155_s5 + $0x18] sm:$0xff] }
 0x103   : > { %v1636_v16 = vmul.f32 %v4869_v51, %v1521_v38  ;;  %v1637_v0 = vmul.f32 %v4873_v9, %v1522_v11  ;;  %853 = vrot.lane.b32.xlu1 %v4428_v63, %s4000_s30  ;;  %525 = vrot.lane.b32.xlu0 %v4428_v63, %s4001_s8  ;;  %v4969_v45 = vrot.slane %v4903_v24, %v4490_v12 }
 0x104   : > { %2138 = vmatpush1.bf16.msra.mxu1 %v1933_v7  ;;  %v4923_v7 = vrot.slane %v4903_v24, %v4493_v61 }
 0x105   : > { %v1949_v8 = vpack.c.bf16 %v1636_v16, %v1636_v16  ;;  %v1950_v32 = vpack.c.bf16 %v1637_v0, %v1637_v0  ;;  %v4890_v36 = vpop.permute.xlu1 %523  ;;  %v522_v35 = vpop.permute.xlu0 %521  ;;  %v4928_v16 = vld [vmem:[%s7155_s5 + $0x8] sm:$0xff]  ;;  %7588 = vst [vmem:[#allocation71_spill] sm:$0xff] %v4969_v45 }
 0x106   : > { %7579 = vst [vmem:[#allocation62_spill] sm:$0xff] %v4890_v36  ;;  %7583 = vst [vmem:[#allocation66_spill] sm:$0xff] %v4923_v7  ;;  %v542_v0 = vsel %vm531_vm1, %v522_v35, %v4890_v36  ;;  %v4951_v9 = vrot.slane %v4928_v16, %v4493_v61 }
 0x107   : > { %689 = vrot.lane.b32.xlu1 %v4428_v63, %s4003_s10  ;;  %361 = vrot.lane.b32.xlu0 %v4428_v63, %s4002_s9  ;;  %v1983_v26 = vsel %vm1963_vm9, %v1949_v8, 0  ;;  %v4912_v63 = vld [vmem:[%s7155_s5 + $0x38] sm:$0xff]  ;;  %v657_v50 = vmul.f32 %v4923_v7, %v542_v0 }
 0x108   : > { %3896 = vmatprep.subr.msk.bf16.mxu1 %vm1963_vm9, %v1950_v32  ;;  %v4934_v8 = vrot.slane %v4912_v63, %v4493_v61  ;;  %7586 = vst [vmem:[#allocation69_spill] sm:$0xff] %v4951_v9  ;;  %v4962_v36 = vrot.slane %v4912_v63, %v4490_v12 }
 0x109   : > { %2140 = vmatpush1.bf16.msra.mxu1 %v1983_v26  ;;  %v4898_v40 = vpop.permute.xlu1 %851  ;;  %v850_v17 = vpop.permute.xlu0 %849  ;;  %v4945_v26 = vld [vmem:[%s7155_s5 + $0x28] sm:$0xff] }
 0x10a   : > { %7580 = vst [vmem:[#allocation63_spill] sm:$0xff] %v4898_v40  ;;  %7584 = vst [vmem:[#allocation67_spill] sm:$0xff] %v4934_v8  ;;  %v870_v32 = vsel %vm859_vm0, %v850_v17, %v4898_v40  ;;  %v4973_v58 = vrot.slane %v4945_v26, %v4493_v61  ;;  %v4986_v47 = vrot.slane %v4945_v26, %v4490_v12 }
 0x10b   : > { %1344 = vrot.lane.b32.xlu1 %v4575_v43, %s4005_s12  ;;  %1016 = vrot.lane.b32.xlu0 %v4575_v43, %s4004_s11  ;;  %7587 = vst [vmem:[#allocation70_spill] sm:$0xff] %v4962_v36  ;;  %v985_v5 = vmul.f32 %v4934_v8, %v870_v32  ;;  %v1673_v8 = vrot.slane %v657_v50, 4 }
 0x10c   : > { %3897 = vmatmul.mubr.msk.bf16.vlgmr.msra.gmra.mrb[8].mxu1 %vm1959_vm10, %v4506_v48  ;;  %7589 = vst [vmem:[#allocation72_spill] sm:$0xff] %v4973_v58  ;;  %7591 = vst [vmem:[#allocation74_spill] sm:$0xff] %v4986_v47 }
 0x10d   : > { %v4916_v38 = vpop.permute.xlu1 %847  ;;  %v4918_v11 = vpop.permute.xlu0 %519  ;;  %2249 = vmatprep.mubr.bf16.mxu1 %v7544_v39 }
 0x10e   : > { %7581 = vst [vmem:[#allocation64_spill] sm:$0xff] %v4916_v38  ;;  %7582 = vst [vmem:[#allocation65_spill] sm:$0xff] %v4918_v11  ;;  %v869_v0 = vsel %vm859_vm0, %v4916_v38, %v850_v17  ;;  %v541_v7 = vsel %vm531_vm1, %v4918_v11, %v522_v35 }
 0x10f   : > { %1508 = vrot.lane.b32.xlu1 %v4575_v43, %s4007_s14  ;;  %1180 = vrot.lane.b32.xlu0 %v4575_v43, %s4006_s13  ;;  %v2362_v43 = vld [vmem:[%s7153_s3] sm:$0xff]  ;;  %v984_v35 = vmul.f32 %v4962_v36, %v869_v0 }
 0x111   : > { %v4947_v51 = vpop.permute.xlu1 %359  ;;  %v358_v4 = vpop.permute.xlu0 %357  ;;  %v1720_v0 = vrot.slane %v984_v35, 4 }
 0x112   : > { %7585 = vst [vmem:[#allocation68_spill] sm:$0xff] %v4947_v51  ;;  %v378_v40 = vsel %vm367_vm2, %v358_v4, %v4947_v51 }
 0x113   : > { %2343 = vperm.xlu0 %3965, %v2340_v1   ;;  %2365 = vperm.xlu1 %3966, %v2362_v43   ;;  %v493_v51 = vmul.f32 %v4951_v9, %v378_v40  ;;  %v4990_v43 = vrot.slane %v4928_v16, %v4490_v12  ;;  %v1721_v1 = vrot.slane %v985_v5, 4  ;;  %v656_v40 = vmul.f32 %v4969_v45, %v541_v7 }
 0x115   : > { %v4980_v6 = vpop.permute.xlu1 %687  ;;  %v686_v32 = vpop.permute.xlu0 %685  ;;  %7592 = vst [vmem:[#allocation75_spill] sm:$0xff] %v4990_v43  ;;  %v1672_v36 = vrot.slane %v656_v40, 4  ;;  %v5038_v40 = vld [vmem:[%s7155_s5 + $0x68] sm:$0xff] }
 0x116   : > { %7590 = vst [vmem:[#allocation73_spill] sm:$0xff] %v4980_v6  ;;  %v706_v21 = vsel %vm695_vm3, %v686_v32, %v4980_v6  ;;  %v1858_v6 = vsel %vm1846_vm4, %v493_v51, %v1673_v8  ;;  %7599 = vst [vmem:[#allocation82_spill] sm:$0xff] %v5038_v40 }
 0x117   : > { %v821_v17 = vmul.f32 %v4973_v58, %v706_v21 }
 0x119   : > { %v4995_v9 = vpop.permute.xlu1 %683  ;;  %v4997_v50 = vpop.permute.xlu0 %355  ;;  %v1874_v11 = vsel %vm1846_vm4, %v821_v17, %v1721_v1 }
 0x11a   : > { %7593 = vst [vmem:[#allocation76_spill] sm:$0xff] %v4995_v9  ;;  %7594 = vst [vmem:[#allocation77_spill] sm:$0xff] %v4997_v50  ;;  %v705_v38 = vsel %vm695_vm3, %v4995_v9, %v686_v32  ;;  %v377_v5 = vsel %vm367_vm2, %v4997_v50, %v358_v4  ;;  %v1922_v33 = vpack.c.bf16 %v1874_v11, %v1858_v6  ;;  %v5014_v32 = vld [vmem:[%s7155_s5 + $0x58] sm:$0xff] }
 0x11b   : > { %v820_v7 = vmul.f32 %v4986_v47, %v705_v38  ;;  %v492_v21 = vmul.f32 %v4990_v43, %v377_v5  ;;  %v5019_v4 = vld [vmem:[%s7155_s5 + $0x78] sm:$0xff] }
 0x11c   : > { %2217 = vmatprep.subr.bf16.mxu1 %v1922_v33  ;;  %v5023_v33 = vrot.slane %v5014_v32, %v4493_v61  ;;  %v5031_v1 = vrot.slane %v5019_v4, %v4493_v61 }
 0x11d   : > { %v5007_v58 = vpop.permute.xlu1 %1014  ;;  %v1013_v45 = vpop.permute.xlu0 %1012  ;;  %v1857_v51 = vsel %vm1846_vm4, %v492_v21, %v1672_v36  ;;  %v1873_v8 = vsel %vm1846_vm4, %v820_v7, %v1720_v0  ;;  %v5045_v0 = vrot.slane %v5014_v32, %v4490_v12 }
 0x11e   : > { %7595 = vst [vmem:[#allocation78_spill] sm:$0xff] %v5007_v58  ;;  %v1921_v6 = vpack.c.bf16 %v1873_v8, %v1857_v51  ;;  %7596 = vst [vmem:[#allocation79_spill] sm:$0xff] %v5023_v33  ;;  %v1034_v11 = vsel %vm1022_vm5, %v1013_v45, %v5007_v58  ;;  %v5054_v8 = vrot.slane %v5019_v4, %v4490_v12 }
 0x11f   : > { %7598 = vst [vmem:[#allocation81_spill] sm:$0xff] %v5031_v1  ;;  %v1149_v17 = vmul.f32 %v5023_v33, %v1034_v11  ;;  %7601 = vst [vmem:[#allocation84_spill] sm:$0xff] %v5045_v0 }
 0x120   : > { %2218 = vmatpush1.bf16.msra.mxu1 %v1921_v6  ;;  %7603 = vst [vmem:[#allocation86_spill] sm:$0xff] %v5054_v8  ;;  %v5058_v6 = vrot.slane %v5038_v40, %v4493_v61 }
 0x121   : > { %v5025_v38 = vpop.permute.xlu1 %1342  ;;  %v1341_v36 = vpop.permute.xlu0 %1340  ;;  %v1777_v33 = vrot.slane %v1149_v17, 4 }
 0x122   : > { %7597 = vst [vmem:[#allocation80_spill] sm:$0xff] %v5025_v38  ;;  %v1362_v35 = vsel %vm1350_vm6, %v1341_v36, %v5025_v38  ;;  %7604 = vst [vmem:[#allocation87_spill] sm:$0xff] %v5058_v6 }
 0x123   : > { %v1477_v51 = vmul.f32 %v5031_v1, %v1362_v35 }
 0x125   : > { %v5041_v5 = vpop.permute.xlu1 %1338  ;;  %v5047_v7 = vpop.permute.xlu0 %1010  ;;  %v1825_v35 = vrot.slane %v1477_v51, 4  ;;  %v1890_v51 = vsel %vm1846_vm4, %v4281_v29, %v1777_v33 }
 0x126   : > { %7600 = vst [vmem:[#allocation83_spill] sm:$0xff] %v5041_v5  ;;  %7602 = vst [vmem:[#allocation85_spill] sm:$0xff] %v5047_v7  ;;  %v1033_v21 = vsel %vm1022_vm5, %v5047_v7, %v1013_v45  ;;  %v1361_v11 = vsel %vm1350_vm6, %v5041_v5, %v1341_v36  ;;  %v5071_v7 = vrot.slane %v5038_v40, %v4490_v12  ;;  %v5076_v36 = vld [vmem:[%s7155_s5 + $0x88] sm:$0xff] }
 0x127   : > { %v1148_v47 = vmul.f32 %v5045_v0, %v1033_v21  ;;  %v1476_v1 = vmul.f32 %v5054_v8, %v1361_v11  ;;  %v5090_v5 = vrot.slane %v5076_v36, %v4490_v12 }
 0x128   : > { %7606 = vst [vmem:[#allocation89_spill] sm:$0xff] %v5071_v7 }
 0x129   : > { %v5063_v43 = vpop.permute.xlu1 %1178  ;;  %v1177_v58 = vpop.permute.xlu0 %1176  ;;  %v1776_v17 = vrot.slane %v1148_v47, 4  ;;  %v1824_v8 = vrot.slane %v1476_v1, 4  ;;  %7609 = vst [vmem:[#allocation92_spill] sm:$0xff] %v5090_v5  ;;  %v5094_v47 = vrot.slane %v5076_v36, %v4493_v61 }
 0x12a   : > { %7605 = vst [vmem:[#allocation88_spill] sm:$0xff] %v5063_v43  ;;  %v1198_v45 = vsel %vm1186_vm7, %v1177_v58, %v5063_v43 }
 0x12b   : > { %v1313_v38 = vmul.f32 %v5058_v6, %v1198_v45  ;;  %7610 = vst [vmem:[#allocation93_spill] sm:$0xff] %v5094_v47  ;;  %v1889_v33 = vsel %vm1846_vm4, %v4246_v20, %v1776_v17  ;;  %v957_v20 = vrot.slane %v4912_v63, %v4688_v49 }
 0x12d   : > { %v5078_v21 = vpop.permute.xlu1 %1502  ;;  %v5080_v0 = vpop.permute.xlu0 %1174  ;;  %v1906_v11 = vsel %vm1846_vm4, %v1313_v38, %v1825_v35 }
 0x12e   : > { %7607 = vst [vmem:[#allocation90_spill] sm:$0xff] %v5078_v21  ;;  %7608 = vst [vmem:[#allocation91_spill] sm:$0xff] %v5080_v0  ;;  %v1197_v45 = vsel %vm1186_vm7, %v5080_v0, %v1177_v58  ;;  %v1938_v6 = vpack.c.bf16 %v1906_v11, %v1890_v51 }
 0x12f   : > { %v1312_v43 = vmul.f32 %v5071_v7, %v1197_v45 }
 0x130   : > { %2219 = vmatprep.subr.bf16.mxu1 %v1938_v6 }
 0x131   : > { %v5096_v50 = vpop.permute.xlu1 %1506  ;;  %v1505_v29 = vpop.permute.xlu0 %1504  ;;  %v1905_v58 = vsel %vm1846_vm4, %v1312_v43, %v1824_v8  ;;  %v629_v43 = vrot.slane %v4903_v24, %v4688_v49 }
 0x132   : > { %7611 = vst [vmem:[#allocation94_spill] sm:$0xff] %v5096_v50  ;;  %v1525_v38 = vsel %vm1514_vm8, %v5078_v21, %v1505_v29  ;;  %v1526_v12 = vsel %vm1514_vm8, %v1505_v29, %v5096_v50  ;;  %v1937_v1 = vpack.c.bf16 %v1905_v58, %v1889_v33 }
 0x133   : > { %v1640_v35 = vmul.f32 %v5090_v5, %v1525_v38  ;;  %v1641_v61 = vmul.f32 %v5094_v47, %v1526_v12 }
 0x134   : > { %2220 = vmatpush1.bf16.msra.mxu1 %v1937_v1  ;;  %v953_v1 = vrot.slane %v4912_v63, %v4706_v13 }
 0x135   : > { %v1953_v6 = vpack.c.bf16 %v1640_v35, %v1640_v35  ;;  %v1954_v51 = vpack.c.bf16 %v1641_v61, %v1641_v61  ;;  %v858_v11 = vpop.permute.xlu1 %857  ;;  %v530_v45 = vpop.permute.xlu0 %529  ;;  %v465_v35 = vrot.slane %v4928_v16, %v4688_v49 }
 0x136   : > { %v874_v8 = vsel %vm859_vm0, %v858_v11, %v4253_v22  ;;  %v546_v17 = vsel %vm531_vm1, %v530_v45, %v4255_v23  ;;  %v625_v22 = vrot.slane %v4903_v24, %v4706_v13  ;;  %v793_v23 = vrot.slane %v4945_v26, %v4688_v49 }
 0x137   : > { %3900 = vmatprep.subr.msk.bf16.mxu1 %vm1963_vm9, %v1954_v51  ;;  %v1995_v29 = vsel %vm1963_vm9, %v1953_v6, 0  ;;  %v989_v38 = vmul.f32 %v957_v20, %v874_v8  ;;  %v661_v12 = vmul.f32 %v629_v43, %v546_v17  ;;  %v789_v43 = vrot.slane %v4945_v26, %v4706_v13 }
 0x138   : > { %2222 = vmatpush1.bf16.msra.mxu1 %v1995_v29  ;;  %v461_v8 = vrot.slane %v4928_v16, %v4706_v13 }
 0x139   : > { %v5117_v33 = vpop.permute.xlu1 %855  ;;  %v5119_v58 = vpop.permute.xlu0 %527  ;;  %v1725_v17 = vrot.slane %v989_v38, 4  ;;  %v1677_v29 = vrot.slane %v661_v12, 4 }
 0x13a   : > { %7612 = vst [vmem:[#allocation95_spill] sm:$0xff] %v5117_v33  ;;  %7613 = vst [vmem:[#allocation96_spill] sm:$0xff] %v5119_v58  ;;  %v873_v61 = vsel %vm859_vm0, %v5117_v33, %v858_v11  ;;  %v545_v6 = vsel %vm531_vm1, %v5119_v58, %v530_v45 }
 0x13b   : > { %3901 = vmatmul.mubr.msk.bf16.vlgmr.msra.gmra.mrb[12].mxu1 %vm1959_vm10, %v4506_v48  ;;  %v988_v47 = vmul.f32 %v953_v1, %v873_v61  ;;  %v660_v45 = vmul.f32 %v625_v22, %v545_v6 }
 0x13c   : > { %2331 = vmatprep.mubr.bf16.mxu1 %v7544_v39 }
 0x13d   : > { %v694_v51 = vpop.permute.xlu1 %693  ;;  %v366_v20 = vpop.permute.xlu0 %365  ;;  %v1676_v1 = vrot.slane %v660_v45, 4 }
 0x13e   : > { %v710_v5 = vsel %vm695_vm3, %v694_v51, %v4344_v55  ;;  %v382_v11 = vsel %vm367_vm2, %v366_v20, %v4346_v56  ;;  %v1724_v56 = vrot.slane %v988_v47, 4  ;;  %v1117_v47 = vrot.slane %v5014_v32, %v4706_v13 }
 0x13f   : > { %v825_v7 = vmul.f32 %v793_v23, %v710_v5  ;;  %v497_v50 = vmul.f32 %v465_v35, %v382_v11  ;;  %v1121_v35 = vrot.slane %v5014_v32, %v4688_v49 }
 0x141   : > { %v5144_v58 = vpop.permute.xlu1 %691  ;;  %v5146_v33 = vpop.permute.xlu0 %363  ;;  %v1862_v39 = vsel %vm1846_vm4, %v497_v50, %v1677_v29  ;;  %v1878_v21 = vsel %vm1846_vm4, %v825_v7, %v1725_v17 }
 0x142   : > { %7614 = vst [vmem:[#allocation97_spill] sm:$0xff] %v5144_v58  ;;  %7615 = vst [vmem:[#allocation98_spill] sm:$0xff] %v5146_v33  ;;  %v709_v38 = vsel %vm695_vm3, %v5144_v58, %v694_v51  ;;  %v381_v55 = vsel %vm367_vm2, %v5146_v33, %v366_v20  ;;  %v1926_v12 = vpack.c.bf16 %v1878_v21, %v1862_v39 }
 0x143   : > { %v824_v22 = vmul.f32 %v789_v43, %v709_v38  ;;  %v496_v5 = vmul.f32 %v461_v8, %v381_v55  ;;  %v1449_v39 = vrot.slane %v5019_v4, %v4688_v49  ;;  %v1445_v21 = vrot.slane %v5019_v4, %v4706_v13 }
 0x144   : > { %2299 = vmatprep.subr.bf16.mxu1 %v1926_v12  ;;  %v5169_v43 = vsub.s32 4, %v4223_v15  ;;  %v5172_v8 = vsub.s32 5, %v4223_v15  ;;  %v1285_v38 = vrot.slane %v5038_v40, %v4688_v49 }
 0x145   : > { %v1349_v23 = vpop.permute.xlu1 %1348  ;;  %v1021_v61 = vpop.permute.xlu0 %1020  ;;  %v1861_v50 = vsel %vm1846_vm4, %v496_v5, %v1676_v1  ;;  %v1877_v7 = vsel %vm1846_vm4, %v824_v22, %v1724_v56  ;;  %v1613_v56 = vrot.slane %v5076_v36, %v4688_v49  ;;  %v1609_v1 = vrot.slane %v5076_v36, %v4706_v13  ;;  %v3978_v22 = vld [vmem:[%s7155_s5 + $0x30] sm:$0xff] }
 0x146   : > { %v1055_v6 = vsel %vm1022_vm5, %v1021_v61, %v4408_v57  ;;  %v1925_v51 = vpack.c.bf16 %v1877_v7, %v1861_v50  ;;  %v1383_v20 = vsel %vm1350_vm6, %v1349_v23, %v4402_v53  ;;  %v1281_v53 = vrot.slane %v5038_v40, %v4706_v13 }
 0x147   : > { %v1153_v57 = vmul.f32 %v1121_v35, %v1055_v6  ;;  %v1481_v55 = vmul.f32 %v1449_v39, %v1383_v20  ;;  %v5194_v5 = vrot.slane %v3978_v22, %v5169_v43  ;;  %v3979_v35 = vld [vmem:[%s7155_s5 + $0x10] sm:$0xff] }
 0x148   : > { %2300 = vmatpush1.bf16.msra.mxu1 %v1925_v51  ;;  %v5208_v6 = vrot.slane %v3979_v35, %v5172_v8  ;;  %v3980_v51 = vld [vmem:[%s7155_s5 + $0x20] sm:$0xff] }
 0x149   : > { %v5174_v17 = vpop.permute.xlu1 %1346  ;;  %v5176_v29 = vpop.permute.xlu0 %1018  ;;  %7618 = vst [vmem:[#allocation101_spill] sm:$0xff] %v5194_v5  ;;  %v1781_v49 = vrot.slane %v1153_v57, 4  ;;  %v5214_v39 = vrot.slane %v3980_v51, %v5169_v43  ;;  %v5221_v20 = vrot.slane %v3980_v51, %v5172_v8  ;;  %v3981_v57 = vld [vmem:[%s7155_s5] sm:$0xff] }
 0x14a   : > { %7616 = vst [vmem:[#allocation99_spill] sm:$0xff] %v5174_v17  ;;  %7617 = vst [vmem:[#allocation100_spill] sm:$0xff] %v5176_v29  ;;  %v1365_v11 = vsel %vm1350_vm6, %v5174_v17, %v1349_v23  ;;  %v1037_v45 = vsel %vm1022_vm5, %v5176_v29, %v1021_v61  ;;  %v5197_v23 = vrot.slane %v3978_v22, %v5172_v8 }
 0x14b   : > { %v1480_v15 = vmul.f32 %v1445_v21, %v1365_v11  ;;  %v1152_v12 = vmul.f32 %v1117_v47, %v1037_v45  ;;  %v5203_v61 = vrot.slane %v3979_v35, %v5169_v43  ;;  %7622 = vst [vmem:[#allocation105_spill] sm:$0xff] %v5208_v6  ;;  %7623 = vst [vmem:[#allocation106_spill] sm:$0xff] %v5214_v39  ;;  %v1829_v45 = vrot.slane %v1481_v55, 4  ;;  %v3983_v55 = vld [vmem:[%s7155_s5 + $0x50] sm:$0xff] }
 0x14c   : > { %7619 = vst [vmem:[#allocation102_spill] sm:$0xff] %v5197_v23  ;;  %7624 = vst [vmem:[#allocation107_spill] sm:$0xff] %v5221_v20  ;;  %v5227_v11 = vrot.slane %v3981_v57, %v5169_v43  ;;  %v5260_v40 = vrot.slane %v3983_v55, %v5172_v8 }
 0x14d   : > { %7620 = vst [vmem:[#allocation103_spill] sm:$0xff] %v5203_v61  ;;  %v1780_v50 = vrot.slane %v1152_v12, 4  ;;  %v5205_v13 = vpop.permute.xlu1 %1182  ;;  %v1185_v7 = vpop.permute.xlu0 %1184  ;;  %v1828_v12 = vrot.slane %v1480_v15, 4 }
 0x14e   : > { %7621 = vst [vmem:[#allocation104_spill] sm:$0xff] %v5205_v13  ;;  %v1201_v21 = vsel %vm1186_vm7, %v5205_v13, %v1185_v7  ;;  %v1219_v47 = vsel %vm1186_vm7, %v1185_v7, %v4452_v62  ;;  %7625 = vst [vmem:[#allocation108_spill] sm:$0xff] %v5227_v11  ;;  %v5230_v13 = vrot.slane %v3981_v57, %v5172_v8  ;;  %v3982_v62 = vld [vmem:[%s7155_s5 + $0x70] sm:$0xff]  ;;  %v3984_v57 = vld [vmem:[%s4063_s29 + $0x38] sm:$0xff] }
 0x14f   : > { %v1316_v22 = vmul.f32 %v1281_v53, %v1201_v21  ;;  %v1317_v35 = vmul.f32 %v1285_v38, %v1219_v47  ;;  %v5236_v7 = vrot.slane %v3982_v62, %v5169_v43  ;;  %v5239_v51 = vrot.slane %v3982_v62, %v5172_v8  ;;  %7630 = vst [vmem:[#allocation113_spill] sm:$0xff] %v5260_v40 }
 0x150   : > { %7626 = vst [vmem:[#allocation109_spill] sm:$0xff] %v5230_v13  ;;  %v5245_v53 = vrot.slane %v3983_v55, %v5169_v43  ;;  %v1894_v21 = vsel %vm1846_vm4, %v4085_v3, %v1781_v49  ;;  %v1893_v29 = vsel %vm1846_vm4, %v3984_v57, %v1780_v50  ;;  %v5264_v3 = vrot.slane %v4448_v52, %v5172_v8  ;;  %v3985_v49 = vld [vmem:[%s7155_s5 + $0x60] sm:$0xff] }
 0x151   : > { %7627 = vst [vmem:[#allocation110_spill] sm:$0xff] %v5236_v7  ;;  %7628 = vst [vmem:[#allocation111_spill] sm:$0xff] %v5239_v51  ;;  %v1513_v38 = vpop.permute.xlu1 %1512  ;;  %v5247_v15 = vpop.permute.xlu0 %1510  ;;  %v1910_v47 = vsel %vm1846_vm4, %v1317_v35, %v1829_v45  ;;  %v1909_v62 = vsel %vm1846_vm4, %v1316_v22, %v1828_v12  ;;  %v5273_v50 = vrot.slane %v3985_v49, %v5172_v8 }
 0x152   : > { %7629 = vst [vmem:[#allocation112_spill] sm:$0xff] %v5245_v53  ;;  %v1547_v17 = vsel %vm1514_vm8, %v1513_v38, %v4450_v59  ;;  %v1529_v33 = vsel %vm1514_vm8, %v5247_v15, %v1513_v38  ;;  %v1942_v58 = vpack.c.bf16 %v1910_v47, %v1894_v21  ;;  %v1941_v0 = vpack.c.bf16 %v1909_v62, %v1893_v29 }
 0x153   : > { %v1645_v9 = vmul.f32 %v1613_v56, %v1547_v17  ;;  %v1644_v10 = vmul.f32 %v1609_v1, %v1529_v33  ;;  %7631 = vst [vmem:[#allocation114_spill] sm:$0xff] %v5264_v3  ;;  %v5270_v59 = vrot.slane %v3985_v49, %v5169_v43  ;;  %7633 = vst [vmem:[#allocation116_spill] sm:$0xff] %v5273_v50 }
 0x154   : > { %2301 = vmatprep.subr.bf16.mxu1 %v1942_v58  ;;  %v5277_v33 = vrot.slane %v4912_v63, %v4262_v25  ;;  %v5281_v17 = vrot.slane %v4448_v52, %v5169_v43  ;;  %v5285_v45 = vrot.slane %v4912_v63, %v4234_v18  ;;  %v5289_v12 = vrot.slane %v4903_v24, %v4262_v25 }
 0x155   : > { %7632 = vst [vmem:[#allocation115_spill] sm:$0xff] %v5270_v59  ;;  %v1958_v29 = vpack.c.bf16 %v1645_v9, %v1645_v9  ;;  %v1957_v58 = vpack.c.bf16 %v1644_v10, %v1644_v10  ;;  %v838_v56 = vpop.permute.xlu1 %837  ;;  %2302 = vmatpush1.bf16.msra.mxu1 %v1941_v0  ;;  %v510_v1 = vpop.permute.xlu0 %509 }
 0x156   : > { %7634 = vst [vmem:[#allocation117_spill] sm:$0xff] %v5277_v33  ;;  %7635 = vst [vmem:[#allocation118_spill] sm:$0xff] %v5281_v17  ;;  %v863_v22 = vsel %vm859_vm0, %v4501_v37, %v838_v56  ;;  %v864_v52 = vsel %vm859_vm0, %v838_v56, %v4696_v44  ;;  %v535_v10 = vsel %vm531_vm1, %v4487_v41, %v510_v1 }
 0x157   : > { %7636 = vst [vmem:[#allocation119_spill] sm:$0xff] %v5285_v45  ;;  %7637 = vst [vmem:[#allocation120_spill] sm:$0xff] %v5289_v12  ;;  %v536_v9 = vsel %vm531_vm1, %v510_v1, %v4698_v42  ;;  %v978_v0 = vmul.f32 %v5194_v5, %v863_v22  ;;  %v979_v35 = vmul.f32 %v5197_v23, %v864_v52  ;;  %3904 = vmatprep.subr.msk.bf16.mxu1 %vm1963_vm9, %v1958_v29  ;;  %v7641_v1 = vld [vmem:[#allocation24_spill] sm:$0xff] }
 0x158   : > { %v650_v55 = vmul.f32 %v5203_v61, %v535_v10  ;;  %v651_v38 = vmul.f32 %v5208_v6, %v536_v9  ;;  %v2007_v37 = vsel %vm1963_vm9, %v1957_v58, 0  ;;  %v5307_v44 = vrot.slane %v4903_v24, %v4234_v18 }
 0x159   : > { %v5311_v41 = vrot.slane %v4945_v26, %v4262_v25  ;;  %v5315_v42 = vrot.slane %v4945_v26, %v4234_v18  ;;  %v1714_v21 = vrot.slane %v978_v0, 4  ;;  %v1715_v47 = vrot.slane %v979_v35, 4  ;;  %v674_v49 = vpop.permute.xlu1 %673  ;;  %2304 = vmatpush1.bf16.msra.mxu1 %v2007_v37  ;;  %v346_v29 = vpop.permute.xlu0 %345 }
 0x15a   : > { %7638 = vst [vmem:[#allocation121_spill] sm:$0xff] %v5307_v44  ;;  %v1666_v57 = vrot.slane %v650_v55, 4  ;;  %v1667_v62 = vrot.slane %v651_v38, 4  ;;  %v699_v58 = vsel %vm695_vm3, %v4571_v34, %v674_v49  ;;  %v700_v56 = vsel %vm695_vm3, %v674_v49, %v4770_v60 }
 0x15b   : > { %7639 = vst [vmem:[#allocation122_spill] sm:$0xff] %v5311_v41  ;;  %7640 = vst [vmem:[#allocation123_spill] sm:$0xff] %v5315_v42  ;;  %v371_v22 = vsel %vm367_vm2, %v7641_v1, %v346_v29  ;;  %v372_v52 = vsel %vm367_vm2, %v346_v29, %v4772_v31  ;;  %v814_v10 = vmul.f32 %v5214_v39, %v699_v58 }
 0x15c   : > { %v815_v9 = vmul.f32 %v5221_v20, %v700_v56  ;;  %v486_v0 = vmul.f32 %v5227_v11, %v371_v22  ;;  %v487_v35 = vmul.f32 %v5230_v13, %v372_v52  ;;  %3905 = vmatmul.mubr.msk.bf16.vlgmr.msra.gmra.mrb[16].mxu1 %vm1959_vm10, %v4506_v48  ;;  %v5333_v34 = vrot.slane %v4928_v16, %v4262_v25 }
 0x15d   : > { %v5337_v60 = vrot.slane %v4928_v16, %v4234_v18  ;;  %v5341_v31 = vrot.slane %v5019_v4, %v4262_v25  ;;  %v5345_v55 = vrot.slane %v5019_v4, %v4234_v18  ;;  %v1329_v38 = vpop.permute.xlu1 %1328  ;;  %v1001_v37 = vpop.permute.xlu0 %1000  ;;  %v1867_v58 = vsel %vm1846_vm4, %v814_v10, %v1714_v21 }
 0x15e   : > { %7642 = vst [vmem:[#allocation24_spill] sm:$0xff] %v5333_v34  ;;  %v1852_v48 = vsel %vm1846_vm4, %v487_v35, %v1667_v62  ;;  %v1868_v49 = vsel %vm1846_vm4, %v815_v9, %v1715_v47  ;;  %v1851_v29 = vsel %vm1846_vm4, %v486_v0, %v1666_v57  ;;  %v1355_v56 = vsel %vm1350_vm6, %v4619_v30, %v1329_v38 }
 0x15f   : > { %7643 = vst [vmem:[#allocation124_spill] sm:$0xff] %v5337_v60  ;;  %7644 = vst [vmem:[#allocation125_spill] sm:$0xff] %v5341_v31  ;;  %v1356_v1 = vsel %vm1350_vm6, %v1329_v38, %v4813_v2  ;;  %v1027_v22 = vsel %vm1022_vm5, %v4595_v54, %v1001_v37  ;;  %v1028_v52 = vsel %vm1022_vm5, %v1001_v37, %v4819_v46 }
 0x160   : > { %7645 = vst [vmem:[#allocation126_spill] sm:$0xff] %v5345_v55  ;;  %v1470_v62 = vmul.f32 %v5236_v7, %v1355_v56  ;;  %v1471_v47 = vmul.f32 %v5239_v51, %v1356_v1  ;;  %v1142_v57 = vmul.f32 %v5245_v53, %v1027_v22  ;;  %v1143_v21 = vmul.f32 %v5260_v40, %v1028_v52 }
 0x161   : > { %v1916_v10 = vpack.c.bf16 %v1868_v49, %v1852_v48  ;;  %v1915_v9 = vpack.c.bf16 %v1867_v58, %v1851_v29  ;;  %v5365_v30 = vrot.slane %v5014_v32, %v4262_v25  ;;  %v5369_v54 = vrot.slane %v5014_v32, %v4234_v18  ;;  %v1493_v0 = vpop.permute.xlu1 %1492  ;;  %v1165_v35 = vpop.permute.xlu0 %1164 }
 0x162   : > { %v1770_v2 = vrot.slane %v1142_v57, 4  ;;  %v1771_v46 = vrot.slane %v1143_v21, 4  ;;  %v5373_v38 = vrot.slane %v5076_v36, %v4262_v25  ;;  %v5377_v37 = vrot.slane %v5076_v36, %v4234_v18 }
 0x163   : > { %7646 = vst [vmem:[#allocation127_spill] sm:$0xff] %v5365_v30  ;;  %7647 = vst [vmem:[#allocation128_spill] sm:$0xff] %v5369_v54  ;;  %2094 = vmatprep.subr.bf16.mxu0 %v1916_v10  ;;  %v1519_v48 = vsel %vm1514_vm8, %v4659_v27, %v1493_v0  ;;  %v1520_v49 = vsel %vm1514_vm8, %v1493_v0, %v4853_v14  ;;  %v1191_v29 = vsel %vm1186_vm7, %v4639_v28, %v1165_v35  ;;  %v7650_v14 = vld [vmem:[#allocation82_spill] sm:$0xff]  ;;  %v3986_v0 = vld [vmem:[%s4063_s29 + $0x10] sm:$0xff] }
 0x164   : > { %7648 = vst [vmem:[#allocation129_spill] sm:$0xff] %v5373_v38  ;;  %7649 = vst [vmem:[#allocation130_spill] sm:$0xff] %v5377_v37  ;;  %v1192_v58 = vsel %vm1186_vm7, %v1165_v35, %v4855_v19  ;;  %v1818_v56 = vrot.slane %v1470_v62, 4  ;;  %v1819_v1 = vrot.slane %v1471_v47, 4  ;;  %2095 = vmatpush1.bf16.msra.mxu0 %v1915_v9  ;;  %v1306_v22 = vmul.f32 %v5270_v59, %v1191_v29  ;;  %v7653_v47 = vld [vmem:[#allocation2_spill] sm:$0xff]  ;;  %v7655_v29 = vld [vmem:[#allocation64_spill] sm:$0xff] }
 0x165   : > { %v1307_v52 = vmul.f32 %v5273_v50, %v1192_v58  ;;  %v1635_v57 = vmul.f32 %v5264_v3, %v1520_v49  ;;  %v1634_v27 = vmul.f32 %v5281_v17, %v1519_v48  ;;  %v5393_v21 = vrot.slane %v7650_v14, %v4262_v25  ;;  %v846_v19 = vpop.permute.xlu1 %845  ;;  %v518_v62 = vpop.permute.xlu0 %517  ;;  %v7654_v49 = vld [vmem:[#allocation39_spill] sm:$0xff]  ;;  %v7657_v3 = vld [vmem:[#allocation65_spill] sm:$0xff] }
 0x166   : > { %v5397_v28 = vrot.slane %v7650_v14, %v4234_v18  ;;  %v1884_v10 = vsel %vm1846_vm4, %v7653_v47, %v1771_v46  ;;  %v1883_v35 = vsel %vm1846_vm4, %v3986_v0, %v1770_v2  ;;  %v1899_v48 = vsel %vm1846_vm4, %v1306_v22, %v1818_v56  ;;  %v7656_v18 = vld [vmem:[#allocation38_spill] sm:$0xff] }
 0x167   : > { %7651 = vst [vmem:[#allocation82_spill] sm:$0xff] %v5393_v21  ;;  %v1900_v9 = vsel %vm1846_vm4, %v1307_v52, %v1819_v1  ;;  %v867_v25 = vsel %vm859_vm0, %v7654_v49, %v846_v19  ;;  %v868_v58 = vsel %vm859_vm0, %v846_v19, %v7655_v29  ;;  %v539_v17 = vsel %vm531_vm1, %v7656_v18, %v518_v62 }
 0x168   : > { %7652 = vst [vmem:[#allocation131_spill] sm:$0xff] %v5397_v28  ;;  %v540_v59 = vsel %vm531_vm1, %v518_v62, %v7657_v3  ;;  %v982_v46 = vmul.f32 %v5277_v33, %v867_v25  ;;  %v983_v1 = vmul.f32 %v5285_v45, %v868_v58  ;;  %v654_v2 = vmul.f32 %v5289_v12, %v539_v17  ;;  %v7658_v3 = vld [vmem:[#allocation47_spill] sm:$0xff]  ;;  %v7659_v25 = vld [vmem:[#allocation76_spill] sm:$0xff]  ;;  %v7660_v17 = vld [vmem:[#allocation42_spill] sm:$0xff] }
 0x169   : > { %v655_v56 = vmul.f32 %v5307_v44, %v540_v59  ;;  %v1948_v22 = vpack.c.bf16 %v1635_v57, %v1635_v57  ;;  %v1932_v52 = vpack.c.bf16 %v1900_v9, %v1884_v10  ;;  %v1931_v47 = vpack.c.bf16 %v1899_v48, %v1883_v35  ;;  %v682_v18 = vpop.permute.xlu1 %681  ;;  %v354_v50 = vpop.permute.xlu0 %353  ;;  %v7661_v57 = vld [vmem:[#allocation77_spill] sm:$0xff] }
 0x16a   : > { %v1947_v0 = vpack.c.bf16 %v1634_v27, %v1634_v27  ;;  %v1718_v49 = vrot.slane %v982_v46, 4  ;;  %v1719_v19 = vrot.slane %v983_v1, 4  ;;  %v1670_v29 = vrot.slane %v654_v2, 4 }
 0x16b   : > { %v1671_v7 = vrot.slane %v655_v56, 4  ;;  %2096 = vmatprep.subr.bf16.mxu0 %v1932_v52  ;;  %v703_v62 = vsel %vm695_vm3, %v7658_v3, %v682_v18  ;;  %v704_v58 = vsel %vm695_vm3, %v682_v18, %v7659_v25  ;;  %v375_v59 = vsel %vm367_vm2, %v7660_v17, %v354_v50  ;;  %v7665_v3 = vld [vmem:[#allocation52_spill] sm:$0xff]  ;;  %v7666_v25 = vld [vmem:[#allocation83_spill] sm:$0xff] }
 0x16c   : > { %v376_v10 = vsel %vm367_vm2, %v354_v50, %v7661_v57  ;;  %v818_v27 = vmul.f32 %v5311_v41, %v703_v62  ;;  %v819_v9 = vmul.f32 %v5315_v42, %v704_v58  ;;  %2097 = vmatpush1.bf16.msra.mxu0 %v1931_v47  ;;  %v490_v35 = vmul.f32 %v5333_v34, %v375_v59  ;;  %v7667_v58 = vld [vmem:[#allocation50_spill] sm:$0xff]  ;;  %v7668_v59 = vld [vmem:[#allocation85_spill] sm:$0xff] }
 0x16d   : > { %v491_v48 = vmul.f32 %v5337_v60, %v376_v10  ;;  %3894 = vmatprep.subr.msk.bf16.mxu0 %vm1963_vm9, %v1948_v22  ;;  %v1977_v46 = vsel %vm1963_vm9, %v1947_v0, 0  ;;  %v5433_v1 = vrot.slane %v4912_v63, %v5169_v43  ;;  %v5437_v50 = vrot.slane %v4912_v63, %v5172_v8  ;;  %v1337_v56 = vpop.permute.xlu1 %1336  ;;  %v1009_v52 = vpop.permute.xlu0 %1008 }
 0x16e   : > { %v5441_v2 = vrot.slane %v4903_v24, %v5169_v43  ;;  %v1872_v22 = vsel %vm1846_vm4, %v819_v9, %v1719_v19  ;;  %v1855_v0 = vsel %vm1846_vm4, %v490_v35, %v1670_v29  ;;  %v1871_v18 = vsel %vm1846_vm4, %v818_v27, %v1718_v49 }
 0x16f   : > { %7662 = vst [vmem:[#allocation2_spill] sm:$0xff] %v5433_v1  ;;  %7663 = vst [vmem:[#allocation39_spill] sm:$0xff] %v5437_v50  ;;  %v1856_v47 = vsel %vm1846_vm4, %v491_v48, %v1671_v7  ;;  %v1359_v62 = vsel %vm1350_vm6, %v7665_v3, %v1337_v56  ;;  %v1360_v63 = vsel %vm1350_vm6, %v1337_v56, %v7666_v25  ;;  %v7678_v25 = vld [vmem:[#allocation91_spill] sm:$0xff] }
 0x170   : > { %7664 = vst [vmem:[#allocation64_spill] sm:$0xff] %v5441_v2  ;;  %v1031_v17 = vsel %vm1022_vm5, %v7667_v58, %v1009_v52  ;;  %v1032_v57 = vsel %vm1022_vm5, %v1009_v52, %v7668_v59  ;;  %v1474_v7 = vmul.f32 %v5341_v31, %v1359_v62  ;;  %2099 = vmatpush1.bf16.msra.mxu0 %v1977_v46  ;;  %v7679_v59 = vld [vmem:[#allocation61_spill] sm:$0xff]  ;;  %v7681_v31 = vmov 0  }
 0x171   : > { %v1146_v19 = vmul.f32 %v5365_v30, %v1031_v17  ;;  %v5459_v49 = vrot.slane %v4903_v24, %v5172_v8  ;;  %v5463_v29 = vrot.slane %v4945_v26, %v5169_v43  ;;  %v1147_v10 = vmul.f32 %v5369_v54, %v1032_v57  ;;  %v1501_v46 = vpop.permute.xlu1 %1500  ;;  %v1173_v56 = vpop.permute.xlu0 %1172 }
 0x172   : > { %v1920_v27 = vpack.c.bf16 %v1872_v22, %v1856_v47  ;;  %v1919_v9 = vpack.c.bf16 %v1871_v18, %v1855_v0  ;;  %v5468_v35 = vrot.slane %v4945_v26, %v5172_v8  ;;  %v1475_v48 = vmul.f32 %v5345_v55, %v1360_v63  ;;  %v5486_v26 = vld [vmem:[%s7151_s1] sm:$0xf]  ;;  %v7675_v22 = vld [vmem:[#allocation57_spill] sm:$0xff] }
 0x173   : > { %7669 = vst [vmem:[#allocation38_spill] sm:$0xff] %v5459_v49  ;;  %7670 = vst [vmem:[#allocation65_spill] sm:$0xff] %v5463_v29  ;;  %v5473_v24 = vrot.slane %v4928_v16, %v5169_v43  ;;  %v5477_v52 = vrot.slane %v4928_v16, %v5172_v8  ;;  %v5481_v47 = vrot.slane %v5019_v4, %v5169_v43  ;;  %3895 = vmatmul.mubr.msk.bf16.vlgmr.msra.gmra.mrb[0].mxu0 %vm1959_vm10, %v5486_v26 }
 0x174   : > { %7671 = vst [vmem:[#allocation47_spill] sm:$0xff] %v5468_v35  ;;  %2176 = vmatprep.subr.bf16.mxu0 %v1920_v27  ;;  %v1195_v0 = vsel %vm1186_vm7, %v7675_v22, %v1173_v56  ;;  %v5494_v16 = vrot.slane %v5019_v4, %v5172_v8  ;;  %v5498_v18 = vrot.slane %v5014_v32, %v5169_v43  ;;  %v1822_v3 = vrot.slane %v1474_v7, 4  ;;  %v7680_v27 = vld [vmem:[#allocation90_spill] sm:$0xff] }
 0x175   : > { %7672 = vst [vmem:[#allocation76_spill] sm:$0xff] %v5473_v24  ;;  %7673 = vst [vmem:[#allocation42_spill] sm:$0xff] %v5477_v52  ;;  %v1774_v62 = vrot.slane %v1146_v19, 4  ;;  %2177 = vmatpush1.bf16.msra.mxu0 %v1919_v9  ;;  %v1196_v63 = vsel %vm1186_vm7, %v1173_v56, %v7678_v25  ;;  %v1310_v58 = vmul.f32 %v5393_v21, %v1195_v0  ;;  %v1775_v17 = vrot.slane %v1147_v10, 4  ;;  %v854_v7 = vpop.permute.xlu1 %853  ;;  %v526_v19 = vpop.permute.xlu0 %525  ;;  %v7684_v0 = vld [vmem:[#allocation63_spill] sm:$0xff] }
 0x176   : > { %7674 = vst [vmem:[#allocation77_spill] sm:$0xff] %v5481_v47  ;;  %7676 = vst [vmem:[#allocation52_spill] sm:$0xff] %v5494_v16  ;;  %v1523_v57 = vsel %vm1514_vm8, %v7679_v59, %v1501_v46  ;;  %v1524_v4 = vsel %vm1514_vm8, %v1501_v46, %v7680_v27  ;;  %v1311_v22 = vmul.f32 %v5397_v28, %v1196_v63  ;;  %2208 = vmatprep.mubr.bf16.mxu0 %v7681_v31  ;;  %v7685_v25 = vld [vmem:[#allocation95_spill] sm:$0xff]  ;;  %v7687_v27 = vld [vmem:[#allocation96_spill] sm:$0xff] }
 0x177   : > { %7677 = vst [vmem:[#allocation83_spill] sm:$0xff] %v5498_v18  ;;  %v1823_v55 = vrot.slane %v1475_v48, 4  ;;  %v1903_v9 = vsel %vm1846_vm4, %v1310_v58, %v1822_v3  ;;  %v5512_v56 = vrot.slane %v5014_v32, %v5172_v8  ;;  %v5516_v10 = vrot.slane %v5076_v36, %v5169_v43  ;;  %v7686_v48 = vld [vmem:[#allocation62_spill] sm:$0xff] }
 0x178   : > { %v871_v46 = vsel %vm859_vm0, %v7684_v0, %v854_v7  ;;  %v872_v63 = vsel %vm859_vm0, %v854_v7, %v7685_v25  ;;  %v543_v59 = vsel %vm531_vm1, %v7686_v48, %v526_v19  ;;  %v544_v3 = vsel %vm531_vm1, %v526_v19, %v7687_v27  ;;  %v7688_v0 = vld [vmem:[#allocation11_spill] sm:$0xff]  ;;  %v3988_v25 = vld [vmem:[%s4063_s29 + $0x20] sm:$0xff] }
 0x179   : > { %7682 = vst [vmem:[#allocation50_spill] sm:$0xff] %v5512_v56  ;;  %7683 = vst [vmem:[#allocation85_spill] sm:$0xff] %v5516_v10  ;;  %v1638_v58 = vmul.f32 %v5373_v38, %v1523_v57  ;;  %v1639_v32 = vmul.f32 %v5377_v37, %v1524_v4  ;;  %v986_v21 = vmul.f32 %v5433_v1, %v871_v46  ;;  %v690_v27 = vpop.permute.xlu1 %689  ;;  %v362_v38 = vpop.permute.xlu0 %361  ;;  %v7689_v1 = vld [vmem:[#allocation73_spill] sm:$0xff] }
 0x17a   : > { %v658_v28 = vmul.f32 %v5441_v2, %v543_v59  ;;  %v987_v30 = vmul.f32 %v5437_v50, %v872_v63  ;;  %v1888_v41 = vsel %vm1846_vm4, %v7688_v0, %v1775_v17  ;;  %v1904_v7 = vsel %vm1846_vm4, %v1311_v22, %v1823_v55  ;;  %v7690_v63 = vld [vmem:[#allocation97_spill] sm:$0xff]  ;;  %v7691_v17 = vld [vmem:[#allocation68_spill] sm:$0xff] }
 0x17b   : > { %v1887_v48 = vsel %vm1846_vm4, %v3988_v25, %v1774_v62  ;;  %v1722_v54 = vrot.slane %v986_v21, 4  ;;  %v659_v19 = vmul.f32 %v5459_v49, %v544_v3  ;;  %v1936_v46 = vpack.c.bf16 %v1904_v7, %v1888_v41  ;;  %v7692_v62 = vld [vmem:[#allocation98_spill] sm:$0xff]  ;;  %v7723_v2 = vld [vmem:[#allocation5_spill] sm:$0xff]  ;;  %v7724_v49 = vld [vmem:[#allocation4_spill] sm:$0xff] }
 0x17c   : > { %v1674_v57 = vrot.slane %v658_v28, 4  ;;  %v1935_v4 = vpack.c.bf16 %v1903_v9, %v1887_v48  ;;  %v707_v59 = vsel %vm695_vm3, %v7689_v1, %v690_v27  ;;  %v708_v50 = vsel %vm695_vm3, %v690_v27, %v7690_v63  ;;  %v7696_v63 = vld [vmem:[#allocation78_spill] sm:$0xff] }
 0x17d   : > { %v379_v55 = vsel %vm367_vm2, %v7691_v17, %v362_v38  ;;  %v822_v22 = vmul.f32 %v5463_v29, %v707_v59  ;;  %v823_v21 = vmul.f32 %v5468_v35, %v708_v50  ;;  %v380_v28 = vsel %vm367_vm2, %v362_v38, %v7692_v62  ;;  %2178 = vmatprep.subr.bf16.mxu0 %v1936_v46  ;;  %v1345_v48 = vpop.permute.xlu1 %1344  ;;  %v1017_v27 = vpop.permute.xlu0 %1016  ;;  %v7695_v46 = vld [vmem:[#allocation99_spill] sm:$0xff] }
 0x17e   : > { %v494_v9 = vmul.f32 %v5473_v24, %v379_v55  ;;  %v1951_v3 = vpack.c.bf16 %v1638_v58, %v1638_v58  ;;  %v1952_v41 = vpack.c.bf16 %v1639_v32, %v1639_v32  ;;  %v495_v1 = vmul.f32 %v5477_v52, %v380_v28  ;;  %2179 = vmatpush1.bf16.msra.mxu0 %v1935_v4  ;;  %v7694_v58 = vld [vmem:[#allocation80_spill] sm:$0xff] }
 0x17f   : > { %v5551_v0 = vrot.slane %v7650_v14, %v5169_v43  ;;  %v1723_v7 = vrot.slane %v987_v30, 4  ;;  %v1675_v25 = vrot.slane %v659_v19, 4  ;;  %v1875_v38 = vsel %vm1846_vm4, %v822_v22, %v1722_v54  ;;  %v7697_v30 = vld [vmem:[#allocation100_spill] sm:$0xff] }
 0x180   : > { %v1859_v50 = vsel %vm1846_vm4, %v494_v9, %v1674_v57  ;;  %3898 = vmatprep.subr.msk.bf16.mxu0 %vm1963_vm9, %v1952_v41  ;;  %v1363_v32 = vsel %vm1350_vm6, %v7694_v58, %v1345_v48  ;;  %v1364_v59 = vsel %vm1350_vm6, %v1345_v48, %v7695_v46  ;;  %v1035_v43 = vsel %vm1022_vm5, %v7696_v63, %v1017_v27 }
 0x181   : > { %7693 = vst [vmem:[#allocation57_spill] sm:$0xff] %v5551_v0  ;;  %v1036_v19 = vsel %vm1022_vm5, %v1017_v27, %v7697_v30  ;;  %v1478_v4 = vmul.f32 %v5481_v47, %v1363_v32  ;;  %v1150_v57 = vmul.f32 %v5498_v18, %v1035_v43  ;;  %v1876_v17 = vsel %vm1846_vm4, %v823_v21, %v1723_v7  ;;  %v1509_v27 = vpop.permute.xlu1 %1508  ;;  %v1181_v21 = vpop.permute.xlu0 %1180  ;;  %v7700_v32 = vld [vmem:[#allocation94_spill] sm:$0xff]  ;;  %v3989_v43 = vld [vmem:[%s4063_s29 + $0x30] sm:$0xff] }
 0x182   : > { %v1151_v54 = vmul.f32 %v5512_v56, %v1036_v19  ;;  %v1479_v55 = vmul.f32 %v5494_v16, %v1364_v59  ;;  %v1989_v22 = vsel %vm1963_vm9, %v1951_v3, 0  ;;  %v1860_v62 = vsel %vm1846_vm4, %v495_v1, %v1675_v25  ;;  %v7702_v59 = vld [vmem:[#allocation104_spill] sm:$0xff] }
 0x183   : > { %v5573_v28 = vrot.slane %v7650_v14, %v5172_v8  ;;  %2181 = vmatpush1.bf16.msra.mxu0 %v1989_v22  ;;  %v1778_v9 = vrot.slane %v1150_v57, 4  ;;  %v5577_v48 = vrot.slane %v5076_v36, %v5172_v8  ;;  %v1923_v58 = vpack.c.bf16 %v1875_v38, %v1859_v50  ;;  %v7701_v14 = vld [vmem:[#allocation88_spill] sm:$0xff] }
 0x184   : > { %v1779_v41 = vrot.slane %v1151_v54, 4  ;;  %v1924_v7 = vpack.c.bf16 %v1876_v17, %v1860_v62  ;;  %v1527_v3 = vsel %vm1514_vm8, %v7700_v32, %v1509_v27  ;;  %v1528_v1 = vsel %vm1514_vm8, %v1509_v27, %v5247_v15 }
 0x185   : > { %7698 = vst [vmem:[#allocation91_spill] sm:$0xff] %v5573_v28  ;;  %7699 = vst [vmem:[#allocation61_spill] sm:$0xff] %v5577_v48  ;;  %v1199_v25 = vsel %vm1186_vm7, %v7701_v14, %v1181_v21  ;;  %v1826_v46 = vrot.slane %v1478_v4, 4  ;;  %v1200_v63 = vsel %vm1186_vm7, %v1181_v21, %v7702_v59  ;;  %v1827_v8 = vrot.slane %v1479_v55, 4  ;;  %v7703_v4 = vld [vmem:[#allocation29_spill] sm:$0xff] }
 0x186   : > { %v1314_v36 = vmul.f32 %v5551_v0, %v1199_v25  ;;  %3899 = vmatmul.mubr.msk.bf16.vlgmr.msra.gmra.mrb[4].mxu0 %vm1959_vm10, %v5486_v26  ;;  %2258 = vmatprep.subr.bf16.mxu0 %v1924_v7  ;;  %v1642_v50 = vmul.f32 %v5516_v10, %v1527_v3  ;;  %v1315_v38 = vmul.f32 %v5573_v28, %v1200_v63 }
 0x187   : > { %v1643_v15 = vmul.f32 %v5577_v48, %v1528_v1  ;;  %2259 = vmatpush1.bf16.msra.mxu0 %v1923_v58  ;;  %v1891_v30 = vsel %vm1846_vm4, %v3989_v43, %v1778_v9  ;;  %2290 = vmatprep.mubr.bf16.mxu0 %v7681_v31  ;;  %v1892_v57 = vsel %vm1846_vm4, %v7703_v4, %v1779_v41 }
 0x188   : > { %v1907_v19 = vsel %vm1846_vm4, %v1314_v36, %v1826_v46  ;;  %v1908_v54 = vsel %vm1846_vm4, %v1315_v38, %v1827_v8  ;;  %v1955_v22 = vpack.c.bf16 %v1642_v50, %v1642_v50 }
 0x189   : > { %v1939_v17 = vpack.c.bf16 %v1907_v19, %v1891_v30  ;;  %v1940_v55 = vpack.c.bf16 %v1908_v54, %v1892_v57  ;;  %v1956_v62 = vpack.c.bf16 %v1643_v15, %v1643_v15 }
 0x18a   : > { %v2001_v27 = vsel %vm1963_vm9, %v1955_v22, 0 }
 0x18b   : > { %2260 = vmatprep.subr.bf16.mxu0 %v1940_v55 }
 0x18c   : > { %2261 = vmatpush1.bf16.msra.mxu0 %v1939_v17 }
 0x18d   : > { %3902 = vmatprep.subr.msk.bf16.mxu0 %vm1963_vm9, %v1956_v62 }
 0x18f   : > { %v2046_v9 = vpop.f32.mrb[0].mxu1 }
 0x190   : > { %2263 = vmatpush1.bf16.msra.mxu0 %v2001_v27  ;;  %v2048_v58 = vpop.f32.mrb[1].mxu1 }
 0x191   : > { %v2050_v31 = vpop.f32.mrb[2].mxu1 }
 0x192   : > { %v5604_v41 = vpop.permute.xlu0 %2343  ;;  %v5606_v21 = vpop.permute.xlu1 %2365 }
 0x193   : > { %3903 = vmatmul.mubr.msk.bf16.vlgmr.msra.gmra.mrb[8].mxu0 %vm1959_vm10, %v5486_v26  ;;  %v2051_v7 = vpop.f32.mrb[3].mxu1  ;;  %v2346_v32 = vmul.f32 %v5604_v41, %v2046_v9  ;;  %v2347_v31 = vmul.f32 %v5604_v41, %v2048_v58 }
 0x195   : > { %v2368_v3 = vadd.f32 %v5606_v21, %v2346_v32  ;;  %v2369_v7 = vadd.f32 %v5606_v21, %v2347_v31 }
 0x197   : > { %v5610_v1 = vmax.f32 %v2368_v3, 0.0 }
 0x199   : > { %7704 = vst [vmem:[#allocation90_spill] sm:$0xff] %v5610_v1  ;;  %2420 = vrot.lane.b32.xlu1 %v5610_v1, %s4002_s9  ;;  %2782 = vrot.lane.b32.xlu0 %v5610_v1, %s4006_s13 }
 0x19d   : > { %2493 = vrot.lane.b32.xlu1 %v5610_v1, %s4001_s8  ;;  %2926 = vrot.lane.b32.xlu0 %v5610_v1, %s4007_s14 }
 0x1a1   : > { %2566 = vrot.lane.b32.xlu1 %v5610_v1, %s4003_s10 }
 0x1a5   : > { %2639 = vrot.lane.b32.xlu1 %v5610_v1, %s4000_s30 }
 0x1a9   : > { %2710 = vrot.lane.b32.xlu1 %v5610_v1, %s4004_s11 }
 0x1ad   : > { %2854 = vrot.lane.b32.xlu1 %v5610_v1, %s4005_s12 }
 0x1af   : > { %v2087_v26 = vpop.f32.mrb[4].mxu1 }
 0x1b0   : > { %v5628_v14 = vpop.f32.mrb[5].mxu1 }
 0x1b1   : > { %v2091_v25 = vpop.f32.mrb[6].mxu1 }
 0x1b2   : > { %v2092_v46 = vpop.f32.mrb[7].mxu1 }
 0x1b3   : > { %v5669_v46 = vmax.f32 %v2369_v7, 0.0 }
 0x1b5   : > { %7706 = vst [vmem:[#allocation95_spill] sm:$0xff] %v5669_v46 }
 0x1df   : > { %v5630_v59 = vpop.f32.mrb[8].mxu1 }
 0x1e0   : > { %v5632_v63 = vpop.f32.mrb[9].mxu1 }
 0x1e1   : > { %v2173_v36 = vpop.f32.mrb[10].mxu1 }
 0x1e2   : > { %v2174_v8 = vpop.f32.mrb[11].mxu1 }
 0x20e   : > { %v5634_v50 = vpop.f32.mrb[12].mxu1 }
 0x20f   : > { %v5636_v38 = vpop.f32.mrb[13].mxu1 }
 0x210   : > { %v2255_v15 = vpop.f32.mrb[14].mxu1 }
 0x211   : > { %v2256_v43 = vpop.f32.mrb[15].mxu1 }
 0x22f   : > { %v5638_v30 = vpop.f32.mrb[16].mxu1 }
 0x230   : > { %v5640_v19 = vpop.f32.mrb[17].mxu1 }
 0x231   : > { %v2337_v4 = vpop.f32.mrb[18].mxu1 }
 0x232   : > { %v2338_v57 = vpop.f32.mrb[19].mxu1 }
 0x233   : > { %v2348_v57 = vmul.f32 %v5604_v41, %v2087_v26  ;;  %v2349_v26 = vmul.f32 %v5604_v41, %v5628_v14  ;;  %v2352_v14 = vmul.f32 %v5604_v41, %v5630_v59  ;;  %v5760_v59 = vpop.permute.xlu1 %2420 }
 0x234   : > { %7711 = vst [vmem:[#allocation97_spill] sm:$0xff] %v5760_v59 }
 0x235   : > { %v2374_v31 = vadd.f32 %v5606_v21, %v2352_v14 }
 0x237   : > { %v5754_v7 = vmax.f32 %v2374_v31, 0.0 }
 0x239   : > { %7710 = vst [vmem:[#allocation73_spill] sm:$0xff] %v5754_v7 }
 0x246   : > { %v2128_v54 = vpop.f32.mrb[0].mxu0 }
 0x247   : > { %v2350_v17 = vmul.f32 %v5604_v41, %v2128_v54  ;;  %v2130_v55 = vpop.f32.mrb[1].mxu0 }
 0x248   : > { %v2132_v22 = vpop.f32.mrb[2].mxu0  ;;  %v2351_v32 = vmul.f32 %v5604_v41, %v2130_v55  ;;  %v2370_v55 = vadd.f32 %v5606_v21, %v2348_v57 }
 0x249   : > { %v2372_v62 = vadd.f32 %v5606_v21, %v2350_v17  ;;  %v2133_v27 = vpop.f32.mrb[3].mxu0 }
 0x24a   : > { %v2373_v36 = vadd.f32 %v5606_v21, %v2351_v32  ;;  %v5700_v22 = vmax.f32 %v2370_v55, 0.0  ;;  %v2361_v32 = vmul.f32 %v5604_v41, %v5640_v19  ;;  %v5801_v55 = vld [vmem:[%s7154_s4 + $0x4] ss:$8 sps:$4 sm:$0xff]  }
 0x24b   : > { %v5644_v9 = vmax.f32 %v2372_v62, 0.0  ;;  %v2371_v62 = vadd.f32 %v5606_v21, %v2349_v26  ;;  %7715 = vst [vmem:[#allocation99_spill] sm:$0xff] %v5801_v55  ;;  %3909 = vmatprep.mubr.msk.bf16.mxu1 %vm531_vm1, %v5801_v55  ;;  %3908 = vmatprep.mubr.msk.bf16.mxu0 %vm531_vm1, %v5801_v55  ;;  %v5807_v26 = vpop.permute.xlu0 %2782 }
 0x24c   : > { %v5676_v15 = vmax.f32 %v2373_v36, 0.0  ;;  %7708 = vst [vmem:[#allocation96_spill] sm:$0xff] %v5700_v22  ;;  %v2383_v36 = vadd.f32 %v5606_v21, %v2361_v32  ;;  %7716 = vst [vmem:[#allocation78_spill] sm:$0xff] %v5807_v26 }
 0x24d   : > { %7705 = vst [vmem:[#allocation63_spill] sm:$0xff] %v5644_v9  ;;  %2718 = vrot.lane.b32.xlu0 %v5644_v9, %s4004_s11  ;;  %2428 = vrot.lane.b32.xlu1 %v5644_v9, %s4002_s9  ;;  %v5729_v27 = vmax.f32 %v2371_v62, 0.0 }
 0x24e   : > { %7707 = vst [vmem:[#allocation62_spill] sm:$0xff] %v5676_v15  ;;  %v5778_v57 = vmax.f32 %v2383_v36, 0.0 }
 0x24f   : > { %7709 = vst [vmem:[#allocation11_spill] sm:$0xff] %v5729_v27  ;;  %v5821_v31 = vpop.permute.xlu0 %2926 }
 0x250   : > { %7713 = vst [vmem:[#allocation98_spill] sm:$0xff] %v5778_v57  ;;  %7718 = vst [vmem:[#allocation94_spill] sm:$0xff] %v5821_v31  ;;  %v7739_v31 = vld [vmem:[#allocation26_spill] sm:$0xff] }
 0x251   : > { %2790 = vrot.lane.b32.xlu0 %v5644_v9, %s4006_s13  ;;  %2501 = vrot.lane.b32.xlu1 %v5644_v9, %s4001_s8 }
 0x255   : > { %2862 = vrot.lane.b32.xlu0 %v5644_v9, %s4005_s12  ;;  %2574 = vrot.lane.b32.xlu1 %v5644_v9, %s4003_s10 }
 0x259   : > { %v5661_v3 = vpop.f32.mrb[4].mxu0  ;;  %2934 = vrot.lane.b32.xlu0 %v5644_v9, %s4007_s14  ;;  %2647 = vrot.lane.b32.xlu1 %v5644_v9, %s4000_s30  ;;  %v7753_v9 = vld [vmem:[#allocation27_spill] sm:$0xff] }
 0x25a   : > { %v5663_v25 = vpop.f32.mrb[5].mxu0  ;;  %v2354_v14 = vmul.f32 %v5604_v41, %v5661_v3 }
 0x25b   : > { %v2214_v58 = vpop.f32.mrb[6].mxu0 }
 0x25c   : > { %v2215_v8 = vpop.f32.mrb[7].mxu0  ;;  %v2353_v58 = vmul.f32 %v5604_v41, %v5632_v63 }
 0x25d   : > { %2422 = vrot.lane.b32.xlu0 %v5669_v46, %s4002_s9  ;;  %2712 = vrot.lane.b32.xlu1 %v5669_v46, %s4004_s11  ;;  %v5771_v8 = vpop.permute.xlu1 %2493 }
 0x25e   : > { %7712 = vst [vmem:[#allocation68_spill] sm:$0xff] %v5771_v8  ;;  %v2375_v19 = vadd.f32 %v5606_v21, %v2353_v58  ;;  %v2376_v58 = vadd.f32 %v5606_v21, %v2354_v14 }
 0x260   : > { %v5786_v63 = vmax.f32 %v2375_v19, 0.0  ;;  %v5838_v3 = vmax.f32 %v2376_v58, 0.0  ;;  %v2355_v58 = vmul.f32 %v5604_v41, %v5663_v25 }
 0x261   : > { %2495 = vrot.lane.b32.xlu0 %v5669_v46, %s4001_s8  ;;  %2720 = vrot.lane.b32.xlu1 %v5676_v15, %s4004_s11 }
 0x262   : > { %7714 = vst [vmem:[#allocation80_spill] sm:$0xff] %v5786_v63  ;;  %7720 = vst [vmem:[#allocation104_spill] sm:$0xff] %v5838_v3  ;;  %v2377_v47 = vadd.f32 %v5606_v21, %v2355_v58 }
 0x264   : > { %v5878_v56 = vmax.f32 %v2377_v47, 0.0  ;;  %v2356_v47 = vmul.f32 %v5604_v41, %v5634_v50 }
 0x265   : > { %2568 = vrot.lane.b32.xlu0 %v5669_v46, %s4003_s10  ;;  %2792 = vrot.lane.b32.xlu1 %v5676_v15, %s4006_s13 }
 0x266   : > { %v5686_v43 = vpop.f32.mrb[8].mxu0  ;;  %7722 = vst [vmem:[#allocation132_spill] sm:$0xff] %v5878_v56 }
 0x267   : > { %v5688_v4 = vpop.f32.mrb[9].mxu0  ;;  %v2358_v5 = vmul.f32 %v5604_v41, %v5686_v43 }
 0x268   : > { %v2296_v54 = vpop.f32.mrb[10].mxu0  ;;  %v2359_v26 = vmul.f32 %v5604_v41, %v5688_v4 }
 0x269   : > { %v2297_v17 = vpop.f32.mrb[11].mxu0  ;;  %2641 = vrot.lane.b32.xlu0 %v5669_v46, %s4000_s30  ;;  %2864 = vrot.lane.b32.xlu1 %v5676_v15, %s4005_s12  ;;  %v5780_v54 = vpop.permute.xlu1 %2566 }
 0x26a   : > { %v2381_v1 = vadd.f32 %v5606_v21, %v2359_v26 }
 0x26d   : > { %2784 = vrot.lane.b32.xlu0 %v5669_v46, %s4006_s13  ;;  %2936 = vrot.lane.b32.xlu1 %v5676_v15, %s4007_s14  ;;  %v5792_v17 = vpop.permute.xlu1 %2639 }
 0x271   : > { %2856 = vrot.lane.b32.xlu0 %v5669_v46, %s4005_s12  ;;  %2786 = vrot.lane.b32.xlu1 %v5700_v22, %s4006_s13  ;;  %v5809_v62 = vpop.permute.xlu1 %2710 }
 0x272   : > { %7717 = vst [vmem:[#allocation100_spill] sm:$0xff] %v5809_v62 }
 0x275   : > { %2928 = vrot.lane.b32.xlu0 %v5669_v46, %s4007_s14  ;;  %2858 = vrot.lane.b32.xlu1 %v5700_v22, %s4005_s12  ;;  %v5823_v32 = vpop.permute.xlu1 %2854 }
 0x276   : > { %7719 = vst [vmem:[#allocation88_spill] sm:$0xff] %v5823_v32 }
 0x279   : > { %2430 = vrot.lane.b32.xlu0 %v5676_v15, %s4002_s9  ;;  %2930 = vrot.lane.b32.xlu1 %v5700_v22, %s4007_s14 }
 0x27d   : > { %2503 = vrot.lane.b32.xlu0 %v5676_v15, %s4001_s8  ;;  %2497 = vrot.lane.b32.xlu1 %v5700_v22, %s4001_s8 }
 0x281   : > { %2576 = vrot.lane.b32.xlu0 %v5676_v15, %s4003_s10  ;;  %2570 = vrot.lane.b32.xlu1 %v5700_v22, %s4003_s10 }
 0x285   : > { %2649 = vrot.lane.b32.xlu0 %v5676_v15, %s4000_s30  ;;  %2643 = vrot.lane.b32.xlu1 %v5700_v22, %s4000_s30 }
 0x289   : > { %2714 = vrot.lane.b32.xlu0 %v5700_v22, %s4004_s11  ;;  %2426 = vrot.lane.b32.xlu1 %v5729_v27, %s4002_s9 }
 0x28d   : > { %2424 = vrot.lane.b32.xlu0 %v5700_v22, %s4002_s9  ;;  %2716 = vrot.lane.b32.xlu1 %v5729_v27, %s4004_s11 }
 0x291   : > { %2499 = vrot.lane.b32.xlu0 %v5729_v27, %s4001_s8  ;;  %2788 = vrot.lane.b32.xlu1 %v5729_v27, %s4006_s13 }
 0x295   : > { %2572 = vrot.lane.b32.xlu0 %v5729_v27, %s4003_s10  ;;  %2860 = vrot.lane.b32.xlu1 %v5729_v27, %s4005_s12 }
 0x299   : > { %2645 = vrot.lane.b32.xlu0 %v5729_v27, %s4000_s30  ;;  %2932 = vrot.lane.b32.xlu1 %v5729_v27, %s4007_s14 }
 0x29d   : > { %2722 = vrot.lane.b32.xlu0 %v5754_v7, %s4004_s11  ;;  %2432 = vrot.lane.b32.xlu1 %v5754_v7, %s4002_s9 }
 0x2a1   : > { %2794 = vrot.lane.b32.xlu0 %v5754_v7, %s4006_s13  ;;  %2505 = vrot.lane.b32.xlu1 %v5754_v7, %s4001_s8 }
 0x2a5   : > { %2866 = vrot.lane.b32.xlu0 %v5754_v7, %s4005_s12  ;;  %2578 = vrot.lane.b32.xlu1 %v5754_v7, %s4003_s10 }
 0x2a9   : > { %2938 = vrot.lane.b32.xlu0 %v5754_v7, %s4007_s14  ;;  %2403 = vrot.lane.b32.xlu1 %v5778_v57, %s4002_s9 }
 0x2ad   : > { %2434 = vrot.lane.b32.xlu0 %v5786_v63, %s4002_s9  ;;  %2563 = vrot.lane.b32.xlu1 %v5778_v57, %s4003_s10 }
 0x2b1   : > { %2507 = vrot.lane.b32.xlu0 %v5786_v63, %s4001_s8  ;;  %2651 = vrot.lane.b32.xlu1 %v5754_v7, %s4000_s30 }
 0x2b5   : > { %2490 = vrot.lane.b32.xlu0 %v5778_v57, %s4001_s8  ;;  %2724 = vrot.lane.b32.xlu1 %v5786_v63, %s4004_s11 }
 0x2b9   : > { %2636 = vrot.lane.b32.xlu0 %v5778_v57, %s4000_s30  ;;  %2796 = vrot.lane.b32.xlu1 %v5786_v63, %s4006_s13 }
 0x2bd   : > { %2580 = vrot.lane.b32.xlu0 %v5786_v63, %s4003_s10  ;;  %2868 = vrot.lane.b32.xlu1 %v5786_v63, %s4005_s12 }
 0x2bf   : > { %v5830_v36 = vpop.permute.xlu0 %2718  ;;  %v5832_v19 = vpop.permute.xlu1 %2428 }
 0x2c1   : > { %2653 = vrot.lane.b32.xlu0 %v5786_v63, %s4000_s30  ;;  %2940 = vrot.lane.b32.xlu1 %v5786_v63, %s4007_s14  ;;  %v7738_v63 = vld [vmem:[#allocation25_spill] sm:$0xff] }
 0x2c3   : > { %v5840_v10 = vpop.permute.xlu0 %2790  ;;  %v5842_v48 = vpop.permute.xlu1 %2501 }
 0x2c5   : > { %2726 = vrot.lane.b32.xlu0 %v5838_v3, %s4004_s11  ;;  %2436 = vrot.lane.b32.xlu1 %v5838_v3, %s4002_s9 }
 0x2c7   : > { %v5848_v14 = vpop.permute.xlu0 %2862  ;;  %v5850_v0 = vpop.permute.xlu1 %2574 }
 0x2c8   : > { %7721 = vst [vmem:[#allocation29_spill] sm:$0xff] %v5848_v14 }
 0x2c9   : > { %2798 = vrot.lane.b32.xlu0 %v5838_v3, %s4006_s13  ;;  %2509 = vrot.lane.b32.xlu1 %v5838_v3, %s4001_s8 }
 0x2cb   : > { %v5858_v16 = vpop.permute.xlu0 %2934  ;;  %v5860_v28 = vpop.permute.xlu1 %2647 }
 0x2cd   : > { %2870 = vrot.lane.b32.xlu0 %v5838_v3, %s4005_s12  ;;  %2582 = vrot.lane.b32.xlu1 %v5838_v3, %s4003_s10 }
 0x2cf   : > { %v5867_v18 = vpop.permute.xlu0 %2422  ;;  %v5869_v29 = vpop.permute.xlu1 %2712 }
 0x2d0   : > { %v2448_v25 = vsel %vm367_vm2, %v5760_v59, %v5867_v18 }
 0x2d1   : > { %2942 = vrot.lane.b32.xlu0 %v5838_v3, %s4007_s14  ;;  %2655 = vrot.lane.b32.xlu1 %v5838_v3, %s4000_s30  ;;  %v2477_v52 = vmul.f32 %v2448_v25, %v7723_v2  ;;  %v2378_v25 = vadd.f32 %v5606_v21, %v2356_v47 }
 0x2d3   : > { %v5880_v24 = vpop.permute.xlu0 %2495  ;;  %v5882_v35 = vpop.permute.xlu1 %2720 }
 0x2d4   : > { %v2521_v58 = vsel %vm531_vm1, %v5771_v8, %v5880_v24 }
 0x2d5   : > { %v2550_v37 = vmul.f32 %v2521_v58, %v7724_v49  ;;  %2438 = vrot.lane.b32.xlu0 %v5878_v56, %s4002_s9  ;;  %2728 = vrot.lane.b32.xlu1 %v5878_v56, %s4004_s11 }
 0x2d7   : > { %v5895_v33 = vpop.permute.xlu0 %2568  ;;  %v5897_v42 = vpop.permute.xlu1 %2792  ;;  %v3163_v45 = vpack.c.bf16 %v2550_v37, %v2477_v52  ;;  %v5912_v37 = vmax.f32 %v2378_v25, 0.0  ;;  %v2357_v25 = vmul.f32 %v5604_v41, %v5636_v38 }
 0x2d9   : > { %2511 = vrot.lane.b32.xlu0 %v5878_v56, %s4001_s8  ;;  %2800 = vrot.lane.b32.xlu1 %v5878_v56, %s4006_s13  ;;  %7726 = vst [vmem:[#allocation134_spill] sm:$0xff] %v5912_v37  ;;  %v2379_v44 = vadd.f32 %v5606_v21, %v2357_v25 }
 0x2da   : > { %3300 = vmatprep.subr.bf16.mxu0 %v3163_v45 }
 0x2db   : > { %v5904_v58 = vpop.permute.xlu0 %2641  ;;  %v5906_v34 = vpop.permute.xlu1 %2864  ;;  %v5949_v38 = vmax.f32 %v2379_v44, 0.0 }
 0x2dc   : > { %7725 = vst [vmem:[#allocation133_spill] sm:$0xff] %v5906_v34 }
 0x2dd   : > { %2584 = vrot.lane.b32.xlu0 %v5878_v56, %s4003_s10  ;;  %2872 = vrot.lane.b32.xlu1 %v5878_v56, %s4005_s12  ;;  %7731 = vst [vmem:[#allocation139_spill] sm:$0xff] %v5949_v38 }
 0x2df   : > { %v5914_v52 = vpop.permute.xlu0 %2784  ;;  %v5916_v50 = vpop.permute.xlu1 %2936 }
 0x2e0   : > { %7727 = vst [vmem:[#allocation135_spill] sm:$0xff] %v5914_v52 }
 0x2e1   : > { %2657 = vrot.lane.b32.xlu0 %v5878_v56, %s4000_s30  ;;  %2440 = vrot.lane.b32.xlu1 %v5912_v37, %s4002_s9 }
 0x2e3   : > { %v5922_v45 = vpop.permute.xlu0 %2856  ;;  %v5924_v47 = vpop.permute.xlu1 %2786 }
 0x2e4   : > { %7728 = vst [vmem:[#allocation136_spill] sm:$0xff] %v5922_v45  ;;  %7729 = vst [vmem:[#allocation137_spill] sm:$0xff] %v5924_v47 }
 0x2e5   : > { %2730 = vrot.lane.b32.xlu0 %v5912_v37, %s4004_s11  ;;  %2944 = vrot.lane.b32.xlu1 %v5878_v56, %s4007_s14 }
 0x2e7   : > { %v5932_v60 = vpop.permute.xlu0 %2928  ;;  %v5934_v12 = vpop.permute.xlu1 %2858 }
 0x2e8   : > { %7730 = vst [vmem:[#allocation138_spill] sm:$0xff] %v5932_v60 }
 0x2e9   : > { %2802 = vrot.lane.b32.xlu0 %v5912_v37, %s4006_s13  ;;  %2513 = vrot.lane.b32.xlu1 %v5912_v37, %s4001_s8 }
 0x2eb   : > { %v5941_v3 = vpop.permute.xlu0 %2430  ;;  %v5943_v51 = vpop.permute.xlu1 %2930 }
 0x2ed   : > { %2874 = vrot.lane.b32.xlu0 %v5912_v37, %s4005_s12  ;;  %2586 = vrot.lane.b32.xlu1 %v5912_v37, %s4003_s10 }
 0x2ef   : > { %v5951_v56 = vpop.permute.xlu0 %2503  ;;  %v2498_v53 = vpop.permute.xlu1 %2497 }
 0x2f0   : > { %v5998_v49 = vsel %vm531_vm1, %v5880_v24, %v2498_v53  ;;  %v7741_v24 = vld [vmem:[#allocation20_spill] sm:$0xff] }
 0x2f1   : > { %2442 = vrot.lane.b32.xlu0 %v5949_v38, %s4002_s9  ;;  %2659 = vrot.lane.b32.xlu1 %v5912_v37, %s4000_s30  ;;  %7736 = vst [vmem:[#allocation144_spill] sm:$0xff] %v5998_v49  ;;  %v2551_v2 = vmul.f32 %v5998_v49, %v7741_v24 }
 0x2f3   : > { %v5957_v25 = vpop.permute.xlu0 %2576  ;;  %v2571_v39 = vpop.permute.xlu1 %2570 }
 0x2f4   : > { %v6046_v4 = vsel %vm695_vm3, %v5895_v33, %v2571_v39 }
 0x2f5   : > { %2946 = vrot.lane.b32.xlu0 %v5912_v37, %s4007_s14  ;;  %2732 = vrot.lane.b32.xlu1 %v5949_v38, %s4004_s11  ;;  %v2380_v37 = vadd.f32 %v5606_v21, %v2358_v5  ;;  %7746 = vst [vmem:[#allocation146_spill] sm:$0xff] %v6046_v4  ;;  %v2624_v34 = vmul.f32 %v6046_v4, %v7753_v9 }
 0x2f7   : > { %v5963_v44 = vpop.permute.xlu0 %2649  ;;  %v2644_v40 = vpop.permute.xlu1 %2643  ;;  %v5992_v6 = vmax.f32 %v2380_v37, 0.0 }
 0x2f8   : > { %v6028_v49 = vsel %vm859_vm0, %v5904_v58, %v2644_v40 }
 0x2f9   : > { %2515 = vrot.lane.b32.xlu0 %v5949_v38, %s4001_s8  ;;  %2804 = vrot.lane.b32.xlu1 %v5949_v38, %s4006_s13  ;;  %7735 = vst [vmem:[#allocation143_spill] sm:$0xff] %v5992_v6  ;;  %7742 = vst [vmem:[#allocation25_spill] sm:$0xff] %v6028_v49 }
 0x2fb   : > { %v5971_v20 = vpop.permute.xlu0 %2714  ;;  %v5973_v11 = vpop.permute.xlu1 %2426 }
 0x2fc   : > { %7732 = vst [vmem:[#allocation140_spill] sm:$0xff] %v5971_v20 }
 0x2fd   : > { %2588 = vrot.lane.b32.xlu0 %v5949_v38, %s4003_s10  ;;  %2876 = vrot.lane.b32.xlu1 %v5949_v38, %s4005_s12 }
 0x2ff   : > { %v2425_v23 = vpop.permute.xlu0 %2424  ;;  %v2717_v61 = vpop.permute.xlu1 %2716 }
 0x300   : > { %v5984_v43 = vsel %vm367_vm2, %v5867_v18, %v2425_v23  ;;  %v5988_v13 = vsel %vm367_vm2, %v2425_v23, %v5973_v11  ;;  %v6061_v57 = vsel %vm1022_vm5, %v5971_v20, %v2717_v61 }
 0x301   : > { %2661 = vrot.lane.b32.xlu0 %v5949_v38, %s4000_s30  ;;  %7733 = vst [vmem:[#allocation141_spill] sm:$0xff] %v5984_v43  ;;  %7734 = vst [vmem:[#allocation142_spill] sm:$0xff] %v5988_v13  ;;  %2948 = vrot.lane.b32.xlu1 %v5949_v38, %s4007_s14  ;;  %v2478_v23 = vmul.f32 %v5984_v43, %v7738_v63  ;;  %v2479_v55 = vmul.f32 %v5988_v13, %v7739_v31  ;;  %v7740_v38 = vld [vmem:[#allocation21_spill] sm:$0xff] }
 0x303   : > { %v5994_v7 = vpop.permute.xlu0 %2499  ;;  %v2789_v5 = vpop.permute.xlu1 %2788  ;;  %v3164_v43 = vpack.c.bf16 %v2551_v2, %v2478_v23 }
 0x304   : > { %v6002_v18 = vsel %vm531_vm1, %v2498_v53, %v5994_v7 }
 0x305   : > { %7737 = vst [vmem:[#allocation145_spill] sm:$0xff] %v6002_v18  ;;  %v2552_v37 = vmul.f32 %v6002_v18, %v7740_v38  ;;  %2734 = vrot.lane.b32.xlu0 %v5992_v6, %s4004_s11  ;;  %2444 = vrot.lane.b32.xlu1 %v5992_v6, %s4002_s9 }
 0x307   : > { %v6016_v53 = vpop.permute.xlu0 %2572  ;;  %v2861_v60 = vpop.permute.xlu1 %2860  ;;  %v3165_v46 = vpack.c.bf16 %v2552_v37, %v2479_v55  ;;  %v6036_v55 = vsel %vm1022_vm5, %v2717_v61, %v5830_v36 }
 0x308   : > { %7744 = vst [vmem:[#allocation21_spill] sm:$0xff] %v6036_v55  ;;  %v6091_v59 = vsel %vm1350_vm6, %v5934_v12, %v2861_v60 }
 0x309   : > { %2806 = vrot.lane.b32.xlu0 %v5992_v6, %s4006_s13  ;;  %2517 = vrot.lane.b32.xlu1 %v5992_v6, %s4001_s8 }
 0x30a   : > { %3343 = vmatprep.subr.bf16.mxu1 %v3165_v46  ;;  %v6040_v46 = vsel %vm695_vm3, %v2571_v39, %v6016_v53  ;;  %v7751_v39 = vld [vmem:[#allocation31_spill] sm:$0xff] }
 0x30b   : > { %3344 = vmatpush1.bf16.msra.mxu1 %v3164_v43  ;;  %v6022_v18 = vpop.permute.xlu0 %2645  ;;  %v2933_v13 = vpop.permute.xlu1 %2932  ;;  %7745 = vst [vmem:[#allocation20_spill] sm:$0xff] %v6040_v46  ;;  %v7747_v43 = vld [vmem:[#allocation23_spill] sm:$0xff]  ;;  %v2771_v45 = vmul.f32 %v6036_v55, %v7751_v39 }
 0x30c   : > { %v6032_v2 = vsel %vm859_vm0, %v2644_v40, %v6022_v18  ;;  %v7748_v40 = vld [vmem:[#allocation22_spill] sm:$0xff] }
 0x30d   : > { %7743 = vst [vmem:[#allocation26_spill] sm:$0xff] %v6032_v2  ;;  %2878 = vrot.lane.b32.xlu0 %v5992_v6, %s4005_s12  ;;  %v2698_v23 = vmul.f32 %v6032_v2, %v7747_v43  ;;  %2590 = vrot.lane.b32.xlu1 %v5992_v6, %s4003_s10  ;;  %v2697_v37 = vmul.f32 %v6028_v49, %v7748_v40  ;;  %7750 = vst [vmem:[#allocation22_spill] sm:$0xff] %v6061_v57  ;;  %v7752_v2 = vld [vmem:[#allocation28_spill] sm:$0xff] }
 0x30e   : > { %v2625_v8 = vmul.f32 %v6040_v46, %v7752_v2  ;;  %v6071_v49 = vsel %vm1350_vm6, %v2861_v60, %v5848_v14  ;;  %v6081_v46 = vsel %vm1186_vm7, %v2789_v5, %v5840_v10  ;;  %v6087_v14 = vmax.f32 %v2381_v1, 0.0  ;;  %v7761_v1 = vld [vmem:[#allocation35_spill] sm:$0xff] }
 0x30f   : > { %v6054_v52 = vpop.permute.xlu0 %2722  ;;  %v6056_v32 = vpop.permute.xlu1 %2432  ;;  %7754 = vst [vmem:[#allocation31_spill] sm:$0xff] %v6071_v49  ;;  %v3178_v26 = vpack.c.bf16 %v2697_v37, %v2624_v34  ;;  %7756 = vst [vmem:[#allocation28_spill] sm:$0xff] %v6081_v46  ;;  %v6102_v37 = vsel %vm1186_vm7, %v5924_v47, %v2789_v5  ;;  %v6111_v60 = vsel %vm367_vm2, %v5832_v19, %v5941_v3 }
 0x310   : > { %7749 = vst [vmem:[#allocation23_spill] sm:$0xff] %v6056_v32  ;;  %v3179_v61 = vpack.c.bf16 %v2698_v23, %v2625_v8  ;;  %v7755_v32 = vld [vmem:[#allocation30_spill] sm:$0xff]  ;;  %7757 = vst [vmem:[#allocation27_spill] sm:$0xff] %v6087_v14  ;;  %v3193_v8 = vpack.c.bf16 %v2771_v45, %v5729_v27  ;;  %v6098_v23 = vsel %vm1514_vm8, %v2933_v13, %v5858_v16  ;;  %v7765_v27 = vld [vmem:[#allocation37_spill] sm:$0xff] }
 0x311   : > { %2950 = vrot.lane.b32.xlu0 %v5992_v6, %s4007_s14  ;;  %2663 = vrot.lane.b32.xlu1 %v5992_v6, %s4000_s30  ;;  %v2770_v55 = vmul.f32 %v6061_v57, %v7755_v32  ;;  %7758 = vst [vmem:[#allocation30_spill] sm:$0xff] %v6091_v59  ;;  %v7759_v6 = vld [vmem:[#allocation33_spill] sm:$0xff]  ;;  %v2843_v57 = vmul.f32 %v6081_v46, %v7761_v1  ;;  %7762 = vst [vmem:[#allocation35_spill] sm:$0xff] %v6111_v60 }
 0x312   : > { %v2915_v34 = vmul.f32 %v6071_v49, %v7759_v6  ;;  %3345 = vmatprep.subr.bf16.mxu1 %v3179_v61  ;;  %7760 = vst [vmem:[#allocation33_spill] sm:$0xff] %v6098_v23  ;;  %v7763_v61 = vld [vmem:[#allocation32_spill] sm:$0xff]  ;;  %v2987_v46 = vmul.f32 %v6098_v23, %v7765_v27 }
 0x313   : > { %v6083_v4 = vpop.permute.xlu0 %2794  ;;  %v6085_v20 = vpop.permute.xlu1 %2505  ;;  %3346 = vmatpush1.bf16.msra.mxu1 %v3178_v26  ;;  %v3192_v45 = vpack.c.bf16 %v2770_v55, %v5700_v22  ;;  %v2914_v26 = vmul.f32 %v6091_v59, %v7763_v61  ;;  %v6131_v55 = vsel %vm695_vm3, %v5850_v0, %v5957_v25  ;;  %v7766_v59 = vld [vmem:[#allocation34_spill] sm:$0xff]  ;;  %v7767_v23 = vld [vmem:[#allocation36_spill] sm:$0xff] }
 0x314   : > { %3347 = vmatprep.subr.bf16.mxu1 %v3193_v8  ;;  %v6124_v8 = vsel %vm1514_vm8, %v5943_v51, %v2933_v13  ;;  %v3207_v47 = vpack.c.bf16 %v2915_v34, %v2843_v57  ;;  %v2842_v22 = vmul.f32 %v6102_v37, %v7766_v59  ;;  %v6140_v13 = vsel %vm367_vm2, %v5973_v11, %v5832_v19 }
 0x315   : > { %2446 = vrot.lane.b32.xlu0 %v6087_v14, %s4002_s9  ;;  %2736 = vrot.lane.b32.xlu1 %v6087_v14, %s4004_s11  ;;  %v2360_v57 = vmul.f32 %v5604_v41, %v5638_v30  ;;  %v6149_v34 = vsel %vm531_vm1, %v5842_v48, %v5951_v56  ;;  %v6164_v41 = vsel %vm695_vm3, %v6016_v53, %v5850_v0 }
 0x316   : > { %7769 = vst [vmem:[#allocation34_spill] sm:$0xff] %v6164_v41  ;;  %v3046_v0 = vmul.f32 %v6164_v41, %v7753_v9  ;;  %v6201_v9 = vsel %vm1186_vm7, %v5840_v10, %v5897_v42  ;;  %v2594_v10 = vsel %vm695_vm3, %v5780_v54, %v5895_v33 }
 0x317   : > { %v6118_v5 = vpop.permute.xlu0 %2866  ;;  %v6120_v49 = vpop.permute.xlu1 %2578  ;;  %3348 = vmatpush1.bf16.msra.mxu1 %v3192_v45  ;;  %v3206_v45 = vpack.c.bf16 %v2914_v26, %v2842_v22  ;;  %v6169_v22 = vsel %vm859_vm0, %v5860_v28, %v5963_v44  ;;  %v3006_v26 = vmul.f32 %v6140_v13, %v7738_v63  ;;  %7771 = vst [vmem:[#allocation147_spill] sm:$0xff] %v6201_v9 }
 0x318   : > { %7764 = vst [vmem:[#allocation32_spill] sm:$0xff] %v6120_v49  ;;  %v3007_v49 = vmul.f32 %v6111_v60, %v7739_v31  ;;  %3349 = vmatprep.subr.bf16.mxu1 %v3207_v47  ;;  %v2986_v31 = vmul.f32 %v6124_v8, %v7767_v23  ;;  %v3047_v47 = vmul.f32 %v6131_v55, %v7752_v2 }
 0x319   : > { %2519 = vrot.lane.b32.xlu0 %v6087_v14, %s4001_s8  ;;  %2808 = vrot.lane.b32.xlu1 %v6087_v14, %s4006_s13  ;;  %v3027_v60 = vmul.f32 %v6149_v34, %v7740_v38  ;;  %v6178_v2 = vsel %vm531_vm1, %v5994_v7, %v5842_v48  ;;  %v3067_v48 = vmul.f32 %v6169_v22, %v7747_v43 }
 0x31a   : > { %v3221_v30 = vpack.c.bf16 %v3007_v49, %v2987_v46  ;;  %v2382_v49 = vadd.f32 %v5606_v21, %v2360_v57  ;;  %v3220_v53 = vpack.c.bf16 %v3006_v26, %v2986_v31  ;;  %v6196_v7 = vsel %vm859_vm0, %v6022_v18, %v5860_v28 }
 0x31b   : > { %v6155_v11 = vpop.permute.xlu0 %2938  ;;  %v6157_v19 = vpop.permute.xlu1 %2403  ;;  %3350 = vmatpush1.bf16.msra.mxu1 %v3206_v45  ;;  %v3235_v21 = vpack.c.bf16 %v3047_v47, %v3027_v60  ;;  %v3026_v46 = vmul.f32 %v6178_v2, %v7741_v24  ;;  %v6208_v57 = vsel %vm1186_vm7, %v5897_v42, %v6083_v4  ;;  %v2740_v28 = vsel %vm1022_vm5, %v5809_v62, %v5869_v29  ;;  %v7775_v47 = vld [vmem:[#allocation14_spill] sm:$0xff] }
 0x31c   : > { %7768 = vst [vmem:[#allocation37_spill] sm:$0xff] %v6157_v19  ;;  %3351 = vmatprep.subr.bf16.mxu1 %v3221_v30  ;;  %7772 = vst [vmem:[#allocation148_spill] sm:$0xff] %v6208_v57  ;;  %v6216_v18 = vsel %vm1022_vm5, %v5830_v36, %v5882_v35  ;;  %v6223_v42 = vmax.f32 %v2382_v49, 0.0  ;;  %v3066_v43 = vmul.f32 %v6196_v7, %v7748_v40  ;;  %v7776_v49 = vld [vmem:[#allocation8_spill] sm:$0xff] }
 0x31d   : > { %2592 = vrot.lane.b32.xlu0 %v6087_v14, %s4003_s10  ;;  %2880 = vrot.lane.b32.xlu1 %v6087_v14, %s4005_s12  ;;  %7773 = vst [vmem:[#allocation149_spill] sm:$0xff] %v6216_v18  ;;  %v3234_v24 = vpack.c.bf16 %v3046_v0, %v3026_v46  ;;  %v6230_v60 = vsel %vm1022_vm5, %v5882_v35, %v6054_v52  ;;  %v7781_v46 = vld [vmem:[#allocation133_spill] sm:$0xff] }
 0x31e   : > { %7774 = vst [vmem:[#allocation150_spill] sm:$0xff] %v6223_v42  ;;  %v3108_v45 = vmul.f32 %v6201_v9, %v7766_v59  ;;  %v2667_v31 = vsel %vm859_vm0, %v5792_v17, %v5904_v58  ;;  %v3109_v40 = vmul.f32 %v6208_v57, %v7761_v1  ;;  %v3249_v35 = vpack.c.bf16 %v5676_v15, %v3067_v48  ;;  %v7780_v48 = vld [vmem:[#allocation3_spill] sm:$0xff]  ;;  %v7820_v15 = vld [vmem:[#allocation44_spill] sm:$0xff] }
 0x31f   : > { %v6187_v63 = vpop.permute.xlu0 %2434  ;;  %v6189_v38 = vpop.permute.xlu1 %2563  ;;  %3352 = vmatpush1.bf16.msra.mxu1 %v3220_v53  ;;  %v6247_v30 = vmul.f32 %v2740_v28, %v7775_v47  ;;  %v3087_v26 = vmul.f32 %v6216_v18, %v7755_v32  ;;  %v2623_v0 = vmul.f32 %v2594_v10, %v7776_v49  ;;  %v6255_v59 = vsel %vm1514_vm8, %v5916_v50, %v6155_v11  ;;  %v7779_v53 = vld [vmem:[#allocation97_spill] sm:$0xff] }
 0x320   : > { %7770 = vst [vmem:[#allocation36_spill] sm:$0xff] %v6189_v38  ;;  %3353 = vmatprep.subr.bf16.mxu1 %v3235_v21  ;;  %7777 = vst [vmem:[#allocation14_spill] sm:$0xff] %v6255_v59  ;;  %v6260_v58 = vsel %vm1514_vm8, %v5858_v16, %v5916_v50  ;;  %v3088_v1 = vmul.f32 %v6230_v60, %v7751_v39  ;;  %v2475_v32 = vsel %vm367_vm2, %v6157_v19, %v7779_v53  ;;  %v7782_v28 = vld [vmem:[#allocation29_spill] sm:$0xff]  ;;  %v7784_v16 = vld [vmem:[#allocation63_spill] sm:$0xff] }
 0x321   : > { %2665 = vrot.lane.b32.xlu0 %v6087_v14, %s4000_s30  ;;  %2952 = vrot.lane.b32.xlu1 %v6087_v14, %s4007_s14  ;;  %7778 = vst [vmem:[#allocation8_spill] sm:$0xff] %v6260_v58  ;;  %v2696_v21 = vmul.f32 %v2667_v31, %v7780_v48  ;;  %v6273_v10 = vsel %vm1350_vm6, %v7782_v28, %v7781_v46  ;;  %v7787_v28 = vld [vmem:[#allocation68_spill] sm:$0xff]  ;;  %v7788_v19 = vld [vmem:[#allocation10_spill] sm:$0xff] }
 0x322   : > { %7783 = vst [vmem:[#allocation97_spill] sm:$0xff] %v6273_v10  ;;  %v3248_v50 = vpack.c.bf16 %v7784_v16, %v3066_v43  ;;  %v6279_v39 = vsel %vm1350_vm6, %v7781_v46, %v6118_v5  ;;  %v3262_v31 = vpack.c.bf16 %v3108_v45, %v3087_v26  ;;  %v3151_v53 = vmul.f32 %v6255_v59, %v7765_v27  ;;  %v7790_v45 = vld [vmem:[#allocation7_spill] sm:$0xff]  ;;  %v7798_v59 = vld [vmem:[#allocation6_spill] sm:$0xff] }
 0x323   : > { %v6234_v36 = vpop.permute.xlu0 %2507  ;;  %v6236_v33 = vpop.permute.xlu1 %2651  ;;  %3354 = vmatpush1.bf16.msra.mxu1 %v3234_v24  ;;  %7785 = vst [vmem:[#allocation3_spill] sm:$0xff] %v6279_v39  ;;  %v3263_v62 = vpack.c.bf16 %v3109_v40, %v3088_v1  ;;  %v3150_v46 = vmul.f32 %v6260_v58, %v7767_v23  ;;  %v2476_v14 = vmul.f32 %v2475_v32, %v7788_v19  ;;  %v7791_v40 = vld [vmem:[#allocation140_spill] sm:$0xff]  ;;  %v7792_v32 = vld [vmem:[#allocation23_spill] sm:$0xff] }
 0x324   : > { %3355 = vmatprep.subr.bf16.mxu1 %v3249_v35  ;;  %v6298_v9 = vsel %vm531_vm1, %v6085_v20, %v6234_v36  ;;  %v3129_v27 = vmul.f32 %v6273_v10, %v7763_v61  ;;  %v2621_v23 = vsel %vm695_vm3, %v6189_v38, %v5780_v54  ;;  %v2741_v1 = vsel %vm1022_vm5, %v5869_v29, %v7791_v40  ;;  %v7796_v29 = vld [vmem:[#allocation40_spill] sm:$0xff]  ;;  %v7797_v38 = vld [vmem:[#allocation9_spill] sm:$0xff] }
 0x325   : > { %2738 = vrot.lane.b32.xlu0 %v6223_v42, %s4004_s11  ;;  %2998 = vrot.lane.b32.xlu1 %v6223_v42, %s4002_s9  ;;  %7789 = vst [vmem:[#allocation29_spill] sm:$0xff] %v6298_v9  ;;  %v2556_v40 = vmul.f32 %v6298_v9, %v7796_v29  ;;  %v2622_v58 = vmul.f32 %v2621_v23, %v7797_v38 }
 0x327   : > { %v6283_v24 = vpop.permute.xlu0 %2490  ;;  %v6285_v35 = vpop.permute.xlu1 %2724  ;;  %3356 = vmatpush1.bf16.msra.mxu1 %v3248_v50  ;;  %v6316_v50 = vsel %vm367_vm2, %v7792_v32, %v6187_v63 }
 0x328   : > { %7786 = vst [vmem:[#allocation133_spill] sm:$0xff] %v6283_v24  ;;  %v2548_v43 = vsel %vm531_vm1, %v6283_v24, %v7787_v28  ;;  %v3130_v28 = vmul.f32 %v6279_v39, %v7759_v6  ;;  %3357 = vmatprep.subr.bf16.mxu1 %v3263_v62  ;;  %7793 = vst [vmem:[#allocation68_spill] sm:$0xff] %v6316_v50  ;;  %v3177_v62 = vpack.c.bf16 %v2696_v21, %v2623_v0  ;;  %v7799_v0 = vld [vmem:[#allocation12_spill] sm:$0xff] }
 0x329   : > { %v2549_v26 = vmul.f32 %v2548_v43, %v7790_v45  ;;  %2810 = vrot.lane.b32.xlu0 %v6223_v42, %s4006_s13  ;;  %3038 = vrot.lane.b32.xlu1 %v6223_v42, %s4003_s10  ;;  %v6327_v43 = vsel %vm531_vm1, %v5951_v56, %v6085_v20  ;;  %v3276_v24 = vpack.c.bf16 %v3150_v46, %v3129_v27  ;;  %v7801_v56 = vld [vmem:[#allocation43_spill] sm:$0xff]  ;;  %v7828_v39 = vld [vmem:[#allocation48_spill] sm:$0xff] }
 0x32a   : > { %7795 = vst [vmem:[#allocation7_spill] sm:$0xff] %v6327_v43  ;;  %v2769_v21 = vmul.f32 %v2741_v1, %v7799_v0  ;;  %v6340_v20 = vsel %vm367_vm2, %v5941_v3, %v7792_v32  ;;  %v2483_v9 = vmul.f32 %v6316_v50, %v7801_v56  ;;  %v7805_v1 = vld [vmem:[#allocation90_spill] sm:$0xff]  ;;  %v7811_v50 = vld [vmem:[#allocation49_spill] sm:$0xff] }
 0x32b   : > { %v3162_v61 = vpack.c.bf16 %v2549_v26, %v2476_v14  ;;  %v6320_v6 = vpop.permute.xlu0 %2636  ;;  %v6322_v54 = vpop.permute.xlu1 %2796  ;;  %v3277_v26 = vpack.c.bf16 %v3151_v53, %v3130_v28  ;;  %3358 = vmatpush1.bf16.msra.mxu1 %v3262_v31  ;;  %7800 = vst [vmem:[#allocation140_spill] sm:$0xff] %v6340_v20  ;;  %v7803_v53 = vld [vmem:[#allocation45_spill] sm:$0xff]  ;;  %v7804_v28 = vld [vmem:[#allocation98_spill] sm:$0xff]  ;;  %v3190_v32 = vpack.c.bf16 %v6247_v30, %v7805_v1  ;;  %v7814_v1 = vld [vmem:[#allocation32_spill] sm:$0xff] }
 0x32c   : > { %7794 = vst [vmem:[#allocation10_spill] sm:$0xff] %v6320_v6  ;;  %v2694_v14 = vsel %vm859_vm0, %v6320_v6, %v5792_v17  ;;  %v7802_v17 = vld [vmem:[#allocation136_spill] sm:$0xff]  ;;  %v2555_v46 = vmul.f32 %v6327_v43, %v7803_v53  ;;  %v7810_v6 = vld [vmem:[#allocation137_spill] sm:$0xff]  ;;  %v2482_v30 = vmul.f32 %v6340_v20, %v7811_v50  ;;  %v7833_v53 = vld [vmem:[#allocation54_spill] sm:$0xff] }
 0x32d   : > { %v2695_v10 = vmul.f32 %v2694_v14, %v7798_v59  ;;  %3301 = vmatpush1.bf16.msra.mxu0 %v3162_v61  ;;  %3359 = vmatprep.subr.bf16.mxu1 %v3277_v26  ;;  %v2885_v31 = vsel %vm1350_vm6, %v7802_v17, %v5934_v12  ;;  %v7806_v61 = vld [vmem:[#allocation88_spill] sm:$0xff]  ;;  %v3169_v12 = vpack.c.bf16 %v2556_v40, %v2483_v9  ;;  %v7809_v26 = vld [vmem:[#allocation78_spill] sm:$0xff]  ;;  %v7813_v40 = vld [vmem:[#allocation13_spill] sm:$0xff] }
 0x32e   : > { %2882 = vrot.lane.b32.xlu0 %v6223_v42, %s4005_s12  ;;  %3078 = vrot.lane.b32.xlu1 %v7804_v28, %s4004_s11  ;;  %v2884_v14 = vsel %vm1350_vm6, %v7806_v61, %v7802_v17  ;;  %v6378_v9 = vsel %vm859_vm0, %v5963_v44, %v6236_v33  ;;  %v2913_v17 = vmul.f32 %v2885_v31, %v7813_v40 }
 0x32f   : > { %v3176_v27 = vpack.c.bf16 %v2695_v10, %v2622_v58  ;;  %3302 = vmatprep.subr.bf16.mxu0 %v3177_v62  ;;  %v6353_v3 = vpop.permute.xlu0 %2580  ;;  %v6355_v23 = vpop.permute.xlu1 %2868  ;;  %v6365_v58 = vld [vmem:[%s7154_s4] ss:$8 sps:$4 sm:$0xff]   ;;  %7812 = vst [vmem:[#allocation40_spill] sm:$0xff] %v6378_v9  ;;  %3360 = vmatpush1.bf16.msra.mxu1 %v3276_v24  ;;  %v3168_v16 = vpack.c.bf16 %v2555_v46, %v2482_v30 }
 0x330   : > { %7807 = vst [vmem:[#allocation23_spill] sm:$0xff] %v6365_v58  ;;  %v7808_v10 = vld [vmem:[#allocation135_spill] sm:$0xff]  ;;  %v6384_v61 = vsel %vm695_vm3, %v7814_v1, %v6353_v3  ;;  %3429 = vmatprep.subr.bf16.mxu1 %v3169_v12  ;;  %v6393_v44 = vsel %vm695_vm3, %v5957_v25, %v7814_v1  ;;  %v7819_v12 = vld [vmem:[#allocation16_spill] sm:$0xff]  ;;  %v7822_v46 = vld [vmem:[#allocation138_spill] sm:$0xff] }
 0x331   : > { %v2812_v62 = vsel %vm1186_vm7, %v7809_v26, %v7808_v10  ;;  %v2813_v43 = vsel %vm1186_vm7, %v7808_v10, %v7810_v6  ;;  %7815 = vst [vmem:[#allocation9_spill] sm:$0xff] %v6384_v61  ;;  %v7816_v6 = vld [vmem:[#allocation95_spill] sm:$0xff]  ;;  %7818 = vst [vmem:[#allocation6_spill] sm:$0xff] %v6393_v44  ;;  %3303 = vmatpush1.bf16.msra.mxu0 %v3176_v27  ;;  %v2957_v27 = vsel %vm1514_vm8, %v7822_v46, %v5943_v51  ;;  %v7825_v1 = vld [vmem:[#allocation41_spill] sm:$0xff] }
 0x332   : > { %2954 = vrot.lane.b32.xlu0 %v6223_v42, %s4007_s14  ;;  %v3191_v10 = vpack.c.bf16 %v2769_v21, %v7816_v6  ;;  %v7817_v26 = vld [vmem:[#allocation15_spill] sm:$0xff]  ;;  %3120 = vrot.lane.b32.xlu1 %v7804_v28, %s4005_s12  ;;  %v2841_v57 = vmul.f32 %v2813_v43, %v7819_v12  ;;  %v2701_v21 = vmul.f32 %v6378_v9, %v7820_v15  ;;  %v7824_v43 = vld [vmem:[#allocation46_spill] sm:$0xff] }
 0x333   : > { %v2912_v20 = vmul.f32 %v2884_v14, %v7817_v26  ;;  %v6397_v24 = vpop.permute.xlu0 %2653  ;;  %v6399_v31 = vpop.permute.xlu1 %2940  ;;  %3376 = vmatmul.mubr.bf16.vlgmr.msra.gmra.mrb[20].mxu1 %v6365_v58  ;;  %v6416_v14 = vsel %vm1022_vm5, %v6054_v52, %v6285_v35  ;;  %v2629_v30 = vmul.f32 %v6384_v61, %v7824_v43  ;;  %v7827_v9 = vld [vmem:[#allocation142_spill] sm:$0xff]  ;;  %v2628_v18 = vmul.f32 %v6393_v44, %v7828_v39  ;;  %v7829_v15 = vld [vmem:[#allocation99_spill] sm:$0xff]  ;;  %v7830_v52 = vld [vmem:[#allocation17_spill] sm:$0xff] }
 0x334   : > { %3304 = vmatprep.subr.bf16.mxu0 %v3191_v10  ;;  %v6408_v25 = vsel %vm859_vm0, %v6236_v33, %v6397_v24  ;;  %7823 = vst [vmem:[#allocation43_spill] sm:$0xff] %v6416_v14  ;;  %3430 = vmatpush1.bf16.msra.mxu1 %v3168_v16  ;;  %v7826_v10 = vld [vmem:[#allocation5_spill] sm:$0xff]  ;;  %v3205_v51 = vpack.c.bf16 %v2913_v17, %v2841_v57  ;;  %v7831_v16 = vld [vmem:[#allocation94_spill] sm:$0xff] }
 0x335   : > { %7821 = vst [vmem:[#allocation12_spill] sm:$0xff] %v6408_v25  ;;  %v2702_v6 = vmul.f32 %v6408_v25, %v7825_v1  ;;  %v3005_v33 = vmul.f32 %v7827_v9, %v7826_v10  ;;  %3911 = vmatprep.mubr.msk.bf16.mxu1 %vm531_vm1, %v7829_v15  ;;  %v2840_v41 = vmul.f32 %v2812_v62, %v7830_v52  ;;  %v7832_v44 = vld [vmem:[#allocation18_spill] sm:$0xff] }
 0x336   : > { %3018 = vrot.lane.b32.xlu0 %v6223_v42, %s4001_s8  ;;  %v2956_v61 = vsel %vm1514_vm8, %v7831_v16, %v7822_v46  ;;  %3305 = vmatpush1.bf16.msra.mxu0 %v3190_v32  ;;  %v2985_v1 = vmul.f32 %v2957_v27, %v7832_v44  ;;  %v3182_v58 = vpack.c.bf16 %v2701_v21, %v2628_v18  ;;  %v7835_v32 = vld [vmem:[#allocation141_spill] sm:$0xff]  ;;  %v7836_v16 = vld [vmem:[#allocation51_spill] sm:$0xff]  ;;  %v7837_v27 = vld [vmem:[#allocation20_spill] sm:$0xff] }
 0x337   : > { %v6434_v25 = vpop.permute.xlu0 %2726  ;;  %v6436_v9 = vpop.permute.xlu1 %2436  ;;  %v3183_v10 = vpack.c.bf16 %v2702_v6, %v2629_v30  ;;  %v2774_v57 = vmul.f32 %v6416_v14, %v7833_v53  ;;  %3306 = vmatprep.subr.bf16.mxu0 %v3205_v51  ;;  %v3204_v17 = vpack.c.bf16 %v2912_v20, %v2840_v41  ;;  %v3004_v46 = vmul.f32 %v7835_v32, %v7788_v19  ;;  %v7838_v30 = vld [vmem:[#allocation19_spill] sm:$0xff]  ;;  %v7839_v19 = vld [vmem:[#allocation80_spill] sm:$0xff]  ;;  %v7841_v32 = vld [vmem:[#allocation145_spill] sm:$0xff] }
 0x338   : > { %v6444_v62 = vsel %vm1022_vm5, %v6285_v35, %v6434_v25  ;;  %v3045_v18 = vmul.f32 %v7837_v27, %v7776_v49  ;;  %v3219_v21 = vpack.c.bf16 %v3005_v33, %v2985_v1  ;;  %v2984_v6 = vmul.f32 %v2956_v61, %v7838_v30  ;;  %v7840_v51 = vld [vmem:[#allocation4_spill] sm:$0xff]  ;;  %v7842_v14 = vld [vmem:[#allocation73_spill] sm:$0xff]  ;;  %v7843_v49 = vld [vmem:[#allocation146_spill] sm:$0xff] }
 0x339   : > { %7834 = vst [vmem:[#allocation136_spill] sm:$0xff] %v6444_v62  ;;  %v2775_v15 = vmul.f32 %v6444_v62, %v7836_v16  ;;  %3431 = vmatprep.subr.bf16.mxu1 %v3183_v10  ;;  %v3025_v10 = vmul.f32 %v7841_v32, %v7840_v51  ;;  %v3196_v62 = vpack.c.bf16 %v2774_v57, %v7842_v14  ;;  %v7850_v51 = vld [vmem:[#allocation53_spill] sm:$0xff] }
 0x33a   : > { %3058 = vrot.lane.b32.xlu0 %v6223_v42, %s4000_s30  ;;  %3432 = vmatpush1.bf16.msra.mxu1 %v3182_v58  ;;  %v3044_v27 = vmul.f32 %v7843_v49, %v7797_v38  ;;  %v3218_v1 = vpack.c.bf16 %v3004_v46, %v2984_v6  ;;  %v6468_v61 = vsel %vm1350_vm6, %v6118_v5, %v6355_v23  ;;  %v7845_v58 = vld [vmem:[#allocation26_spill] sm:$0xff]  ;;  %v7846_v38 = vld [vmem:[#allocation144_spill] sm:$0xff] }
 0x33b   : > { %3307 = vmatpush1.bf16.msra.mxu0 %v3204_v17  ;;  %v6455_v35 = vpop.permute.xlu0 %2798  ;;  %v6457_v41 = vpop.permute.xlu1 %2509  ;;  %v3197_v20 = vpack.c.bf16 %v2775_v15, %v7839_v19  ;;  %7844 = vst [vmem:[#allocation90_spill] sm:$0xff] %v6468_v61  ;;  %v3065_v33 = vmul.f32 %v7845_v58, %v7780_v48  ;;  %v3233_v57 = vpack.c.bf16 %v3045_v18, %v3025_v10  ;;  %v7848_v18 = vld [vmem:[#allocation25_spill] sm:$0xff]  ;;  %v7851_v10 = vld [vmem:[#allocation28_spill] sm:$0xff] }
 0x33c   : > { %3308 = vmatprep.subr.bf16.mxu0 %v3219_v21  ;;  %v6475_v15 = vsel %vm1186_vm7, %v6322_v54, %v6455_v35  ;;  %v3024_v17 = vmul.f32 %v7846_v38, %v7790_v45  ;;  %v6484_v5 = vsel %vm1186_vm7, %v6083_v4, %v6322_v54  ;;  %v7847_v21 = vld [vmem:[#allocation55_spill] sm:$0xff]  ;;  %v7849_v4 = vld [vmem:[#allocation56_spill] sm:$0xff]  ;;  %v3107_v49 = vmul.f32 %v7851_v10, %v7819_v12 }
 0x33d   : > { %3433 = vmatprep.subr.bf16.mxu1 %v3197_v20  ;;  %v2918_v6 = vmul.f32 %v6468_v61, %v7847_v21  ;;  %v3064_v20 = vmul.f32 %v7848_v18, %v7798_v59  ;;  %v2847_v54 = vmul.f32 %v6475_v15, %v7849_v4  ;;  %v7855_v12 = vld [vmem:[#allocation96_spill] sm:$0xff]  ;;  %v3106_v61 = vmul.f32 %v6102_v37, %v7830_v52 }
 0x33e   : > { %3099 = vrot.lane.b32.xlu0 %v7804_v28, %s4006_s13  ;;  %3434 = vmatpush1.bf16.msra.mxu1 %v3196_v62  ;;  %v3232_v45 = vpack.c.bf16 %v3044_v27, %v3024_v17  ;;  %v7854_v17 = vld [vmem:[#allocation21_spill] sm:$0xff]  ;;  %v6536_v37 = vsel %vm1514_vm8, %v6155_v11, %v6399_v31  ;;  %v3148_v11 = vmul.f32 %v6124_v8, %v7838_v30  ;;  %s3947_s13 = smul.u32 112, %s8002_s25 }
 0x33f   : > { %3309 = vmatpush1.bf16.msra.mxu0 %v3218_v1  ;;  %v6486_v48 = vpop.permute.xlu0 %2870  ;;  %v6488_v46 = vpop.permute.xlu1 %2582  ;;  %v7852_v1 = vld [vmem:[#allocation58_spill] sm:$0xff]  ;;  %v3086_v18 = vmul.f32 %v7854_v17, %v7799_v0  ;;  %v3246_v10 = vpack.c.bf16 %v7855_v12, %v3064_v20 }
 0x340   : > { %3310 = vmatprep.subr.bf16.mxu0 %v3233_v57  ;;  %v6495_v62 = vsel %vm1350_vm6, %v6355_v23, %v6486_v48  ;;  %v2846_v58 = vmul.f32 %v6484_v5, %v7852_v1  ;;  %v7853_v23 = vld [vmem:[#allocation11_spill] sm:$0xff]  ;;  %v7857_v20 = vld [vmem:[#allocation22_spill] sm:$0xff]  ;;  %s7125_s23 = scalar_lea.vmem %s7156_s6, %s3947_s13 }
 0x341   : > { %v2919_v32 = vmul.f32 %v6495_v62, %v7850_v51  ;;  %v3247_v27 = vpack.c.bf16 %v7853_v23, %v3065_v33  ;;  %v6522_v33 = vsel %vm367_vm2, %v6187_v63, %v6436_v9 }
 0x342   : > { %3141 = vrot.lane.b32.xlu0 %v7804_v28, %s4007_s14  ;;  %v3210_v42 = vpack.c.bf16 %v2918_v6, %v2846_v58  ;;  %v3261_v6 = vpack.c.bf16 %v3107_v49, %v3086_v18  ;;  %v3010_v49 = vmul.f32 %v6522_v33, %v7811_v50  ;;  %v7861_v50 = vld [vmem:[#allocation59_spill] sm:$0xff]  ;;  %v7884_v28 = vld [vmem:[#allocation41_spill] sm:$0xff] }
 0x343   : > { %3311 = vmatpush1.bf16.msra.mxu0 %v3232_v45  ;;  %v6510_v57 = vpop.permute.xlu0 %2942  ;;  %v6512_v59 = vpop.permute.xlu1 %2655  ;;  %v3211_v38 = vpack.c.bf16 %v2919_v32, %v2847_v54  ;;  %v7856_v45 = vld [vmem:[#allocation33_spill] sm:$0xff]  ;;  %v3085_v54 = vmul.f32 %v7857_v20, %v7775_v47  ;;  %v2990_v17 = vmul.f32 %v6536_v37, %v7861_v50 }
 0x344   : > { %3312 = vmatprep.subr.bf16.mxu0 %v3247_v27  ;;  %v3149_v23 = vmul.f32 %v7856_v45, %v7832_v44  ;;  %v6529_v0 = vsel %vm1514_vm8, %v6399_v31, %v6510_v57  ;;  %v7858_v44 = vld [vmem:[#allocation31_spill] sm:$0xff]  ;;  %v7859_v31 = vld [vmem:[#allocation60_spill] sm:$0xff] }
 0x345   : > { %3435 = vmatprep.subr.bf16.mxu1 %v3211_v38  ;;  %v3128_v32 = vmul.f32 %v7858_v44, %v7813_v40  ;;  %v3260_v47 = vpack.c.bf16 %v3106_v61, %v3085_v54  ;;  %v2991_v58 = vmul.f32 %v6529_v0, %v7859_v31  ;;  %v7860_v40 = vld [vmem:[#allocation105_spill] sm:$0xff]  ;;  %v7864_v45 = vld [vmem:[#allocation35_spill] sm:$0xff] }
 0x346   : > { %3436 = vmatpush1.bf16.msra.mxu1 %v3210_v42  ;;  %v2554_v38 = vmul.f32 %v6149_v34, %v7860_v40  ;;  %v3224_v34 = vpack.c.bf16 %v3010_v49, %v2990_v17  ;;  %v6588_v49 = vsel %vm531_vm1, %v6234_v36, %v6457_v41  ;;  %v7872_v36 = vld [vmem:[#allocation101_spill] sm:$0xff] }
 0x347   : > { %3313 = vmatpush1.bf16.msra.mxu0 %v3246_v10  ;;  %v6538_v63 = vpop.permute.xlu0 %2438  ;;  %v6540_v52 = vpop.permute.xlu1 %2728  ;;  %v3275_v18 = vpack.c.bf16 %v3149_v23, %v3128_v32  ;;  %v7863_v10 = vld [vmem:[#allocation109_spill] sm:$0xff]  ;;  %v6574_v23 = vsel %vm695_vm3, %v6353_v3, %v6488_v46  ;;  %v7868_v32 = vld [vmem:[#allocation108_spill] sm:$0xff] }
 0x348   : > { %3314 = vmatprep.subr.bf16.mxu0 %v3261_v6  ;;  %v6549_v42 = vsel %vm367_vm2, %v6436_v9, %v6538_v63  ;;  %v7862_v9 = vld [vmem:[#allocation30_spill] sm:$0xff]  ;;  %v2481_v6 = vmul.f32 %v7864_v45, %v7863_v10  ;;  %7866 = vst [vmem:[#allocation135_spill] sm:$0xff] %v6574_v23  ;;  %v3050_v17 = vmul.f32 %v6574_v23, %v7828_v39  ;;  %v7876_v45 = vld [vmem:[#allocation23_spill] sm:$0xff] }
 0x349   : > { %v3011_v27 = vmul.f32 %v6549_v42, %v7801_v56  ;;  %v3127_v12 = vmul.f32 %v7862_v9, %v7817_v26  ;;  %v7865_v56 = vld [vmem:[#allocation103_spill] sm:$0xff]  ;;  %v7867_v26 = vld [vmem:[#allocation102_spill] sm:$0xff]  ;;  %v7874_v9 = vld [vmem:[#allocation113_spill] sm:$0xff] }
 0x34a   : > { %v2553_v20 = vmul.f32 %v6178_v2, %v7865_v56  ;;  %v2700_v44 = vmul.f32 %v6169_v22, %v7867_v26  ;;  %v3167_v2 = vpack.c.bf16 %v2554_v38, %v2481_v6  ;;  %v7870_v22 = vld [vmem:[#allocation107_spill] sm:$0xff]  ;;  %v7877_v6 = vld [vmem:[#allocation106_spill] sm:$0xff] }
 0x34b   : > { %3315 = vmatpush1.bf16.msra.mxu0 %v3260_v47  ;;  %v6563_v61 = vpop.permute.xlu0 %2511  ;;  %v6565_v8 = vpop.permute.xlu1 %2800  ;;  %v3225_v30 = vpack.c.bf16 %v3011_v27, %v2991_v58  ;;  %v3274_v54 = vpack.c.bf16 %v3148_v11, %v3127_v12  ;;  %v2480_v47 = vmul.f32 %v6140_v13, %v7868_v32  ;;  %v2627_v13 = vmul.f32 %v6131_v55, %v7870_v22 }
 0x34c   : > { %3316 = vmatprep.subr.bf16.mxu0 %v3275_v18  ;;  %v6583_v58 = vsel %vm531_vm1, %v6457_v41, %v6563_v61  ;;  %v2699_v41 = vmul.f32 %v6196_v7, %v7872_v36  ;;  %v6608_v18 = vsel %vm859_vm0, %v6397_v24, %v6512_v59  ;;  %v2773_v12 = vmul.f32 %v6230_v60, %v7874_v9  ;;  %v7880_v60 = vld [vmem:[#allocation44_spill] sm:$0xff] }
 0x34d   : > { %3437 = vmatprep.subr.bf16.mxu1 %v3225_v30  ;;  %v3166_v27 = vpack.c.bf16 %v2553_v20, %v2480_v47  ;;  %7873 = vst [vmem:[#allocation13_spill] sm:$0xff] %v6608_v18  ;;  %v3031_v55 = vmul.f32 %v6583_v58, %v7796_v29  ;;  %v7875_v30 = vld [vmem:[#allocation45_spill] sm:$0xff]  ;;  %v3181_v7 = vpack.c.bf16 %v2700_v44, %v2627_v13  ;;  %v7878_v20 = vld [vmem:[#allocation34_spill] sm:$0xff]  ;;  %v7879_v47 = vld [vmem:[#allocation99_spill] sm:$0xff] }
 0x34e   : > { %3438 = vmatpush1.bf16.msra.mxu1 %v3224_v34  ;;  %v2626_v34 = vmul.f32 %v7878_v20, %v7877_v6  ;;  %v7882_v13 = vld [vmem:[#allocation112_spill] sm:$0xff] }
 0x34f   : > { %3317 = vmatpush1.bf16.msra.mxu0 %v3274_v54  ;;  %v6590_v3 = vpop.permute.xlu0 %2584  ;;  %v6592_v11 = vpop.permute.xlu1 %2872 }
 0x350   : > { %7869 = vst [vmem:[#allocation137_spill] sm:$0xff] %v6590_v3  ;;  %3386 = vmatprep.subr.bf16.mxu0 %v3167_v2  ;;  %v6601_v38 = vsel %vm695_vm3, %v6488_v46, %v6590_v3  ;;  %v3030_v46 = vmul.f32 %v6588_v49, %v7875_v30  ;;  %v3070_v2 = vmul.f32 %v6608_v18, %v7880_v60  ;;  %v7890_v3 = vld [vmem:[#allocation148_spill] sm:$0xff] }
 0x351   : > { %7871 = vst [vmem:[#allocation49_spill] sm:$0xff] %v6601_v38  ;;  %v3051_v39 = vmul.f32 %v6601_v38, %v7824_v43  ;;  %v3180_v20 = vpack.c.bf16 %v2699_v41, %v2626_v34  ;;  %v7889_v38 = vld [vmem:[#allocation116_spill] sm:$0xff] }
 0x352   : > { %3333 = vmatmul.mubr.bf16.vlgmr.msra.gmra.mrb[12].mxu0 %v7876_v45  ;;  %v3238_v43 = vpack.c.bf16 %v3050_v17, %v3030_v46  ;;  %v7887_v46 = vld [vmem:[#allocation62_spill] sm:$0xff]  ;;  %v7891_v41 = vld [vmem:[#allocation104_spill] sm:$0xff]  ;;  %v7894_v45 = vld [vmem:[#allocation97_spill] sm:$0xff] }
 0x353   : > { %3387 = vmatpush1.bf16.msra.mxu0 %v3166_v27  ;;  %v6621_v24 = vpop.permute.xlu0 %2657  ;;  %v6623_v54 = vpop.permute.xlu1 %2440  ;;  %v3239_v29 = vpack.c.bf16 %v3051_v39, %v3031_v55  ;;  %3910 = vmatprep.mubr.msk.bf16.mxu0 %vm531_vm1, %v7879_v47  ;;  %v7883_v27 = vld [vmem:[#allocation149_spill] sm:$0xff]  ;;  %v7885_v39 = vld [vmem:[#allocation111_spill] sm:$0xff]  ;;  %v3195_v23 = vpack.c.bf16 %v2773_v12, %v7887_v46  ;;  %v3252_v34 = vpack.c.bf16 %v7891_v41, %v3070_v2  ;;  %v7901_v46 = vld [vmem:[#allocation14_spill] sm:$0xff] }
 0x354   : > { %3388 = vmatprep.subr.bf16.mxu0 %v3181_v7  ;;  %v6632_v44 = vsel %vm859_vm0, %v6512_v59, %v6621_v24  ;;  %v2772_v30 = vmul.f32 %v7883_v27, %v7882_v13  ;;  %v7886_v47 = vld [vmem:[#allocation3_spill] sm:$0xff]  ;;  %v7888_v59 = vld [vmem:[#allocation132_spill] sm:$0xff]  ;;  %v2845_v27 = vmul.f32 %v7890_v3, %v7889_v38  ;;  %v6653_v12 = vsel %vm1186_vm7, %v6455_v35, %v6565_v8 }
 0x355   : > { %7881 = vst [vmem:[#allocation32_spill] sm:$0xff] %v6632_v44  ;;  %v3071_v55 = vmul.f32 %v6632_v44, %v7884_v28  ;;  %3439 = vmatprep.subr.bf16.mxu1 %v3239_v29  ;;  %v2917_v17 = vmul.f32 %v7886_v47, %v7885_v39  ;;  %v7892_v28 = vld [vmem:[#allocation63_spill] sm:$0xff]  ;;  %v7893_v44 = vld [vmem:[#allocation110_spill] sm:$0xff]  ;;  %7895 = vst [vmem:[#allocation95_spill] sm:$0xff] %v6653_v12 }
 0x356   : > { %3440 = vmatpush1.bf16.msra.mxu1 %v3238_v43  ;;  %v3194_v29 = vpack.c.bf16 %v2772_v30, %v7892_v28  ;;  %v2916_v47 = vmul.f32 %v7894_v45, %v7893_v44  ;;  %v7896_v43 = vld [vmem:[#allocation68_spill] sm:$0xff]  ;;  %v7897_v2 = vld [vmem:[#allocation115_spill] sm:$0xff]  ;;  %v6667_v45 = vsel %vm1022_vm5, %v6434_v25, %v6540_v52 }
 0x357   : > { %3389 = vmatpush1.bf16.msra.mxu0 %v3180_v20  ;;  %v6641_v7 = vpop.permute.xlu0 %2730  ;;  %v2945_v60 = vpop.permute.xlu1 %2944  ;;  %v3253_v18 = vpack.c.bf16 %v7888_v59, %v3071_v55  ;;  %v3009_v20 = vmul.f32 %v7896_v43, %v7863_v10  ;;  %v7898_v30 = vld [vmem:[#allocation147_spill] sm:$0xff]  ;;  %v7900_v10 = vld [vmem:[#allocation114_spill] sm:$0xff]  ;;  %v7902_v25 = vld [vmem:[#allocation140_spill] sm:$0xff] }
 0x358   : > { %3390 = vmatprep.subr.bf16.mxu0 %v3195_v23  ;;  %v6660_v3 = vsel %vm1022_vm5, %v6540_v52, %v6641_v7  ;;  %v3209_v23 = vpack.c.bf16 %v2917_v17, %v2845_v27  ;;  %v2844_v55 = vmul.f32 %v7898_v30, %v7897_v2  ;;  %v2989_v28 = vmul.f32 %v7901_v46, %v7900_v10  ;;  %v7903_v30 = vld [vmem:[#allocation9_spill] sm:$0xff] }
 0x359   : > { %3441 = vmatprep.subr.bf16.mxu1 %v3253_v18  ;;  %v3112_v17 = vmul.f32 %v6653_v12, %v7852_v1  ;;  %v3008_v52 = vmul.f32 %v7902_v25, %v7868_v32  ;;  %v3049_v46 = vmul.f32 %v7903_v30, %v7870_v22  ;;  %v3091_v1 = vmul.f32 %v6667_v45, %v7833_v53  ;;  %v7904_v12 = vld [vmem:[#allocation118_spill] sm:$0xff]  ;;  %v7908_v53 = vld [vmem:[#allocation12_spill] sm:$0xff] }
 0x35a   : > { %3442 = vmatpush1.bf16.msra.mxu1 %v3252_v34  ;;  %v3208_v34 = vpack.c.bf16 %v2916_v47, %v2844_v55  ;;  %v7907_v22 = vld [vmem:[#allocation6_spill] sm:$0xff] }
 0x35b   : > { %3391 = vmatpush1.bf16.msra.mxu0 %v3194_v29  ;;  %v6669_v35 = vpop.permute.xlu0 %2802  ;;  %v6671_v18 = vpop.permute.xlu1 %2513  ;;  %v3092_v29 = vmul.f32 %v6660_v3, %v7836_v16  ;;  %v7906_v16 = vld [vmem:[#allocation29_spill] sm:$0xff]  ;;  %v3048_v30 = vmul.f32 %v7907_v22, %v7877_v6  ;;  %v6714_v6 = vsel %vm1514_vm8, %v6510_v57, %v2945_v60 }
 0x35c   : > { %7899 = vst [vmem:[#allocation15_spill] sm:$0xff] %v6669_v35  ;;  %3392 = vmatprep.subr.bf16.mxu0 %v3209_v23  ;;  %v6680_v27 = vsel %vm1186_vm7, %v6565_v8, %v6669_v35  ;;  %v3223_v23 = vpack.c.bf16 %v3009_v20, %v2989_v28  ;;  %v7905_v8 = vld [vmem:[#allocation8_spill] sm:$0xff]  ;;  %v3029_v25 = vmul.f32 %v7906_v16, %v7860_v40 }
 0x35d   : > { %v3113_v43 = vmul.f32 %v6680_v27, %v7849_v4  ;;  %v2988_v35 = vmul.f32 %v7905_v8, %v7904_v12  ;;  %v3266_v4 = vpack.c.bf16 %v3112_v17, %v3091_v1  ;;  %v3069_v20 = vmul.f32 %v7908_v53, %v7867_v26  ;;  %v7910_v40 = vld [vmem:[#allocation40_spill] sm:$0xff] }
 0x35e   : > { %v3237_v28 = vpack.c.bf16 %v3049_v46, %v3029_v25  ;;  %v3068_v17 = vmul.f32 %v7910_v40, %v7872_v36  ;;  %v3111_v26 = vmul.f32 %v6475_v15, %v7889_v38  ;;  %v6727_v36 = vsel %vm1350_vm6, %v6486_v48, %v6592_v11  ;;  %v7911_v46 = vld [vmem:[#allocation136_spill] sm:$0xff] }
 0x35f   : > { %3393 = vmatpush1.bf16.msra.mxu0 %v3208_v34  ;;  %v6694_v47 = vpop.permute.xlu0 %2874  ;;  %v6696_v32 = vpop.permute.xlu1 %2586  ;;  %v3267_v55 = vpack.c.bf16 %v3113_v43, %v3092_v29  ;;  %v3222_v41 = vpack.c.bf16 %v3008_v52, %v2988_v35  ;;  %v7909_v34 = vld [vmem:[#allocation7_spill] sm:$0xff]  ;;  %v3090_v15 = vmul.f32 %v7911_v46, %v7874_v9  ;;  %v3154_v38 = vmul.f32 %v6714_v6, %v7861_v50  ;;  %v7919_v40 = vld [vmem:[#allocation120_spill] sm:$0xff] }
 0x360   : > { %3394 = vmatprep.subr.bf16.mxu0 %v3223_v23  ;;  %v3028_v8 = vmul.f32 %v7909_v34, %v7865_v56  ;;  %v6721_v56 = vsel %vm1350_vm6, %v6592_v11, %v6694_v47  ;;  %v3250_v57 = vpack.c.bf16 %v7842_v14, %v3068_v17  ;;  %v3110_v48 = vmul.f32 %v6484_v5, %v7897_v2  ;;  %v7918_v34 = vld [vmem:[#allocation90_spill] sm:$0xff]  ;;  %v7921_v46 = vld [vmem:[#allocation24_spill] sm:$0xff] }
 0x361   : > { %3443 = vmatprep.subr.bf16.mxu1 %v3267_v55  ;;  %v6747_v14 = vsel %vm531_vm1, %v6563_v61, %v6671_v18  ;;  %v3134_v11 = vmul.f32 %v6721_v56, %v7850_v51  ;;  %v3153_v9 = vmul.f32 %v6529_v0, %v7900_v10  ;;  %v3265_v2 = vpack.c.bf16 %v3111_v26, %v3090_v15  ;;  %v7912_v61 = vld [vmem:[#allocation43_spill] sm:$0xff] }
 0x362   : > { %3444 = vmatpush1.bf16.msra.mxu1 %v3266_v4  ;;  %v3236_v52 = vpack.c.bf16 %v3048_v30, %v3028_v8  ;;  %v3089_v23 = vmul.f32 %v7912_v61, %v7882_v13  ;;  %v6767_v51 = vsel %vm367_vm2, %v6538_v63, %v6623_v54  ;;  %v7913_v55 = vld [vmem:[#allocation71_spill] sm:$0xff]  ;;  %v7914_v4 = vld [vmem:[#allocation69_spill] sm:$0xff]  ;;  %v3131_v8 = vmul.f32 %v7918_v34, %v7893_v44 }
 0x363   : > { %3395 = vmatpush1.bf16.msra.mxu0 %v3222_v41  ;;  %v6706_v29 = vpop.permute.xlu0 %2442  ;;  %v6710_v35 = vpop.permute.xlu1 %2659  ;;  %v3251_v41 = vpack.c.bf16 %v7839_v19, %v3069_v20  ;;  %v2559_v16 = vmul.f32 %v6747_v14, %v7913_v55  ;;  %v7916_v30 = vld [vmem:[#allocation121_spill] sm:$0xff]  ;;  %v7917_v20 = vld [vmem:[#allocation75_spill] sm:$0xff]  ;;  %v2557_v17 = vmul.f32 %v6588_v49, %v7919_v40  ;;  %v2484_v15 = vmul.f32 %v6522_v33, %v7921_v46 }
 0x364   : > { %3396 = vmatprep.subr.bf16.mxu0 %v3237_v28  ;;  %v6760_v5 = vsel %vm367_vm2, %v6623_v54, %v6706_v29  ;;  %v3264_v63 = vpack.c.bf16 %v3110_v48, %v3089_v23  ;;  %v3152_v54 = vmul.f32 %v6536_v37, %v7904_v12  ;;  %v2558_v53 = vmul.f32 %v6583_v58, %v7916_v30  ;;  %v7923_v49 = vld [vmem:[#allocation119_spill] sm:$0xff]  ;;  %v7924_v48 = vld [vmem:[#allocation32_spill] sm:$0xff]  ;;  %v7928_v23 = vld [vmem:[#allocation49_spill] sm:$0xff] }
 0x365   : > { %v2487_v22 = vmul.f32 %v6760_v5, %v7914_v4  ;;  %v6807_v44 = vsel %vm859_vm0, %v6621_v24, %v6710_v35  ;;  %v6820_v33 = vld [vmem:[%s7154_s4 + $0x4] ss:$8 sps:$4 sm:$0xff]   ;;  %v7926_v24 = vld [vmem:[#allocation137_spill] sm:$0xff] }
 0x366   : > { %7925 = vst [vmem:[#allocation16_spill] sm:$0xff] %v6820_v33  ;;  %v7927_v61 = vld [vmem:[#allocation123_spill] sm:$0xff] }
 0x367   : > { %3397 = vmatpush1.bf16.msra.mxu0 %v3236_v52  ;;  %v6729_v43 = vpop.permute.xlu0 %2946  ;;  %v6740_v1 = vpop.permute.xlu1 %2732  ;;  %v7920_v52 = vld [vmem:[#allocation124_spill] sm:$0xff] }
 0x368   : > { %3398 = vmatprep.subr.bf16.mxu0 %v3251_v41  ;;  %v6738_v19 = vsel %vm1514_vm8, %v2945_v60, %v6729_v43  ;;  %v3133_v60 = vmul.f32 %v6727_v36, %v7847_v21  ;;  %v3132_v21 = vmul.f32 %v6495_v62, %v7885_v39  ;;  %v7915_v62 = vld [vmem:[#allocation66_spill] sm:$0xff]  ;;  %v2485_v26 = vmul.f32 %v6549_v42, %v7920_v52 }
 0x369   : > { %v3155_v50 = vmul.f32 %v6738_v19, %v7859_v31 }
 0x36a   : > { %v3280_v10 = vpack.c.bf16 %v3154_v38, %v3133_v60  ;;  %v3279_v28 = vpack.c.bf16 %v3153_v9, %v3132_v21  ;;  %v7922_v38 = vld [vmem:[#allocation23_spill] sm:$0xff]  ;;  %v6827_v9 = vsel %vm695_vm3, %v7926_v24, %v6696_v32  ;;  %v7929_v21 = vld [vmem:[#allocation70_spill] sm:$0xff]  ;;  %v7939_v24 = vld [vmem:[#allocation84_spill] sm:$0xff] }
 0x36b   : > { %3399 = vmatpush1.bf16.msra.mxu0 %v3250_v57  ;;  %v6769_v31 = vpop.permute.xlu0 %2515  ;;  %v3281_v0 = vpack.c.bf16 %v3155_v50, %v3134_v11  ;;  %v6780_v25 = vpop.permute.xlu1 %2804  ;;  %v3278_v57 = vpack.c.bf16 %v3152_v54, %v3131_v8  ;;  %v2704_v11 = vmul.f32 %v7924_v48, %v7923_v49  ;;  %v3171_v50 = vpack.c.bf16 %v2558_v53, %v2485_v26  ;;  %v7931_v54 = vld [vmem:[#allocation13_spill] sm:$0xff]  ;;  %v7932_v53 = vld [vmem:[#allocation72_spill] sm:$0xff] }
 0x36c   : > { %3400 = vmatprep.subr.bf16.mxu0 %v3265_v2  ;;  %v6778_v13 = vsel %vm531_vm1, %v6671_v18, %v6769_v31  ;;  %v2486_v18 = vmul.f32 %v6767_v51, %v7917_v20  ;;  %v3170_v2 = vpack.c.bf16 %v2557_v17, %v2484_v15  ;;  %v7934_v8 = vld [vmem:[#allocation128_spill] sm:$0xff] }
 0x36d   : > { %v2560_v39 = vmul.f32 %v6778_v13, %v7915_v62  ;;  %3445 = vmatprep.subr.bf16.mxu1 %v3281_v0  ;;  %v2631_v0 = vmul.f32 %v7928_v23, %v7927_v61 }
 0x36e   : > { %3446 = vmatpush1.bf16.msra.mxu1 %v3280_v10  ;;  %v3172_v41 = vpack.c.bf16 %v2559_v16, %v2486_v18  ;;  %v2705_v10 = vmul.f32 %v6807_v44, %v7929_v21  ;;  %v7958_v21 = vld [vmem:[#allocation89_spill] sm:$0xff] }
 0x36f   : > { %3401 = vmatpush1.bf16.msra.mxu0 %v3264_v63  ;;  %v6794_v37 = vpop.permute.xlu0 %2588  ;;  %v3173_v12 = vpack.c.bf16 %v2560_v39, %v2487_v22  ;;  %v6800_v58 = vpop.permute.xlu1 %2876  ;;  %v6847_v39 = vsel %vm1022_vm5, %v6641_v7, %v6740_v1  ;;  %v3185_v26 = vpack.c.bf16 %v2704_v11, %v2631_v0 }
 0x370   : > { %3402 = vmatprep.subr.bf16.mxu0 %v3279_v28  ;;  %v6815_v42 = vsel %vm695_vm3, %v6696_v32, %v6794_v37  ;;  %v7930_v32 = vld [vmem:[#allocation117_spill] sm:$0xff]  ;;  %v7933_v28 = vld [vmem:[#allocation67_spill] sm:$0xff] }
 0x371   : > { %3515 = vmatprep.subr.bf16.mxu1 %v3173_v12  ;;  %3462 = vmatmul.mubr.bf16.vlgmr.msra.gmra.mrb[24].mxu1 %v7922_v38  ;;  %v2703_v22 = vmul.f32 %v7931_v54, %v7930_v32  ;;  %v2633_v18 = vmul.f32 %v6815_v42, %v7932_v53  ;;  %v7935_v12 = vld [vmem:[#allocation74_spill] sm:$0xff] }
 0x372   : > { %3516 = vmatpush1.bf16.msra.mxu1 %v3172_v41  ;;  %3913 = vmatprep.mubr.msk.bf16.mxu1 %vm531_vm1, %v6820_v33  ;;  %v2632_v17 = vmul.f32 %v6827_v9, %v7935_v12  ;;  %v7936_v41 = vld [vmem:[#allocation122_spill] sm:$0xff] }
 0x373   : > { %3403 = vmatpush1.bf16.msra.mxu0 %v3278_v57  ;;  %v6829_v60 = vpop.permute.xlu0 %2661  ;;  %v6840_v63 = vpop.permute.xlu1 %2948  ;;  %v7937_v57 = vld [vmem:[#allocation135_spill] sm:$0xff] }
 0x374   : > { %3472 = vmatprep.subr.bf16.mxu0 %v3171_v50  ;;  %v6838_v16 = vsel %vm859_vm0, %v6710_v35, %v6829_v60  ;;  %v2777_v35 = vmul.f32 %v6660_v3, %v7934_v8  ;;  %v2630_v15 = vmul.f32 %v7937_v57, %v7936_v41  ;;  %v3186_v50 = vpack.c.bf16 %v2705_v10, %v2632_v17  ;;  %v7942_v10 = vld [vmem:[#allocation126_spill] sm:$0xff] }
 0x375   : > { %v2706_v34 = vmul.f32 %v6838_v16, %v7933_v28  ;;  %v2778_v3 = vmul.f32 %v6847_v39, %v7939_v24  ;;  %v2921_v17 = vmul.f32 %v6721_v56, %v7942_v10 }
 0x376   : > { %3419 = vmatmul.mubr.bf16.vlgmr.msra.gmra.mrb[16].mxu0 %v7922_v38  ;;  %v3184_v0 = vpack.c.bf16 %v2703_v22, %v2630_v15  ;;  %v7946_v15 = vld [vmem:[#allocation134_spill] sm:$0xff] }
 0x377   : > { %3473 = vmatpush1.bf16.msra.mxu0 %v3170_v2  ;;  %v6860_v7 = vpop.permute.xlu0 %2734  ;;  %v3187_v48 = vpack.c.bf16 %v2706_v34, %v2633_v18  ;;  %3912 = vmatprep.mubr.msk.bf16.mxu0 %vm531_vm1, %v6820_v33  ;;  %v6871_v11 = vpop.permute.xlu1 %2444  ;;  %v7940_v2 = vld [vmem:[#allocation127_spill] sm:$0xff] }
 0x378   : > { %7938 = vst [vmem:[#allocation138_spill] sm:$0xff] %v6860_v7  ;;  %3474 = vmatprep.subr.bf16.mxu0 %v3185_v26  ;;  %v6869_v23 = vsel %vm1022_vm5, %v6740_v1, %v6860_v7  ;;  %v2776_v54 = vmul.f32 %v6667_v45, %v7940_v2  ;;  %v7941_v18 = vld [vmem:[#allocation79_spill] sm:$0xff]  ;;  %v3199_v26 = vpack.c.bf16 %v2777_v35, %v7888_v59  ;;  %v7948_v7 = vld [vmem:[#allocation125_spill] sm:$0xff]  ;;  %v7949_v35 = vld [vmem:[#allocation130_spill] sm:$0xff] }
 0x379   : > { %v2779_v34 = vmul.f32 %v6869_v23, %v7941_v18  ;;  %3517 = vmatprep.subr.bf16.mxu1 %v3187_v48  ;;  %v7944_v1 = vld [vmem:[#allocation139_spill] sm:$0xff]  ;;  %v3200_v45 = vpack.c.bf16 %v2778_v3, %v7946_v15  ;;  %v7947_v48 = vld [vmem:[#allocation104_spill] sm:$0xff]  ;;  %v2920_v56 = vmul.f32 %v6727_v36, %v7948_v7  ;;  %v6894_v59 = vsel %vm1350_vm6, %v6694_v47, %v6800_v58 }
 0x37a   : > { %3518 = vmatpush1.bf16.msra.mxu1 %v3186_v50  ;;  %v7945_v33 = vld [vmem:[#allocation131_spill] sm:$0xff]  ;;  %v3198_v18 = vpack.c.bf16 %v2776_v54, %v7947_v48  ;;  %v2993_v50 = vmul.f32 %v6738_v19, %v7949_v35  ;;  %v7954_v19 = vld [vmem:[#allocation86_spill] sm:$0xff] }
 0x37b   : > { %3475 = vmatpush1.bf16.msra.mxu0 %v3184_v0  ;;  %v6880_v57 = vpop.permute.xlu0 %2806  ;;  %v3201_v24 = vpack.c.bf16 %v2779_v34, %v7944_v1  ;;  %v2849_v22 = vmul.f32 %v6680_v27, %v7945_v33  ;;  %v6886_v38 = vpop.permute.xlu1 %2517  ;;  %v7950_v0 = vld [vmem:[#allocation82_spill] sm:$0xff]  ;;  %v7951_v54 = vld [vmem:[#allocation95_spill] sm:$0xff]  ;;  %v2922_v48 = vmul.f32 %v6894_v59, %v7954_v19  ;;  %v3012_v19 = vmul.f32 %v6767_v51, %v7921_v46 }
 0x37c   : > { %7943 = vst [vmem:[#allocation46_spill] sm:$0xff] %v6880_v57  ;;  %3476 = vmatprep.subr.bf16.mxu0 %v3199_v26  ;;  %v2823_v27 = vsel %vm1186_vm7, %v6780_v25, %v6880_v57  ;;  %v2848_v34 = vmul.f32 %v7951_v54, %v7950_v0  ;;  %v7952_v36 = vld [vmem:[#allocation15_spill] sm:$0xff]  ;;  %v7955_v54 = vld [vmem:[#allocation129_spill] sm:$0xff]  ;;  %v6939_v51 = vsel %vm367_vm2, %v6706_v29, %v6871_v11 }
 0x37d   : > { %3519 = vmatprep.subr.bf16.mxu1 %v3201_v24  ;;  %v3213_v3 = vpack.c.bf16 %v2921_v17, %v2849_v22  ;;  %v2822_v26 = vsel %vm1186_vm7, %v7952_v36, %v6780_v25  ;;  %v3013_v24 = vmul.f32 %v6760_v5, %v7920_v52  ;;  %v2992_v25 = vmul.f32 %v6714_v6, %v7955_v54  ;;  %v7957_v57 = vld [vmem:[#allocation81_spill] sm:$0xff] }
 0x37e   : > { %3520 = vmatpush1.bf16.msra.mxu1 %v3200_v45  ;;  %v3212_v45 = vpack.c.bf16 %v2920_v56, %v2848_v34  ;;  %v2850_v5 = vmul.f32 %v2822_v26, %v7958_v21  ;;  %v3053_v52 = vmul.f32 %v6815_v42, %v7927_v61  ;;  %v3033_v6 = vmul.f32 %v6778_v13, %v7916_v30 }
 0x37f   : > { %3477 = vmatpush1.bf16.msra.mxu0 %v3198_v18  ;;  %v6906_v47 = vpop.permute.xlu0 %2878  ;;  %v6915_v22 = vpop.permute.xlu1 %2590  ;;  %v7956_v18 = vld [vmem:[#allocation87_spill] sm:$0xff]  ;;  %v3073_v42 = vmul.f32 %v6838_v16, %v7923_v49  ;;  %v3032_v13 = vmul.f32 %v6747_v14, %v7919_v40  ;;  %v3072_v29 = vmul.f32 %v6807_v44, %v7930_v32  ;;  %v3014_v16 = vmul.f32 %v6939_v51, %v7917_v20 }
 0x380   : > { %7953 = vst [vmem:[#allocation5_spill] sm:$0xff] %v6906_v47  ;;  %3478 = vmatprep.subr.bf16.mxu0 %v3213_v3  ;;  %v2895_v17 = vsel %vm1350_vm6, %v6800_v58, %v6906_v47  ;;  %v2851_v36 = vmul.f32 %v2823_v27, %v7956_v18  ;;  %v3227_v3 = vpack.c.bf16 %v3013_v24, %v2993_v50  ;;  %v7960_v50 = vld [vmem:[#allocation92_spill] sm:$0xff] }
 0x381   : > { %v2923_v28 = vmul.f32 %v2895_v17, %v7957_v57  ;;  %v3214_v34 = vpack.c.bf16 %v2922_v48, %v2850_v5  ;;  %v3226_v57 = vpack.c.bf16 %v3012_v19, %v2992_v25  ;;  %v3052_v47 = vmul.f32 %v6827_v9, %v7936_v41  ;;  %v7959_v41 = vld [vmem:[#allocation93_spill] sm:$0xff] }
 0x382   : > { %v3241_v46 = vpack.c.bf16 %v3053_v52, %v3033_v6  ;;  %v2966_v9 = vsel %vm1514_vm8, %v6729_v43, %v6840_v63  ;;  %v3114_v44 = vmul.f32 %v2822_v26, %v7950_v0  ;;  %v3094_v20 = vmul.f32 %v6869_v23, %v7934_v8 }
 0x383   : > { %3479 = vmatpush1.bf16.msra.mxu0 %v3212_v45  ;;  %v6926_v58 = vpop.permute.xlu0 %2950  ;;  %v3215_v56 = vpack.c.bf16 %v2923_v28, %v2851_v36  ;;  %v6930_v18 = vpop.permute.xlu1 %2663  ;;  %v3240_v61 = vpack.c.bf16 %v3052_v47, %v3032_v13  ;;  %v3115_v28 = vmul.f32 %v2823_v27, %v7945_v33  ;;  %v2994_v47 = vmul.f32 %v2966_v9, %v7960_v50 }
 0x384   : > { %3480 = vmatprep.subr.bf16.mxu0 %v3227_v3  ;;  %v2967_v30 = vsel %vm1514_vm8, %v6840_v63, %v6926_v58  ;;  %v3254_v33 = vpack.c.bf16 %v7946_v15, %v3072_v29  ;;  %v3156_v26 = vmul.f32 %v2966_v9, %v7955_v54  ;;  %v2678_v48 = vsel %vm859_vm0, %v6829_v60, %v6930_v18  ;;  %v7968_v9 = vld [vmem:[#allocation76_spill] sm:$0xff] }
 0x385   : > { %3521 = vmatprep.subr.bf16.mxu1 %v3215_v56  ;;  %v2995_v43 = vmul.f32 %v2967_v30, %v7959_v41  ;;  %v3228_v27 = vpack.c.bf16 %v3014_v16, %v2994_v47  ;;  %v3157_v0 = vmul.f32 %v2967_v30, %v7949_v35  ;;  %v3269_v8 = vpack.c.bf16 %v3115_v28, %v3094_v20  ;;  %v7964_v56 = vld [vmem:[#allocation70_spill] sm:$0xff]  ;;  %v7972_v20 = vld [vmem:[#allocation143_spill] sm:$0xff] }
 0x386   : > { %3522 = vmatpush1.bf16.msra.mxu1 %v3214_v34  ;;  %v3135_v35 = vmul.f32 %v6894_v59, %v7948_v7  ;;  %v7962_v59 = vld [vmem:[#allocation42_spill] sm:$0xff]  ;;  %v3074_v6 = vmul.f32 %v2678_v48, %v7964_v56  ;;  %v7983_v56 = vld [vmem:[#allocation77_spill] sm:$0xff] }
 0x387   : > { %3481 = vmatpush1.bf16.msra.mxu0 %v3226_v57  ;;  %v6949_v49 = vpop.permute.xlu0 %2446  ;;  %v6958_v40 = vpop.permute.xlu1 %2736  ;;  %v3255_v57 = vpack.c.bf16 %v7944_v1, %v3073_v42  ;;  %v2605_v1 = vsel %vm695_vm3, %v6794_v37, %v6915_v22  ;;  %v7971_v47 = vld [vmem:[#allocation138_spill] sm:$0xff] }
 0x388   : > { %3482 = vmatprep.subr.bf16.mxu0 %v3241_v46  ;;  %v2460_v14 = vsel %vm367_vm2, %v6871_v11, %v6949_v49  ;;  %v3054_v19 = vmul.f32 %v2605_v1, %v7935_v12  ;;  %v3282_v12 = vpack.c.bf16 %v3156_v26, %v3135_v35  ;;  %v7967_v46 = vld [vmem:[#allocation67_spill] sm:$0xff] }
 0x389   : > { %v3015_v63 = vmul.f32 %v2460_v14, %v7914_v4  ;;  %v3093_v4 = vmul.f32 %v6847_v39, %v7940_v2  ;;  %v2532_v39 = vsel %vm531_vm1, %v6769_v31, %v6886_v38  ;;  %v3136_v2 = vmul.f32 %v2895_v17, %v7942_v10  ;;  %v7961_v31 = vld [vmem:[#allocation38_spill] sm:$0xff]  ;;  %v7977_v26 = vld [vmem:[#allocation83_spill] sm:$0xff] }
 0x38a   : > { %v3034_v7 = vmul.f32 %v2532_v39, %v7913_v55  ;;  %v2489_v36 = vmul.f32 %v2460_v14, %v7962_v59  ;;  %v7966_v55 = vld [vmem:[#allocation39_spill] sm:$0xff] }
 0x38b   : > { %3483 = vmatpush1.bf16.msra.mxu0 %v3240_v61  ;;  %v6968_v32 = vpop.permute.xlu0 %2519  ;;  %v3229_v11 = vpack.c.bf16 %v3015_v63, %v2995_v43  ;;  %v6971_v24 = vpop.permute.xlu1 %2808  ;;  %v3268_v15 = vpack.c.bf16 %v3114_v44, %v3093_v4  ;;  %v3283_v25 = vpack.c.bf16 %v3157_v0, %v3136_v2  ;;  %v2488_v61 = vmul.f32 %v6939_v51, %v7968_v9  ;;  %v7969_v14 = vld [vmem:[#allocation27_spill] sm:$0xff]  ;;  %v7970_v63 = vld [vmem:[#allocation2_spill] sm:$0xff] }
 0x38c   : > { %3484 = vmatprep.subr.bf16.mxu0 %v3255_v57  ;;  %v2533_v23 = vsel %vm531_vm1, %v6886_v38, %v6968_v32  ;;  %v3242_v3 = vpack.c.bf16 %v3054_v19, %v3034_v7  ;;  %v2707_v57 = vmul.f32 %v2678_v48, %v7970_v63  ;;  %v2752_v44 = vsel %vm1022_vm5, %v7971_v47, %v6958_v40  ;;  %v7974_v4 = vld [vmem:[#allocation50_spill] sm:$0xff]  ;;  %v7981_v7 = vld [vmem:[#allocation87_spill] sm:$0xff] }
 0x38d   : > { %3523 = vmatprep.subr.bf16.mxu1 %v3229_v11  ;;  %v2562_v38 = vmul.f32 %v2533_v23, %v7961_v31  ;;  %v3035_v10 = vmul.f32 %v2533_v23, %v7915_v62  ;;  %v3256_v11 = vpack.c.bf16 %v7972_v20, %v3074_v6  ;;  %v7976_v23 = vld [vmem:[#allocation65_spill] sm:$0xff] }
 0x38e   : > { %3524 = vmatpush1.bf16.msra.mxu1 %v3228_v27 }
 0x38f   : > { %3485 = vmatpush1.bf16.msra.mxu0 %v3254_v33  ;;  %v6987_v37 = vpop.permute.xlu0 %2592  ;;  %v6998_v54 = vpop.permute.xlu1 %2880  ;;  %v3175_v30 = vpack.c.bf16 %v2562_v38, %v2489_v36  ;;  %v7973_v33 = vld [vmem:[#allocation46_spill] sm:$0xff]  ;;  %v7978_v38 = vld [vmem:[#allocation16_spill] sm:$0xff] }
 0x390   : > { %3486 = vmatprep.subr.bf16.mxu0 %v3269_v8  ;;  %v2606_v45 = vsel %vm695_vm3, %v6915_v22, %v6987_v37  ;;  %v7963_v22 = vld [vmem:[#allocation64_spill] sm:$0xff]  ;;  %v2824_v27 = vsel %vm1186_vm7, %v7973_v33, %v6971_v24  ;;  %v7975_v8 = vld [vmem:[#allocation23_spill] sm:$0xff] }
 0x391   : > { %v3055_v17 = vmul.f32 %v2606_v45, %v7932_v53  ;;  %v2561_v52 = vmul.f32 %v2532_v39, %v7963_v22  ;;  %v7965_v53 = vld [vmem:[#allocation47_spill] sm:$0xff]  ;;  %v2780_v39 = vmul.f32 %v2752_v44, %v7977_v26  ;;  %v3116_v19 = vmul.f32 %v2824_v27, %v7958_v21  ;;  %v7982_v36 = vld [vmem:[#allocation84_spill] sm:$0xff] }
 0x392   : > { %v2635_v34 = vmul.f32 %v2606_v45, %v7965_v53 }
 0x393   : > { %3487 = vmatpush1.bf16.msra.mxu0 %v3268_v15  ;;  %v7005_v60 = vpop.permute.xlu0 %2665  ;;  %v3243_v5 = vpack.c.bf16 %v3055_v17, %v3035_v10  ;;  %v2953_v29 = vpop.permute.xlu1 %2952  ;;  %v3174_v43 = vpack.c.bf16 %v2561_v52, %v2488_v61  ;;  %v2634_v15 = vmul.f32 %v2605_v1, %v7976_v23  ;;  %v7979_v1 = vld [vmem:[#allocation5_spill] sm:$0xff]  ;;  %v7980_v17 = vld [vmem:[#allocation79_spill] sm:$0xff]  ;;  %v3202_v21 = vpack.c.bf16 %v2780_v39, %v7972_v20 }
 0x394   : > { %3488 = vmatprep.subr.bf16.mxu0 %v3283_v25  ;;  %v2679_v62 = vsel %vm859_vm0, %v6930_v18, %v7005_v60  ;;  %v2896_v10 = vsel %vm1350_vm6, %v7979_v1, %v6998_v54 }
 0x395   : > { %v2708_v42 = vmul.f32 %v2679_v62, %v7966_v55  ;;  %v3075_v13 = vmul.f32 %v2679_v62, %v7967_v46  ;;  %3525 = vmatprep.subr.bf16.mxu1 %v3243_v5  ;;  %v3188_v35 = vpack.c.bf16 %v2707_v57, %v2634_v15  ;;  %v3095_v5 = vmul.f32 %v2752_v44, %v7982_v36  ;;  %v7984_v46 = vld [vmem:[#allocation37_spill] sm:$0xff] }
 0x396   : > { %3526 = vmatpush1.bf16.msra.mxu1 %v3242_v3  ;;  %v2924_v6 = vmul.f32 %v2896_v10, %v7983_v56  ;;  %v2968_v62 = vsel %vm1514_vm8, %v6926_v58, %v2953_v29  ;;  %v7988_v58 = vld [vmem:[#allocation86_spill] sm:$0xff]  ;;  %v7990_v15 = vld [vmem:[#allocation61_spill] sm:$0xff] }
 0x397   : > { %3489 = vmatpush1.bf16.msra.mxu0 %v3282_v12  ;;  %v7017_v16 = vpop.permute.xlu0 %2738  ;;  %v3257_v28 = vpack.c.bf16 %v7969_v14, %v3075_v13  ;;  %v3189_v18 = vpack.c.bf16 %v2708_v42, %v2635_v34  ;;  %v2999_v48 = vpop.permute.xlu1 %2998  ;;  %v3270_v3 = vpack.c.bf16 %v3116_v19, %v3095_v5  ;;  %v3137_v47 = vmul.f32 %v2896_v10, %v7988_v58  ;;  %v7992_v19 = vld [vmem:[#allocation36_spill] sm:$0xff]  ;;  %v7993_v10 = vld [vmem:[#allocation133_spill] sm:$0xff] }
 0x398   : > { %3558 = vmatprep.subr.bf16.mxu0 %v3175_v30  ;;  %v2753_v51 = vsel %vm1022_vm5, %v6958_v40, %v7017_v16  ;;  %v3000_v42 = vsel %vm367_vm2, %v6949_v49, %v2999_v48  ;;  %v3001_v13 = vsel %vm367_vm2, %v2999_v48, %v7984_v46  ;;  %v7985_v30 = vld [vmem:[#allocation91_spill] sm:$0xff] }
 0x399   : > { %v2781_v0 = vmul.f32 %v2753_v51, %v7974_v4  ;;  %3527 = vmatprep.subr.bf16.mxu1 %v3257_v28  ;;  %v3096_v25 = vmul.f32 %v2753_v51, %v7980_v17  ;;  %v3016_v20 = vmul.f32 %v3000_v42, %v7968_v9 }
 0x39a   : > { %3505 = vmatmul.mubr.bf16.vlgmr.msra.gmra.mrb[20].mxu0 %v7975_v8  ;;  %3528 = vmatpush1.bf16.msra.mxu1 %v3256_v11  ;;  %v3017_v11 = vmul.f32 %v3001_v13, %v7962_v59 }
 0x39b   : > { %3559 = vmatpush1.bf16.msra.mxu0 %v3174_v43  ;;  %v7035_v2 = vpop.permute.xlu0 %2810  ;;  %v3203_v40 = vpack.c.bf16 %v2781_v0, %v7969_v14  ;;  %3914 = vmatprep.mubr.msk.bf16.mxu0 %vm531_vm1, %v7978_v38  ;;  %v7986_v14 = vld [vmem:[#allocation52_spill] sm:$0xff]  ;;  %v3039_v57 = vpop.permute.xlu1 %3038 }
 0x39c   : > { %3560 = vmatprep.subr.bf16.mxu0 %v3189_v18  ;;  %v2825_v45 = vsel %vm1186_vm7, %v6971_v24, %v7035_v2  ;;  %v7987_v18 = vld [vmem:[#allocation57_spill] sm:$0xff]  ;;  %v3040_v0 = vsel %vm695_vm3, %v6987_v37, %v3039_v57  ;;  %v3041_v48 = vsel %vm695_vm3, %v3039_v57, %v7992_v19 }
 0x39d   : > { %v3117_v12 = vmul.f32 %v2825_v45, %v7981_v7  ;;  %v2853_v61 = vmul.f32 %v2825_v45, %v7985_v30  ;;  %v2852_v43 = vmul.f32 %v2824_v27, %v7987_v18  ;;  %v7989_v27 = vld [vmem:[#allocation81_spill] sm:$0xff]  ;;  %v3056_v37 = vmul.f32 %v3040_v0, %v7976_v23 }
 0x39e   : > { %v3057_v17 = vmul.f32 %v3041_v48, %v7965_v53 }
 0x39f   : > { %3561 = vmatpush1.bf16.msra.mxu0 %v3188_v35  ;;  %v3271_v24 = vpack.c.bf16 %v3117_v12, %v3096_v25  ;;  %v3216_v49 = vpack.c.bf16 %v2924_v6, %v2852_v43  ;;  %v7995_v6 = vld [vmem:[#allocation100_spill] sm:$0xff] }
 0x3a0   : > { %3562 = vmatprep.subr.bf16.mxu0 %v3203_v40  ;;  %v7051_v52 = vpop.permute.xlu0 %2882  ;;  %v3079_v25 = vpop.permute.xlu1 %3078 }
 0x3a1   : > { %v2897_v34 = vsel %vm1350_vm6, %v6998_v54, %v7051_v52  ;;  %3529 = vmatprep.subr.bf16.mxu1 %v3271_v24  ;;  %v3158_v54 = vmul.f32 %v2968_v62, %v7960_v50  ;;  %v7991_v50 = vld [vmem:[#allocation85_spill] sm:$0xff] }
 0x3a2   : > { %v2925_v28 = vmul.f32 %v2897_v34, %v7986_v14  ;;  %3530 = vmatpush1.bf16.msra.mxu1 %v3270_v3  ;;  %v3138_v8 = vmul.f32 %v2897_v34, %v7989_v27  ;;  %v2996_v35 = vmul.f32 %v2968_v62, %v7991_v50  ;;  %v3084_v62 = vsel %vm1022_vm5, %v3079_v25, %v7995_v6  ;;  %v7996_v34 = vld [vmem:[#allocation150_spill] sm:$0xff] }
 0x3a3   : > { %3563 = vmatpush1.bf16.msra.mxu0 %v3202_v21  ;;  %v3284_v9 = vpack.c.bf16 %v3158_v54, %v3137_v47  ;;  %v7994_v21 = vld [vmem:[#allocation10_spill] sm:$0xff]  ;;  %v7999_v54 = vld [vmem:[#allocation88_spill] sm:$0xff] }
 0x3a4   : > { %v2955_v44 = vpop.permute.xlu0 %2954  ;;  %v3217_v51 = vpack.c.bf16 %v2925_v28, %v2853_v61  ;;  %v3230_v38 = vpack.c.bf16 %v3016_v20, %v2996_v35  ;;  %v7998_v61 = vld [vmem:[#allocation78_spill] sm:$0xff] }
 0x3a5   : > { %v2969_v33 = vsel %vm1514_vm8, %v2953_v29, %v2955_v44 }
 0x3a6   : > { %v2997_v39 = vmul.f32 %v2969_v33, %v7990_v15  ;;  %v3159_v40 = vmul.f32 %v2969_v33, %v7959_v41  ;;  %3564 = vmatprep.subr.bf16.mxu0 %v3217_v51 }
 0x3a7   : > { %3565 = vmatpush1.bf16.msra.mxu0 %v3216_v49 }
 0x3a8   : > { %v3019_v59 = vpop.permute.xlu0 %3018  ;;  %v3285_v45 = vpack.c.bf16 %v3159_v40, %v3138_v8  ;;  %v3231_v29 = vpack.c.bf16 %v3017_v11, %v2997_v39  ;;  %v8000_v11 = vld [vmem:[#allocation94_spill] sm:$0xff] }
 0x3a9   : > { %v3020_v1 = vsel %vm531_vm1, %v6968_v32, %v3019_v59  ;;  %v3021_v41 = vsel %vm531_vm1, %v3019_v59, %v7993_v10 }
 0x3aa   : > { %v3036_v7 = vmul.f32 %v3020_v1, %v7963_v22  ;;  %v3037_v12 = vmul.f32 %v3021_v41, %v7961_v31  ;;  %3531 = vmatprep.subr.bf16.mxu1 %v3285_v45  ;;  %3566 = vmatprep.subr.bf16.mxu0 %v3231_v29  ;;  %v3991_v31 = vld [vmem:[%s7154_s4] ss:$8 sps:$4 sm:$0xff]   ;;  %v3080_v22 = vsel %vm1022_vm5, %v7017_v16, %v3079_v25 }
 0x3ab   : > { %3532 = vmatpush1.bf16.msra.mxu1 %v3284_v9  ;;  %3567 = vmatpush1.bf16.msra.mxu0 %v3230_v38  ;;  %v3097_v43 = vmul.f32 %v3080_v22, %v7977_v26  ;;  %v3098_v16 = vmul.f32 %v3084_v62, %v7974_v4 }
 0x3ac   : > { %v3244_v36 = vpack.c.bf16 %v3056_v37, %v3036_v7  ;;  %v3059_v5 = vpop.permute.xlu0 %3058  ;;  %v3245_v23 = vpack.c.bf16 %v3057_v17, %v3037_v12 }
 0x3ad   : > { %v3060_v32 = vsel %vm859_vm0, %v7005_v60, %v3059_v5  ;;  %v3061_v24 = vsel %vm859_vm0, %v3059_v5, %v7994_v21  ;;  %v3121_v60 = vpop.permute.xlu1 %3120 }
 0x3ae   : > { %v3076_v53 = vmul.f32 %v3060_v32, %v7970_v63  ;;  %v3077_v3 = vmul.f32 %v3061_v24, %v7966_v55  ;;  %3548 = vmatmul.mubr.bf16.vlgmr.msra.gmra.mrb[28].mxu1 %v3991_v31  ;;  %3568 = vmatprep.subr.bf16.mxu0 %v3245_v23  ;;  %v7997_v63 = vld [vmem:[#allocation98_spill] sm:$0xff]  ;;  %v3122_v47 = vsel %vm1350_vm6, %v7051_v52, %v3121_v60 }
 0x3af   : > { %3569 = vmatpush1.bf16.msra.mxu0 %v3244_v36  ;;  %v3126_v51 = vsel %vm1350_vm6, %v3121_v60, %v7999_v54 }
 0x3b0   : > { %v3258_v42 = vpack.c.bf16 %v7996_v34, %v3076_v53  ;;  %v3100_v46 = vpop.permute.xlu0 %3099  ;;  %v3259_v13 = vpack.c.bf16 %v7997_v63, %v3077_v3 }
 0x3b1   : > { %v3101_v55 = vsel %vm1186_vm7, %v7035_v2, %v3100_v46  ;;  %v3105_v28 = vsel %vm1186_vm7, %v3100_v46, %v7998_v61 }
 0x3b2   : > { %v3118_v57 = vmul.f32 %v3101_v55, %v7987_v18  ;;  %v3119_v58 = vmul.f32 %v3105_v28, %v7985_v30  ;;  %3570 = vmatprep.subr.bf16.mxu0 %v3259_v13  ;;  %v3139_v18 = vmul.f32 %v3122_v47, %v7983_v56  ;;  %v3140_v30 = vmul.f32 %v3126_v51, %v7986_v14 }
 0x3b3   : > { %3571 = vmatpush1.bf16.msra.mxu0 %v3258_v42 }
 0x3b4   : > { %v3272_v2 = vpack.c.bf16 %v3118_v57, %v3097_v43  ;;  %v3142_v49 = vpop.permute.xlu0 %3141  ;;  %v3273_v20 = vpack.c.bf16 %v3119_v58, %v3098_v16 }
 0x3b5   : > { %v3143_v26 = vsel %vm1514_vm8, %v2955_v44, %v3142_v49  ;;  %v3147_v4 = vsel %vm1514_vm8, %v3142_v49, %v8000_v11 }
 0x3b6   : > { %v3160_v33 = vmul.f32 %v3143_v26, %v7991_v50  ;;  %v3161_v52 = vmul.f32 %v3147_v4, %v7990_v15  ;;  %3572 = vmatprep.subr.bf16.mxu0 %v3273_v20 }
 0x3b7   : > { %3573 = vmatpush1.bf16.msra.mxu0 %v3272_v2 }
 0x3b8   : > { %v3286_v0 = vpack.c.bf16 %v3160_v33, %v3139_v18  ;;  %v3287_v27 = vpack.c.bf16 %v3161_v52, %v3140_v30 }
 0x3ba   : > { %3574 = vmatprep.subr.bf16.mxu0 %v3287_v27 }
 0x3bb   : > { %3575 = vmatpush1.bf16.msra.mxu0 %v3286_v0 }
 0x3be   : > { %3591 = vmatmul.mubr.bf16.vlgmr.msra.gmra.mrb[24].mxu0 %v3991_v31 }
 0x406   : > { %v3377_v44 = vpop.f32.mrb[20].mxu1 }
 0x407   : > { %v3379_v8 = vpop.f32.mrb[21].mxu1  ;;  %v3633_v45 = vmul.f32 %v3377_v44, %v3377_v44 }
 0x408   : > { %v3934_v39 = vpack.c.bf16 %v3379_v8, %v3377_v44  ;;  %v3381_v40 = vpop.f32.mrb[22].mxu1  ;;  %v3634_v37 = vmul.f32 %v3379_v8, %v3379_v8 }
 0x409   : > { %v3383_v56 = vpop.f32.mrb[23].mxu1  ;;  %v3647_v1 = vmul.f32 %v3381_v40, %v3381_v40 }
 0x40a   : > { %3779 = vst [vmem:[%s7125_s23 + $0x8] sm:$0xff] %v3934_v39  ;;  %v3941_v14 = vpack.c.bf16 %v3383_v56, %v3381_v40  ;;  %v3648_v23 = vmul.f32 %v3383_v56, %v3383_v56 }
 0x40c   : > { %3786 = vst [vmem:[%s7125_s23 + $0x40] sm:$0xff] %v3941_v14 }
 0x425   : > { %v3334_v15 = vpop.f32.mrb[12].mxu0 }
 0x426   : > { %v3631_v50 = vmul.f32 %v3334_v15, %v3334_v15  ;;  %v3336_v35 = vpop.f32.mrb[13].mxu0 }
 0x427   : > { %v3601_v19 = vadd.f32 %v3336_v35, %v3334_v15  ;;  %v3632_v48 = vmul.f32 %v3336_v35, %v3336_v35  ;;  %v3933_v9 = vpack.c.bf16 %v3336_v35, %v3334_v15  ;;  %v3338_v59 = vpop.f32.mrb[14].mxu0 }
 0x428   : > { %v3645_v29 = vmul.f32 %v3338_v59, %v3338_v59  ;;  %v3340_v38 = vpop.f32.mrb[15].mxu0 }
 0x429   : > { %v3659_v10 = vadd.f32 %v3632_v48, %v3631_v50  ;;  %3778 = vst [vmem:[%s7125_s23] sm:$0xff] %v3933_v9  ;;  %v3616_v41 = vadd.f32 %v3340_v38, %v3338_v59  ;;  %v3646_v17 = vmul.f32 %v3340_v38, %v3340_v38  ;;  %v3940_v25 = vpack.c.bf16 %v3340_v38, %v3338_v59 }
 0x42a   : > { %v3602_v7 = vadd.f32 %v3601_v19, %v3377_v44 }
 0x42b   : > { %v3674_v12 = vadd.f32 %v3646_v17, %v3645_v29  ;;  %3785 = vst [vmem:[%s7125_s23 + $0x38] sm:$0xff] %v3940_v25  ;;  %v3660_v36 = vadd.f32 %v3659_v10, %v3633_v45  ;;  %v3617_v5 = vadd.f32 %v3616_v41, %v3381_v40 }
 0x42c   : > { %v3603_v32 = vadd.f32 %v3602_v7, %v3379_v8 }
 0x42d   : > { %v3661_v21 = vadd.f32 %v3660_v36, %v3634_v37  ;;  %v3675_v24 = vadd.f32 %v3674_v12, %v3647_v1  ;;  %v3618_v53 = vadd.f32 %v3617_v5, %v3383_v56 }
 0x42f   : > { %v3676_v3 = vadd.f32 %v3675_v24, %v3648_v23 }
 0x444   : > { %v3463_v31 = vpop.f32.mrb[24].mxu1 }
 0x445   : > { %v3465_v22 = vpop.f32.mrb[25].mxu1  ;;  %v3637_v43 = vmul.f32 %v3463_v31, %v3463_v31 }
 0x446   : > { %v3936_v6 = vpack.c.bf16 %v3465_v22, %v3463_v31  ;;  %v3467_v62 = vpop.f32.mrb[26].mxu1  ;;  %v3638_v49 = vmul.f32 %v3465_v22, %v3465_v22 }
 0x447   : > { %v3469_v60 = vpop.f32.mrb[27].mxu1  ;;  %v3651_v20 = vmul.f32 %v3467_v62, %v3467_v62 }
 0x448   : > { %3781 = vst [vmem:[%s7125_s23 + $0x18] sm:$0xff] %v3936_v6  ;;  %v3943_v34 = vpack.c.bf16 %v3469_v60, %v3467_v62  ;;  %v3652_v30 = vmul.f32 %v3469_v60, %v3469_v60 }
 0x449   : > { %v3420_v42 = vpop.f32.mrb[16].mxu0 }
 0x44a   : > { %v3604_v46 = vadd.f32 %v3603_v32, %v3420_v42  ;;  %v3635_v63 = vmul.f32 %v3420_v42, %v3420_v42  ;;  %v3422_v13 = vpop.f32.mrb[17].mxu0  ;;  %3788 = vst [vmem:[%s7125_s23 + $0x50] sm:$0xff] %v3943_v34 }
 0x44b   : > { %v3636_v55 = vmul.f32 %v3422_v13, %v3422_v13  ;;  %v3935_v61 = vpack.c.bf16 %v3422_v13, %v3420_v42  ;;  %v3424_v28 = vpop.f32.mrb[18].mxu0 }
 0x44c   : > { %v3662_v16 = vadd.f32 %v3661_v21, %v3635_v63  ;;  %v3605_v57 = vadd.f32 %v3604_v46, %v3422_v13  ;;  %v3619_v58 = vadd.f32 %v3618_v53, %v3424_v28  ;;  %v3649_v47 = vmul.f32 %v3424_v28, %v3424_v28  ;;  %v3426_v54 = vpop.f32.mrb[19].mxu0 }
 0x44d   : > { %3780 = vst [vmem:[%s7125_s23 + $0x10] sm:$0xff] %v3935_v61  ;;  %v3650_v51 = vmul.f32 %v3426_v54, %v3426_v54  ;;  %v3942_v2 = vpack.c.bf16 %v3426_v54, %v3424_v28 }
 0x44e   : > { %v3663_v26 = vadd.f32 %v3662_v16, %v3636_v55  ;;  %v3677_v11 = vadd.f32 %v3676_v3, %v3649_v47  ;;  %v3620_v4 = vadd.f32 %v3619_v58, %v3426_v54  ;;  %v3606_v18 = vadd.f32 %v3605_v57, %v3463_v31 }
 0x44f   : > { %3787 = vst [vmem:[%s7125_s23 + $0x48] sm:$0xff] %v3942_v2 }
 0x450   : > { %v3678_v33 = vadd.f32 %v3677_v11, %v3650_v51  ;;  %v3664_v52 = vadd.f32 %v3663_v26, %v3637_v43  ;;  %v3607_v0 = vadd.f32 %v3606_v18, %v3465_v22  ;;  %v3621_v27 = vadd.f32 %v3620_v4, %v3467_v62 }
 0x452   : > { %v3665_v44 = vadd.f32 %v3664_v52, %v3638_v49  ;;  %v3679_v8 = vadd.f32 %v3678_v33, %v3651_v20  ;;  %v3622_v39 = vadd.f32 %v3621_v27, %v3469_v60 }
 0x454   : > { %v3680_v40 = vadd.f32 %v3679_v8, %v3652_v30 }
 0x46d   : > { %v3506_v56 = vpop.f32.mrb[20].mxu0 }
 0x46e   : > { %v3608_v14 = vadd.f32 %v3607_v0, %v3506_v56  ;;  %v3639_v15 = vmul.f32 %v3506_v56, %v3506_v56  ;;  %v3508_v50 = vpop.f32.mrb[21].mxu0 }
 0x46f   : > { %v3640_v35 = vmul.f32 %v3508_v50, %v3508_v50  ;;  %v3937_v19 = vpack.c.bf16 %v3508_v50, %v3506_v56  ;;  %v3510_v48 = vpop.f32.mrb[22].mxu0 }
 0x470   : > { %v3666_v9 = vadd.f32 %v3665_v44, %v3639_v15  ;;  %v3609_v59 = vadd.f32 %v3608_v14, %v3508_v50  ;;  %v3623_v45 = vadd.f32 %v3622_v39, %v3510_v48  ;;  %v3653_v29 = vmul.f32 %v3510_v48, %v3510_v48  ;;  %v3512_v38 = vpop.f32.mrb[23].mxu0 }
 0x471   : > { %3782 = vst [vmem:[%s7125_s23 + $0x20] sm:$0xff] %v3937_v19  ;;  %v3654_v37 = vmul.f32 %v3512_v38, %v3512_v38  ;;  %v3944_v1 = vpack.c.bf16 %v3512_v38, %v3510_v48 }
 0x472   : > { %v3667_v10 = vadd.f32 %v3666_v9, %v3640_v35  ;;  %v3681_v41 = vadd.f32 %v3680_v40, %v3653_v29  ;;  %v3624_v17 = vadd.f32 %v3623_v45, %v3512_v38 }
 0x473   : > { %3789 = vst [vmem:[%s7125_s23 + $0x58] sm:$0xff] %v3944_v1 }
 0x474   : > { %v3682_v25 = vadd.f32 %v3681_v41, %v3654_v37 }
 0x481   : > { %v3549_v7 = vpop.f32.mrb[28].mxu1 }
 0x482   : > { %v3610_v12 = vadd.f32 %v3609_v59, %v3549_v7  ;;  %v3641_v36 = vmul.f32 %v3549_v7, %v3549_v7  ;;  %v3551_v5 = vpop.f32.mrb[29].mxu1 }
 0x483   : > { %v3642_v23 = vmul.f32 %v3551_v5, %v3551_v5  ;;  %v3938_v32 = vpack.c.bf16 %v3551_v5, %v3549_v7  ;;  %v3553_v21 = vpop.f32.mrb[30].mxu1 }
 0x484   : > { %v3668_v24 = vadd.f32 %v3667_v10, %v3641_v36  ;;  %v3611_v53 = vadd.f32 %v3610_v12, %v3551_v5  ;;  %v3625_v3 = vadd.f32 %v3624_v17, %v3553_v21  ;;  %v3655_v31 = vmul.f32 %v3553_v21, %v3553_v21  ;;  %v3555_v22 = vpop.f32.mrb[31].mxu1 }
 0x485   : > { %3783 = vst [vmem:[%s7125_s23 + $0x28] sm:$0xff] %v3938_v32  ;;  %v3656_v6 = vmul.f32 %v3555_v22, %v3555_v22  ;;  %v3945_v62 = vpack.c.bf16 %v3555_v22, %v3553_v21 }
 0x486   : > { %v3669_v60 = vadd.f32 %v3668_v24, %v3642_v23  ;;  %v3683_v34 = vadd.f32 %v3682_v25, %v3655_v31  ;;  %v3626_v42 = vadd.f32 %v3625_v3, %v3555_v22 }
 0x487   : > { %3790 = vst [vmem:[%s7125_s23 + $0x60] sm:$0xff] %v3945_v62 }
 0x488   : > { %v3684_v46 = vadd.f32 %v3683_v34, %v3656_v6 }
 0x491   : > { %v3592_v63 = vpop.f32.mrb[24].mxu0 }
 0x492   : > { %v3612_v13 = vadd.f32 %v3611_v53, %v3592_v63  ;;  %v3643_v55 = vmul.f32 %v3592_v63, %v3592_v63  ;;  %v3594_v61 = vpop.f32.mrb[25].mxu0 }
 0x493   : > { %v3644_v28 = vmul.f32 %v3594_v61, %v3594_v61  ;;  %v3939_v43 = vpack.c.bf16 %v3594_v61, %v3592_v63  ;;  %v3596_v16 = vpop.f32.mrb[26].mxu0 }
 0x494   : > { %v3670_v57 = vadd.f32 %v3669_v60, %v3643_v55  ;;  %v3613_v58 = vadd.f32 %v3612_v13, %v3594_v61  ;;  %v3627_v47 = vadd.f32 %v3626_v42, %v3596_v16  ;;  %v3657_v54 = vmul.f32 %v3596_v16, %v3596_v16  ;;  %v3598_v51 = vpop.f32.mrb[27].mxu0 }
 0x495   : > { %3784 = vst [vmem:[%s7125_s23 + $0x30] sm:$0xff] %v3939_v43  ;;  %v3658_v2 = vmul.f32 %v3598_v51, %v3598_v51  ;;  %v3946_v49 = vpack.c.bf16 %v3598_v51, %v3596_v16 }
 0x496   : > { %v3685_v20 = vadd.f32 %v3684_v46, %v3657_v54  ;;  %v3628_v26 = vadd.f32 %v3627_v47, %v3598_v51  ;;  %3614 = vadd.xlane.f32.xlu1 %v3613_v58  ;;  %v3671_v11 = vadd.f32 %v3670_v57, %v3644_v28 }
 0x497   : > { %3791 = vst [vmem:[%s7125_s23 + $0x68] sm:$0xff] %v3946_v49 }
 0x498   : > { %v3686_v4 = vadd.f32 %v3685_v20, %v3658_v2  ;;  %3629 = vadd.xlane.f32.xlu0 %v3628_v26 }
 0x49a   : > { %3687 = vadd.xlane.f32.xlu1 %v3686_v4 }
 0x49c   : > { %3672 = vadd.xlane.f32.xlu0 %v3671_v11 }
 0x523   : > { %v3615_v18 = vpop.xlane.xlu1 %3614 }
 0x525   : > { %v3630_v30 = vpop.xlane.xlu0 %3629 }
 0x527   : > { %v3688_v33 = vpop.xlane.xlu1 %3687 }
 0x528   : > { %v3690_v52 = vsel %vm859_vm0, %v3630_v30, %v3688_v33 }
 0x529   : > { %3693 = vst.msk [vmem:[%s291_s15 + $0x8] sm:$0xff] %vm3691_vm11, %v3690_v52  ;;  %v3673_v0 = vpop.xlane.xlu0 %3672 }
 0x52a   : > { %v3689_v27 = vsel %vm859_vm0, %v3615_v18, %v3673_v0 }
 0x52b   : > { %3692 = vst.msk [vmem:[%s291_s15] sm:$0xff] %vm3691_vm11, %v3689_v27 }
 0x52c PF: > { %s18_s24 = sadd.s32 1, %s3998_s24  }
 0x52d   : > { %p15_p4 = scmp.ge.s32.totalorder %s18_s24, 4  }
 0x52f   :  { %17 = sbr.rel (!%p15_p4) target bundleno = 1 (0x1), region = 86 }

// kernel: down_forward.5
= control target key start
LH: loop header
LB: loop body
LE: loop exit
PB: predicated region body
PF: predicated region fallthrough
CT: control target
= control target key end

     0   :  { %s455_s12 = smov 0   ;;  %s574_s0 = inlined_call_operand.vmem [shape: bf16[2,16,1792], index: 0, kind: input, shape index: {}]   ;;  %s575_s1 = inlined_call_operand.vmem [shape: f32[16,1], index: 1, kind: input, shape index: {}]   ;;  %s576_s2 = inlined_call_operand.vmem [shape: f32[16,1], index: 2, kind: input, shape index: {}]   ;;  %s577_s3 = inlined_call_operand.vmem [shape: f32[2,16,1792], index: 3, kind: output, shape index: {}]  }
   0x1 LB: > { %s404_s13 = sadd.s32 4294967295, %s432_s12   ;;  %p408_p0 = scmp.ge.s32.totalorder %s432_s12, 1  ;;  %s432_s12 = sphi %s455_s12, %s13_s12  }
   0x2   : > { %p137_p1 = scmp.lt.s32.totalorder %s432_s12, 3 }
   0x4   : > { %p138_p2 = pnand %p408_p0, %p137_p1 }
   0x5   : > { %v253_v0 = vld [vmem:[%s576_s2] sm:$0xff] (!%p138_p2)  ;;  %v434_v2 = vmov (!%p138_p2), 0   ;;  %v254_v3 = vld [vmem:[%s576_s2 + $0x8] sm:$0xff] (!%p138_p2)  ;;  %p161_p3 = scmp.lt.s32.totalorder (!%p138_p2), %s404_s13, 1 }
   0x6   : > { %141 = sbr.rel (%p138_p2) target bundleno = 163 (0xa3), region = 32  ;;  %v213_v1 = vld [vmem:[%s575_s1] sm:$0xff] (!%p138_p2)  ;;  %425 = vset.pattern.permute.xlu1 (!%p138_p2), %v434_v2  ;;  %424 = vset.pattern.permute.xlu0 (!%p138_p2), %v434_v2  ;;  %v214_v4 = vld [vmem:[%s575_s1 + $0x8] sm:$0xff] (!%p138_p2) }
   0x7   : > { %257 = vperm.xlu1 (!%p138_p2), %425, %v253_v0   ;;  %217 = vperm.xlu0 (!%p138_p2), %424, %v213_v1  }
   0xb   : > { %262 = vperm.xlu1 (!%p138_p2), %425, %v254_v3   ;;  %222 = vperm.xlu0 (!%p138_p2), %424, %v214_v4  }
   0xd   : > { %s579_s13 = smov (!%p161_p3, %s404_s13), 1 }
   0xe   : > { %s413_s22 = smul.u32 112, %s579_s13 }
   0xf   : > { %s414_s26 = smul.u32 224, %s579_s13 }
  0x10   : > { %s165_s25 = scalar_lea.vmem %s574_s0, %s413_s22 }
  0x11   : > { %v171_v5 = vld [vmem:[%s165_s25] sm:$0xff]  ;;  %v172_v6 = vld [vmem:[%s165_s25 + $0x8] sm:$0xff]  ;;  %v173_v7 = vld [vmem:[%s165_s25 + $0x10] sm:$0xff]  ;;  %s513_s29 = scalar_lea.vmem %s577_s3, %s414_s26 }
  0x12   : > { %v174_v8 = vld [vmem:[%s165_s25 + $0x18] sm:$0xff]  ;;  %v175_v9 = vld [vmem:[%s165_s25 + $0x20] sm:$0xff]  ;;  %v176_v10 = vld [vmem:[%s165_s25 + $0x28] sm:$0xff]  ;;  %v185_v12 = vunpack.c.l.bf16 %v171_v5  ;;  %v186_v13 = vunpack.c.h.bf16 %v171_v5  ;;  %v187_v14 = vunpack.c.l.bf16 %v172_v6  ;;  %v188_v15 = vunpack.c.h.bf16 %v172_v6 }
  0x13   : > { %v177_v11 = vld [vmem:[%s165_s25 + $0x30] sm:$0xff]  ;;  %v481_v16 = vld [vmem:[%s165_s25 + $0x38] sm:$0xff]  ;;  %v189_v17 = vunpack.c.l.bf16 %v173_v7  ;;  %v190_v18 = vunpack.c.h.bf16 %v173_v7  ;;  %v191_v19 = vunpack.c.l.bf16 %v174_v8  ;;  %v192_v20 = vunpack.c.h.bf16 %v174_v8  ;;  %v483_v21 = vld [vmem:[%s165_s25 + $0x40] sm:$0xff] }
  0x14   : > { %v485_v22 = vld [vmem:[%s165_s25 + $0x48] sm:$0xff]  ;;  %v193_v23 = vunpack.c.l.bf16 %v175_v9  ;;  %v194_v24 = vunpack.c.h.bf16 %v175_v9  ;;  %v195_v25 = vunpack.c.l.bf16 %v176_v10  ;;  %v196_v26 = vunpack.c.h.bf16 %v176_v10  ;;  %v487_v27 = vld [vmem:[%s165_s25 + $0x50] sm:$0xff]  ;;  %v489_v28 = vld [vmem:[%s165_s25 + $0x58] sm:$0xff] }
  0x15   : > { %v197_v29 = vunpack.c.l.bf16 %v177_v11  ;;  %v198_v30 = vunpack.c.h.bf16 %v177_v11  ;;  %v491_v31 = vld [vmem:[%s165_s25 + $0x60] sm:$0xff]  ;;  %v493_v32 = vld [vmem:[%s165_s25 + $0x68] sm:$0xff]  ;;  %v199_v33 = vunpack.c.l.bf16 %v481_v16  ;;  %v200_v34 = vunpack.c.h.bf16 %v481_v16 }
  0x16   : > { %v201_v35 = vunpack.c.l.bf16 %v483_v21  ;;  %v202_v36 = vunpack.c.h.bf16 %v483_v21  ;;  %v203_v37 = vunpack.c.l.bf16 %v485_v22  ;;  %v204_v38 = vunpack.c.h.bf16 %v485_v22 }
  0x17   : > { %v205_v39 = vunpack.c.l.bf16 %v487_v27  ;;  %v206_v40 = vunpack.c.h.bf16 %v487_v27  ;;  %v207_v41 = vunpack.c.l.bf16 %v489_v28  ;;  %v208_v42 = vunpack.c.h.bf16 %v489_v28 }
  0x18   : > { %v209_v44 = vunpack.c.l.bf16 %v491_v31  ;;  %v210_v45 = vunpack.c.h.bf16 %v491_v31  ;;  %v211_v46 = vunpack.c.l.bf16 %v493_v32  ;;  %v212_v47 = vunpack.c.h.bf16 %v493_v32 }
  0x86   : > { %v218_v43 = vpop.permute.xlu0 %217  ;;  %v258_v56 = vpop.permute.xlu1 %257 }
  0x87   : > { %v225_v48 = vmul.f32 %v218_v43, %v185_v12  ;;  %v226_v49 = vmul.f32 %v218_v43, %v186_v13  ;;  %v227_v50 = vmul.f32 %v218_v43, %v187_v14  ;;  %v228_v51 = vmul.f32 %v218_v43, %v188_v15 }
  0x88   : > { %v229_v52 = vmul.f32 %v218_v43, %v189_v17  ;;  %v230_v53 = vmul.f32 %v218_v43, %v190_v18  ;;  %v231_v54 = vmul.f32 %v218_v43, %v191_v19  ;;  %v232_v55 = vmul.f32 %v218_v43, %v192_v20 }
  0x89   : > { %v233_v57 = vmul.f32 %v218_v43, %v193_v23  ;;  %v234_v58 = vmul.f32 %v218_v43, %v194_v24  ;;  %v235_v59 = vmul.f32 %v218_v43, %v195_v25  ;;  %v236_v60 = vmul.f32 %v218_v43, %v196_v26 }
  0x8a   : > { %v237_v61 = vmul.f32 %v218_v43, %v197_v29  ;;  %v238_v62 = vmul.f32 %v218_v43, %v198_v30  ;;  %v265_v63 = vadd.f32 %v258_v56, %v225_v48  ;;  %v266_v0 = vadd.f32 %v258_v56, %v226_v49  ;;  %v223_v18 = vpop.permute.xlu0 %222 }
  0x8b   : > { %v267_v1 = vadd.f32 %v258_v56, %v227_v50  ;;  %v268_v2 = vadd.f32 %v258_v56, %v228_v51  ;;  %v269_v3 = vadd.f32 %v258_v56, %v229_v52  ;;  %v270_v4 = vadd.f32 %v258_v56, %v230_v53 }
  0x8c   : > { %v271_v5 = vadd.f32 %v258_v56, %v231_v54  ;;  %v272_v6 = vadd.f32 %v258_v56, %v232_v55  ;;  %v273_v7 = vadd.f32 %v258_v56, %v233_v57  ;;  %v274_v8 = vadd.f32 %v258_v56, %v234_v58 }
  0x8d   : > { %v275_v9 = vadd.f32 %v258_v56, %v235_v59  ;;  %v276_v10 = vadd.f32 %v258_v56, %v236_v60  ;;  %v277_v11 = vadd.f32 %v258_v56, %v237_v61  ;;  %v278_v12 = vadd.f32 %v258_v56, %v238_v62 }
  0x8e   : > { %v293_v13 = vmax.f32 %v265_v63, 0.0  ;;  %v294_v14 = vmax.f32 %v266_v0, 0.0  ;;  %v295_v15 = vmax.f32 %v267_v1, 0.0  ;;  %v296_v17 = vmax.f32 %v268_v2, 0.0 }
  0x8f   : > { %v297_v19 = vmax.f32 %v269_v3, 0.0  ;;  %v298_v20 = vmax.f32 %v270_v4, 0.0  ;;  %v299_v23 = vmax.f32 %v271_v5, 0.0  ;;  %v300_v24 = vmax.f32 %v272_v6, 0.0 }
  0x90   : > { %v301_v25 = vmax.f32 %v273_v7, 0.0  ;;  %v302_v26 = vmax.f32 %v274_v8, 0.0  ;;  %v303_v29 = vmax.f32 %v275_v9, 0.0  ;;  %v304_v30 = vmax.f32 %v276_v10, 0.0  ;;  %321 = vst [vmem:[%s513_s29] sm:$0xff] %v293_v13  ;;  %322 = vst [vmem:[%s513_s29 + $0x8] sm:$0xff] %v294_v14 }
  0x91   : > { %323 = vst [vmem:[%s513_s29 + $0x10] sm:$0xff] %v295_v15  ;;  %324 = vst [vmem:[%s513_s29 + $0x18] sm:$0xff] %v296_v17  ;;  %v305_v43 = vmax.f32 %v277_v11, 0.0  ;;  %v306_v48 = vmax.f32 %v278_v12, 0.0  ;;  %v239_v49 = vmul.f32 %v223_v18, %v199_v33  ;;  %v240_v50 = vmul.f32 %v223_v18, %v200_v34 }
  0x92   : > { %325 = vst [vmem:[%s513_s29 + $0x20] sm:$0xff] %v297_v19  ;;  %326 = vst [vmem:[%s513_s29 + $0x28] sm:$0xff] %v298_v20  ;;  %v241_v51 = vmul.f32 %v223_v18, %v201_v35  ;;  %v242_v52 = vmul.f32 %v223_v18, %v202_v36  ;;  %v243_v53 = vmul.f32 %v223_v18, %v203_v37  ;;  %v263_v35 = vpop.permute.xlu1 %262 }
  0x93   : > { %327 = vst [vmem:[%s513_s29 + $0x30] sm:$0xff] %v299_v23  ;;  %328 = vst [vmem:[%s513_s29 + $0x38] sm:$0xff] %v300_v24  ;;  %v244_v54 = vmul.f32 %v223_v18, %v204_v38  ;;  %v245_v16 = vmul.f32 %v223_v18, %v205_v39  ;;  %v246_v33 = vmul.f32 %v223_v18, %v206_v40 }
  0x94   : > { %329 = vst [vmem:[%s513_s29 + $0x40] sm:$0xff] %v301_v25  ;;  %330 = vst [vmem:[%s513_s29 + $0x48] sm:$0xff] %v302_v26  ;;  %v247_v34 = vmul.f32 %v223_v18, %v207_v41  ;;  %v248_v21 = vmul.f32 %v223_v18, %v208_v42  ;;  %v249_v36 = vmul.f32 %v223_v18, %v209_v44 }
  0x95   : > { %331 = vst [vmem:[%s513_s29 + $0x50] sm:$0xff] %v303_v29  ;;  %332 = vst [vmem:[%s513_s29 + $0x58] sm:$0xff] %v304_v30  ;;  %v250_v22 = vmul.f32 %v223_v18, %v210_v45  ;;  %v251_v37 = vmul.f32 %v223_v18, %v211_v46  ;;  %v252_v27 = vmul.f32 %v223_v18, %v212_v47 }
  0x96   : > { %333 = vst [vmem:[%s513_s29 + $0x60] sm:$0xff] %v305_v43  ;;  %334 = vst [vmem:[%s513_s29 + $0x68] sm:$0xff] %v306_v48  ;;  %v279_v38 = vadd.f32 %v263_v35, %v239_v49  ;;  %v280_v39 = vadd.f32 %v263_v35, %v240_v50  ;;  %v281_v40 = vadd.f32 %v263_v35, %v241_v51 }
  0x97   : > { %v282_v41 = vadd.f32 %v263_v35, %v242_v52  ;;  %v283_v55 = vadd.f32 %v263_v35, %v243_v53  ;;  %v284_v28 = vadd.f32 %v263_v35, %v244_v54  ;;  %v285_v42 = vadd.f32 %v263_v35, %v245_v16 }
  0x98   : > { %v286_v56 = vadd.f32 %v263_v35, %v246_v33  ;;  %v287_v57 = vadd.f32 %v263_v35, %v247_v34  ;;  %v288_v44 = vadd.f32 %v263_v35, %v248_v21  ;;  %v289_v31 = vadd.f32 %v263_v35, %v249_v36 }
  0x99   : > { %v290_v45 = vadd.f32 %v263_v35, %v250_v22  ;;  %v291_v58 = vadd.f32 %v263_v35, %v251_v37  ;;  %v292_v59 = vadd.f32 %v263_v35, %v252_v27  ;;  %v307_v46 = vmax.f32 %v279_v38, 0.0 }
  0x9a   : > { %v308_v32 = vmax.f32 %v280_v39, 0.0  ;;  %v309_v47 = vmax.f32 %v281_v40, 0.0  ;;  %v310_v60 = vmax.f32 %v282_v41, 0.0  ;;  %v311_v61 = vmax.f32 %v283_v55, 0.0 }
  0x9b   : > { %v312_v62 = vmax.f32 %v284_v28, 0.0  ;;  %v313_v63 = vmax.f32 %v285_v42, 0.0  ;;  %v314_v0 = vmax.f32 %v286_v56, 0.0  ;;  %v315_v1 = vmax.f32 %v287_v57, 0.0  ;;  %335 = vst [vmem:[%s513_s29 + $0x70] sm:$0xff] %v307_v46 }
  0x9c   : > { %v316_v2 = vmax.f32 %v288_v44, 0.0  ;;  %336 = vst [vmem:[%s513_s29 + $0x78] sm:$0xff] %v308_v32  ;;  %v317_v3 = vmax.f32 %v289_v31, 0.0  ;;  %v318_v4 = vmax.f32 %v290_v45, 0.0  ;;  %v319_v5 = vmax.f32 %v291_v58, 0.0  ;;  %337 = vst [vmem:[%s513_s29 + $0x80] sm:$0xff] %v309_v47 }
  0x9d   : > { %v320_v6 = vmax.f32 %v292_v59, 0.0  ;;  %338 = vst [vmem:[%s513_s29 + $0x88] sm:$0xff] %v310_v60  ;;  %339 = vst [vmem:[%s513_s29 + $0x90] sm:$0xff] %v311_v61 }
  0x9e   : > { %340 = vst [vmem:[%s513_s29 + $0x98] sm:$0xff] %v312_v62  ;;  %341 = vst [vmem:[%s513_s29 + $0xa0] sm:$0xff] %v313_v63 }
  0x9f   : > { %342 = vst [vmem:[%s513_s29 + $0xa8] sm:$0xff] %v314_v0  ;;  %343 = vst [vmem:[%s513_s29 + $0xb0] sm:$0xff] %v315_v1 }
  0xa0   : > { %344 = vst [vmem:[%s513_s29 + $0xb8] sm:$0xff] %v316_v2  ;;  %345 = vst [vmem:[%s513_s29 + $0xc0] sm:$0xff] %v317_v3 }
  0xa1   : > { %346 = vst [vmem:[%s513_s29 + $0xc8] sm:$0xff] %v318_v4  ;;  %347 = vst [vmem:[%s513_s29 + $0xd0] sm:$0xff] %v319_v5 }
  0xa2   : > { %348 = vst [vmem:[%s513_s29 + $0xd8] sm:$0xff] %v320_v6 }
  0xa3 PF: > { %s13_s12 = sadd.s32 1, %s432_s12  }
  0xa4   : > { %p10_p4 = scmp.ge.s32.totalorder %s13_s12, 4  }
  0xa6   :  { %12 = sbr.rel (!%p10_p4) target bundleno = 1 (0x1), region = 62 }

</bundles_post_ra>
